<compile_context>
chip_gen: v7x
topology: tpu7x:2x2x1
jax: 0.10.0
libtpu: 0.0.40
codegen_flags: <defaults>
</compile_context>

<pallas_src>
from functools import partial

import numpy as np
import jax
import jax.numpy as jnp
from jax.experimental import pallas as pl
from jax.experimental.pallas import tpu as pltpu  # noqa: F401  (TPU backend assumed)

# ----------------------------------------------------------------------------
# Small config consistent with the Encoder constructor
# ----------------------------------------------------------------------------
BATCH = 2
SEQ_LEN = 8
NJOINTS = 8
NFEATS = 4
INPUT_FEATS = NJOINTS * NFEATS          # input_feature_dim = njoints * nfeats = 32
NUM_CLASSES = 4
LATENT_DIM = 128                        # d_model
NUM_HEADS = 4
HEAD_DIM = LATENT_DIM // NUM_HEADS      # 32
DIM_FF = 256                            # dim_feedforward
NUM_LAYERS = 2                          # num_att_layers (kept small for speed)
LN_EPS = 1e-5                           # PyTorch LayerNorm default
NEG_BIG = -1e30                         # finite "minus infinity" for key padding


# ----------------------------------------------------------------------------
# In-kernel helpers (operate on values, not refs)
# ----------------------------------------------------------------------------
def _add_layernorm(x, res, g, b):
    """LayerNorm(x + res) * g + b, reduction over the last (lane) dim."""
    h = x + res
    mean = jnp.mean(h, axis=-1, keepdims=True)
    c = h - mean
    var = jnp.mean(c * c, axis=-1, keepdims=True)
    return c * jax.lax.rsqrt(var + LN_EPS) * g + b


def _erf(z):
    # Abramowitz & Stegun 7.1.26 rational approximation, |err| < 1.5e-7.
    # TODO(synk): lax.erf has no guaranteed Mosaic lowering, so exact-erf GELU
    # uses this polynomial (error is at float32 noise level).
    a1, a2, a3, a4, a5 = (0.254829592, -0.284496736, 1.421413741,
                          -1.453152027, 1.061405429)
    p = 0.3275911
    az = jnp.abs(z)
    t = 1.0 / (1.0 + p * az)
    poly = ((((a5 * t + a4) * t + a3) * t + a2) * t + a1) * t
    y = 1.0 - poly * jnp.exp(-az * az)
    return jnp.where(z < 0, -y, y)


def _gelu_exact(x):
    # PyTorch F.gelu (approximate='none'): 0.5 * x * (1 + erf(x / sqrt(2)))
    return 0.5 * x * (1.0 + _erf(x * 0.7071067811865476))


# ----------------------------------------------------------------------------
# Fused transformer-stack kernel (single pallas_call, everything in VMEM)
# ----------------------------------------------------------------------------
def _encoder_stack_kernel(x_ref, bias_ref,
                          wq_ref, bq_ref, wk_ref, bk_ref, wv_ref, bv_ref,
                          wo_ref, bo_ref, f1w_ref, f1b_ref, f2w_ref, f2b_ref,
                          ln1g_ref, ln1b_ref, ln2g_ref, ln2b_ref,
                          mu_ref, sigma_ref,
                          *, num_layers, batch, num_heads, head_dim):
    """
    x_ref:    [B, T_PAD, D]  token slab (mu-token, sigma-token, embedded frames,
                             zero padding rows), positional encoding already added.
    bias_ref: [B, 1, T_PAD]  additive key-padding bias (0 valid, -1e30 masked).
    w*_ref:   per-layer weights; q/k/v/out weights are pre-split per head on
              the host so no lane-offset slicing is needed inside the kernel.
    Outputs:  mu_ref / sigma_ref [B, D] = rows t=0 / t=1 after the stack.
    """
    scale = 1.0 / (head_dim ** 0.5)

    for b in range(batch):                       # static, unrolled (B = 2)
        h = x_ref[b]                             # [T_PAD, D]
        att_bias = bias_ref[b]                   # [1, T_PAD]

        for l in range(num_layers):              # static, unrolled
            # ---- multi-head self-attention (post-norm block) ----
            attn = None
            for hh in range(num_heads):          # static, unrolled
                q = jnp.dot(h, wq_ref[l, hh],
                            preferred_element_type=jnp.float32) + bq_ref[l, hh]
                k = jnp.dot(h, wk_ref[l, hh],
                            preferred_element_type=jnp.float32) + bk_ref[l, hh]
                v = jnp.dot(h, wv_ref[l, hh],
                            preferred_element_type=jnp.float32) + bv_ref[l, hh]
                # scores with key-padding bias
                s = jax.lax.dot_general(
                    q, k, (((1,), (1,)), ((), ())),
                    preferred_element_type=jnp.float32) * scale + att_bias
                m = jnp.max(s, axis=-1, keepdims=True)
                p = jnp.exp(s - m)
                p = p / jnp.sum(p, axis=-1, keepdims=True)
                o = jnp.dot(p, v, preferred_element_type=jnp.float32)   # [T, Dh]
                # fold out_proj per head: concat(o_h) @ Wout == sum_h o_h @ Wout_h
                part = jnp.dot(o, wo_ref[l, hh],
                               preferred_element_type=jnp.float32)      # [T, D]
                attn = part if attn is None else attn + part
            attn = attn + bo_ref[l]
            h = _add_layernorm(attn, h, ln1g_ref[l], ln1b_ref[l])

            # ---- feed-forward block (exact-erf GELU) ----
            ff = jnp.dot(h, f1w_ref[l],
                         preferred_element_type=jnp.float32) + f1b_ref[l]
            ff = _gelu_exact(ff)
            ff = jnp.dot(ff, f2w_ref[l],
                         preferred_element_type=jnp.float32) + f2b_ref[l]
            h = _add_layernorm(ff, h, ln2g_ref[l], ln2b_ref[l])

        # final[0] -> mu, final[1] -> sigma (per batch element)
        mu_ref[b:b + 1, :] = h[0:1, :]
        sigma_ref[b:b + 1, :] = h[1:2, :]


def _full_block(shape):
    n = len(shape)
    return pl.BlockSpec(shape, lambda *_: (0,) * n)


# ----------------------------------------------------------------------------
# Parameters (deterministic, synthetic), PyTorch-shaped, then packed per head
# ----------------------------------------------------------------------------
def init_params(key):
    keys = jax.random.split(key, 4 + NUM_LAYERS)
    s = 0.05
    params = {
        "muQuery": jax.random.normal(keys[0], (NUM_CLASSES, LATENT_DIM), jnp.float32),
        "sigmaQuery": jax.random.normal(keys[1], (NUM_CLASSES, LATENT_DIM), jnp.float32),
        "skel_w": s * jax.random.normal(keys[2], (INPUT_FEATS, LATENT_DIM), jnp.float32),
        "skel_b": s * jax.random.normal(keys[3], (1, LATENT_DIM), jnp.float32),
        "layers": [],
    }
    for l in range(NUM_LAYERS):
        k = jax.random.split(keys[4 + l], 8)
        params["layers"].append({
            "in_proj_w": s * jax.random.normal(k[0], (LATENT_DIM, 3 * LATENT_DIM), jnp.float32),
            "in_proj_b": s * jax.random.normal(k[1], (1, 3 * LATENT_DIM), jnp.float32),
            "out_proj_w": s * jax.random.normal(k[2], (LATENT_DIM, LATENT_DIM), jnp.float32),
            "out_proj_b": s * jax.random.normal(k[3], (1, LATENT_DIM), jnp.float32),
            "ff1_w": s * jax.random.normal(k[4], (LATENT_DIM, DIM_FF), jnp.float32),
            "ff1_b": s * jax.random.normal(k[5], (1, DIM_FF), jnp.float32),
            "ff2_w": s * jax.random.normal(k[6], (DIM_FF, LATENT_DIM), jnp.float32),
            "ff2_b": s * jax.random.normal(k[7], (1, LATENT_DIM), jnp.float32),
            "ln1_g": jnp.ones((1, LATENT_DIM), jnp.float32),
            "ln1_b": jnp.zeros((1, LATENT_DIM), jnp.float32),
            "ln2_g": jnp.ones((1, LATENT_DIM), jnp.float32),
            "ln2_b": jnp.zeros((1, LATENT_DIM), jnp.float32),
        })
    return params


def pack_params(params):
    """Host-side, one-time re-layout: split q/k/v/out_proj weights per head and
    stack all layers, so the fused kernel never slices at 32-lane offsets."""
    D, H, Dh = LATENT_DIM, NUM_HEADS, HEAD_DIM
    wq, wk, wv, bq, bk, bv = [], [], [], [], [], []
    wo, bo = [], []
    f1w, f1b, f2w, f2b = [], [], [], []
    ln1g, ln1b, ln2g, ln2b = [], [], [], []
    for layer in params["layers"]:
        ipw, ipb = layer["in_proj_w"], layer["in_proj_b"]          # [D,3D], [1,3D]
        for off, (wl, bl) in ((0, (wq, bq)), (D, (wk, bk)), (2 * D, (wv, bv))):
            wl.append(jnp.transpose(ipw[:, off:off + D].reshape(D, H, Dh), (1, 0, 2)))
            bl.append(ipb[:, off:off + D].reshape(H, 1, Dh))
        wo.append(layer["out_proj_w"].reshape(H, Dh, D))
        bo.append(layer["out_proj_b"])
        f1w.append(layer["ff1_w"]); f1b.append(layer["ff1_b"])
        f2w.append(layer["ff2_w"]); f2b.append(layer["ff2_b"])
        ln1g.append(layer["ln1_g"]); ln1b.append(layer["ln1_b"])
        ln2g.append(layer["ln2_g"]); ln2b.append(layer["ln2_b"])
    return {
        "skel_w": params["skel_w"], "skel_b": params["skel_b"],
        "muQuery": params["muQuery"], "sigmaQuery": params["sigmaQuery"],
        "wq": jnp.stack(wq), "bq": jnp.stack(bq),
        "wk": jnp.stack(wk), "bk": jnp.stack(bk),
        "wv": jnp.stack(wv), "bv": jnp.stack(bv),
        "wo": jnp.stack(wo), "bo": jnp.stack(bo),
        "f1w": jnp.stack(f1w), "f1b": jnp.stack(f1b),
        "f2w": jnp.stack(f2w), "f2b": jnp.stack(f2b),
        "ln1g": jnp.stack(ln1g), "ln1b": jnp.stack(ln1b),
        "ln2g": jnp.stack(ln2g), "ln2b": jnp.stack(ln2b),
    }


def positional_encoding(length, d_model):
    # Matches the PositionalEncoding buffer: pe[t, 0::2]=sin, pe[t, 1::2]=cos.
    pos = np.arange(length, dtype=np.float32)[:, None]
    div = np.exp(np.arange(0, d_model, 2, dtype=np.float32)
                 * (-np.log(10000.0) / d_model))
    ang = pos * div
    pe = np.zeros((length, d_model), dtype=np.float32)
    pe[:, 0::2] = np.sin(ang)
    pe[:, 1::2] = np.cos(ang)
    return jnp.asarray(pe)


# ----------------------------------------------------------------------------
# Forward pass
# ----------------------------------------------------------------------------
def encoder_forward(packed, x, y, mask):
    """
    x:    [B, S, njoints*nfeats] float32  (combined_poses, flat per frame)
    y:    [B, num_classes]       float32  (one-hot label)
    mask: [B, S]                 bool     (src_key_padding_mask, True = pad)
    Returns {'mu': [B, D], 'sigma': [B, D]}  (final[0], final[1])
    """
    B, S, F = x.shape
    L, H, D, Dh = packed["wq"].shape
    T = S + 2
    T_PAD = ((T + 7) // 8) * 8        # pad per-batch rows to a sublane multiple

    # ---- tiny plain-JAX prologue (fused by XLA into ~1 op; per review) ----
    # reshape(batch, -1, njoints*nfeats) then skelEmbedding (row-wise linear)
    x_emb = (jnp.dot(x.reshape(B * S, F), packed["skel_w"])
             + packed["skel_b"]).reshape(B, S, D)
    muQ = jnp.dot(y, packed["muQuery"])           # [B, D]
    sigQ = jnp.dot(y, packed["sigmaQuery"])       # [B, D]
    # xseq = cat(muQuery, sigmaQuery, x) along time, + positional encoding
    xseq = jnp.concatenate([muQ[:, None, :], sigQ[:, None, :], x_emb], axis=1)  # [B, T, D]
    xseq = xseq + positional_encoding(T, D)[None, :, :]
    # TODO(synk): nn.Dropout layers are implemented as identity (eval-mode forward).
    xseq = jnp.pad(xseq, ((0, 0), (0, T_PAD - T), (0, 0)))                      # [B, T_PAD, D]

    # key padding: [zeros(B,2) | mask | pad-True] -> additive bias (0 / -1e30)
    maskseq = jnp.concatenate([jnp.zeros((B, 2), dtype=bool), mask.astype(bool)], axis=1)
    maskseq = jnp.pad(maskseq, ((0, 0), (0, T_PAD - T)), constant_values=True)
    attn_bias = jnp.where(maskseq, NEG_BIG, 0.0).astype(jnp.float32)[:, None, :]  # [B,1,T_PAD]

    # ---- single fused pallas_call for the whole transformer stack ----
    operands = (
        xseq, attn_bias,
        packed["wq"], packed["bq"], packed["wk"], packed["bk"],
        packed["wv"], packed["bv"], packed["wo"], packed["bo"],
        packed["f1w"], packed["f1b"], packed["f2w"], packed["f2b"],
        packed["ln1g"], packed["ln1b"], packed["ln2g"], packed["ln2b"],
    )
    kernel = partial(_encoder_stack_kernel, num_layers=L, batch=B,
                     num_heads=H, head_dim=Dh)
    mu, sigma = pl.pallas_call(
        kernel,
        out_shape=(jax.ShapeDtypeStruct((B, D), jnp.float32),
                   jax.ShapeDtypeStruct((B, D), jnp.float32)),
        in_specs=[_full_block(op.shape) for op in operands],
        out_specs=(_full_block((B, D)), _full_block((B, D))),
    )(*operands)

    return {"mu": mu, "sigma": sigma}


# ----------------------------------------------------------------------------
# Main
# ----------------------------------------------------------------------------
if __name__ == "__main__":
    key = jax.random.PRNGKey(0)
    kp, kx, ky = jax.random.split(key, 3)

    params = init_params(kp)
    packed = pack_params(params)

    x = jax.random.normal(kx, (BATCH, SEQ_LEN, INPUT_FEATS), dtype=jnp.float32)
    labels = jax.random.randint(ky, (BATCH,), 0, NUM_CLASSES)
    y = jax.nn.one_hot(labels, NUM_CLASSES, dtype=jnp.float32)
    # last two timesteps of every sequence are padding (True = ignore)
    mask = jnp.broadcast_to(jnp.arange(SEQ_LEN)[None, :] >= (SEQ_LEN - 2),
                            (BATCH, SEQ_LEN))

    out = jax.jit(encoder_forward)(packed, x, y, mask)
    jax.block_until_ready(out)

    assert out["mu"].shape == (BATCH, LATENT_DIM)
    assert out["sigma"].shape == (BATCH, LATENT_DIM)
    assert np.isfinite(np.asarray(out["mu"])).all()
    assert np.isfinite(np.asarray(out["sigma"])).all()
    print("KERNEL_OK")
</pallas_src>

<mosaic_0001>
module attributes {stable_mosaic.version = 11 : i64} {
  func.func @_encoder_stack_kernel(%arg0: memref<2x16x128xf32, #tpu.memory_space<vmem>>, %arg1: memref<2x1x16xf32, #tpu.memory_space<vmem>>, %arg2: memref<2x4x128x32xf32, #tpu.memory_space<vmem>>, %arg3: memref<2x4x1x32xf32, #tpu.memory_space<vmem>>, %arg4: memref<2x4x128x32xf32, #tpu.memory_space<vmem>>, %arg5: memref<2x4x1x32xf32, #tpu.memory_space<vmem>>, %arg6: memref<2x4x128x32xf32, #tpu.memory_space<vmem>>, %arg7: memref<2x4x1x32xf32, #tpu.memory_space<vmem>>, %arg8: memref<2x4x32x128xf32, #tpu.memory_space<vmem>>, %arg9: memref<2x1x128xf32, #tpu.memory_space<vmem>>, %arg10: memref<2x128x256xf32, #tpu.memory_space<vmem>>, %arg11: memref<2x1x256xf32, #tpu.memory_space<vmem>>, %arg12: memref<2x256x128xf32, #tpu.memory_space<vmem>>, %arg13: memref<2x1x128xf32, #tpu.memory_space<vmem>>, %arg14: memref<2x1x128xf32, #tpu.memory_space<vmem>>, %arg15: memref<2x1x128xf32, #tpu.memory_space<vmem>>, %arg16: memref<2x1x128xf32, #tpu.memory_space<vmem>>, %arg17: memref<2x1x128xf32, #tpu.memory_space<vmem>>, %arg18: memref<2x128xf32, #tpu.memory_space<vmem>>, %arg19: memref<2x128xf32, #tpu.memory_space<vmem>>) attributes {dimension_semantics = [], scalar_prefetch = 0 : i64, scratch_operands = 0 : i64, tpu.core_type = #tpu.core_type<tc>} {
    %c0 = arith.constant 0 : index
    %c0_0 = arith.constant 0 : index
    %c0_1 = arith.constant 0 : index
    %0 = vector.load %arg0[%c0, %c0_0, %c0_1] : memref<2x16x128xf32, #tpu.memory_space<vmem>>, vector<1x16x128xf32>
    %1 = vector.shape_cast %0 : vector<1x16x128xf32> to vector<16x128xf32>
    %c0_2 = arith.constant 0 : index
    %c0_3 = arith.constant 0 : index
    %c0_4 = arith.constant 0 : index
    %2 = vector.load %arg1[%c0_2, %c0_3, %c0_4] : memref<2x1x16xf32, #tpu.memory_space<vmem>>, vector<1x1x16xf32>
    %3 = vector.shape_cast %2 : vector<1x1x16xf32> to vector<1x16xf32>
    %c0_5 = arith.constant 0 : index
    %c0_6 = arith.constant 0 : index
    %c0_7 = arith.constant 0 : index
    %c0_8 = arith.constant 0 : index
    %4 = vector.load %arg2[%c0_5, %c0_6, %c0_7, %c0_8] : memref<2x4x128x32xf32, #tpu.memory_space<vmem>>, vector<1x1x128x32xf32>
    %5 = vector.shape_cast %4 : vector<1x1x128x32xf32> to vector<128x32xf32>
    %cst = arith.constant dense<0.000000e+00> : vector<16x32xf32>
    %6 = tpu.matmul %1, %5, %cst {dimension_numbers = #tpu.dot_dimension_numbers<[1], [0], [0], [1], [0, 0, 1, 1], [], []>} : vector<16x128xf32>, vector<128x32xf32>, vector<16x32xf32> -> vector<16x32xf32>
    %c0_9 = arith.constant 0 : index
    %c0_10 = arith.constant 0 : index
    %c0_11 = arith.constant 0 : index
    %c0_12 = arith.constant 0 : index
    %7 = vector.load %arg3[%c0_9, %c0_10, %c0_11, %c0_12] : memref<2x4x1x32xf32, #tpu.memory_space<vmem>>, vector<1x1x1x32xf32>
    %8 = vector.shape_cast %7 : vector<1x1x1x32xf32> to vector<1x32xf32>
    %9 = vector.broadcast %8 : vector<1x32xf32> to vector<16x32xf32>
    %10 = arith.addf %6, %9 : vector<16x32xf32>
    %c0_13 = arith.constant 0 : index
    %c0_14 = arith.constant 0 : index
    %c0_15 = arith.constant 0 : index
    %c0_16 = arith.constant 0 : index
    %11 = vector.load %arg4[%c0_13, %c0_14, %c0_15, %c0_16] : memref<2x4x128x32xf32, #tpu.memory_space<vmem>>, vector<1x1x128x32xf32>
    %12 = vector.shape_cast %11 : vector<1x1x128x32xf32> to vector<128x32xf32>
    %cst_17 = arith.constant dense<0.000000e+00> : vector<16x32xf32>
    %13 = tpu.matmul %1, %12, %cst_17 {dimension_numbers = #tpu.dot_dimension_numbers<[1], [0], [0], [1], [0, 0, 1, 1], [], []>} : vector<16x128xf32>, vector<128x32xf32>, vector<16x32xf32> -> vector<16x32xf32>
    %c0_18 = arith.constant 0 : index
    %c0_19 = arith.constant 0 : index
    %c0_20 = arith.constant 0 : index
    %c0_21 = arith.constant 0 : index
    %14 = vector.load %arg5[%c0_18, %c0_19, %c0_20, %c0_21] : memref<2x4x1x32xf32, #tpu.memory_space<vmem>>, vector<1x1x1x32xf32>
    %15 = vector.shape_cast %14 : vector<1x1x1x32xf32> to vector<1x32xf32>
    %16 = vector.broadcast %15 : vector<1x32xf32> to vector<16x32xf32>
    %17 = arith.addf %13, %16 : vector<16x32xf32>
    %c0_22 = arith.constant 0 : index
    %c0_23 = arith.constant 0 : index
    %c0_24 = arith.constant 0 : index
    %c0_25 = arith.constant 0 : index
    %18 = vector.load %arg6[%c0_22, %c0_23, %c0_24, %c0_25] : memref<2x4x128x32xf32, #tpu.memory_space<vmem>>, vector<1x1x128x32xf32>
    %19 = vector.shape_cast %18 : vector<1x1x128x32xf32> to vector<128x32xf32>
    %cst_26 = arith.constant dense<0.000000e+00> : vector<16x32xf32>
    %20 = tpu.matmul %1, %19, %cst_26 {dimension_numbers = #tpu.dot_dimension_numbers<[1], [0], [0], [1], [0, 0, 1, 1], [], []>} : vector<16x128xf32>, vector<128x32xf32>, vector<16x32xf32> -> vector<16x32xf32>
    %c0_27 = arith.constant 0 : index
    %c0_28 = arith.constant 0 : index
    %c0_29 = arith.constant 0 : index
    %c0_30 = arith.constant 0 : index
    %21 = vector.load %arg7[%c0_27, %c0_28, %c0_29, %c0_30] : memref<2x4x1x32xf32, #tpu.memory_space<vmem>>, vector<1x1x1x32xf32>
    %22 = vector.shape_cast %21 : vector<1x1x1x32xf32> to vector<1x32xf32>
    %23 = vector.broadcast %22 : vector<1x32xf32> to vector<16x32xf32>
    %24 = arith.addf %20, %23 : vector<16x32xf32>
    %cst_31 = arith.constant dense<0.000000e+00> : vector<16x16xf32>
    %25 = tpu.matmul %10, %17, %cst_31 {dimension_numbers = #tpu.dot_dimension_numbers<[1], [1], [0], [0], [0, 0, 1, 0], [], []>} : vector<16x32xf32>, vector<16x32xf32>, vector<16x16xf32> -> vector<16x16xf32>
    %cst_32 = arith.constant 0.176776692 : f32
    %26 = vector.broadcast %cst_32 : f32 to vector<16x16xf32>
    %27 = arith.mulf %25, %26 : vector<16x16xf32>
    %28 = vector.broadcast %3 : vector<1x16xf32> to vector<16x16xf32>
    %29 = arith.addf %27, %28 : vector<16x16xf32>
    %cst_33 = arith.constant dense<0xFF800000> : vector<16xf32>
    %30 = vector.multi_reduction <maximumf>, %29, %cst_33 [1] : vector<16x16xf32> to vector<16xf32>
    %31 = vector.shape_cast %30 : vector<16xf32> to vector<16x1xf32>
    %32 = vector.broadcast %31 : vector<16x1xf32> to vector<16x16xf32>
    %33 = arith.subf %29, %32 : vector<16x16xf32>
    %34 = math.exp %33 : vector<16x16xf32>
    %cst_34 = arith.constant dense<0.000000e+00> : vector<16xf32>
    %35 = vector.multi_reduction <add>, %34, %cst_34 [1] : vector<16x16xf32> to vector<16xf32>
    %36 = vector.shape_cast %35 : vector<16xf32> to vector<16x1xf32>
    %37 = vector.broadcast %36 : vector<16x1xf32> to vector<16x16xf32>
    %38 = arith.divf %34, %37 : vector<16x16xf32>
    %cst_35 = arith.constant dense<0.000000e+00> : vector<16x32xf32>
    %39 = tpu.matmul %38, %24, %cst_35 {dimension_numbers = #tpu.dot_dimension_numbers<[1], [0], [0], [1], [0, 0, 1, 1], [], []>} : vector<16x16xf32>, vector<16x32xf32>, vector<16x32xf32> -> vector<16x32xf32>
    %c0_36 = arith.constant 0 : index
    %c0_37 = arith.constant 0 : index
    %c0_38 = arith.constant 0 : index
    %c0_39 = arith.constant 0 : index
    %40 = vector.load %arg8[%c0_36, %c0_37, %c0_38, %c0_39] : memref<2x4x32x128xf32, #tpu.memory_space<vmem>>, vector<1x1x32x128xf32>
    %41 = vector.shape_cast %40 : vector<1x1x32x128xf32> to vector<32x128xf32>
    %cst_40 = arith.constant dense<0.000000e+00> : vector<16x128xf32>
    %42 = tpu.matmul %39, %41, %cst_40 {dimension_numbers = #tpu.dot_dimension_numbers<[1], [0], [0], [1], [0, 0, 1, 1], [], []>} : vector<16x32xf32>, vector<32x128xf32>, vector<16x128xf32> -> vector<16x128xf32>
    %c0_41 = arith.constant 0 : index
    %c1 = arith.constant 1 : index
    %c0_42 = arith.constant 0 : index
    %c0_43 = arith.constant 0 : index
    %43 = vector.load %arg2[%c0_41, %c1, %c0_42, %c0_43] : memref<2x4x128x32xf32, #tpu.memory_space<vmem>>, vector<1x1x128x32xf32>
    %44 = vector.shape_cast %43 : vector<1x1x128x32xf32> to vector<128x32xf32>
    %cst_44 = arith.constant dense<0.000000e+00> : vector<16x32xf32>
    %45 = tpu.matmul %1, %44, %cst_44 {dimension_numbers = #tpu.dot_dimension_numbers<[1], [0], [0], [1], [0, 0, 1, 1], [], []>} : vector<16x128xf32>, vector<128x32xf32>, vector<16x32xf32> -> vector<16x32xf32>
    %c0_45 = arith.constant 0 : index
    %c1_46 = arith.constant 1 : index
    %c0_47 = arith.constant 0 : index
    %c0_48 = arith.constant 0 : index
    %46 = vector.load %arg3[%c0_45, %c1_46, %c0_47, %c0_48] : memref<2x4x1x32xf32, #tpu.memory_space<vmem>>, vector<1x1x1x32xf32>
    %47 = vector.shape_cast %46 : vector<1x1x1x32xf32> to vector<1x32xf32>
    %48 = vector.broadcast %47 : vector<1x32xf32> to vector<16x32xf32>
    %49 = arith.addf %45, %48 : vector<16x32xf32>
    %c0_49 = arith.constant 0 : index
    %c1_50 = arith.constant 1 : index
    %c0_51 = arith.constant 0 : index
    %c0_52 = arith.constant 0 : index
    %50 = vector.load %arg4[%c0_49, %c1_50, %c0_51, %c0_52] : memref<2x4x128x32xf32, #tpu.memory_space<vmem>>, vector<1x1x128x32xf32>
    %51 = vector.shape_cast %50 : vector<1x1x128x32xf32> to vector<128x32xf32>
    %cst_53 = arith.constant dense<0.000000e+00> : vector<16x32xf32>
    %52 = tpu.matmul %1, %51, %cst_53 {dimension_numbers = #tpu.dot_dimension_numbers<[1], [0], [0], [1], [0, 0, 1, 1], [], []>} : vector<16x128xf32>, vector<128x32xf32>, vector<16x32xf32> -> vector<16x32xf32>
    %c0_54 = arith.constant 0 : index
    %c1_55 = arith.constant 1 : index
    %c0_56 = arith.constant 0 : index
    %c0_57 = arith.constant 0 : index
    %53 = vector.load %arg5[%c0_54, %c1_55, %c0_56, %c0_57] : memref<2x4x1x32xf32, #tpu.memory_space<vmem>>, vector<1x1x1x32xf32>
    %54 = vector.shape_cast %53 : vector<1x1x1x32xf32> to vector<1x32xf32>
    %55 = vector.broadcast %54 : vector<1x32xf32> to vector<16x32xf32>
    %56 = arith.addf %52, %55 : vector<16x32xf32>
    %c0_58 = arith.constant 0 : index
    %c1_59 = arith.constant 1 : index
    %c0_60 = arith.constant 0 : index
    %c0_61 = arith.constant 0 : index
    %57 = vector.load %arg6[%c0_58, %c1_59, %c0_60, %c0_61] : memref<2x4x128x32xf32, #tpu.memory_space<vmem>>, vector<1x1x128x32xf32>
    %58 = vector.shape_cast %57 : vector<1x1x128x32xf32> to vector<128x32xf32>
    %cst_62 = arith.constant dense<0.000000e+00> : vector<16x32xf32>
    %59 = tpu.matmul %1, %58, %cst_62 {dimension_numbers = #tpu.dot_dimension_numbers<[1], [0], [0], [1], [0, 0, 1, 1], [], []>} : vector<16x128xf32>, vector<128x32xf32>, vector<16x32xf32> -> vector<16x32xf32>
    %c0_63 = arith.constant 0 : index
    %c1_64 = arith.constant 1 : index
    %c0_65 = arith.constant 0 : index
    %c0_66 = arith.constant 0 : index
    %60 = vector.load %arg7[%c0_63, %c1_64, %c0_65, %c0_66] : memref<2x4x1x32xf32, #tpu.memory_space<vmem>>, vector<1x1x1x32xf32>
    %61 = vector.shape_cast %60 : vector<1x1x1x32xf32> to vector<1x32xf32>
    %62 = vector.broadcast %61 : vector<1x32xf32> to vector<16x32xf32>
    %63 = arith.addf %59, %62 : vector<16x32xf32>
    %cst_67 = arith.constant dense<0.000000e+00> : vector<16x16xf32>
    %64 = tpu.matmul %49, %56, %cst_67 {dimension_numbers = #tpu.dot_dimension_numbers<[1], [1], [0], [0], [0, 0, 1, 0], [], []>} : vector<16x32xf32>, vector<16x32xf32>, vector<16x16xf32> -> vector<16x16xf32>
    %cst_68 = arith.constant 0.176776692 : f32
    %65 = vector.broadcast %cst_68 : f32 to vector<16x16xf32>
    %66 = arith.mulf %64, %65 : vector<16x16xf32>
    %67 = vector.broadcast %3 : vector<1x16xf32> to vector<16x16xf32>
    %68 = arith.addf %66, %67 : vector<16x16xf32>
    %cst_69 = arith.constant dense<0xFF800000> : vector<16xf32>
    %69 = vector.multi_reduction <maximumf>, %68, %cst_69 [1] : vector<16x16xf32> to vector<16xf32>
    %70 = vector.shape_cast %69 : vector<16xf32> to vector<16x1xf32>
    %71 = vector.broadcast %70 : vector<16x1xf32> to vector<16x16xf32>
    %72 = arith.subf %68, %71 : vector<16x16xf32>
    %73 = math.exp %72 : vector<16x16xf32>
    %cst_70 = arith.constant dense<0.000000e+00> : vector<16xf32>
    %74 = vector.multi_reduction <add>, %73, %cst_70 [1] : vector<16x16xf32> to vector<16xf32>
    %75 = vector.shape_cast %74 : vector<16xf32> to vector<16x1xf32>
    %76 = vector.broadcast %75 : vector<16x1xf32> to vector<16x16xf32>
    %77 = arith.divf %73, %76 : vector<16x16xf32>
    %cst_71 = arith.constant dense<0.000000e+00> : vector<16x32xf32>
    %78 = tpu.matmul %77, %63, %cst_71 {dimension_numbers = #tpu.dot_dimension_numbers<[1], [0], [0], [1], [0, 0, 1, 1], [], []>} : vector<16x16xf32>, vector<16x32xf32>, vector<16x32xf32> -> vector<16x32xf32>
    %c0_72 = arith.constant 0 : index
    %c1_73 = arith.constant 1 : index
    %c0_74 = arith.constant 0 : index
    %c0_75 = arith.constant 0 : index
    %79 = vector.load %arg8[%c0_72, %c1_73, %c0_74, %c0_75] : memref<2x4x32x128xf32, #tpu.memory_space<vmem>>, vector<1x1x32x128xf32>
    %80 = vector.shape_cast %79 : vector<1x1x32x128xf32> to vector<32x128xf32>
    %cst_76 = arith.constant dense<0.000000e+00> : vector<16x128xf32>
    %81 = tpu.matmul %78, %80, %cst_76 {dimension_numbers = #tpu.dot_dimension_numbers<[1], [0], [0], [1], [0, 0, 1, 1], [], []>} : vector<16x32xf32>, vector<32x128xf32>, vector<16x128xf32> -> vector<16x128xf32>
    %82 = arith.addf %42, %81 : vector<16x128xf32>
    %c0_77 = arith.constant 0 : index
    %c2 = arith.constant 2 : index
    %c0_78 = arith.constant 0 : index
    %c0_79 = arith.constant 0 : index
    %83 = vector.load %arg2[%c0_77, %c2, %c0_78, %c0_79] : memref<2x4x128x32xf32, #tpu.memory_space<vmem>>, vector<1x1x128x32xf32>
    %84 = vector.shape_cast %83 : vector<1x1x128x32xf32> to vector<128x32xf32>
    %cst_80 = arith.constant dense<0.000000e+00> : vector<16x32xf32>
    %85 = tpu.matmul %1, %84, %cst_80 {dimension_numbers = #tpu.dot_dimension_numbers<[1], [0], [0], [1], [0, 0, 1, 1], [], []>} : vector<16x128xf32>, vector<128x32xf32>, vector<16x32xf32> -> vector<16x32xf32>
    %c0_81 = arith.constant 0 : index
    %c2_82 = arith.constant 2 : index
    %c0_83 = arith.constant 0 : index
    %c0_84 = arith.constant 0 : index
    %86 = vector.load %arg3[%c0_81, %c2_82, %c0_83, %c0_84] : memref<2x4x1x32xf32, #tpu.memory_space<vmem>>, vector<1x1x1x32xf32>
    %87 = vector.shape_cast %86 : vector<1x1x1x32xf32> to vector<1x32xf32>
    %88 = vector.broadcast %87 : vector<1x32xf32> to vector<16x32xf32>
    %89 = arith.addf %85, %88 : vector<16x32xf32>
    %c0_85 = arith.constant 0 : index
    %c2_86 = arith.constant 2 : index
    %c0_87 = arith.constant 0 : index
    %c0_88 = arith.constant 0 : index
    %90 = vector.load %arg4[%c0_85, %c2_86, %c0_87, %c0_88] : memref<2x4x128x32xf32, #tpu.memory_space<vmem>>, vector<1x1x128x32xf32>
    %91 = vector.shape_cast %90 : vector<1x1x128x32xf32> to vector<128x32xf32>
    %cst_89 = arith.constant dense<0.000000e+00> : vector<16x32xf32>
    %92 = tpu.matmul %1, %91, %cst_89 {dimension_numbers = #tpu.dot_dimension_numbers<[1], [0], [0], [1], [0, 0, 1, 1], [], []>} : vector<16x128xf32>, vector<128x32xf32>, vector<16x32xf32> -> vector<16x32xf32>
    %c0_90 = arith.constant 0 : index
    %c2_91 = arith.constant 2 : index
    %c0_92 = arith.constant 0 : index
    %c0_93 = arith.constant 0 : index
    %93 = vector.load %arg5[%c0_90, %c2_91, %c0_92, %c0_93] : memref<2x4x1x32xf32, #tpu.memory_space<vmem>>, vector<1x1x1x32xf32>
    %94 = vector.shape_cast %93 : vector<1x1x1x32xf32> to vector<1x32xf32>
    %95 = vector.broadcast %94 : vector<1x32xf32> to vector<16x32xf32>
    %96 = arith.addf %92, %95 : vector<16x32xf32>
    %c0_94 = arith.constant 0 : index
    %c2_95 = arith.constant 2 : index
    %c0_96 = arith.constant 0 : index
    %c0_97 = arith.constant 0 : index
    %97 = vector.load %arg6[%c0_94, %c2_95, %c0_96, %c0_97] : memref<2x4x128x32xf32, #tpu.memory_space<vmem>>, vector<1x1x128x32xf32>
    %98 = vector.shape_cast %97 : vector<1x1x128x32xf32> to vector<128x32xf32>
    %cst_98 = arith.constant dense<0.000000e+00> : vector<16x32xf32>
    %99 = tpu.matmul %1, %98, %cst_98 {dimension_numbers = #tpu.dot_dimension_numbers<[1], [0], [0], [1], [0, 0, 1, 1], [], []>} : vector<16x128xf32>, vector<128x32xf32>, vector<16x32xf32> -> vector<16x32xf32>
    %c0_99 = arith.constant 0 : index
    %c2_100 = arith.constant 2 : index
    %c0_101 = arith.constant 0 : index
    %c0_102 = arith.constant 0 : index
    %100 = vector.load %arg7[%c0_99, %c2_100, %c0_101, %c0_102] : memref<2x4x1x32xf32, #tpu.memory_space<vmem>>, vector<1x1x1x32xf32>
    %101 = vector.shape_cast %100 : vector<1x1x1x32xf32> to vector<1x32xf32>
    %102 = vector.broadcast %101 : vector<1x32xf32> to vector<16x32xf32>
    %103 = arith.addf %99, %102 : vector<16x32xf32>
    %cst_103 = arith.constant dense<0.000000e+00> : vector<16x16xf32>
    %104 = tpu.matmul %89, %96, %cst_103 {dimension_numbers = #tpu.dot_dimension_numbers<[1], [1], [0], [0], [0, 0, 1, 0], [], []>} : vector<16x32xf32>, vector<16x32xf32>, vector<16x16xf32> -> vector<16x16xf32>
    %cst_104 = arith.constant 0.176776692 : f32
    %105 = vector.broadcast %cst_104 : f32 to vector<16x16xf32>
    %106 = arith.mulf %104, %105 : vector<16x16xf32>
    %107 = vector.broadcast %3 : vector<1x16xf32> to vector<16x16xf32>
    %108 = arith.addf %106, %107 : vector<16x16xf32>
    %cst_105 = arith.constant dense<0xFF800000> : vector<16xf32>
    %109 = vector.multi_reduction <maximumf>, %108, %cst_105 [1] : vector<16x16xf32> to vector<16xf32>
    %110 = vector.shape_cast %109 : vector<16xf32> to vector<16x1xf32>
    %111 = vector.broadcast %110 : vector<16x1xf32> to vector<16x16xf32>
    %112 = arith.subf %108, %111 : vector<16x16xf32>
    %113 = math.exp %112 : vector<16x16xf32>
    %cst_106 = arith.constant dense<0.000000e+00> : vector<16xf32>
    %114 = vector.multi_reduction <add>, %113, %cst_106 [1] : vector<16x16xf32> to vector<16xf32>
    %115 = vector.shape_cast %114 : vector<16xf32> to vector<16x1xf32>
    %116 = vector.broadcast %115 : vector<16x1xf32> to vector<16x16xf32>
    %117 = arith.divf %113, %116 : vector<16x16xf32>
    %cst_107 = arith.constant dense<0.000000e+00> : vector<16x32xf32>
    %118 = tpu.matmul %117, %103, %cst_107 {dimension_numbers = #tpu.dot_dimension_numbers<[1], [0], [0], [1], [0, 0, 1, 1], [], []>} : vector<16x16xf32>, vector<16x32xf32>, vector<16x32xf32> -> vector<16x32xf32>
    %c0_108 = arith.constant 0 : index
    %c2_109 = arith.constant 2 : index
    %c0_110 = arith.constant 0 : index
    %c0_111 = arith.constant 0 : index
    %119 = vector.load %arg8[%c0_108, %c2_109, %c0_110, %c0_111] : memref<2x4x32x128xf32, #tpu.memory_space<vmem>>, vector<1x1x32x128xf32>
    %120 = vector.shape_cast %119 : vector<1x1x32x128xf32> to vector<32x128xf32>
    %cst_112 = arith.constant dense<0.000000e+00> : vector<16x128xf32>
    %121 = tpu.matmul %118, %120, %cst_112 {dimension_numbers = #tpu.dot_dimension_numbers<[1], [0], [0], [1], [0, 0, 1, 1], [], []>} : vector<16x32xf32>, vector<32x128xf32>, vector<16x128xf32> -> vector<16x128xf32>
    %122 = arith.addf %82, %121 : vector<16x128xf32>
    %c0_113 = arith.constant 0 : index
    %c3 = arith.constant 3 : index
    %c0_114 = arith.constant 0 : index
    %c0_115 = arith.constant 0 : index
    %123 = vector.load %arg2[%c0_113, %c3, %c0_114, %c0_115] : memref<2x4x128x32xf32, #tpu.memory_space<vmem>>, vector<1x1x128x32xf32>
    %124 = vector.shape_cast %123 : vector<1x1x128x32xf32> to vector<128x32xf32>
    %cst_116 = arith.constant dense<0.000000e+00> : vector<16x32xf32>
    %125 = tpu.matmul %1, %124, %cst_116 {dimension_numbers = #tpu.dot_dimension_numbers<[1], [0], [0], [1], [0, 0, 1, 1], [], []>} : vector<16x128xf32>, vector<128x32xf32>, vector<16x32xf32> -> vector<16x32xf32>
    %c0_117 = arith.constant 0 : index
    %c3_118 = arith.constant 3 : index
    %c0_119 = arith.constant 0 : index
    %c0_120 = arith.constant 0 : index
    %126 = vector.load %arg3[%c0_117, %c3_118, %c0_119, %c0_120] : memref<2x4x1x32xf32, #tpu.memory_space<vmem>>, vector<1x1x1x32xf32>
    %127 = vector.shape_cast %126 : vector<1x1x1x32xf32> to vector<1x32xf32>
    %128 = vector.broadcast %127 : vector<1x32xf32> to vector<16x32xf32>
    %129 = arith.addf %125, %128 : vector<16x32xf32>
    %c0_121 = arith.constant 0 : index
    %c3_122 = arith.constant 3 : index
    %c0_123 = arith.constant 0 : index
    %c0_124 = arith.constant 0 : index
    %130 = vector.load %arg4[%c0_121, %c3_122, %c0_123, %c0_124] : memref<2x4x128x32xf32, #tpu.memory_space<vmem>>, vector<1x1x128x32xf32>
    %131 = vector.shape_cast %130 : vector<1x1x128x32xf32> to vector<128x32xf32>
    %cst_125 = arith.constant dense<0.000000e+00> : vector<16x32xf32>
    %132 = tpu.matmul %1, %131, %cst_125 {dimension_numbers = #tpu.dot_dimension_numbers<[1], [0], [0], [1], [0, 0, 1, 1], [], []>} : vector<16x128xf32>, vector<128x32xf32>, vector<16x32xf32> -> vector<16x32xf32>
    %c0_126 = arith.constant 0 : index
    %c3_127 = arith.constant 3 : index
    %c0_128 = arith.constant 0 : index
    %c0_129 = arith.constant 0 : index
    %133 = vector.load %arg5[%c0_126, %c3_127, %c0_128, %c0_129] : memref<2x4x1x32xf32, #tpu.memory_space<vmem>>, vector<1x1x1x32xf32>
    %134 = vector.shape_cast %133 : vector<1x1x1x32xf32> to vector<1x32xf32>
    %135 = vector.broadcast %134 : vector<1x32xf32> to vector<16x32xf32>
    %136 = arith.addf %132, %135 : vector<16x32xf32>
    %c0_130 = arith.constant 0 : index
    %c3_131 = arith.constant 3 : index
    %c0_132 = arith.constant 0 : index
    %c0_133 = arith.constant 0 : index
    %137 = vector.load %arg6[%c0_130, %c3_131, %c0_132, %c0_133] : memref<2x4x128x32xf32, #tpu.memory_space<vmem>>, vector<1x1x128x32xf32>
    %138 = vector.shape_cast %137 : vector<1x1x128x32xf32> to vector<128x32xf32>
    %cst_134 = arith.constant dense<0.000000e+00> : vector<16x32xf32>
    %139 = tpu.matmul %1, %138, %cst_134 {dimension_numbers = #tpu.dot_dimension_numbers<[1], [0], [0], [1], [0, 0, 1, 1], [], []>} : vector<16x128xf32>, vector<128x32xf32>, vector<16x32xf32> -> vector<16x32xf32>
    %c0_135 = arith.constant 0 : index
    %c3_136 = arith.constant 3 : index
    %c0_137 = arith.constant 0 : index
    %c0_138 = arith.constant 0 : index
    %140 = vector.load %arg7[%c0_135, %c3_136, %c0_137, %c0_138] : memref<2x4x1x32xf32, #tpu.memory_space<vmem>>, vector<1x1x1x32xf32>
    %141 = vector.shape_cast %140 : vector<1x1x1x32xf32> to vector<1x32xf32>
    %142 = vector.broadcast %141 : vector<1x32xf32> to vector<16x32xf32>
    %143 = arith.addf %139, %142 : vector<16x32xf32>
    %cst_139 = arith.constant dense<0.000000e+00> : vector<16x16xf32>
    %144 = tpu.matmul %129, %136, %cst_139 {dimension_numbers = #tpu.dot_dimension_numbers<[1], [1], [0], [0], [0, 0, 1, 0], [], []>} : vector<16x32xf32>, vector<16x32xf32>, vector<16x16xf32> -> vector<16x16xf32>
    %cst_140 = arith.constant 0.176776692 : f32
    %145 = vector.broadcast %cst_140 : f32 to vector<16x16xf32>
    %146 = arith.mulf %144, %145 : vector<16x16xf32>
    %147 = vector.broadcast %3 : vector<1x16xf32> to vector<16x16xf32>
    %148 = arith.addf %146, %147 : vector<16x16xf32>
    %cst_141 = arith.constant dense<0xFF800000> : vector<16xf32>
    %149 = vector.multi_reduction <maximumf>, %148, %cst_141 [1] : vector<16x16xf32> to vector<16xf32>
    %150 = vector.shape_cast %149 : vector<16xf32> to vector<16x1xf32>
    %151 = vector.broadcast %150 : vector<16x1xf32> to vector<16x16xf32>
    %152 = arith.subf %148, %151 : vector<16x16xf32>
    %153 = math.exp %152 : vector<16x16xf32>
    %cst_142 = arith.constant dense<0.000000e+00> : vector<16xf32>
    %154 = vector.multi_reduction <add>, %153, %cst_142 [1] : vector<16x16xf32> to vector<16xf32>
    %155 = vector.shape_cast %154 : vector<16xf32> to vector<16x1xf32>
    %156 = vector.broadcast %155 : vector<16x1xf32> to vector<16x16xf32>
    %157 = arith.divf %153, %156 : vector<16x16xf32>
    %cst_143 = arith.constant dense<0.000000e+00> : vector<16x32xf32>
    %158 = tpu.matmul %157, %143, %cst_143 {dimension_numbers = #tpu.dot_dimension_numbers<[1], [0], [0], [1], [0, 0, 1, 1], [], []>} : vector<16x16xf32>, vector<16x32xf32>, vector<16x32xf32> -> vector<16x32xf32>
    %c0_144 = arith.constant 0 : index
    %c3_145 = arith.constant 3 : index
    %c0_146 = arith.constant 0 : index
    %c0_147 = arith.constant 0 : index
    %159 = vector.load %arg8[%c0_144, %c3_145, %c0_146, %c0_147] : memref<2x4x32x128xf32, #tpu.memory_space<vmem>>, vector<1x1x32x128xf32>
    %160 = vector.shape_cast %159 : vector<1x1x32x128xf32> to vector<32x128xf32>
    %cst_148 = arith.constant dense<0.000000e+00> : vector<16x128xf32>
    %161 = tpu.matmul %158, %160, %cst_148 {dimension_numbers = #tpu.dot_dimension_numbers<[1], [0], [0], [1], [0, 0, 1, 1], [], []>} : vector<16x32xf32>, vector<32x128xf32>, vector<16x128xf32> -> vector<16x128xf32>
    %162 = arith.addf %122, %161 : vector<16x128xf32>
    %c0_149 = arith.constant 0 : index
    %c0_150 = arith.constant 0 : index
    %c0_151 = arith.constant 0 : index
    %163 = vector.load %arg9[%c0_149, %c0_150, %c0_151] : memref<2x1x128xf32, #tpu.memory_space<vmem>>, vector<1x1x128xf32>
    %164 = vector.shape_cast %163 : vector<1x1x128xf32> to vector<1x128xf32>
    %165 = vector.broadcast %164 : vector<1x128xf32> to vector<16x128xf32>
    %166 = arith.addf %162, %165 : vector<16x128xf32>
    %c0_152 = arith.constant 0 : index
    %c0_153 = arith.constant 0 : index
    %c0_154 = arith.constant 0 : index
    %167 = vector.load %arg14[%c0_152, %c0_153, %c0_154] : memref<2x1x128xf32, #tpu.memory_space<vmem>>, vector<1x1x128xf32>
    %168 = vector.shape_cast %167 : vector<1x1x128xf32> to vector<1x128xf32>
    %c0_155 = arith.constant 0 : index
    %c0_156 = arith.constant 0 : index
    %c0_157 = arith.constant 0 : index
    %169 = vector.load %arg15[%c0_155, %c0_156, %c0_157] : memref<2x1x128xf32, #tpu.memory_space<vmem>>, vector<1x1x128xf32>
    %170 = vector.shape_cast %169 : vector<1x1x128xf32> to vector<1x128xf32>
    %171 = arith.addf %166, %1 : vector<16x128xf32>
    %cst_158 = arith.constant dense<0.000000e+00> : vector<16xf32>
    %172 = vector.multi_reduction <add>, %171, %cst_158 [1] : vector<16x128xf32> to vector<16xf32>
    %173 = vector.shape_cast %172 : vector<16xf32> to vector<16x1xf32>
    %cst_159 = arith.constant 1.280000e+02 : f32
    %174 = vector.broadcast %cst_159 : f32 to vector<16x1xf32>
    %175 = arith.divf %173, %174 : vector<16x1xf32>
    %176 = vector.broadcast %175 : vector<16x1xf32> to vector<16x128xf32>
    %177 = arith.subf %171, %176 : vector<16x128xf32>
    %178 = arith.mulf %177, %177 : vector<16x128xf32>
    %cst_160 = arith.constant dense<0.000000e+00> : vector<16xf32>
    %179 = vector.multi_reduction <add>, %178, %cst_160 [1] : vector<16x128xf32> to vector<16xf32>
    %180 = vector.shape_cast %179 : vector<16xf32> to vector<16x1xf32>
    %cst_161 = arith.constant 1.280000e+02 : f32
    %181 = vector.broadcast %cst_161 : f32 to vector<16x1xf32>
    %182 = arith.divf %180, %181 : vector<16x1xf32>
    %cst_162 = arith.constant 9.99999974E-6 : f32
    %183 = vector.broadcast %cst_162 : f32 to vector<16x1xf32>
    %184 = arith.addf %182, %183 : vector<16x1xf32>
    %185 = math.rsqrt %184 : vector<16x1xf32>
    %186 = vector.broadcast %185 : vector<16x1xf32> to vector<16x128xf32>
    %187 = arith.mulf %177, %186 : vector<16x128xf32>
    %188 = vector.broadcast %168 : vector<1x128xf32> to vector<16x128xf32>
    %189 = arith.mulf %187, %188 : vector<16x128xf32>
    %190 = vector.broadcast %170 : vector<1x128xf32> to vector<16x128xf32>
    %191 = arith.addf %189, %190 : vector<16x128xf32>
    %c0_163 = arith.constant 0 : index
    %c0_164 = arith.constant 0 : index
    %c0_165 = arith.constant 0 : index
    %192 = vector.load %arg10[%c0_163, %c0_164, %c0_165] : memref<2x128x256xf32, #tpu.memory_space<vmem>>, vector<1x128x256xf32>
    %193 = vector.shape_cast %192 : vector<1x128x256xf32> to vector<128x256xf32>
    %cst_166 = arith.constant dense<0.000000e+00> : vector<16x256xf32>
    %194 = tpu.matmul %191, %193, %cst_166 {dimension_numbers = #tpu.dot_dimension_numbers<[1], [0], [0], [1], [0, 0, 1, 1], [], []>} : vector<16x128xf32>, vector<128x256xf32>, vector<16x256xf32> -> vector<16x256xf32>
    %c0_167 = arith.constant 0 : index
    %c0_168 = arith.constant 0 : index
    %c0_169 = arith.constant 0 : index
    %195 = vector.load %arg11[%c0_167, %c0_168, %c0_169] : memref<2x1x256xf32, #tpu.memory_space<vmem>>, vector<1x1x256xf32>
    %196 = vector.shape_cast %195 : vector<1x1x256xf32> to vector<1x256xf32>
    %197 = vector.broadcast %196 : vector<1x256xf32> to vector<16x256xf32>
    %198 = arith.addf %194, %197 : vector<16x256xf32>
    %cst_170 = arith.constant 5.000000e-01 : f32
    %199 = vector.broadcast %cst_170 : f32 to vector<16x256xf32>
    %200 = arith.mulf %199, %198 : vector<16x256xf32>
    %cst_171 = arith.constant 0.707106769 : f32
    %201 = vector.broadcast %cst_171 : f32 to vector<16x256xf32>
    %202 = arith.mulf %198, %201 : vector<16x256xf32>
    %203 = math.absf %202 : vector<16x256xf32>
    %cst_172 = arith.constant 0.327591091 : f32
    %204 = vector.broadcast %cst_172 : f32 to vector<16x256xf32>
    %205 = arith.mulf %204, %203 : vector<16x256xf32>
    %cst_173 = arith.constant 1.000000e+00 : f32
    %206 = vector.broadcast %cst_173 : f32 to vector<16x256xf32>
    %207 = arith.addf %206, %205 : vector<16x256xf32>
    %cst_174 = arith.constant 1.000000e+00 : f32
    %208 = vector.broadcast %cst_174 : f32 to vector<16x256xf32>
    %209 = arith.divf %208, %207 : vector<16x256xf32>
    %cst_175 = arith.constant 1.06140542 : f32
    %210 = vector.broadcast %cst_175 : f32 to vector<16x256xf32>
    %211 = arith.mulf %210, %209 : vector<16x256xf32>
    %cst_176 = arith.constant -1.45315206 : f32
    %212 = vector.broadcast %cst_176 : f32 to vector<16x256xf32>
    %213 = arith.addf %211, %212 : vector<16x256xf32>
    %214 = arith.mulf %213, %209 : vector<16x256xf32>
    %cst_177 = arith.constant 1.42141378 : f32
    %215 = vector.broadcast %cst_177 : f32 to vector<16x256xf32>
    %216 = arith.addf %214, %215 : vector<16x256xf32>
    %217 = arith.mulf %216, %209 : vector<16x256xf32>
    %cst_178 = arith.constant -0.284496725 : f32
    %218 = vector.broadcast %cst_178 : f32 to vector<16x256xf32>
    %219 = arith.addf %217, %218 : vector<16x256xf32>
    %220 = arith.mulf %219, %209 : vector<16x256xf32>
    %cst_179 = arith.constant 0.254829586 : f32
    %221 = vector.broadcast %cst_179 : f32 to vector<16x256xf32>
    %222 = arith.addf %220, %221 : vector<16x256xf32>
    %223 = arith.mulf %222, %209 : vector<16x256xf32>
    %cst_180 = arith.constant 0.000000e+00 : f32
    %224 = vector.broadcast %cst_180 : f32 to vector<16x256xf32>
    %225 = arith.subf %224, %203 : vector<16x256xf32>
    %226 = arith.mulf %225, %203 : vector<16x256xf32>
    %227 = math.exp %226 : vector<16x256xf32>
    %228 = arith.mulf %223, %227 : vector<16x256xf32>
    %cst_181 = arith.constant 1.000000e+00 : f32
    %229 = vector.broadcast %cst_181 : f32 to vector<16x256xf32>
    %230 = arith.subf %229, %228 : vector<16x256xf32>
    %cst_182 = arith.constant 0.000000e+00 : f32
    %231 = vector.broadcast %cst_182 : f32 to vector<16x256xf32>
    %232 = arith.cmpf olt, %202, %231 : vector<16x256xf32>
    %cst_183 = arith.constant 0.000000e+00 : f32
    %233 = vector.broadcast %cst_183 : f32 to vector<16x256xf32>
    %234 = arith.subf %233, %230 : vector<16x256xf32>
    %235 = arith.select %232, %234, %230 : vector<16x256xi1>, vector<16x256xf32>
    %cst_184 = arith.constant 1.000000e+00 : f32
    %236 = vector.broadcast %cst_184 : f32 to vector<16x256xf32>
    %237 = arith.addf %236, %235 : vector<16x256xf32>
    %238 = arith.mulf %200, %237 : vector<16x256xf32>
    %c0_185 = arith.constant 0 : index
    %c0_186 = arith.constant 0 : index
    %c0_187 = arith.constant 0 : index
    %239 = vector.load %arg12[%c0_185, %c0_186, %c0_187] : memref<2x256x128xf32, #tpu.memory_space<vmem>>, vector<1x256x128xf32>
    %240 = vector.shape_cast %239 : vector<1x256x128xf32> to vector<256x128xf32>
    %cst_188 = arith.constant dense<0.000000e+00> : vector<16x128xf32>
    %241 = tpu.matmul %238, %240, %cst_188 {dimension_numbers = #tpu.dot_dimension_numbers<[1], [0], [0], [1], [0, 0, 1, 1], [], []>} : vector<16x256xf32>, vector<256x128xf32>, vector<16x128xf32> -> vector<16x128xf32>
    %c0_189 = arith.constant 0 : index
    %c0_190 = arith.constant 0 : index
    %c0_191 = arith.constant 0 : index
    %242 = vector.load %arg13[%c0_189, %c0_190, %c0_191] : memref<2x1x128xf32, #tpu.memory_space<vmem>>, vector<1x1x128xf32>
    %243 = vector.shape_cast %242 : vector<1x1x128xf32> to vector<1x128xf32>
    %244 = vector.broadcast %243 : vector<1x128xf32> to vector<16x128xf32>
    %245 = arith.addf %241, %244 : vector<16x128xf32>
    %c0_192 = arith.constant 0 : index
    %c0_193 = arith.constant 0 : index
    %c0_194 = arith.constant 0 : index
    %246 = vector.load %arg16[%c0_192, %c0_193, %c0_194] : memref<2x1x128xf32, #tpu.memory_space<vmem>>, vector<1x1x128xf32>
    %247 = vector.shape_cast %246 : vector<1x1x128xf32> to vector<1x128xf32>
    %c0_195 = arith.constant 0 : index
    %c0_196 = arith.constant 0 : index
    %c0_197 = arith.constant 0 : index
    %248 = vector.load %arg17[%c0_195, %c0_196, %c0_197] : memref<2x1x128xf32, #tpu.memory_space<vmem>>, vector<1x1x128xf32>
    %249 = vector.shape_cast %248 : vector<1x1x128xf32> to vector<1x128xf32>
    %250 = arith.addf %245, %191 : vector<16x128xf32>
    %cst_198 = arith.constant dense<0.000000e+00> : vector<16xf32>
    %251 = vector.multi_reduction <add>, %250, %cst_198 [1] : vector<16x128xf32> to vector<16xf32>
    %252 = vector.shape_cast %251 : vector<16xf32> to vector<16x1xf32>
    %cst_199 = arith.constant 1.280000e+02 : f32
    %253 = vector.broadcast %cst_199 : f32 to vector<16x1xf32>
    %254 = arith.divf %252, %253 : vector<16x1xf32>
    %255 = vector.broadcast %254 : vector<16x1xf32> to vector<16x128xf32>
    %256 = arith.subf %250, %255 : vector<16x128xf32>
    %257 = arith.mulf %256, %256 : vector<16x128xf32>
    %cst_200 = arith.constant dense<0.000000e+00> : vector<16xf32>
    %258 = vector.multi_reduction <add>, %257, %cst_200 [1] : vector<16x128xf32> to vector<16xf32>
    %259 = vector.shape_cast %258 : vector<16xf32> to vector<16x1xf32>
    %cst_201 = arith.constant 1.280000e+02 : f32
    %260 = vector.broadcast %cst_201 : f32 to vector<16x1xf32>
    %261 = arith.divf %259, %260 : vector<16x1xf32>
    %cst_202 = arith.constant 9.99999974E-6 : f32
    %262 = vector.broadcast %cst_202 : f32 to vector<16x1xf32>
    %263 = arith.addf %261, %262 : vector<16x1xf32>
    %264 = math.rsqrt %263 : vector<16x1xf32>
    %265 = vector.broadcast %264 : vector<16x1xf32> to vector<16x128xf32>
    %266 = arith.mulf %256, %265 : vector<16x128xf32>
    %267 = vector.broadcast %247 : vector<1x128xf32> to vector<16x128xf32>
    %268 = arith.mulf %266, %267 : vector<16x128xf32>
    %269 = vector.broadcast %249 : vector<1x128xf32> to vector<16x128xf32>
    %270 = arith.addf %268, %269 : vector<16x128xf32>
    %c1_203 = arith.constant 1 : index
    %c0_204 = arith.constant 0 : index
    %c0_205 = arith.constant 0 : index
    %c0_206 = arith.constant 0 : index
    %271 = vector.load %arg2[%c1_203, %c0_204, %c0_205, %c0_206] : memref<2x4x128x32xf32, #tpu.memory_space<vmem>>, vector<1x1x128x32xf32>
    %272 = vector.shape_cast %271 : vector<1x1x128x32xf32> to vector<128x32xf32>
    %cst_207 = arith.constant dense<0.000000e+00> : vector<16x32xf32>
    %273 = tpu.matmul %270, %272, %cst_207 {dimension_numbers = #tpu.dot_dimension_numbers<[1], [0], [0], [1], [0, 0, 1, 1], [], []>} : vector<16x128xf32>, vector<128x32xf32>, vector<16x32xf32> -> vector<16x32xf32>
    %c1_208 = arith.constant 1 : index
    %c0_209 = arith.constant 0 : index
    %c0_210 = arith.constant 0 : index
    %c0_211 = arith.constant 0 : index
    %274 = vector.load %arg3[%c1_208, %c0_209, %c0_210, %c0_211] : memref<2x4x1x32xf32, #tpu.memory_space<vmem>>, vector<1x1x1x32xf32>
    %275 = vector.shape_cast %274 : vector<1x1x1x32xf32> to vector<1x32xf32>
    %276 = vector.broadcast %275 : vector<1x32xf32> to vector<16x32xf32>
    %277 = arith.addf %273, %276 : vector<16x32xf32>
    %c1_212 = arith.constant 1 : index
    %c0_213 = arith.constant 0 : index
    %c0_214 = arith.constant 0 : index
    %c0_215 = arith.constant 0 : index
    %278 = vector.load %arg4[%c1_212, %c0_213, %c0_214, %c0_215] : memref<2x4x128x32xf32, #tpu.memory_space<vmem>>, vector<1x1x128x32xf32>
    %279 = vector.shape_cast %278 : vector<1x1x128x32xf32> to vector<128x32xf32>
    %cst_216 = arith.constant dense<0.000000e+00> : vector<16x32xf32>
    %280 = tpu.matmul %270, %279, %cst_216 {dimension_numbers = #tpu.dot_dimension_numbers<[1], [0], [0], [1], [0, 0, 1, 1], [], []>} : vector<16x128xf32>, vector<128x32xf32>, vector<16x32xf32> -> vector<16x32xf32>
    %c1_217 = arith.constant 1 : index
    %c0_218 = arith.constant 0 : index
    %c0_219 = arith.constant 0 : index
    %c0_220 = arith.constant 0 : index
    %281 = vector.load %arg5[%c1_217, %c0_218, %c0_219, %c0_220] : memref<2x4x1x32xf32, #tpu.memory_space<vmem>>, vector<1x1x1x32xf32>
    %282 = vector.shape_cast %281 : vector<1x1x1x32xf32> to vector<1x32xf32>
    %283 = vector.broadcast %282 : vector<1x32xf32> to vector<16x32xf32>
    %284 = arith.addf %280, %283 : vector<16x32xf32>
    %c1_221 = arith.constant 1 : index
    %c0_222 = arith.constant 0 : index
    %c0_223 = arith.constant 0 : index
    %c0_224 = arith.constant 0 : index
    %285 = vector.load %arg6[%c1_221, %c0_222, %c0_223, %c0_224] : memref<2x4x128x32xf32, #tpu.memory_space<vmem>>, vector<1x1x128x32xf32>
    %286 = vector.shape_cast %285 : vector<1x1x128x32xf32> to vector<128x32xf32>
    %cst_225 = arith.constant dense<0.000000e+00> : vector<16x32xf32>
    %287 = tpu.matmul %270, %286, %cst_225 {dimension_numbers = #tpu.dot_dimension_numbers<[1], [0], [0], [1], [0, 0, 1, 1], [], []>} : vector<16x128xf32>, vector<128x32xf32>, vector<16x32xf32> -> vector<16x32xf32>
    %c1_226 = arith.constant 1 : index
    %c0_227 = arith.constant 0 : index
    %c0_228 = arith.constant 0 : index
    %c0_229 = arith.constant 0 : index
    %288 = vector.load %arg7[%c1_226, %c0_227, %c0_228, %c0_229] : memref<2x4x1x32xf32, #tpu.memory_space<vmem>>, vector<1x1x1x32xf32>
    %289 = vector.shape_cast %288 : vector<1x1x1x32xf32> to vector<1x32xf32>
    %290 = vector.broadcast %289 : vector<1x32xf32> to vector<16x32xf32>
    %291 = arith.addf %287, %290 : vector<16x32xf32>
    %cst_230 = arith.constant dense<0.000000e+00> : vector<16x16xf32>
    %292 = tpu.matmul %277, %284, %cst_230 {dimension_numbers = #tpu.dot_dimension_numbers<[1], [1], [0], [0], [0, 0, 1, 0], [], []>} : vector<16x32xf32>, vector<16x32xf32>, vector<16x16xf32> -> vector<16x16xf32>
    %cst_231 = arith.constant 0.176776692 : f32
    %293 = vector.broadcast %cst_231 : f32 to vector<16x16xf32>
    %294 = arith.mulf %292, %293 : vector<16x16xf32>
    %295 = vector.broadcast %3 : vector<1x16xf32> to vector<16x16xf32>
    %296 = arith.addf %294, %295 : vector<16x16xf32>
    %cst_232 = arith.constant dense<0xFF800000> : vector<16xf32>
    %297 = vector.multi_reduction <maximumf>, %296, %cst_232 [1] : vector<16x16xf32> to vector<16xf32>
    %298 = vector.shape_cast %297 : vector<16xf32> to vector<16x1xf32>
    %299 = vector.broadcast %298 : vector<16x1xf32> to vector<16x16xf32>
    %300 = arith.subf %296, %299 : vector<16x16xf32>
    %301 = math.exp %300 : vector<16x16xf32>
    %cst_233 = arith.constant dense<0.000000e+00> : vector<16xf32>
    %302 = vector.multi_reduction <add>, %301, %cst_233 [1] : vector<16x16xf32> to vector<16xf32>
    %303 = vector.shape_cast %302 : vector<16xf32> to vector<16x1xf32>
    %304 = vector.broadcast %303 : vector<16x1xf32> to vector<16x16xf32>
    %305 = arith.divf %301, %304 : vector<16x16xf32>
    %cst_234 = arith.constant dense<0.000000e+00> : vector<16x32xf32>
    %306 = tpu.matmul %305, %291, %cst_234 {dimension_numbers = #tpu.dot_dimension_numbers<[1], [0], [0], [1], [0, 0, 1, 1], [], []>} : vector<16x16xf32>, vector<16x32xf32>, vector<16x32xf32> -> vector<16x32xf32>
    %c1_235 = arith.constant 1 : index
    %c0_236 = arith.constant 0 : index
    %c0_237 = arith.constant 0 : index
    %c0_238 = arith.constant 0 : index
    %307 = vector.load %arg8[%c1_235, %c0_236, %c0_237, %c0_238] : memref<2x4x32x128xf32, #tpu.memory_space<vmem>>, vector<1x1x32x128xf32>
    %308 = vector.shape_cast %307 : vector<1x1x32x128xf32> to vector<32x128xf32>
    %cst_239 = arith.constant dense<0.000000e+00> : vector<16x128xf32>
    %309 = tpu.matmul %306, %308, %cst_239 {dimension_numbers = #tpu.dot_dimension_numbers<[1], [0], [0], [1], [0, 0, 1, 1], [], []>} : vector<16x32xf32>, vector<32x128xf32>, vector<16x128xf32> -> vector<16x128xf32>
    %c1_240 = arith.constant 1 : index
    %c1_241 = arith.constant 1 : index
    %c0_242 = arith.constant 0 : index
    %c0_243 = arith.constant 0 : index
    %310 = vector.load %arg2[%c1_240, %c1_241, %c0_242, %c0_243] : memref<2x4x128x32xf32, #tpu.memory_space<vmem>>, vector<1x1x128x32xf32>
    %311 = vector.shape_cast %310 : vector<1x1x128x32xf32> to vector<128x32xf32>
    %cst_244 = arith.constant dense<0.000000e+00> : vector<16x32xf32>
    %312 = tpu.matmul %270, %311, %cst_244 {dimension_numbers = #tpu.dot_dimension_numbers<[1], [0], [0], [1], [0, 0, 1, 1], [], []>} : vector<16x128xf32>, vector<128x32xf32>, vector<16x32xf32> -> vector<16x32xf32>
    %c1_245 = arith.constant 1 : index
    %c1_246 = arith.constant 1 : index
    %c0_247 = arith.constant 0 : index
    %c0_248 = arith.constant 0 : index
    %313 = vector.load %arg3[%c1_245, %c1_246, %c0_247, %c0_248] : memref<2x4x1x32xf32, #tpu.memory_space<vmem>>, vector<1x1x1x32xf32>
    %314 = vector.shape_cast %313 : vector<1x1x1x32xf32> to vector<1x32xf32>
    %315 = vector.broadcast %314 : vector<1x32xf32> to vector<16x32xf32>
    %316 = arith.addf %312, %315 : vector<16x32xf32>
    %c1_249 = arith.constant 1 : index
    %c1_250 = arith.constant 1 : index
    %c0_251 = arith.constant 0 : index
    %c0_252 = arith.constant 0 : index
    %317 = vector.load %arg4[%c1_249, %c1_250, %c0_251, %c0_252] : memref<2x4x128x32xf32, #tpu.memory_space<vmem>>, vector<1x1x128x32xf32>
    %318 = vector.shape_cast %317 : vector<1x1x128x32xf32> to vector<128x32xf32>
    %cst_253 = arith.constant dense<0.000000e+00> : vector<16x32xf32>
    %319 = tpu.matmul %270, %318, %cst_253 {dimension_numbers = #tpu.dot_dimension_numbers<[1], [0], [0], [1], [0, 0, 1, 1], [], []>} : vector<16x128xf32>, vector<128x32xf32>, vector<16x32xf32> -> vector<16x32xf32>
    %c1_254 = arith.constant 1 : index
    %c1_255 = arith.constant 1 : index
    %c0_256 = arith.constant 0 : index
    %c0_257 = arith.constant 0 : index
    %320 = vector.load %arg5[%c1_254, %c1_255, %c0_256, %c0_257] : memref<2x4x1x32xf32, #tpu.memory_space<vmem>>, vector<1x1x1x32xf32>
    %321 = vector.shape_cast %320 : vector<1x1x1x32xf32> to vector<1x32xf32>
    %322 = vector.broadcast %321 : vector<1x32xf32> to vector<16x32xf32>
    %323 = arith.addf %319, %322 : vector<16x32xf32>
    %c1_258 = arith.constant 1 : index
    %c1_259 = arith.constant 1 : index
    %c0_260 = arith.constant 0 : index
    %c0_261 = arith.constant 0 : index
    %324 = vector.load %arg6[%c1_258, %c1_259, %c0_260, %c0_261] : memref<2x4x128x32xf32, #tpu.memory_space<vmem>>, vector<1x1x128x32xf32>
    %325 = vector.shape_cast %324 : vector<1x1x128x32xf32> to vector<128x32xf32>
    %cst_262 = arith.constant dense<0.000000e+00> : vector<16x32xf32>
    %326 = tpu.matmul %270, %325, %cst_262 {dimension_numbers = #tpu.dot_dimension_numbers<[1], [0], [0], [1], [0, 0, 1, 1], [], []>} : vector<16x128xf32>, vector<128x32xf32>, vector<16x32xf32> -> vector<16x32xf32>
    %c1_263 = arith.constant 1 : index
    %c1_264 = arith.constant 1 : index
    %c0_265 = arith.constant 0 : index
    %c0_266 = arith.constant 0 : index
    %327 = vector.load %arg7[%c1_263, %c1_264, %c0_265, %c0_266] : memref<2x4x1x32xf32, #tpu.memory_space<vmem>>, vector<1x1x1x32xf32>
    %328 = vector.shape_cast %327 : vector<1x1x1x32xf32> to vector<1x32xf32>
    %329 = vector.broadcast %328 : vector<1x32xf32> to vector<16x32xf32>
    %330 = arith.addf %326, %329 : vector<16x32xf32>
    %cst_267 = arith.constant dense<0.000000e+00> : vector<16x16xf32>
    %331 = tpu.matmul %316, %323, %cst_267 {dimension_numbers = #tpu.dot_dimension_numbers<[1], [1], [0], [0], [0, 0, 1, 0], [], []>} : vector<16x32xf32>, vector<16x32xf32>, vector<16x16xf32> -> vector<16x16xf32>
    %cst_268 = arith.constant 0.176776692 : f32
    %332 = vector.broadcast %cst_268 : f32 to vector<16x16xf32>
    %333 = arith.mulf %331, %332 : vector<16x16xf32>
    %334 = vector.broadcast %3 : vector<1x16xf32> to vector<16x16xf32>
    %335 = arith.addf %333, %334 : vector<16x16xf32>
    %cst_269 = arith.constant dense<0xFF800000> : vector<16xf32>
    %336 = vector.multi_reduction <maximumf>, %335, %cst_269 [1] : vector<16x16xf32> to vector<16xf32>
    %337 = vector.shape_cast %336 : vector<16xf32> to vector<16x1xf32>
    %338 = vector.broadcast %337 : vector<16x1xf32> to vector<16x16xf32>
    %339 = arith.subf %335, %338 : vector<16x16xf32>
    %340 = math.exp %339 : vector<16x16xf32>
    %cst_270 = arith.constant dense<0.000000e+00> : vector<16xf32>
    %341 = vector.multi_reduction <add>, %340, %cst_270 [1] : vector<16x16xf32> to vector<16xf32>
    %342 = vector.shape_cast %341 : vector<16xf32> to vector<16x1xf32>
    %343 = vector.broadcast %342 : vector<16x1xf32> to vector<16x16xf32>
    %344 = arith.divf %340, %343 : vector<16x16xf32>
    %cst_271 = arith.constant dense<0.000000e+00> : vector<16x32xf32>
    %345 = tpu.matmul %344, %330, %cst_271 {dimension_numbers = #tpu.dot_dimension_numbers<[1], [0], [0], [1], [0, 0, 1, 1], [], []>} : vector<16x16xf32>, vector<16x32xf32>, vector<16x32xf32> -> vector<16x32xf32>
    %c1_272 = arith.constant 1 : index
    %c1_273 = arith.constant 1 : index
    %c0_274 = arith.constant 0 : index
    %c0_275 = arith.constant 0 : index
    %346 = vector.load %arg8[%c1_272, %c1_273, %c0_274, %c0_275] : memref<2x4x32x128xf32, #tpu.memory_space<vmem>>, vector<1x1x32x128xf32>
    %347 = vector.shape_cast %346 : vector<1x1x32x128xf32> to vector<32x128xf32>
    %cst_276 = arith.constant dense<0.000000e+00> : vector<16x128xf32>
    %348 = tpu.matmul %345, %347, %cst_276 {dimension_numbers = #tpu.dot_dimension_numbers<[1], [0], [0], [1], [0, 0, 1, 1], [], []>} : vector<16x32xf32>, vector<32x128xf32>, vector<16x128xf32> -> vector<16x128xf32>
    %349 = arith.addf %309, %348 : vector<16x128xf32>
    %c1_277 = arith.constant 1 : index
    %c2_278 = arith.constant 2 : index
    %c0_279 = arith.constant 0 : index
    %c0_280 = arith.constant 0 : index
    %350 = vector.load %arg2[%c1_277, %c2_278, %c0_279, %c0_280] : memref<2x4x128x32xf32, #tpu.memory_space<vmem>>, vector<1x1x128x32xf32>
    %351 = vector.shape_cast %350 : vector<1x1x128x32xf32> to vector<128x32xf32>
    %cst_281 = arith.constant dense<0.000000e+00> : vector<16x32xf32>
    %352 = tpu.matmul %270, %351, %cst_281 {dimension_numbers = #tpu.dot_dimension_numbers<[1], [0], [0], [1], [0, 0, 1, 1], [], []>} : vector<16x128xf32>, vector<128x32xf32>, vector<16x32xf32> -> vector<16x32xf32>
    %c1_282 = arith.constant 1 : index
    %c2_283 = arith.constant 2 : index
    %c0_284 = arith.constant 0 : index
    %c0_285 = arith.constant 0 : index
    %353 = vector.load %arg3[%c1_282, %c2_283, %c0_284, %c0_285] : memref<2x4x1x32xf32, #tpu.memory_space<vmem>>, vector<1x1x1x32xf32>
    %354 = vector.shape_cast %353 : vector<1x1x1x32xf32> to vector<1x32xf32>
    %355 = vector.broadcast %354 : vector<1x32xf32> to vector<16x32xf32>
    %356 = arith.addf %352, %355 : vector<16x32xf32>
    %c1_286 = arith.constant 1 : index
    %c2_287 = arith.constant 2 : index
    %c0_288 = arith.constant 0 : index
    %c0_289 = arith.constant 0 : index
    %357 = vector.load %arg4[%c1_286, %c2_287, %c0_288, %c0_289] : memref<2x4x128x32xf32, #tpu.memory_space<vmem>>, vector<1x1x128x32xf32>
    %358 = vector.shape_cast %357 : vector<1x1x128x32xf32> to vector<128x32xf32>
    %cst_290 = arith.constant dense<0.000000e+00> : vector<16x32xf32>
    %359 = tpu.matmul %270, %358, %cst_290 {dimension_numbers = #tpu.dot_dimension_numbers<[1], [0], [0], [1], [0, 0, 1, 1], [], []>} : vector<16x128xf32>, vector<128x32xf32>, vector<16x32xf32> -> vector<16x32xf32>
    %c1_291 = arith.constant 1 : index
    %c2_292 = arith.constant 2 : index
    %c0_293 = arith.constant 0 : index
    %c0_294 = arith.constant 0 : index
    %360 = vector.load %arg5[%c1_291, %c2_292, %c0_293, %c0_294] : memref<2x4x1x32xf32, #tpu.memory_space<vmem>>, vector<1x1x1x32xf32>
    %361 = vector.shape_cast %360 : vector<1x1x1x32xf32> to vector<1x32xf32>
    %362 = vector.broadcast %361 : vector<1x32xf32> to vector<16x32xf32>
    %363 = arith.addf %359, %362 : vector<16x32xf32>
    %c1_295 = arith.constant 1 : index
    %c2_296 = arith.constant 2 : index
    %c0_297 = arith.constant 0 : index
    %c0_298 = arith.constant 0 : index
    %364 = vector.load %arg6[%c1_295, %c2_296, %c0_297, %c0_298] : memref<2x4x128x32xf32, #tpu.memory_space<vmem>>, vector<1x1x128x32xf32>
    %365 = vector.shape_cast %364 : vector<1x1x128x32xf32> to vector<128x32xf32>
    %cst_299 = arith.constant dense<0.000000e+00> : vector<16x32xf32>
    %366 = tpu.matmul %270, %365, %cst_299 {dimension_numbers = #tpu.dot_dimension_numbers<[1], [0], [0], [1], [0, 0, 1, 1], [], []>} : vector<16x128xf32>, vector<128x32xf32>, vector<16x32xf32> -> vector<16x32xf32>
    %c1_300 = arith.constant 1 : index
    %c2_301 = arith.constant 2 : index
    %c0_302 = arith.constant 0 : index
    %c0_303 = arith.constant 0 : index
    %367 = vector.load %arg7[%c1_300, %c2_301, %c0_302, %c0_303] : memref<2x4x1x32xf32, #tpu.memory_space<vmem>>, vector<1x1x1x32xf32>
    %368 = vector.shape_cast %367 : vector<1x1x1x32xf32> to vector<1x32xf32>
    %369 = vector.broadcast %368 : vector<1x32xf32> to vector<16x32xf32>
    %370 = arith.addf %366, %369 : vector<16x32xf32>
    %cst_304 = arith.constant dense<0.000000e+00> : vector<16x16xf32>
    %371 = tpu.matmul %356, %363, %cst_304 {dimension_numbers = #tpu.dot_dimension_numbers<[1], [1], [0], [0], [0, 0, 1, 0], [], []>} : vector<16x32xf32>, vector<16x32xf32>, vector<16x16xf32> -> vector<16x16xf32>
    %cst_305 = arith.constant 0.176776692 : f32
    %372 = vector.broadcast %cst_305 : f32 to vector<16x16xf32>
    %373 = arith.mulf %371, %372 : vector<16x16xf32>
    %374 = vector.broadcast %3 : vector<1x16xf32> to vector<16x16xf32>
    %375 = arith.addf %373, %374 : vector<16x16xf32>
    %cst_306 = arith.constant dense<0xFF800000> : vector<16xf32>
    %376 = vector.multi_reduction <maximumf>, %375, %cst_306 [1] : vector<16x16xf32> to vector<16xf32>
    %377 = vector.shape_cast %376 : vector<16xf32> to vector<16x1xf32>
    %378 = vector.broadcast %377 : vector<16x1xf32> to vector<16x16xf32>
    %379 = arith.subf %375, %378 : vector<16x16xf32>
    %380 = math.exp %379 : vector<16x16xf32>
    %cst_307 = arith.constant dense<0.000000e+00> : vector<16xf32>
    %381 = vector.multi_reduction <add>, %380, %cst_307 [1] : vector<16x16xf32> to vector<16xf32>
    %382 = vector.shape_cast %381 : vector<16xf32> to vector<16x1xf32>
    %383 = vector.broadcast %382 : vector<16x1xf32> to vector<16x16xf32>
    %384 = arith.divf %380, %383 : vector<16x16xf32>
    %cst_308 = arith.constant dense<0.000000e+00> : vector<16x32xf32>
    %385 = tpu.matmul %384, %370, %cst_308 {dimension_numbers = #tpu.dot_dimension_numbers<[1], [0], [0], [1], [0, 0, 1, 1], [], []>} : vector<16x16xf32>, vector<16x32xf32>, vector<16x32xf32> -> vector<16x32xf32>
    %c1_309 = arith.constant 1 : index
    %c2_310 = arith.constant 2 : index
    %c0_311 = arith.constant 0 : index
    %c0_312 = arith.constant 0 : index
    %386 = vector.load %arg8[%c1_309, %c2_310, %c0_311, %c0_312] : memref<2x4x32x128xf32, #tpu.memory_space<vmem>>, vector<1x1x32x128xf32>
    %387 = vector.shape_cast %386 : vector<1x1x32x128xf32> to vector<32x128xf32>
    %cst_313 = arith.constant dense<0.000000e+00> : vector<16x128xf32>
    %388 = tpu.matmul %385, %387, %cst_313 {dimension_numbers = #tpu.dot_dimension_numbers<[1], [0], [0], [1], [0, 0, 1, 1], [], []>} : vector<16x32xf32>, vector<32x128xf32>, vector<16x128xf32> -> vector<16x128xf32>
    %389 = arith.addf %349, %388 : vector<16x128xf32>
    %c1_314 = arith.constant 1 : index
    %c3_315 = arith.constant 3 : index
    %c0_316 = arith.constant 0 : index
    %c0_317 = arith.constant 0 : index
    %390 = vector.load %arg2[%c1_314, %c3_315, %c0_316, %c0_317] : memref<2x4x128x32xf32, #tpu.memory_space<vmem>>, vector<1x1x128x32xf32>
    %391 = vector.shape_cast %390 : vector<1x1x128x32xf32> to vector<128x32xf32>
    %cst_318 = arith.constant dense<0.000000e+00> : vector<16x32xf32>
    %392 = tpu.matmul %270, %391, %cst_318 {dimension_numbers = #tpu.dot_dimension_numbers<[1], [0], [0], [1], [0, 0, 1, 1], [], []>} : vector<16x128xf32>, vector<128x32xf32>, vector<16x32xf32> -> vector<16x32xf32>
    %c1_319 = arith.constant 1 : index
    %c3_320 = arith.constant 3 : index
    %c0_321 = arith.constant 0 : index
    %c0_322 = arith.constant 0 : index
    %393 = vector.load %arg3[%c1_319, %c3_320, %c0_321, %c0_322] : memref<2x4x1x32xf32, #tpu.memory_space<vmem>>, vector<1x1x1x32xf32>
    %394 = vector.shape_cast %393 : vector<1x1x1x32xf32> to vector<1x32xf32>
    %395 = vector.broadcast %394 : vector<1x32xf32> to vector<16x32xf32>
    %396 = arith.addf %392, %395 : vector<16x32xf32>
    %c1_323 = arith.constant 1 : index
    %c3_324 = arith.constant 3 : index
    %c0_325 = arith.constant 0 : index
    %c0_326 = arith.constant 0 : index
    %397 = vector.load %arg4[%c1_323, %c3_324, %c0_325, %c0_326] : memref<2x4x128x32xf32, #tpu.memory_space<vmem>>, vector<1x1x128x32xf32>
    %398 = vector.shape_cast %397 : vector<1x1x128x32xf32> to vector<128x32xf32>
    %cst_327 = arith.constant dense<0.000000e+00> : vector<16x32xf32>
    %399 = tpu.matmul %270, %398, %cst_327 {dimension_numbers = #tpu.dot_dimension_numbers<[1], [0], [0], [1], [0, 0, 1, 1], [], []>} : vector<16x128xf32>, vector<128x32xf32>, vector<16x32xf32> -> vector<16x32xf32>
    %c1_328 = arith.constant 1 : index
    %c3_329 = arith.constant 3 : index
    %c0_330 = arith.constant 0 : index
    %c0_331 = arith.constant 0 : index
    %400 = vector.load %arg5[%c1_328, %c3_329, %c0_330, %c0_331] : memref<2x4x1x32xf32, #tpu.memory_space<vmem>>, vector<1x1x1x32xf32>
    %401 = vector.shape_cast %400 : vector<1x1x1x32xf32> to vector<1x32xf32>
    %402 = vector.broadcast %401 : vector<1x32xf32> to vector<16x32xf32>
    %403 = arith.addf %399, %402 : vector<16x32xf32>
    %c1_332 = arith.constant 1 : index
    %c3_333 = arith.constant 3 : index
    %c0_334 = arith.constant 0 : index
    %c0_335 = arith.constant 0 : index
    %404 = vector.load %arg6[%c1_332, %c3_333, %c0_334, %c0_335] : memref<2x4x128x32xf32, #tpu.memory_space<vmem>>, vector<1x1x128x32xf32>
    %405 = vector.shape_cast %404 : vector<1x1x128x32xf32> to vector<128x32xf32>
    %cst_336 = arith.constant dense<0.000000e+00> : vector<16x32xf32>
    %406 = tpu.matmul %270, %405, %cst_336 {dimension_numbers = #tpu.dot_dimension_numbers<[1], [0], [0], [1], [0, 0, 1, 1], [], []>} : vector<16x128xf32>, vector<128x32xf32>, vector<16x32xf32> -> vector<16x32xf32>
    %c1_337 = arith.constant 1 : index
    %c3_338 = arith.constant 3 : index
    %c0_339 = arith.constant 0 : index
    %c0_340 = arith.constant 0 : index
    %407 = vector.load %arg7[%c1_337, %c3_338, %c0_339, %c0_340] : memref<2x4x1x32xf32, #tpu.memory_space<vmem>>, vector<1x1x1x32xf32>
    %408 = vector.shape_cast %407 : vector<1x1x1x32xf32> to vector<1x32xf32>
    %409 = vector.broadcast %408 : vector<1x32xf32> to vector<16x32xf32>
    %410 = arith.addf %406, %409 : vector<16x32xf32>
    %cst_341 = arith.constant dense<0.000000e+00> : vector<16x16xf32>
    %411 = tpu.matmul %396, %403, %cst_341 {dimension_numbers = #tpu.dot_dimension_numbers<[1], [1], [0], [0], [0, 0, 1, 0], [], []>} : vector<16x32xf32>, vector<16x32xf32>, vector<16x16xf32> -> vector<16x16xf32>
    %cst_342 = arith.constant 0.176776692 : f32
    %412 = vector.broadcast %cst_342 : f32 to vector<16x16xf32>
    %413 = arith.mulf %411, %412 : vector<16x16xf32>
    %414 = vector.broadcast %3 : vector<1x16xf32> to vector<16x16xf32>
    %415 = arith.addf %413, %414 : vector<16x16xf32>
    %cst_343 = arith.constant dense<0xFF800000> : vector<16xf32>
    %416 = vector.multi_reduction <maximumf>, %415, %cst_343 [1] : vector<16x16xf32> to vector<16xf32>
    %417 = vector.shape_cast %416 : vector<16xf32> to vector<16x1xf32>
    %418 = vector.broadcast %417 : vector<16x1xf32> to vector<16x16xf32>
    %419 = arith.subf %415, %418 : vector<16x16xf32>
    %420 = math.exp %419 : vector<16x16xf32>
    %cst_344 = arith.constant dense<0.000000e+00> : vector<16xf32>
    %421 = vector.multi_reduction <add>, %420, %cst_344 [1] : vector<16x16xf32> to vector<16xf32>
    %422 = vector.shape_cast %421 : vector<16xf32> to vector<16x1xf32>
    %423 = vector.broadcast %422 : vector<16x1xf32> to vector<16x16xf32>
    %424 = arith.divf %420, %423 : vector<16x16xf32>
    %cst_345 = arith.constant dense<0.000000e+00> : vector<16x32xf32>
    %425 = tpu.matmul %424, %410, %cst_345 {dimension_numbers = #tpu.dot_dimension_numbers<[1], [0], [0], [1], [0, 0, 1, 1], [], []>} : vector<16x16xf32>, vector<16x32xf32>, vector<16x32xf32> -> vector<16x32xf32>
    %c1_346 = arith.constant 1 : index
    %c3_347 = arith.constant 3 : index
    %c0_348 = arith.constant 0 : index
    %c0_349 = arith.constant 0 : index
    %426 = vector.load %arg8[%c1_346, %c3_347, %c0_348, %c0_349] : memref<2x4x32x128xf32, #tpu.memory_space<vmem>>, vector<1x1x32x128xf32>
    %427 = vector.shape_cast %426 : vector<1x1x32x128xf32> to vector<32x128xf32>
    %cst_350 = arith.constant dense<0.000000e+00> : vector<16x128xf32>
    %428 = tpu.matmul %425, %427, %cst_350 {dimension_numbers = #tpu.dot_dimension_numbers<[1], [0], [0], [1], [0, 0, 1, 1], [], []>} : vector<16x32xf32>, vector<32x128xf32>, vector<16x128xf32> -> vector<16x128xf32>
    %429 = arith.addf %389, %428 : vector<16x128xf32>
    %c1_351 = arith.constant 1 : index
    %c0_352 = arith.constant 0 : index
    %c0_353 = arith.constant 0 : index
    %430 = vector.load %arg9[%c1_351, %c0_352, %c0_353] : memref<2x1x128xf32, #tpu.memory_space<vmem>>, vector<1x1x128xf32>
    %431 = vector.shape_cast %430 : vector<1x1x128xf32> to vector<1x128xf32>
    %432 = vector.broadcast %431 : vector<1x128xf32> to vector<16x128xf32>
    %433 = arith.addf %429, %432 : vector<16x128xf32>
    %c1_354 = arith.constant 1 : index
    %c0_355 = arith.constant 0 : index
    %c0_356 = arith.constant 0 : index
    %434 = vector.load %arg14[%c1_354, %c0_355, %c0_356] : memref<2x1x128xf32, #tpu.memory_space<vmem>>, vector<1x1x128xf32>
    %435 = vector.shape_cast %434 : vector<1x1x128xf32> to vector<1x128xf32>
    %c1_357 = arith.constant 1 : index
    %c0_358 = arith.constant 0 : index
    %c0_359 = arith.constant 0 : index
    %436 = vector.load %arg15[%c1_357, %c0_358, %c0_359] : memref<2x1x128xf32, #tpu.memory_space<vmem>>, vector<1x1x128xf32>
    %437 = vector.shape_cast %436 : vector<1x1x128xf32> to vector<1x128xf32>
    %438 = arith.addf %433, %270 : vector<16x128xf32>
    %cst_360 = arith.constant dense<0.000000e+00> : vector<16xf32>
    %439 = vector.multi_reduction <add>, %438, %cst_360 [1] : vector<16x128xf32> to vector<16xf32>
    %440 = vector.shape_cast %439 : vector<16xf32> to vector<16x1xf32>
    %cst_361 = arith.constant 1.280000e+02 : f32
    %441 = vector.broadcast %cst_361 : f32 to vector<16x1xf32>
    %442 = arith.divf %440, %441 : vector<16x1xf32>
    %443 = vector.broadcast %442 : vector<16x1xf32> to vector<16x128xf32>
    %444 = arith.subf %438, %443 : vector<16x128xf32>
    %445 = arith.mulf %444, %444 : vector<16x128xf32>
    %cst_362 = arith.constant dense<0.000000e+00> : vector<16xf32>
    %446 = vector.multi_reduction <add>, %445, %cst_362 [1] : vector<16x128xf32> to vector<16xf32>
    %447 = vector.shape_cast %446 : vector<16xf32> to vector<16x1xf32>
    %cst_363 = arith.constant 1.280000e+02 : f32
    %448 = vector.broadcast %cst_363 : f32 to vector<16x1xf32>
    %449 = arith.divf %447, %448 : vector<16x1xf32>
    %cst_364 = arith.constant 9.99999974E-6 : f32
    %450 = vector.broadcast %cst_364 : f32 to vector<16x1xf32>
    %451 = arith.addf %449, %450 : vector<16x1xf32>
    %452 = math.rsqrt %451 : vector<16x1xf32>
    %453 = vector.broadcast %452 : vector<16x1xf32> to vector<16x128xf32>
    %454 = arith.mulf %444, %453 : vector<16x128xf32>
    %455 = vector.broadcast %435 : vector<1x128xf32> to vector<16x128xf32>
    %456 = arith.mulf %454, %455 : vector<16x128xf32>
    %457 = vector.broadcast %437 : vector<1x128xf32> to vector<16x128xf32>
    %458 = arith.addf %456, %457 : vector<16x128xf32>
    %c1_365 = arith.constant 1 : index
    %c0_366 = arith.constant 0 : index
    %c0_367 = arith.constant 0 : index
    %459 = vector.load %arg10[%c1_365, %c0_366, %c0_367] : memref<2x128x256xf32, #tpu.memory_space<vmem>>, vector<1x128x256xf32>
    %460 = vector.shape_cast %459 : vector<1x128x256xf32> to vector<128x256xf32>
    %cst_368 = arith.constant dense<0.000000e+00> : vector<16x256xf32>
    %461 = tpu.matmul %458, %460, %cst_368 {dimension_numbers = #tpu.dot_dimension_numbers<[1], [0], [0], [1], [0, 0, 1, 1], [], []>} : vector<16x128xf32>, vector<128x256xf32>, vector<16x256xf32> -> vector<16x256xf32>
    %c1_369 = arith.constant 1 : index
    %c0_370 = arith.constant 0 : index
    %c0_371 = arith.constant 0 : index
    %462 = vector.load %arg11[%c1_369, %c0_370, %c0_371] : memref<2x1x256xf32, #tpu.memory_space<vmem>>, vector<1x1x256xf32>
    %463 = vector.shape_cast %462 : vector<1x1x256xf32> to vector<1x256xf32>
    %464 = vector.broadcast %463 : vector<1x256xf32> to vector<16x256xf32>
    %465 = arith.addf %461, %464 : vector<16x256xf32>
    %cst_372 = arith.constant 5.000000e-01 : f32
    %466 = vector.broadcast %cst_372 : f32 to vector<16x256xf32>
    %467 = arith.mulf %466, %465 : vector<16x256xf32>
    %cst_373 = arith.constant 0.707106769 : f32
    %468 = vector.broadcast %cst_373 : f32 to vector<16x256xf32>
    %469 = arith.mulf %465, %468 : vector<16x256xf32>
    %470 = math.absf %469 : vector<16x256xf32>
    %cst_374 = arith.constant 0.327591091 : f32
    %471 = vector.broadcast %cst_374 : f32 to vector<16x256xf32>
    %472 = arith.mulf %471, %470 : vector<16x256xf32>
    %cst_375 = arith.constant 1.000000e+00 : f32
    %473 = vector.broadcast %cst_375 : f32 to vector<16x256xf32>
    %474 = arith.addf %473, %472 : vector<16x256xf32>
    %cst_376 = arith.constant 1.000000e+00 : f32
    %475 = vector.broadcast %cst_376 : f32 to vector<16x256xf32>
    %476 = arith.divf %475, %474 : vector<16x256xf32>
    %cst_377 = arith.constant 1.06140542 : f32
    %477 = vector.broadcast %cst_377 : f32 to vector<16x256xf32>
    %478 = arith.mulf %477, %476 : vector<16x256xf32>
    %cst_378 = arith.constant -1.45315206 : f32
    %479 = vector.broadcast %cst_378 : f32 to vector<16x256xf32>
    %480 = arith.addf %478, %479 : vector<16x256xf32>
    %481 = arith.mulf %480, %476 : vector<16x256xf32>
    %cst_379 = arith.constant 1.42141378 : f32
    %482 = vector.broadcast %cst_379 : f32 to vector<16x256xf32>
    %483 = arith.addf %481, %482 : vector<16x256xf32>
    %484 = arith.mulf %483, %476 : vector<16x256xf32>
    %cst_380 = arith.constant -0.284496725 : f32
    %485 = vector.broadcast %cst_380 : f32 to vector<16x256xf32>
    %486 = arith.addf %484, %485 : vector<16x256xf32>
    %487 = arith.mulf %486, %476 : vector<16x256xf32>
    %cst_381 = arith.constant 0.254829586 : f32
    %488 = vector.broadcast %cst_381 : f32 to vector<16x256xf32>
    %489 = arith.addf %487, %488 : vector<16x256xf32>
    %490 = arith.mulf %489, %476 : vector<16x256xf32>
    %cst_382 = arith.constant 0.000000e+00 : f32
    %491 = vector.broadcast %cst_382 : f32 to vector<16x256xf32>
    %492 = arith.subf %491, %470 : vector<16x256xf32>
    %493 = arith.mulf %492, %470 : vector<16x256xf32>
    %494 = math.exp %493 : vector<16x256xf32>
    %495 = arith.mulf %490, %494 : vector<16x256xf32>
    %cst_383 = arith.constant 1.000000e+00 : f32
    %496 = vector.broadcast %cst_383 : f32 to vector<16x256xf32>
    %497 = arith.subf %496, %495 : vector<16x256xf32>
    %cst_384 = arith.constant 0.000000e+00 : f32
    %498 = vector.broadcast %cst_384 : f32 to vector<16x256xf32>
    %499 = arith.cmpf olt, %469, %498 : vector<16x256xf32>
    %cst_385 = arith.constant 0.000000e+00 : f32
    %500 = vector.broadcast %cst_385 : f32 to vector<16x256xf32>
    %501 = arith.subf %500, %497 : vector<16x256xf32>
    %502 = arith.select %499, %501, %497 : vector<16x256xi1>, vector<16x256xf32>
    %cst_386 = arith.constant 1.000000e+00 : f32
    %503 = vector.broadcast %cst_386 : f32 to vector<16x256xf32>
    %504 = arith.addf %503, %502 : vector<16x256xf32>
    %505 = arith.mulf %467, %504 : vector<16x256xf32>
    %c1_387 = arith.constant 1 : index
    %c0_388 = arith.constant 0 : index
    %c0_389 = arith.constant 0 : index
    %506 = vector.load %arg12[%c1_387, %c0_388, %c0_389] : memref<2x256x128xf32, #tpu.memory_space<vmem>>, vector<1x256x128xf32>
    %507 = vector.shape_cast %506 : vector<1x256x128xf32> to vector<256x128xf32>
    %cst_390 = arith.constant dense<0.000000e+00> : vector<16x128xf32>
    %508 = tpu.matmul %505, %507, %cst_390 {dimension_numbers = #tpu.dot_dimension_numbers<[1], [0], [0], [1], [0, 0, 1, 1], [], []>} : vector<16x256xf32>, vector<256x128xf32>, vector<16x128xf32> -> vector<16x128xf32>
    %c1_391 = arith.constant 1 : index
    %c0_392 = arith.constant 0 : index
    %c0_393 = arith.constant 0 : index
    %509 = vector.load %arg13[%c1_391, %c0_392, %c0_393] : memref<2x1x128xf32, #tpu.memory_space<vmem>>, vector<1x1x128xf32>
    %510 = vector.shape_cast %509 : vector<1x1x128xf32> to vector<1x128xf32>
    %511 = vector.broadcast %510 : vector<1x128xf32> to vector<16x128xf32>
    %512 = arith.addf %508, %511 : vector<16x128xf32>
    %c1_394 = arith.constant 1 : index
    %c0_395 = arith.constant 0 : index
    %c0_396 = arith.constant 0 : index
    %513 = vector.load %arg16[%c1_394, %c0_395, %c0_396] : memref<2x1x128xf32, #tpu.memory_space<vmem>>, vector<1x1x128xf32>
    %514 = vector.shape_cast %513 : vector<1x1x128xf32> to vector<1x128xf32>
    %c1_397 = arith.constant 1 : index
    %c0_398 = arith.constant 0 : index
    %c0_399 = arith.constant 0 : index
    %515 = vector.load %arg17[%c1_397, %c0_398, %c0_399] : memref<2x1x128xf32, #tpu.memory_space<vmem>>, vector<1x1x128xf32>
    %516 = vector.shape_cast %515 : vector<1x1x128xf32> to vector<1x128xf32>
    %517 = arith.addf %512, %458 : vector<16x128xf32>
    %cst_400 = arith.constant dense<0.000000e+00> : vector<16xf32>
    %518 = vector.multi_reduction <add>, %517, %cst_400 [1] : vector<16x128xf32> to vector<16xf32>
    %519 = vector.shape_cast %518 : vector<16xf32> to vector<16x1xf32>
    %cst_401 = arith.constant 1.280000e+02 : f32
    %520 = vector.broadcast %cst_401 : f32 to vector<16x1xf32>
    %521 = arith.divf %519, %520 : vector<16x1xf32>
    %522 = vector.broadcast %521 : vector<16x1xf32> to vector<16x128xf32>
    %523 = arith.subf %517, %522 : vector<16x128xf32>
    %524 = arith.mulf %523, %523 : vector<16x128xf32>
    %cst_402 = arith.constant dense<0.000000e+00> : vector<16xf32>
    %525 = vector.multi_reduction <add>, %524, %cst_402 [1] : vector<16x128xf32> to vector<16xf32>
    %526 = vector.shape_cast %525 : vector<16xf32> to vector<16x1xf32>
    %cst_403 = arith.constant 1.280000e+02 : f32
    %527 = vector.broadcast %cst_403 : f32 to vector<16x1xf32>
    %528 = arith.divf %526, %527 : vector<16x1xf32>
    %cst_404 = arith.constant 9.99999974E-6 : f32
    %529 = vector.broadcast %cst_404 : f32 to vector<16x1xf32>
    %530 = arith.addf %528, %529 : vector<16x1xf32>
    %531 = math.rsqrt %530 : vector<16x1xf32>
    %532 = vector.broadcast %531 : vector<16x1xf32> to vector<16x128xf32>
    %533 = arith.mulf %523, %532 : vector<16x128xf32>
    %534 = vector.broadcast %514 : vector<1x128xf32> to vector<16x128xf32>
    %535 = arith.mulf %533, %534 : vector<16x128xf32>
    %536 = vector.broadcast %516 : vector<1x128xf32> to vector<16x128xf32>
    %537 = arith.addf %535, %536 : vector<16x128xf32>
    %538 = vector.extract_strided_slice %537 {offsets = [0, 0], sizes = [1, 128], strides = [1, 1]} : vector<16x128xf32> to vector<1x128xf32>
    %c0_405 = arith.constant 0 : index
    %c0_406 = arith.constant 0 : index
    %539 = vector.load %arg18[%c0_405, %c0_406] : memref<2x128xf32, #tpu.memory_space<vmem>>, vector<1x128xf32>
    tpu.vector_store %arg18[%c0_405, %c0_406], %538 {strides = array<i32>} : memref<2x128xf32, #tpu.memory_space<vmem>>, vector<1x128xf32>,
    %540 = vector.extract_strided_slice %537 {offsets = [1, 0], sizes = [1, 128], strides = [1, 1]} : vector<16x128xf32> to vector<1x128xf32>
    %c0_407 = arith.constant 0 : index
    %c0_408 = arith.constant 0 : index
    %541 = vector.load %arg19[%c0_407, %c0_408] : memref<2x128xf32, #tpu.memory_space<vmem>>, vector<1x128xf32>
    tpu.vector_store %arg19[%c0_407, %c0_408], %540 {strides = array<i32>} : memref<2x128xf32, #tpu.memory_space<vmem>>, vector<1x128xf32>,
    %c1_409 = arith.constant 1 : index
    %c0_410 = arith.constant 0 : index
    %c0_411 = arith.constant 0 : index
    %542 = vector.load %arg0[%c1_409, %c0_410, %c0_411] : memref<2x16x128xf32, #tpu.memory_space<vmem>>, vector<1x16x128xf32>
    %543 = vector.shape_cast %542 : vector<1x16x128xf32> to vector<16x128xf32>
    %c1_412 = arith.constant 1 : index
    %c0_413 = arith.constant 0 : index
    %c0_414 = arith.constant 0 : index
    %544 = vector.load %arg1[%c1_412, %c0_413, %c0_414] : memref<2x1x16xf32, #tpu.memory_space<vmem>>, vector<1x1x16xf32>
    %545 = vector.shape_cast %544 : vector<1x1x16xf32> to vector<1x16xf32>
    %c0_415 = arith.constant 0 : index
    %c0_416 = arith.constant 0 : index
    %c0_417 = arith.constant 0 : index
    %c0_418 = arith.constant 0 : index
    %546 = vector.load %arg2[%c0_415, %c0_416, %c0_417, %c0_418] : memref<2x4x128x32xf32, #tpu.memory_space<vmem>>, vector<1x1x128x32xf32>
    %547 = vector.shape_cast %546 : vector<1x1x128x32xf32> to vector<128x32xf32>
    %cst_419 = arith.constant dense<0.000000e+00> : vector<16x32xf32>
    %548 = tpu.matmul %543, %547, %cst_419 {dimension_numbers = #tpu.dot_dimension_numbers<[1], [0], [0], [1], [0, 0, 1, 1], [], []>} : vector<16x128xf32>, vector<128x32xf32>, vector<16x32xf32> -> vector<16x32xf32>
    %c0_420 = arith.constant 0 : index
    %c0_421 = arith.constant 0 : index
    %c0_422 = arith.constant 0 : index
    %c0_423 = arith.constant 0 : index
    %549 = vector.load %arg3[%c0_420, %c0_421, %c0_422, %c0_423] : memref<2x4x1x32xf32, #tpu.memory_space<vmem>>, vector<1x1x1x32xf32>
    %550 = vector.shape_cast %549 : vector<1x1x1x32xf32> to vector<1x32xf32>
    %551 = vector.broadcast %550 : vector<1x32xf32> to vector<16x32xf32>
    %552 = arith.addf %548, %551 : vector<16x32xf32>
    %c0_424 = arith.constant 0 : index
    %c0_425 = arith.constant 0 : index
    %c0_426 = arith.constant 0 : index
    %c0_427 = arith.constant 0 : index
    %553 = vector.load %arg4[%c0_424, %c0_425, %c0_426, %c0_427] : memref<2x4x128x32xf32, #tpu.memory_space<vmem>>, vector<1x1x128x32xf32>
    %554 = vector.shape_cast %553 : vector<1x1x128x32xf32> to vector<128x32xf32>
    %cst_428 = arith.constant dense<0.000000e+00> : vector<16x32xf32>
    %555 = tpu.matmul %543, %554, %cst_428 {dimension_numbers = #tpu.dot_dimension_numbers<[1], [0], [0], [1], [0, 0, 1, 1], [], []>} : vector<16x128xf32>, vector<128x32xf32>, vector<16x32xf32> -> vector<16x32xf32>
    %c0_429 = arith.constant 0 : index
    %c0_430 = arith.constant 0 : index
    %c0_431 = arith.constant 0 : index
    %c0_432 = arith.constant 0 : index
    %556 = vector.load %arg5[%c0_429, %c0_430, %c0_431, %c0_432] : memref<2x4x1x32xf32, #tpu.memory_space<vmem>>, vector<1x1x1x32xf32>
    %557 = vector.shape_cast %556 : vector<1x1x1x32xf32> to vector<1x32xf32>
    %558 = vector.broadcast %557 : vector<1x32xf32> to vector<16x32xf32>
    %559 = arith.addf %555, %558 : vector<16x32xf32>
    %c0_433 = arith.constant 0 : index
    %c0_434 = arith.constant 0 : index
    %c0_435 = arith.constant 0 : index
    %c0_436 = arith.constant 0 : index
    %560 = vector.load %arg6[%c0_433, %c0_434, %c0_435, %c0_436] : memref<2x4x128x32xf32, #tpu.memory_space<vmem>>, vector<1x1x128x32xf32>
    %561 = vector.shape_cast %560 : vector<1x1x128x32xf32> to vector<128x32xf32>
    %cst_437 = arith.constant dense<0.000000e+00> : vector<16x32xf32>
    %562 = tpu.matmul %543, %561, %cst_437 {dimension_numbers = #tpu.dot_dimension_numbers<[1], [0], [0], [1], [0, 0, 1, 1], [], []>} : vector<16x128xf32>, vector<128x32xf32>, vector<16x32xf32> -> vector<16x32xf32>
    %c0_438 = arith.constant 0 : index
    %c0_439 = arith.constant 0 : index
    %c0_440 = arith.constant 0 : index
    %c0_441 = arith.constant 0 : index
    %563 = vector.load %arg7[%c0_438, %c0_439, %c0_440, %c0_441] : memref<2x4x1x32xf32, #tpu.memory_space<vmem>>, vector<1x1x1x32xf32>
    %564 = vector.shape_cast %563 : vector<1x1x1x32xf32> to vector<1x32xf32>
    %565 = vector.broadcast %564 : vector<1x32xf32> to vector<16x32xf32>
    %566 = arith.addf %562, %565 : vector<16x32xf32>
    %cst_442 = arith.constant dense<0.000000e+00> : vector<16x16xf32>
    %567 = tpu.matmul %552, %559, %cst_442 {dimension_numbers = #tpu.dot_dimension_numbers<[1], [1], [0], [0], [0, 0, 1, 0], [], []>} : vector<16x32xf32>, vector<16x32xf32>, vector<16x16xf32> -> vector<16x16xf32>
    %cst_443 = arith.constant 0.176776692 : f32
    %568 = vector.broadcast %cst_443 : f32 to vector<16x16xf32>
    %569 = arith.mulf %567, %568 : vector<16x16xf32>
    %570 = vector.broadcast %545 : vector<1x16xf32> to vector<16x16xf32>
    %571 = arith.addf %569, %570 : vector<16x16xf32>
    %cst_444 = arith.constant dense<0xFF800000> : vector<16xf32>
    %572 = vector.multi_reduction <maximumf>, %571, %cst_444 [1] : vector<16x16xf32> to vector<16xf32>
    %573 = vector.shape_cast %572 : vector<16xf32> to vector<16x1xf32>
    %574 = vector.broadcast %573 : vector<16x1xf32> to vector<16x16xf32>
    %575 = arith.subf %571, %574 : vector<16x16xf32>
    %576 = math.exp %575 : vector<16x16xf32>
    %cst_445 = arith.constant dense<0.000000e+00> : vector<16xf32>
    %577 = vector.multi_reduction <add>, %576, %cst_445 [1] : vector<16x16xf32> to vector<16xf32>
    %578 = vector.shape_cast %577 : vector<16xf32> to vector<16x1xf32>
    %579 = vector.broadcast %578 : vector<16x1xf32> to vector<16x16xf32>
    %580 = arith.divf %576, %579 : vector<16x16xf32>
    %cst_446 = arith.constant dense<0.000000e+00> : vector<16x32xf32>
    %581 = tpu.matmul %580, %566, %cst_446 {dimension_numbers = #tpu.dot_dimension_numbers<[1], [0], [0], [1], [0, 0, 1, 1], [], []>} : vector<16x16xf32>, vector<16x32xf32>, vector<16x32xf32> -> vector<16x32xf32>
    %c0_447 = arith.constant 0 : index
    %c0_448 = arith.constant 0 : index
    %c0_449 = arith.constant 0 : index
    %c0_450 = arith.constant 0 : index
    %582 = vector.load %arg8[%c0_447, %c0_448, %c0_449, %c0_450] : memref<2x4x32x128xf32, #tpu.memory_space<vmem>>, vector<1x1x32x128xf32>
    %583 = vector.shape_cast %582 : vector<1x1x32x128xf32> to vector<32x128xf32>
    %cst_451 = arith.constant dense<0.000000e+00> : vector<16x128xf32>
    %584 = tpu.matmul %581, %583, %cst_451 {dimension_numbers = #tpu.dot_dimension_numbers<[1], [0], [0], [1], [0, 0, 1, 1], [], []>} : vector<16x32xf32>, vector<32x128xf32>, vector<16x128xf32> -> vector<16x128xf32>
    %c0_452 = arith.constant 0 : index
    %c1_453 = arith.constant 1 : index
    %c0_454 = arith.constant 0 : index
    %c0_455 = arith.constant 0 : index
    %585 = vector.load %arg2[%c0_452, %c1_453, %c0_454, %c0_455] : memref<2x4x128x32xf32, #tpu.memory_space<vmem>>, vector<1x1x128x32xf32>
    %586 = vector.shape_cast %585 : vector<1x1x128x32xf32> to vector<128x32xf32>
    %cst_456 = arith.constant dense<0.000000e+00> : vector<16x32xf32>
    %587 = tpu.matmul %543, %586, %cst_456 {dimension_numbers = #tpu.dot_dimension_numbers<[1], [0], [0], [1], [0, 0, 1, 1], [], []>} : vector<16x128xf32>, vector<128x32xf32>, vector<16x32xf32> -> vector<16x32xf32>
    %c0_457 = arith.constant 0 : index
    %c1_458 = arith.constant 1 : index
    %c0_459 = arith.constant 0 : index
    %c0_460 = arith.constant 0 : index
    %588 = vector.load %arg3[%c0_457, %c1_458, %c0_459, %c0_460] : memref<2x4x1x32xf32, #tpu.memory_space<vmem>>, vector<1x1x1x32xf32>
    %589 = vector.shape_cast %588 : vector<1x1x1x32xf32> to vector<1x32xf32>
    %590 = vector.broadcast %589 : vector<1x32xf32> to vector<16x32xf32>
    %591 = arith.addf %587, %590 : vector<16x32xf32>
    %c0_461 = arith.constant 0 : index
    %c1_462 = arith.constant 1 : index
    %c0_463 = arith.constant 0 : index
    %c0_464 = arith.constant 0 : index
    %592 = vector.load %arg4[%c0_461, %c1_462, %c0_463, %c0_464] : memref<2x4x128x32xf32, #tpu.memory_space<vmem>>, vector<1x1x128x32xf32>
    %593 = vector.shape_cast %592 : vector<1x1x128x32xf32> to vector<128x32xf32>
    %cst_465 = arith.constant dense<0.000000e+00> : vector<16x32xf32>
    %594 = tpu.matmul %543, %593, %cst_465 {dimension_numbers = #tpu.dot_dimension_numbers<[1], [0], [0], [1], [0, 0, 1, 1], [], []>} : vector<16x128xf32>, vector<128x32xf32>, vector<16x32xf32> -> vector<16x32xf32>
    %c0_466 = arith.constant 0 : index
    %c1_467 = arith.constant 1 : index
    %c0_468 = arith.constant 0 : index
    %c0_469 = arith.constant 0 : index
    %595 = vector.load %arg5[%c0_466, %c1_467, %c0_468, %c0_469] : memref<2x4x1x32xf32, #tpu.memory_space<vmem>>, vector<1x1x1x32xf32>
    %596 = vector.shape_cast %595 : vector<1x1x1x32xf32> to vector<1x32xf32>
    %597 = vector.broadcast %596 : vector<1x32xf32> to vector<16x32xf32>
    %598 = arith.addf %594, %597 : vector<16x32xf32>
    %c0_470 = arith.constant 0 : index
    %c1_471 = arith.constant 1 : index
    %c0_472 = arith.constant 0 : index
    %c0_473 = arith.constant 0 : index
    %599 = vector.load %arg6[%c0_470, %c1_471, %c0_472, %c0_473] : memref<2x4x128x32xf32, #tpu.memory_space<vmem>>, vector<1x1x128x32xf32>
    %600 = vector.shape_cast %599 : vector<1x1x128x32xf32> to vector<128x32xf32>
    %cst_474 = arith.constant dense<0.000000e+00> : vector<16x32xf32>
    %601 = tpu.matmul %543, %600, %cst_474 {dimension_numbers = #tpu.dot_dimension_numbers<[1], [0], [0], [1], [0, 0, 1, 1], [], []>} : vector<16x128xf32>, vector<128x32xf32>, vector<16x32xf32> -> vector<16x32xf32>
    %c0_475 = arith.constant 0 : index
    %c1_476 = arith.constant 1 : index
    %c0_477 = arith.constant 0 : index
    %c0_478 = arith.constant 0 : index
    %602 = vector.load %arg7[%c0_475, %c1_476, %c0_477, %c0_478] : memref<2x4x1x32xf32, #tpu.memory_space<vmem>>, vector<1x1x1x32xf32>
    %603 = vector.shape_cast %602 : vector<1x1x1x32xf32> to vector<1x32xf32>
    %604 = vector.broadcast %603 : vector<1x32xf32> to vector<16x32xf32>
    %605 = arith.addf %601, %604 : vector<16x32xf32>
    %cst_479 = arith.constant dense<0.000000e+00> : vector<16x16xf32>
    %606 = tpu.matmul %591, %598, %cst_479 {dimension_numbers = #tpu.dot_dimension_numbers<[1], [1], [0], [0], [0, 0, 1, 0], [], []>} : vector<16x32xf32>, vector<16x32xf32>, vector<16x16xf32> -> vector<16x16xf32>
    %cst_480 = arith.constant 0.176776692 : f32
    %607 = vector.broadcast %cst_480 : f32 to vector<16x16xf32>
    %608 = arith.mulf %606, %607 : vector<16x16xf32>
    %609 = vector.broadcast %545 : vector<1x16xf32> to vector<16x16xf32>
    %610 = arith.addf %608, %609 : vector<16x16xf32>
    %cst_481 = arith.constant dense<0xFF800000> : vector<16xf32>
    %611 = vector.multi_reduction <maximumf>, %610, %cst_481 [1] : vector<16x16xf32> to vector<16xf32>
    %612 = vector.shape_cast %611 : vector<16xf32> to vector<16x1xf32>
    %613 = vector.broadcast %612 : vector<16x1xf32> to vector<16x16xf32>
    %614 = arith.subf %610, %613 : vector<16x16xf32>
    %615 = math.exp %614 : vector<16x16xf32>
    %cst_482 = arith.constant dense<0.000000e+00> : vector<16xf32>
    %616 = vector.multi_reduction <add>, %615, %cst_482 [1] : vector<16x16xf32> to vector<16xf32>
    %617 = vector.shape_cast %616 : vector<16xf32> to vector<16x1xf32>
    %618 = vector.broadcast %617 : vector<16x1xf32> to vector<16x16xf32>
    %619 = arith.divf %615, %618 : vector<16x16xf32>
    %cst_483 = arith.constant dense<0.000000e+00> : vector<16x32xf32>
    %620 = tpu.matmul %619, %605, %cst_483 {dimension_numbers = #tpu.dot_dimension_numbers<[1], [0], [0], [1], [0, 0, 1, 1], [], []>} : vector<16x16xf32>, vector<16x32xf32>, vector<16x32xf32> -> vector<16x32xf32>
    %c0_484 = arith.constant 0 : index
    %c1_485 = arith.constant 1 : index
    %c0_486 = arith.constant 0 : index
    %c0_487 = arith.constant 0 : index
    %621 = vector.load %arg8[%c0_484, %c1_485, %c0_486, %c0_487] : memref<2x4x32x128xf32, #tpu.memory_space<vmem>>, vector<1x1x32x128xf32>
    %622 = vector.shape_cast %621 : vector<1x1x32x128xf32> to vector<32x128xf32>
    %cst_488 = arith.constant dense<0.000000e+00> : vector<16x128xf32>
    %623 = tpu.matmul %620, %622, %cst_488 {dimension_numbers = #tpu.dot_dimension_numbers<[1], [0], [0], [1], [0, 0, 1, 1], [], []>} : vector<16x32xf32>, vector<32x128xf32>, vector<16x128xf32> -> vector<16x128xf32>
    %624 = arith.addf %584, %623 : vector<16x128xf32>
    %c0_489 = arith.constant 0 : index
    %c2_490 = arith.constant 2 : index
    %c0_491 = arith.constant 0 : index
    %c0_492 = arith.constant 0 : index
    %625 = vector.load %arg2[%c0_489, %c2_490, %c0_491, %c0_492] : memref<2x4x128x32xf32, #tpu.memory_space<vmem>>, vector<1x1x128x32xf32>
    %626 = vector.shape_cast %625 : vector<1x1x128x32xf32> to vector<128x32xf32>
    %cst_493 = arith.constant dense<0.000000e+00> : vector<16x32xf32>
    %627 = tpu.matmul %543, %626, %cst_493 {dimension_numbers = #tpu.dot_dimension_numbers<[1], [0], [0], [1], [0, 0, 1, 1], [], []>} : vector<16x128xf32>, vector<128x32xf32>, vector<16x32xf32> -> vector<16x32xf32>
    %c0_494 = arith.constant 0 : index
    %c2_495 = arith.constant 2 : index
    %c0_496 = arith.constant 0 : index
    %c0_497 = arith.constant 0 : index
    %628 = vector.load %arg3[%c0_494, %c2_495, %c0_496, %c0_497] : memref<2x4x1x32xf32, #tpu.memory_space<vmem>>, vector<1x1x1x32xf32>
    %629 = vector.shape_cast %628 : vector<1x1x1x32xf32> to vector<1x32xf32>
    %630 = vector.broadcast %629 : vector<1x32xf32> to vector<16x32xf32>
    %631 = arith.addf %627, %630 : vector<16x32xf32>
    %c0_498 = arith.constant 0 : index
    %c2_499 = arith.constant 2 : index
    %c0_500 = arith.constant 0 : index
    %c0_501 = arith.constant 0 : index
    %632 = vector.load %arg4[%c0_498, %c2_499, %c0_500, %c0_501] : memref<2x4x128x32xf32, #tpu.memory_space<vmem>>, vector<1x1x128x32xf32>
    %633 = vector.shape_cast %632 : vector<1x1x128x32xf32> to vector<128x32xf32>
    %cst_502 = arith.constant dense<0.000000e+00> : vector<16x32xf32>
    %634 = tpu.matmul %543, %633, %cst_502 {dimension_numbers = #tpu.dot_dimension_numbers<[1], [0], [0], [1], [0, 0, 1, 1], [], []>} : vector<16x128xf32>, vector<128x32xf32>, vector<16x32xf32> -> vector<16x32xf32>
    %c0_503 = arith.constant 0 : index
    %c2_504 = arith.constant 2 : index
    %c0_505 = arith.constant 0 : index
    %c0_506 = arith.constant 0 : index
    %635 = vector.load %arg5[%c0_503, %c2_504, %c0_505, %c0_506] : memref<2x4x1x32xf32, #tpu.memory_space<vmem>>, vector<1x1x1x32xf32>
    %636 = vector.shape_cast %635 : vector<1x1x1x32xf32> to vector<1x32xf32>
    %637 = vector.broadcast %636 : vector<1x32xf32> to vector<16x32xf32>
    %638 = arith.addf %634, %637 : vector<16x32xf32>
    %c0_507 = arith.constant 0 : index
    %c2_508 = arith.constant 2 : index
    %c0_509 = arith.constant 0 : index
    %c0_510 = arith.constant 0 : index
    %639 = vector.load %arg6[%c0_507, %c2_508, %c0_509, %c0_510] : memref<2x4x128x32xf32, #tpu.memory_space<vmem>>, vector<1x1x128x32xf32>
    %640 = vector.shape_cast %639 : vector<1x1x128x32xf32> to vector<128x32xf32>
    %cst_511 = arith.constant dense<0.000000e+00> : vector<16x32xf32>
    %641 = tpu.matmul %543, %640, %cst_511 {dimension_numbers = #tpu.dot_dimension_numbers<[1], [0], [0], [1], [0, 0, 1, 1], [], []>} : vector<16x128xf32>, vector<128x32xf32>, vector<16x32xf32> -> vector<16x32xf32>
    %c0_512 = arith.constant 0 : index
    %c2_513 = arith.constant 2 : index
    %c0_514 = arith.constant 0 : index
    %c0_515 = arith.constant 0 : index
    %642 = vector.load %arg7[%c0_512, %c2_513, %c0_514, %c0_515] : memref<2x4x1x32xf32, #tpu.memory_space<vmem>>, vector<1x1x1x32xf32>
    %643 = vector.shape_cast %642 : vector<1x1x1x32xf32> to vector<1x32xf32>
    %644 = vector.broadcast %643 : vector<1x32xf32> to vector<16x32xf32>
    %645 = arith.addf %641, %644 : vector<16x32xf32>
    %cst_516 = arith.constant dense<0.000000e+00> : vector<16x16xf32>
    %646 = tpu.matmul %631, %638, %cst_516 {dimension_numbers = #tpu.dot_dimension_numbers<[1], [1], [0], [0], [0, 0, 1, 0], [], []>} : vector<16x32xf32>, vector<16x32xf32>, vector<16x16xf32> -> vector<16x16xf32>
    %cst_517 = arith.constant 0.176776692 : f32
    %647 = vector.broadcast %cst_517 : f32 to vector<16x16xf32>
    %648 = arith.mulf %646, %647 : vector<16x16xf32>
    %649 = vector.broadcast %545 : vector<1x16xf32> to vector<16x16xf32>
    %650 = arith.addf %648, %649 : vector<16x16xf32>
    %cst_518 = arith.constant dense<0xFF800000> : vector<16xf32>
    %651 = vector.multi_reduction <maximumf>, %650, %cst_518 [1] : vector<16x16xf32> to vector<16xf32>
    %652 = vector.shape_cast %651 : vector<16xf32> to vector<16x1xf32>
    %653 = vector.broadcast %652 : vector<16x1xf32> to vector<16x16xf32>
    %654 = arith.subf %650, %653 : vector<16x16xf32>
    %655 = math.exp %654 : vector<16x16xf32>
    %cst_519 = arith.constant dense<0.000000e+00> : vector<16xf32>
    %656 = vector.multi_reduction <add>, %655, %cst_519 [1] : vector<16x16xf32> to vector<16xf32>
    %657 = vector.shape_cast %656 : vector<16xf32> to vector<16x1xf32>
    %658 = vector.broadcast %657 : vector<16x1xf32> to vector<16x16xf32>
    %659 = arith.divf %655, %658 : vector<16x16xf32>
    %cst_520 = arith.constant dense<0.000000e+00> : vector<16x32xf32>
    %660 = tpu.matmul %659, %645, %cst_520 {dimension_numbers = #tpu.dot_dimension_numbers<[1], [0], [0], [1], [0, 0, 1, 1], [], []>} : vector<16x16xf32>, vector<16x32xf32>, vector<16x32xf32> -> vector<16x32xf32>
    %c0_521 = arith.constant 0 : index
    %c2_522 = arith.constant 2 : index
    %c0_523 = arith.constant 0 : index
    %c0_524 = arith.constant 0 : index
    %661 = vector.load %arg8[%c0_521, %c2_522, %c0_523, %c0_524] : memref<2x4x32x128xf32, #tpu.memory_space<vmem>>, vector<1x1x32x128xf32>
    %662 = vector.shape_cast %661 : vector<1x1x32x128xf32> to vector<32x128xf32>
    %cst_525 = arith.constant dense<0.000000e+00> : vector<16x128xf32>
    %663 = tpu.matmul %660, %662, %cst_525 {dimension_numbers = #tpu.dot_dimension_numbers<[1], [0], [0], [1], [0, 0, 1, 1], [], []>} : vector<16x32xf32>, vector<32x128xf32>, vector<16x128xf32> -> vector<16x128xf32>
    %664 = arith.addf %624, %663 : vector<16x128xf32>
    %c0_526 = arith.constant 0 : index
    %c3_527 = arith.constant 3 : index
    %c0_528 = arith.constant 0 : index
    %c0_529 = arith.constant 0 : index
    %665 = vector.load %arg2[%c0_526, %c3_527, %c0_528, %c0_529] : memref<2x4x128x32xf32, #tpu.memory_space<vmem>>, vector<1x1x128x32xf32>
    %666 = vector.shape_cast %665 : vector<1x1x128x32xf32> to vector<128x32xf32>
    %cst_530 = arith.constant dense<0.000000e+00> : vector<16x32xf32>
    %667 = tpu.matmul %543, %666, %cst_530 {dimension_numbers = #tpu.dot_dimension_numbers<[1], [0], [0], [1], [0, 0, 1, 1], [], []>} : vector<16x128xf32>, vector<128x32xf32>, vector<16x32xf32> -> vector<16x32xf32>
    %c0_531 = arith.constant 0 : index
    %c3_532 = arith.constant 3 : index
    %c0_533 = arith.constant 0 : index
    %c0_534 = arith.constant 0 : index
    %668 = vector.load %arg3[%c0_531, %c3_532, %c0_533, %c0_534] : memref<2x4x1x32xf32, #tpu.memory_space<vmem>>, vector<1x1x1x32xf32>
    %669 = vector.shape_cast %668 : vector<1x1x1x32xf32> to vector<1x32xf32>
    %670 = vector.broadcast %669 : vector<1x32xf32> to vector<16x32xf32>
    %671 = arith.addf %667, %670 : vector<16x32xf32>
    %c0_535 = arith.constant 0 : index
    %c3_536 = arith.constant 3 : index
    %c0_537 = arith.constant 0 : index
    %c0_538 = arith.constant 0 : index
    %672 = vector.load %arg4[%c0_535, %c3_536, %c0_537, %c0_538] : memref<2x4x128x32xf32, #tpu.memory_space<vmem>>, vector<1x1x128x32xf32>
    %673 = vector.shape_cast %672 : vector<1x1x128x32xf32> to vector<128x32xf32>
    %cst_539 = arith.constant dense<0.000000e+00> : vector<16x32xf32>
    %674 = tpu.matmul %543, %673, %cst_539 {dimension_numbers = #tpu.dot_dimension_numbers<[1], [0], [0], [1], [0, 0, 1, 1], [], []>} : vector<16x128xf32>, vector<128x32xf32>, vector<16x32xf32> -> vector<16x32xf32>
    %c0_540 = arith.constant 0 : index
    %c3_541 = arith.constant 3 : index
    %c0_542 = arith.constant 0 : index
    %c0_543 = arith.constant 0 : index
    %675 = vector.load %arg5[%c0_540, %c3_541, %c0_542, %c0_543] : memref<2x4x1x32xf32, #tpu.memory_space<vmem>>, vector<1x1x1x32xf32>
    %676 = vector.shape_cast %675 : vector<1x1x1x32xf32> to vector<1x32xf32>
    %677 = vector.broadcast %676 : vector<1x32xf32> to vector<16x32xf32>
    %678 = arith.addf %674, %677 : vector<16x32xf32>
    %c0_544 = arith.constant 0 : index
    %c3_545 = arith.constant 3 : index
    %c0_546 = arith.constant 0 : index
    %c0_547 = arith.constant 0 : index
    %679 = vector.load %arg6[%c0_544, %c3_545, %c0_546, %c0_547] : memref<2x4x128x32xf32, #tpu.memory_space<vmem>>, vector<1x1x128x32xf32>
    %680 = vector.shape_cast %679 : vector<1x1x128x32xf32> to vector<128x32xf32>
    %cst_548 = arith.constant dense<0.000000e+00> : vector<16x32xf32>
    %681 = tpu.matmul %543, %680, %cst_548 {dimension_numbers = #tpu.dot_dimension_numbers<[1], [0], [0], [1], [0, 0, 1, 1], [], []>} : vector<16x128xf32>, vector<128x32xf32>, vector<16x32xf32> -> vector<16x32xf32>
    %c0_549 = arith.constant 0 : index
    %c3_550 = arith.constant 3 : index
    %c0_551 = arith.constant 0 : index
    %c0_552 = arith.constant 0 : index
    %682 = vector.load %arg7[%c0_549, %c3_550, %c0_551, %c0_552] : memref<2x4x1x32xf32, #tpu.memory_space<vmem>>, vector<1x1x1x32xf32>
    %683 = vector.shape_cast %682 : vector<1x1x1x32xf32> to vector<1x32xf32>
    %684 = vector.broadcast %683 : vector<1x32xf32> to vector<16x32xf32>
    %685 = arith.addf %681, %684 : vector<16x32xf32>
    %cst_553 = arith.constant dense<0.000000e+00> : vector<16x16xf32>
    %686 = tpu.matmul %671, %678, %cst_553 {dimension_numbers = #tpu.dot_dimension_numbers<[1], [1], [0], [0], [0, 0, 1, 0], [], []>} : vector<16x32xf32>, vector<16x32xf32>, vector<16x16xf32> -> vector<16x16xf32>
    %cst_554 = arith.constant 0.176776692 : f32
    %687 = vector.broadcast %cst_554 : f32 to vector<16x16xf32>
    %688 = arith.mulf %686, %687 : vector<16x16xf32>
    %689 = vector.broadcast %545 : vector<1x16xf32> to vector<16x16xf32>
    %690 = arith.addf %688, %689 : vector<16x16xf32>
    %cst_555 = arith.constant dense<0xFF800000> : vector<16xf32>
    %691 = vector.multi_reduction <maximumf>, %690, %cst_555 [1] : vector<16x16xf32> to vector<16xf32>
    %692 = vector.shape_cast %691 : vector<16xf32> to vector<16x1xf32>
    %693 = vector.broadcast %692 : vector<16x1xf32> to vector<16x16xf32>
    %694 = arith.subf %690, %693 : vector<16x16xf32>
    %695 = math.exp %694 : vector<16x16xf32>
    %cst_556 = arith.constant dense<0.000000e+00> : vector<16xf32>
    %696 = vector.multi_reduction <add>, %695, %cst_556 [1] : vector<16x16xf32> to vector<16xf32>
    %697 = vector.shape_cast %696 : vector<16xf32> to vector<16x1xf32>
    %698 = vector.broadcast %697 : vector<16x1xf32> to vector<16x16xf32>
    %699 = arith.divf %695, %698 : vector<16x16xf32>
    %cst_557 = arith.constant dense<0.000000e+00> : vector<16x32xf32>
    %700 = tpu.matmul %699, %685, %cst_557 {dimension_numbers = #tpu.dot_dimension_numbers<[1], [0], [0], [1], [0, 0, 1, 1], [], []>} : vector<16x16xf32>, vector<16x32xf32>, vector<16x32xf32> -> vector<16x32xf32>
    %c0_558 = arith.constant 0 : index
    %c3_559 = arith.constant 3 : index
    %c0_560 = arith.constant 0 : index
    %c0_561 = arith.constant 0 : index
    %701 = vector.load %arg8[%c0_558, %c3_559, %c0_560, %c0_561] : memref<2x4x32x128xf32, #tpu.memory_space<vmem>>, vector<1x1x32x128xf32>
    %702 = vector.shape_cast %701 : vector<1x1x32x128xf32> to vector<32x128xf32>
    %cst_562 = arith.constant dense<0.000000e+00> : vector<16x128xf32>
    %703 = tpu.matmul %700, %702, %cst_562 {dimension_numbers = #tpu.dot_dimension_numbers<[1], [0], [0], [1], [0, 0, 1, 1], [], []>} : vector<16x32xf32>, vector<32x128xf32>, vector<16x128xf32> -> vector<16x128xf32>
    %704 = arith.addf %664, %703 : vector<16x128xf32>
    %c0_563 = arith.constant 0 : index
    %c0_564 = arith.constant 0 : index
    %c0_565 = arith.constant 0 : index
    %705 = vector.load %arg9[%c0_563, %c0_564, %c0_565] : memref<2x1x128xf32, #tpu.memory_space<vmem>>, vector<1x1x128xf32>
    %706 = vector.shape_cast %705 : vector<1x1x128xf32> to vector<1x128xf32>
    %707 = vector.broadcast %706 : vector<1x128xf32> to vector<16x128xf32>
    %708 = arith.addf %704, %707 : vector<16x128xf32>
    %c0_566 = arith.constant 0 : index
    %c0_567 = arith.constant 0 : index
    %c0_568 = arith.constant 0 : index
    %709 = vector.load %arg14[%c0_566, %c0_567, %c0_568] : memref<2x1x128xf32, #tpu.memory_space<vmem>>, vector<1x1x128xf32>
    %710 = vector.shape_cast %709 : vector<1x1x128xf32> to vector<1x128xf32>
    %c0_569 = arith.constant 0 : index
    %c0_570 = arith.constant 0 : index
    %c0_571 = arith.constant 0 : index
    %711 = vector.load %arg15[%c0_569, %c0_570, %c0_571] : memref<2x1x128xf32, #tpu.memory_space<vmem>>, vector<1x1x128xf32>
    %712 = vector.shape_cast %711 : vector<1x1x128xf32> to vector<1x128xf32>
    %713 = arith.addf %708, %543 : vector<16x128xf32>
    %cst_572 = arith.constant dense<0.000000e+00> : vector<16xf32>
    %714 = vector.multi_reduction <add>, %713, %cst_572 [1] : vector<16x128xf32> to vector<16xf32>
    %715 = vector.shape_cast %714 : vector<16xf32> to vector<16x1xf32>
    %cst_573 = arith.constant 1.280000e+02 : f32
    %716 = vector.broadcast %cst_573 : f32 to vector<16x1xf32>
    %717 = arith.divf %715, %716 : vector<16x1xf32>
    %718 = vector.broadcast %717 : vector<16x1xf32> to vector<16x128xf32>
    %719 = arith.subf %713, %718 : vector<16x128xf32>
    %720 = arith.mulf %719, %719 : vector<16x128xf32>
    %cst_574 = arith.constant dense<0.000000e+00> : vector<16xf32>
    %721 = vector.multi_reduction <add>, %720, %cst_574 [1] : vector<16x128xf32> to vector<16xf32>
    %722 = vector.shape_cast %721 : vector<16xf32> to vector<16x1xf32>
    %cst_575 = arith.constant 1.280000e+02 : f32
    %723 = vector.broadcast %cst_575 : f32 to vector<16x1xf32>
    %724 = arith.divf %722, %723 : vector<16x1xf32>
    %cst_576 = arith.constant 9.99999974E-6 : f32
    %725 = vector.broadcast %cst_576 : f32 to vector<16x1xf32>
    %726 = arith.addf %724, %725 : vector<16x1xf32>
    %727 = math.rsqrt %726 : vector<16x1xf32>
    %728 = vector.broadcast %727 : vector<16x1xf32> to vector<16x128xf32>
    %729 = arith.mulf %719, %728 : vector<16x128xf32>
    %730 = vector.broadcast %710 : vector<1x128xf32> to vector<16x128xf32>
    %731 = arith.mulf %729, %730 : vector<16x128xf32>
    %732 = vector.broadcast %712 : vector<1x128xf32> to vector<16x128xf32>
    %733 = arith.addf %731, %732 : vector<16x128xf32>
    %c0_577 = arith.constant 0 : index
    %c0_578 = arith.constant 0 : index
    %c0_579 = arith.constant 0 : index
    %734 = vector.load %arg10[%c0_577, %c0_578, %c0_579] : memref<2x128x256xf32, #tpu.memory_space<vmem>>, vector<1x128x256xf32>
    %735 = vector.shape_cast %734 : vector<1x128x256xf32> to vector<128x256xf32>
    %cst_580 = arith.constant dense<0.000000e+00> : vector<16x256xf32>
    %736 = tpu.matmul %733, %735, %cst_580 {dimension_numbers = #tpu.dot_dimension_numbers<[1], [0], [0], [1], [0, 0, 1, 1], [], []>} : vector<16x128xf32>, vector<128x256xf32>, vector<16x256xf32> -> vector<16x256xf32>
    %c0_581 = arith.constant 0 : index
    %c0_582 = arith.constant 0 : index
    %c0_583 = arith.constant 0 : index
    %737 = vector.load %arg11[%c0_581, %c0_582, %c0_583] : memref<2x1x256xf32, #tpu.memory_space<vmem>>, vector<1x1x256xf32>
    %738 = vector.shape_cast %737 : vector<1x1x256xf32> to vector<1x256xf32>
    %739 = vector.broadcast %738 : vector<1x256xf32> to vector<16x256xf32>
    %740 = arith.addf %736, %739 : vector<16x256xf32>
    %cst_584 = arith.constant 5.000000e-01 : f32
    %741 = vector.broadcast %cst_584 : f32 to vector<16x256xf32>
    %742 = arith.mulf %741, %740 : vector<16x256xf32>
    %cst_585 = arith.constant 0.707106769 : f32
    %743 = vector.broadcast %cst_585 : f32 to vector<16x256xf32>
    %744 = arith.mulf %740, %743 : vector<16x256xf32>
    %745 = math.absf %744 : vector<16x256xf32>
    %cst_586 = arith.constant 0.327591091 : f32
    %746 = vector.broadcast %cst_586 : f32 to vector<16x256xf32>
    %747 = arith.mulf %746, %745 : vector<16x256xf32>
    %cst_587 = arith.constant 1.000000e+00 : f32
    %748 = vector.broadcast %cst_587 : f32 to vector<16x256xf32>
    %749 = arith.addf %748, %747 : vector<16x256xf32>
    %cst_588 = arith.constant 1.000000e+00 : f32
    %750 = vector.broadcast %cst_588 : f32 to vector<16x256xf32>
    %751 = arith.divf %750, %749 : vector<16x256xf32>
    %cst_589 = arith.constant 1.06140542 : f32
    %752 = vector.broadcast %cst_589 : f32 to vector<16x256xf32>
    %753 = arith.mulf %752, %751 : vector<16x256xf32>
    %cst_590 = arith.constant -1.45315206 : f32
    %754 = vector.broadcast %cst_590 : f32 to vector<16x256xf32>
    %755 = arith.addf %753, %754 : vector<16x256xf32>
    %756 = arith.mulf %755, %751 : vector<16x256xf32>
    %cst_591 = arith.constant 1.42141378 : f32
    %757 = vector.broadcast %cst_591 : f32 to vector<16x256xf32>
    %758 = arith.addf %756, %757 : vector<16x256xf32>
    %759 = arith.mulf %758, %751 : vector<16x256xf32>
    %cst_592 = arith.constant -0.284496725 : f32
    %760 = vector.broadcast %cst_592 : f32 to vector<16x256xf32>
    %761 = arith.addf %759, %760 : vector<16x256xf32>
    %762 = arith.mulf %761, %751 : vector<16x256xf32>
    %cst_593 = arith.constant 0.254829586 : f32
    %763 = vector.broadcast %cst_593 : f32 to vector<16x256xf32>
    %764 = arith.addf %762, %763 : vector<16x256xf32>
    %765 = arith.mulf %764, %751 : vector<16x256xf32>
    %cst_594 = arith.constant 0.000000e+00 : f32
    %766 = vector.broadcast %cst_594 : f32 to vector<16x256xf32>
    %767 = arith.subf %766, %745 : vector<16x256xf32>
    %768 = arith.mulf %767, %745 : vector<16x256xf32>
    %769 = math.exp %768 : vector<16x256xf32>
    %770 = arith.mulf %765, %769 : vector<16x256xf32>
    %cst_595 = arith.constant 1.000000e+00 : f32
    %771 = vector.broadcast %cst_595 : f32 to vector<16x256xf32>
    %772 = arith.subf %771, %770 : vector<16x256xf32>
    %cst_596 = arith.constant 0.000000e+00 : f32
    %773 = vector.broadcast %cst_596 : f32 to vector<16x256xf32>
    %774 = arith.cmpf olt, %744, %773 : vector<16x256xf32>
    %cst_597 = arith.constant 0.000000e+00 : f32
    %775 = vector.broadcast %cst_597 : f32 to vector<16x256xf32>
    %776 = arith.subf %775, %772 : vector<16x256xf32>
    %777 = arith.select %774, %776, %772 : vector<16x256xi1>, vector<16x256xf32>
    %cst_598 = arith.constant 1.000000e+00 : f32
    %778 = vector.broadcast %cst_598 : f32 to vector<16x256xf32>
    %779 = arith.addf %778, %777 : vector<16x256xf32>
    %780 = arith.mulf %742, %779 : vector<16x256xf32>
    %c0_599 = arith.constant 0 : index
    %c0_600 = arith.constant 0 : index
    %c0_601 = arith.constant 0 : index
    %781 = vector.load %arg12[%c0_599, %c0_600, %c0_601] : memref<2x256x128xf32, #tpu.memory_space<vmem>>, vector<1x256x128xf32>
    %782 = vector.shape_cast %781 : vector<1x256x128xf32> to vector<256x128xf32>
    %cst_602 = arith.constant dense<0.000000e+00> : vector<16x128xf32>
    %783 = tpu.matmul %780, %782, %cst_602 {dimension_numbers = #tpu.dot_dimension_numbers<[1], [0], [0], [1], [0, 0, 1, 1], [], []>} : vector<16x256xf32>, vector<256x128xf32>, vector<16x128xf32> -> vector<16x128xf32>
    %c0_603 = arith.constant 0 : index
    %c0_604 = arith.constant 0 : index
    %c0_605 = arith.constant 0 : index
    %784 = vector.load %arg13[%c0_603, %c0_604, %c0_605] : memref<2x1x128xf32, #tpu.memory_space<vmem>>, vector<1x1x128xf32>
    %785 = vector.shape_cast %784 : vector<1x1x128xf32> to vector<1x128xf32>
    %786 = vector.broadcast %785 : vector<1x128xf32> to vector<16x128xf32>
    %787 = arith.addf %783, %786 : vector<16x128xf32>
    %c0_606 = arith.constant 0 : index
    %c0_607 = arith.constant 0 : index
    %c0_608 = arith.constant 0 : index
    %788 = vector.load %arg16[%c0_606, %c0_607, %c0_608] : memref<2x1x128xf32, #tpu.memory_space<vmem>>, vector<1x1x128xf32>
    %789 = vector.shape_cast %788 : vector<1x1x128xf32> to vector<1x128xf32>
    %c0_609 = arith.constant 0 : index
    %c0_610 = arith.constant 0 : index
    %c0_611 = arith.constant 0 : index
    %790 = vector.load %arg17[%c0_609, %c0_610, %c0_611] : memref<2x1x128xf32, #tpu.memory_space<vmem>>, vector<1x1x128xf32>
    %791 = vector.shape_cast %790 : vector<1x1x128xf32> to vector<1x128xf32>
    %792 = arith.addf %787, %733 : vector<16x128xf32>
    %cst_612 = arith.constant dense<0.000000e+00> : vector<16xf32>
    %793 = vector.multi_reduction <add>, %792, %cst_612 [1] : vector<16x128xf32> to vector<16xf32>
    %794 = vector.shape_cast %793 : vector<16xf32> to vector<16x1xf32>
    %cst_613 = arith.constant 1.280000e+02 : f32
    %795 = vector.broadcast %cst_613 : f32 to vector<16x1xf32>
    %796 = arith.divf %794, %795 : vector<16x1xf32>
    %797 = vector.broadcast %796 : vector<16x1xf32> to vector<16x128xf32>
    %798 = arith.subf %792, %797 : vector<16x128xf32>
    %799 = arith.mulf %798, %798 : vector<16x128xf32>
    %cst_614 = arith.constant dense<0.000000e+00> : vector<16xf32>
    %800 = vector.multi_reduction <add>, %799, %cst_614 [1] : vector<16x128xf32> to vector<16xf32>
    %801 = vector.shape_cast %800 : vector<16xf32> to vector<16x1xf32>
    %cst_615 = arith.constant 1.280000e+02 : f32
    %802 = vector.broadcast %cst_615 : f32 to vector<16x1xf32>
    %803 = arith.divf %801, %802 : vector<16x1xf32>
    %cst_616 = arith.constant 9.99999974E-6 : f32
    %804 = vector.broadcast %cst_616 : f32 to vector<16x1xf32>
    %805 = arith.addf %803, %804 : vector<16x1xf32>
    %806 = math.rsqrt %805 : vector<16x1xf32>
    %807 = vector.broadcast %806 : vector<16x1xf32> to vector<16x128xf32>
    %808 = arith.mulf %798, %807 : vector<16x128xf32>
    %809 = vector.broadcast %789 : vector<1x128xf32> to vector<16x128xf32>
    %810 = arith.mulf %808, %809 : vector<16x128xf32>
    %811 = vector.broadcast %791 : vector<1x128xf32> to vector<16x128xf32>
    %812 = arith.addf %810, %811 : vector<16x128xf32>
    %c1_617 = arith.constant 1 : index
    %c0_618 = arith.constant 0 : index
    %c0_619 = arith.constant 0 : index
    %c0_620 = arith.constant 0 : index
    %813 = vector.load %arg2[%c1_617, %c0_618, %c0_619, %c0_620] : memref<2x4x128x32xf32, #tpu.memory_space<vmem>>, vector<1x1x128x32xf32>
    %814 = vector.shape_cast %813 : vector<1x1x128x32xf32> to vector<128x32xf32>
    %cst_621 = arith.constant dense<0.000000e+00> : vector<16x32xf32>
    %815 = tpu.matmul %812, %814, %cst_621 {dimension_numbers = #tpu.dot_dimension_numbers<[1], [0], [0], [1], [0, 0, 1, 1], [], []>} : vector<16x128xf32>, vector<128x32xf32>, vector<16x32xf32> -> vector<16x32xf32>
    %c1_622 = arith.constant 1 : index
    %c0_623 = arith.constant 0 : index
    %c0_624 = arith.constant 0 : index
    %c0_625 = arith.constant 0 : index
    %816 = vector.load %arg3[%c1_622, %c0_623, %c0_624, %c0_625] : memref<2x4x1x32xf32, #tpu.memory_space<vmem>>, vector<1x1x1x32xf32>
    %817 = vector.shape_cast %816 : vector<1x1x1x32xf32> to vector<1x32xf32>
    %818 = vector.broadcast %817 : vector<1x32xf32> to vector<16x32xf32>
    %819 = arith.addf %815, %818 : vector<16x32xf32>
    %c1_626 = arith.constant 1 : index
    %c0_627 = arith.constant 0 : index
    %c0_628 = arith.constant 0 : index
    %c0_629 = arith.constant 0 : index
    %820 = vector.load %arg4[%c1_626, %c0_627, %c0_628, %c0_629] : memref<2x4x128x32xf32, #tpu.memory_space<vmem>>, vector<1x1x128x32xf32>
    %821 = vector.shape_cast %820 : vector<1x1x128x32xf32> to vector<128x32xf32>
    %cst_630 = arith.constant dense<0.000000e+00> : vector<16x32xf32>
    %822 = tpu.matmul %812, %821, %cst_630 {dimension_numbers = #tpu.dot_dimension_numbers<[1], [0], [0], [1], [0, 0, 1, 1], [], []>} : vector<16x128xf32>, vector<128x32xf32>, vector<16x32xf32> -> vector<16x32xf32>
    %c1_631 = arith.constant 1 : index
    %c0_632 = arith.constant 0 : index
    %c0_633 = arith.constant 0 : index
    %c0_634 = arith.constant 0 : index
    %823 = vector.load %arg5[%c1_631, %c0_632, %c0_633, %c0_634] : memref<2x4x1x32xf32, #tpu.memory_space<vmem>>, vector<1x1x1x32xf32>
    %824 = vector.shape_cast %823 : vector<1x1x1x32xf32> to vector<1x32xf32>
    %825 = vector.broadcast %824 : vector<1x32xf32> to vector<16x32xf32>
    %826 = arith.addf %822, %825 : vector<16x32xf32>
    %c1_635 = arith.constant 1 : index
    %c0_636 = arith.constant 0 : index
    %c0_637 = arith.constant 0 : index
    %c0_638 = arith.constant 0 : index
    %827 = vector.load %arg6[%c1_635, %c0_636, %c0_637, %c0_638] : memref<2x4x128x32xf32, #tpu.memory_space<vmem>>, vector<1x1x128x32xf32>
    %828 = vector.shape_cast %827 : vector<1x1x128x32xf32> to vector<128x32xf32>
    %cst_639 = arith.constant dense<0.000000e+00> : vector<16x32xf32>
    %829 = tpu.matmul %812, %828, %cst_639 {dimension_numbers = #tpu.dot_dimension_numbers<[1], [0], [0], [1], [0, 0, 1, 1], [], []>} : vector<16x128xf32>, vector<128x32xf32>, vector<16x32xf32> -> vector<16x32xf32>
    %c1_640 = arith.constant 1 : index
    %c0_641 = arith.constant 0 : index
    %c0_642 = arith.constant 0 : index
    %c0_643 = arith.constant 0 : index
    %830 = vector.load %arg7[%c1_640, %c0_641, %c0_642, %c0_643] : memref<2x4x1x32xf32, #tpu.memory_space<vmem>>, vector<1x1x1x32xf32>
    %831 = vector.shape_cast %830 : vector<1x1x1x32xf32> to vector<1x32xf32>
    %832 = vector.broadcast %831 : vector<1x32xf32> to vector<16x32xf32>
    %833 = arith.addf %829, %832 : vector<16x32xf32>
    %cst_644 = arith.constant dense<0.000000e+00> : vector<16x16xf32>
    %834 = tpu.matmul %819, %826, %cst_644 {dimension_numbers = #tpu.dot_dimension_numbers<[1], [1], [0], [0], [0, 0, 1, 0], [], []>} : vector<16x32xf32>, vector<16x32xf32>, vector<16x16xf32> -> vector<16x16xf32>
    %cst_645 = arith.constant 0.176776692 : f32
    %835 = vector.broadcast %cst_645 : f32 to vector<16x16xf32>
    %836 = arith.mulf %834, %835 : vector<16x16xf32>
    %837 = vector.broadcast %545 : vector<1x16xf32> to vector<16x16xf32>
    %838 = arith.addf %836, %837 : vector<16x16xf32>
    %cst_646 = arith.constant dense<0xFF800000> : vector<16xf32>
    %839 = vector.multi_reduction <maximumf>, %838, %cst_646 [1] : vector<16x16xf32> to vector<16xf32>
    %840 = vector.shape_cast %839 : vector<16xf32> to vector<16x1xf32>
    %841 = vector.broadcast %840 : vector<16x1xf32> to vector<16x16xf32>
    %842 = arith.subf %838, %841 : vector<16x16xf32>
    %843 = math.exp %842 : vector<16x16xf32>
    %cst_647 = arith.constant dense<0.000000e+00> : vector<16xf32>
    %844 = vector.multi_reduction <add>, %843, %cst_647 [1] : vector<16x16xf32> to vector<16xf32>
    %845 = vector.shape_cast %844 : vector<16xf32> to vector<16x1xf32>
    %846 = vector.broadcast %845 : vector<16x1xf32> to vector<16x16xf32>
    %847 = arith.divf %843, %846 : vector<16x16xf32>
    %cst_648 = arith.constant dense<0.000000e+00> : vector<16x32xf32>
    %848 = tpu.matmul %847, %833, %cst_648 {dimension_numbers = #tpu.dot_dimension_numbers<[1], [0], [0], [1], [0, 0, 1, 1], [], []>} : vector<16x16xf32>, vector<16x32xf32>, vector<16x32xf32> -> vector<16x32xf32>
    %c1_649 = arith.constant 1 : index
    %c0_650 = arith.constant 0 : index
    %c0_651 = arith.constant 0 : index
    %c0_652 = arith.constant 0 : index
    %849 = vector.load %arg8[%c1_649, %c0_650, %c0_651, %c0_652] : memref<2x4x32x128xf32, #tpu.memory_space<vmem>>, vector<1x1x32x128xf32>
    %850 = vector.shape_cast %849 : vector<1x1x32x128xf32> to vector<32x128xf32>
    %cst_653 = arith.constant dense<0.000000e+00> : vector<16x128xf32>
    %851 = tpu.matmul %848, %850, %cst_653 {dimension_numbers = #tpu.dot_dimension_numbers<[1], [0], [0], [1], [0, 0, 1, 1], [], []>} : vector<16x32xf32>, vector<32x128xf32>, vector<16x128xf32> -> vector<16x128xf32>
    %c1_654 = arith.constant 1 : index
    %c1_655 = arith.constant 1 : index
    %c0_656 = arith.constant 0 : index
    %c0_657 = arith.constant 0 : index
    %852 = vector.load %arg2[%c1_654, %c1_655, %c0_656, %c0_657] : memref<2x4x128x32xf32, #tpu.memory_space<vmem>>, vector<1x1x128x32xf32>
    %853 = vector.shape_cast %852 : vector<1x1x128x32xf32> to vector<128x32xf32>
    %cst_658 = arith.constant dense<0.000000e+00> : vector<16x32xf32>
    %854 = tpu.matmul %812, %853, %cst_658 {dimension_numbers = #tpu.dot_dimension_numbers<[1], [0], [0], [1], [0, 0, 1, 1], [], []>} : vector<16x128xf32>, vector<128x32xf32>, vector<16x32xf32> -> vector<16x32xf32>
    %c1_659 = arith.constant 1 : index
    %c1_660 = arith.constant 1 : index
    %c0_661 = arith.constant 0 : index
    %c0_662 = arith.constant 0 : index
    %855 = vector.load %arg3[%c1_659, %c1_660, %c0_661, %c0_662] : memref<2x4x1x32xf32, #tpu.memory_space<vmem>>, vector<1x1x1x32xf32>
    %856 = vector.shape_cast %855 : vector<1x1x1x32xf32> to vector<1x32xf32>
    %857 = vector.broadcast %856 : vector<1x32xf32> to vector<16x32xf32>
    %858 = arith.addf %854, %857 : vector<16x32xf32>
    %c1_663 = arith.constant 1 : index
    %c1_664 = arith.constant 1 : index
    %c0_665 = arith.constant 0 : index
    %c0_666 = arith.constant 0 : index
    %859 = vector.load %arg4[%c1_663, %c1_664, %c0_665, %c0_666] : memref<2x4x128x32xf32, #tpu.memory_space<vmem>>, vector<1x1x128x32xf32>
    %860 = vector.shape_cast %859 : vector<1x1x128x32xf32> to vector<128x32xf32>
    %cst_667 = arith.constant dense<0.000000e+00> : vector<16x32xf32>
    %861 = tpu.matmul %812, %860, %cst_667 {dimension_numbers = #tpu.dot_dimension_numbers<[1], [0], [0], [1], [0, 0, 1, 1], [], []>} : vector<16x128xf32>, vector<128x32xf32>, vector<16x32xf32> -> vector<16x32xf32>
    %c1_668 = arith.constant 1 : index
    %c1_669 = arith.constant 1 : index
    %c0_670 = arith.constant 0 : index
    %c0_671 = arith.constant 0 : index
    %862 = vector.load %arg5[%c1_668, %c1_669, %c0_670, %c0_671] : memref<2x4x1x32xf32, #tpu.memory_space<vmem>>, vector<1x1x1x32xf32>
    %863 = vector.shape_cast %862 : vector<1x1x1x32xf32> to vector<1x32xf32>
    %864 = vector.broadcast %863 : vector<1x32xf32> to vector<16x32xf32>
    %865 = arith.addf %861, %864 : vector<16x32xf32>
    %c1_672 = arith.constant 1 : index
    %c1_673 = arith.constant 1 : index
    %c0_674 = arith.constant 0 : index
    %c0_675 = arith.constant 0 : index
    %866 = vector.load %arg6[%c1_672, %c1_673, %c0_674, %c0_675] : memref<2x4x128x32xf32, #tpu.memory_space<vmem>>, vector<1x1x128x32xf32>
    %867 = vector.shape_cast %866 : vector<1x1x128x32xf32> to vector<128x32xf32>
    %cst_676 = arith.constant dense<0.000000e+00> : vector<16x32xf32>
    %868 = tpu.matmul %812, %867, %cst_676 {dimension_numbers = #tpu.dot_dimension_numbers<[1], [0], [0], [1], [0, 0, 1, 1], [], []>} : vector<16x128xf32>, vector<128x32xf32>, vector<16x32xf32> -> vector<16x32xf32>
    %c1_677 = arith.constant 1 : index
    %c1_678 = arith.constant 1 : index
    %c0_679 = arith.constant 0 : index
    %c0_680 = arith.constant 0 : index
    %869 = vector.load %arg7[%c1_677, %c1_678, %c0_679, %c0_680] : memref<2x4x1x32xf32, #tpu.memory_space<vmem>>, vector<1x1x1x32xf32>
    %870 = vector.shape_cast %869 : vector<1x1x1x32xf32> to vector<1x32xf32>
    %871 = vector.broadcast %870 : vector<1x32xf32> to vector<16x32xf32>
    %872 = arith.addf %868, %871 : vector<16x32xf32>
    %cst_681 = arith.constant dense<0.000000e+00> : vector<16x16xf32>
    %873 = tpu.matmul %858, %865, %cst_681 {dimension_numbers = #tpu.dot_dimension_numbers<[1], [1], [0], [0], [0, 0, 1, 0], [], []>} : vector<16x32xf32>, vector<16x32xf32>, vector<16x16xf32> -> vector<16x16xf32>
    %cst_682 = arith.constant 0.176776692 : f32
    %874 = vector.broadcast %cst_682 : f32 to vector<16x16xf32>
    %875 = arith.mulf %873, %874 : vector<16x16xf32>
    %876 = vector.broadcast %545 : vector<1x16xf32> to vector<16x16xf32>
    %877 = arith.addf %875, %876 : vector<16x16xf32>
    %cst_683 = arith.constant dense<0xFF800000> : vector<16xf32>
    %878 = vector.multi_reduction <maximumf>, %877, %cst_683 [1] : vector<16x16xf32> to vector<16xf32>
    %879 = vector.shape_cast %878 : vector<16xf32> to vector<16x1xf32>
    %880 = vector.broadcast %879 : vector<16x1xf32> to vector<16x16xf32>
    %881 = arith.subf %877, %880 : vector<16x16xf32>
    %882 = math.exp %881 : vector<16x16xf32>
    %cst_684 = arith.constant dense<0.000000e+00> : vector<16xf32>
    %883 = vector.multi_reduction <add>, %882, %cst_684 [1] : vector<16x16xf32> to vector<16xf32>
    %884 = vector.shape_cast %883 : vector<16xf32> to vector<16x1xf32>
    %885 = vector.broadcast %884 : vector<16x1xf32> to vector<16x16xf32>
    %886 = arith.divf %882, %885 : vector<16x16xf32>
    %cst_685 = arith.constant dense<0.000000e+00> : vector<16x32xf32>
    %887 = tpu.matmul %886, %872, %cst_685 {dimension_numbers = #tpu.dot_dimension_numbers<[1], [0], [0], [1], [0, 0, 1, 1], [], []>} : vector<16x16xf32>, vector<16x32xf32>, vector<16x32xf32> -> vector<16x32xf32>
    %c1_686 = arith.constant 1 : index
    %c1_687 = arith.constant 1 : index
    %c0_688 = arith.constant 0 : index
    %c0_689 = arith.constant 0 : index
    %888 = vector.load %arg8[%c1_686, %c1_687, %c0_688, %c0_689] : memref<2x4x32x128xf32, #tpu.memory_space<vmem>>, vector<1x1x32x128xf32>
    %889 = vector.shape_cast %888 : vector<1x1x32x128xf32> to vector<32x128xf32>
    %cst_690 = arith.constant dense<0.000000e+00> : vector<16x128xf32>
    %890 = tpu.matmul %887, %889, %cst_690 {dimension_numbers = #tpu.dot_dimension_numbers<[1], [0], [0], [1], [0, 0, 1, 1], [], []>} : vector<16x32xf32>, vector<32x128xf32>, vector<16x128xf32> -> vector<16x128xf32>
    %891 = arith.addf %851, %890 : vector<16x128xf32>
    %c1_691 = arith.constant 1 : index
    %c2_692 = arith.constant 2 : index
    %c0_693 = arith.constant 0 : index
    %c0_694 = arith.constant 0 : index
    %892 = vector.load %arg2[%c1_691, %c2_692, %c0_693, %c0_694] : memref<2x4x128x32xf32, #tpu.memory_space<vmem>>, vector<1x1x128x32xf32>
    %893 = vector.shape_cast %892 : vector<1x1x128x32xf32> to vector<128x32xf32>
    %cst_695 = arith.constant dense<0.000000e+00> : vector<16x32xf32>
    %894 = tpu.matmul %812, %893, %cst_695 {dimension_numbers = #tpu.dot_dimension_numbers<[1], [0], [0], [1], [0, 0, 1, 1], [], []>} : vector<16x128xf32>, vector<128x32xf32>, vector<16x32xf32> -> vector<16x32xf32>
    %c1_696 = arith.constant 1 : index
    %c2_697 = arith.constant 2 : index
    %c0_698 = arith.constant 0 : index
    %c0_699 = arith.constant 0 : index
    %895 = vector.load %arg3[%c1_696, %c2_697, %c0_698, %c0_699] : memref<2x4x1x32xf32, #tpu.memory_space<vmem>>, vector<1x1x1x32xf32>
    %896 = vector.shape_cast %895 : vector<1x1x1x32xf32> to vector<1x32xf32>
    %897 = vector.broadcast %896 : vector<1x32xf32> to vector<16x32xf32>
    %898 = arith.addf %894, %897 : vector<16x32xf32>
    %c1_700 = arith.constant 1 : index
    %c2_701 = arith.constant 2 : index
    %c0_702 = arith.constant 0 : index
    %c0_703 = arith.constant 0 : index
    %899 = vector.load %arg4[%c1_700, %c2_701, %c0_702, %c0_703] : memref<2x4x128x32xf32, #tpu.memory_space<vmem>>, vector<1x1x128x32xf32>
    %900 = vector.shape_cast %899 : vector<1x1x128x32xf32> to vector<128x32xf32>
    %cst_704 = arith.constant dense<0.000000e+00> : vector<16x32xf32>
    %901 = tpu.matmul %812, %900, %cst_704 {dimension_numbers = #tpu.dot_dimension_numbers<[1], [0], [0], [1], [0, 0, 1, 1], [], []>} : vector<16x128xf32>, vector<128x32xf32>, vector<16x32xf32> -> vector<16x32xf32>
    %c1_705 = arith.constant 1 : index
    %c2_706 = arith.constant 2 : index
    %c0_707 = arith.constant 0 : index
    %c0_708 = arith.constant 0 : index
    %902 = vector.load %arg5[%c1_705, %c2_706, %c0_707, %c0_708] : memref<2x4x1x32xf32, #tpu.memory_space<vmem>>, vector<1x1x1x32xf32>
    %903 = vector.shape_cast %902 : vector<1x1x1x32xf32> to vector<1x32xf32>
    %904 = vector.broadcast %903 : vector<1x32xf32> to vector<16x32xf32>
    %905 = arith.addf %901, %904 : vector<16x32xf32>
    %c1_709 = arith.constant 1 : index
    %c2_710 = arith.constant 2 : index
    %c0_711 = arith.constant 0 : index
    %c0_712 = arith.constant 0 : index
    %906 = vector.load %arg6[%c1_709, %c2_710, %c0_711, %c0_712] : memref<2x4x128x32xf32, #tpu.memory_space<vmem>>, vector<1x1x128x32xf32>
    %907 = vector.shape_cast %906 : vector<1x1x128x32xf32> to vector<128x32xf32>
    %cst_713 = arith.constant dense<0.000000e+00> : vector<16x32xf32>
    %908 = tpu.matmul %812, %907, %cst_713 {dimension_numbers = #tpu.dot_dimension_numbers<[1], [0], [0], [1], [0, 0, 1, 1], [], []>} : vector<16x128xf32>, vector<128x32xf32>, vector<16x32xf32> -> vector<16x32xf32>
    %c1_714 = arith.constant 1 : index
    %c2_715 = arith.constant 2 : index
    %c0_716 = arith.constant 0 : index
    %c0_717 = arith.constant 0 : index
    %909 = vector.load %arg7[%c1_714, %c2_715, %c0_716, %c0_717] : memref<2x4x1x32xf32, #tpu.memory_space<vmem>>, vector<1x1x1x32xf32>
    %910 = vector.shape_cast %909 : vector<1x1x1x32xf32> to vector<1x32xf32>
    %911 = vector.broadcast %910 : vector<1x32xf32> to vector<16x32xf32>
    %912 = arith.addf %908, %911 : vector<16x32xf32>
    %cst_718 = arith.constant dense<0.000000e+00> : vector<16x16xf32>
    %913 = tpu.matmul %898, %905, %cst_718 {dimension_numbers = #tpu.dot_dimension_numbers<[1], [1], [0], [0], [0, 0, 1, 0], [], []>} : vector<16x32xf32>, vector<16x32xf32>, vector<16x16xf32> -> vector<16x16xf32>
    %cst_719 = arith.constant 0.176776692 : f32
    %914 = vector.broadcast %cst_719 : f32 to vector<16x16xf32>
    %915 = arith.mulf %913, %914 : vector<16x16xf32>
    %916 = vector.broadcast %545 : vector<1x16xf32> to vector<16x16xf32>
    %917 = arith.addf %915, %916 : vector<16x16xf32>
    %cst_720 = arith.constant dense<0xFF800000> : vector<16xf32>
    %918 = vector.multi_reduction <maximumf>, %917, %cst_720 [1] : vector<16x16xf32> to vector<16xf32>
    %919 = vector.shape_cast %918 : vector<16xf32> to vector<16x1xf32>
    %920 = vector.broadcast %919 : vector<16x1xf32> to vector<16x16xf32>
    %921 = arith.subf %917, %920 : vector<16x16xf32>
    %922 = math.exp %921 : vector<16x16xf32>
    %cst_721 = arith.constant dense<0.000000e+00> : vector<16xf32>
    %923 = vector.multi_reduction <add>, %922, %cst_721 [1] : vector<16x16xf32> to vector<16xf32>
    %924 = vector.shape_cast %923 : vector<16xf32> to vector<16x1xf32>
    %925 = vector.broadcast %924 : vector<16x1xf32> to vector<16x16xf32>
    %926 = arith.divf %922, %925 : vector<16x16xf32>
    %cst_722 = arith.constant dense<0.000000e+00> : vector<16x32xf32>
    %927 = tpu.matmul %926, %912, %cst_722 {dimension_numbers = #tpu.dot_dimension_numbers<[1], [0], [0], [1], [0, 0, 1, 1], [], []>} : vector<16x16xf32>, vector<16x32xf32>, vector<16x32xf32> -> vector<16x32xf32>
    %c1_723 = arith.constant 1 : index
    %c2_724 = arith.constant 2 : index
    %c0_725 = arith.constant 0 : index
    %c0_726 = arith.constant 0 : index
    %928 = vector.load %arg8[%c1_723, %c2_724, %c0_725, %c0_726] : memref<2x4x32x128xf32, #tpu.memory_space<vmem>>, vector<1x1x32x128xf32>
    %929 = vector.shape_cast %928 : vector<1x1x32x128xf32> to vector<32x128xf32>
    %cst_727 = arith.constant dense<0.000000e+00> : vector<16x128xf32>
    %930 = tpu.matmul %927, %929, %cst_727 {dimension_numbers = #tpu.dot_dimension_numbers<[1], [0], [0], [1], [0, 0, 1, 1], [], []>} : vector<16x32xf32>, vector<32x128xf32>, vector<16x128xf32> -> vector<16x128xf32>
    %931 = arith.addf %891, %930 : vector<16x128xf32>
    %c1_728 = arith.constant 1 : index
    %c3_729 = arith.constant 3 : index
    %c0_730 = arith.constant 0 : index
    %c0_731 = arith.constant 0 : index
    %932 = vector.load %arg2[%c1_728, %c3_729, %c0_730, %c0_731] : memref<2x4x128x32xf32, #tpu.memory_space<vmem>>, vector<1x1x128x32xf32>
    %933 = vector.shape_cast %932 : vector<1x1x128x32xf32> to vector<128x32xf32>
    %cst_732 = arith.constant dense<0.000000e+00> : vector<16x32xf32>
    %934 = tpu.matmul %812, %933, %cst_732 {dimension_numbers = #tpu.dot_dimension_numbers<[1], [0], [0], [1], [0, 0, 1, 1], [], []>} : vector<16x128xf32>, vector<128x32xf32>, vector<16x32xf32> -> vector<16x32xf32>
    %c1_733 = arith.constant 1 : index
    %c3_734 = arith.constant 3 : index
    %c0_735 = arith.constant 0 : index
    %c0_736 = arith.constant 0 : index
    %935 = vector.load %arg3[%c1_733, %c3_734, %c0_735, %c0_736] : memref<2x4x1x32xf32, #tpu.memory_space<vmem>>, vector<1x1x1x32xf32>
    %936 = vector.shape_cast %935 : vector<1x1x1x32xf32> to vector<1x32xf32>
    %937 = vector.broadcast %936 : vector<1x32xf32> to vector<16x32xf32>
    %938 = arith.addf %934, %937 : vector<16x32xf32>
    %c1_737 = arith.constant 1 : index
    %c3_738 = arith.constant 3 : index
    %c0_739 = arith.constant 0 : index
    %c0_740 = arith.constant 0 : index
    %939 = vector.load %arg4[%c1_737, %c3_738, %c0_739, %c0_740] : memref<2x4x128x32xf32, #tpu.memory_space<vmem>>, vector<1x1x128x32xf32>
    %940 = vector.shape_cast %939 : vector<1x1x128x32xf32> to vector<128x32xf32>
    %cst_741 = arith.constant dense<0.000000e+00> : vector<16x32xf32>
    %941 = tpu.matmul %812, %940, %cst_741 {dimension_numbers = #tpu.dot_dimension_numbers<[1], [0], [0], [1], [0, 0, 1, 1], [], []>} : vector<16x128xf32>, vector<128x32xf32>, vector<16x32xf32> -> vector<16x32xf32>
    %c1_742 = arith.constant 1 : index
    %c3_743 = arith.constant 3 : index
    %c0_744 = arith.constant 0 : index
    %c0_745 = arith.constant 0 : index
    %942 = vector.load %arg5[%c1_742, %c3_743, %c0_744, %c0_745] : memref<2x4x1x32xf32, #tpu.memory_space<vmem>>, vector<1x1x1x32xf32>
    %943 = vector.shape_cast %942 : vector<1x1x1x32xf32> to vector<1x32xf32>
    %944 = vector.broadcast %943 : vector<1x32xf32> to vector<16x32xf32>
    %945 = arith.addf %941, %944 : vector<16x32xf32>
    %c1_746 = arith.constant 1 : index
    %c3_747 = arith.constant 3 : index
    %c0_748 = arith.constant 0 : index
    %c0_749 = arith.constant 0 : index
    %946 = vector.load %arg6[%c1_746, %c3_747, %c0_748, %c0_749] : memref<2x4x128x32xf32, #tpu.memory_space<vmem>>, vector<1x1x128x32xf32>
    %947 = vector.shape_cast %946 : vector<1x1x128x32xf32> to vector<128x32xf32>
    %cst_750 = arith.constant dense<0.000000e+00> : vector<16x32xf32>
    %948 = tpu.matmul %812, %947, %cst_750 {dimension_numbers = #tpu.dot_dimension_numbers<[1], [0], [0], [1], [0, 0, 1, 1], [], []>} : vector<16x128xf32>, vector<128x32xf32>, vector<16x32xf32> -> vector<16x32xf32>
    %c1_751 = arith.constant 1 : index
    %c3_752 = arith.constant 3 : index
    %c0_753 = arith.constant 0 : index
    %c0_754 = arith.constant 0 : index
    %949 = vector.load %arg7[%c1_751, %c3_752, %c0_753, %c0_754] : memref<2x4x1x32xf32, #tpu.memory_space<vmem>>, vector<1x1x1x32xf32>
    %950 = vector.shape_cast %949 : vector<1x1x1x32xf32> to vector<1x32xf32>
    %951 = vector.broadcast %950 : vector<1x32xf32> to vector<16x32xf32>
    %952 = arith.addf %948, %951 : vector<16x32xf32>
    %cst_755 = arith.constant dense<0.000000e+00> : vector<16x16xf32>
    %953 = tpu.matmul %938, %945, %cst_755 {dimension_numbers = #tpu.dot_dimension_numbers<[1], [1], [0], [0], [0, 0, 1, 0], [], []>} : vector<16x32xf32>, vector<16x32xf32>, vector<16x16xf32> -> vector<16x16xf32>
    %cst_756 = arith.constant 0.176776692 : f32
    %954 = vector.broadcast %cst_756 : f32 to vector<16x16xf32>
    %955 = arith.mulf %953, %954 : vector<16x16xf32>
    %956 = vector.broadcast %545 : vector<1x16xf32> to vector<16x16xf32>
    %957 = arith.addf %955, %956 : vector<16x16xf32>
    %cst_757 = arith.constant dense<0xFF800000> : vector<16xf32>
    %958 = vector.multi_reduction <maximumf>, %957, %cst_757 [1] : vector<16x16xf32> to vector<16xf32>
    %959 = vector.shape_cast %958 : vector<16xf32> to vector<16x1xf32>
    %960 = vector.broadcast %959 : vector<16x1xf32> to vector<16x16xf32>
    %961 = arith.subf %957, %960 : vector<16x16xf32>
    %962 = math.exp %961 : vector<16x16xf32>
    %cst_758 = arith.constant dense<0.000000e+00> : vector<16xf32>
    %963 = vector.multi_reduction <add>, %962, %cst_758 [1] : vector<16x16xf32> to vector<16xf32>
    %964 = vector.shape_cast %963 : vector<16xf32> to vector<16x1xf32>
    %965 = vector.broadcast %964 : vector<16x1xf32> to vector<16x16xf32>
    %966 = arith.divf %962, %965 : vector<16x16xf32>
    %cst_759 = arith.constant dense<0.000000e+00> : vector<16x32xf32>
    %967 = tpu.matmul %966, %952, %cst_759 {dimension_numbers = #tpu.dot_dimension_numbers<[1], [0], [0], [1], [0, 0, 1, 1], [], []>} : vector<16x16xf32>, vector<16x32xf32>, vector<16x32xf32> -> vector<16x32xf32>
    %c1_760 = arith.constant 1 : index
    %c3_761 = arith.constant 3 : index
    %c0_762 = arith.constant 0 : index
    %c0_763 = arith.constant 0 : index
    %968 = vector.load %arg8[%c1_760, %c3_761, %c0_762, %c0_763] : memref<2x4x32x128xf32, #tpu.memory_space<vmem>>, vector<1x1x32x128xf32>
    %969 = vector.shape_cast %968 : vector<1x1x32x128xf32> to vector<32x128xf32>
    %cst_764 = arith.constant dense<0.000000e+00> : vector<16x128xf32>
    %970 = tpu.matmul %967, %969, %cst_764 {dimension_numbers = #tpu.dot_dimension_numbers<[1], [0], [0], [1], [0, 0, 1, 1], [], []>} : vector<16x32xf32>, vector<32x128xf32>, vector<16x128xf32> -> vector<16x128xf32>
    %971 = arith.addf %931, %970 : vector<16x128xf32>
    %c1_765 = arith.constant 1 : index
    %c0_766 = arith.constant 0 : index
    %c0_767 = arith.constant 0 : index
    %972 = vector.load %arg9[%c1_765, %c0_766, %c0_767] : memref<2x1x128xf32, #tpu.memory_space<vmem>>, vector<1x1x128xf32>
    %973 = vector.shape_cast %972 : vector<1x1x128xf32> to vector<1x128xf32>
    %974 = vector.broadcast %973 : vector<1x128xf32> to vector<16x128xf32>
    %975 = arith.addf %971, %974 : vector<16x128xf32>
    %c1_768 = arith.constant 1 : index
    %c0_769 = arith.constant 0 : index
    %c0_770 = arith.constant 0 : index
    %976 = vector.load %arg14[%c1_768, %c0_769, %c0_770] : memref<2x1x128xf32, #tpu.memory_space<vmem>>, vector<1x1x128xf32>
    %977 = vector.shape_cast %976 : vector<1x1x128xf32> to vector<1x128xf32>
    %c1_771 = arith.constant 1 : index
    %c0_772 = arith.constant 0 : index
    %c0_773 = arith.constant 0 : index
    %978 = vector.load %arg15[%c1_771, %c0_772, %c0_773] : memref<2x1x128xf32, #tpu.memory_space<vmem>>, vector<1x1x128xf32>
    %979 = vector.shape_cast %978 : vector<1x1x128xf32> to vector<1x128xf32>
    %980 = arith.addf %975, %812 : vector<16x128xf32>
    %cst_774 = arith.constant dense<0.000000e+00> : vector<16xf32>
    %981 = vector.multi_reduction <add>, %980, %cst_774 [1] : vector<16x128xf32> to vector<16xf32>
    %982 = vector.shape_cast %981 : vector<16xf32> to vector<16x1xf32>
    %cst_775 = arith.constant 1.280000e+02 : f32
    %983 = vector.broadcast %cst_775 : f32 to vector<16x1xf32>
    %984 = arith.divf %982, %983 : vector<16x1xf32>
    %985 = vector.broadcast %984 : vector<16x1xf32> to vector<16x128xf32>
    %986 = arith.subf %980, %985 : vector<16x128xf32>
    %987 = arith.mulf %986, %986 : vector<16x128xf32>
    %cst_776 = arith.constant dense<0.000000e+00> : vector<16xf32>
    %988 = vector.multi_reduction <add>, %987, %cst_776 [1] : vector<16x128xf32> to vector<16xf32>
    %989 = vector.shape_cast %988 : vector<16xf32> to vector<16x1xf32>
    %cst_777 = arith.constant 1.280000e+02 : f32
    %990 = vector.broadcast %cst_777 : f32 to vector<16x1xf32>
    %991 = arith.divf %989, %990 : vector<16x1xf32>
    %cst_778 = arith.constant 9.99999974E-6 : f32
    %992 = vector.broadcast %cst_778 : f32 to vector<16x1xf32>
    %993 = arith.addf %991, %992 : vector<16x1xf32>
    %994 = math.rsqrt %993 : vector<16x1xf32>
    %995 = vector.broadcast %994 : vector<16x1xf32> to vector<16x128xf32>
    %996 = arith.mulf %986, %995 : vector<16x128xf32>
    %997 = vector.broadcast %977 : vector<1x128xf32> to vector<16x128xf32>
    %998 = arith.mulf %996, %997 : vector<16x128xf32>
    %999 = vector.broadcast %979 : vector<1x128xf32> to vector<16x128xf32>
    %1000 = arith.addf %998, %999 : vector<16x128xf32>
    %c1_779 = arith.constant 1 : index
    %c0_780 = arith.constant 0 : index
    %c0_781 = arith.constant 0 : index
    %1001 = vector.load %arg10[%c1_779, %c0_780, %c0_781] : memref<2x128x256xf32, #tpu.memory_space<vmem>>, vector<1x128x256xf32>
    %1002 = vector.shape_cast %1001 : vector<1x128x256xf32> to vector<128x256xf32>
    %cst_782 = arith.constant dense<0.000000e+00> : vector<16x256xf32>
    %1003 = tpu.matmul %1000, %1002, %cst_782 {dimension_numbers = #tpu.dot_dimension_numbers<[1], [0], [0], [1], [0, 0, 1, 1], [], []>} : vector<16x128xf32>, vector<128x256xf32>, vector<16x256xf32> -> vector<16x256xf32>
    %c1_783 = arith.constant 1 : index
    %c0_784 = arith.constant 0 : index
    %c0_785 = arith.constant 0 : index
    %1004 = vector.load %arg11[%c1_783, %c0_784, %c0_785] : memref<2x1x256xf32, #tpu.memory_space<vmem>>, vector<1x1x256xf32>
    %1005 = vector.shape_cast %1004 : vector<1x1x256xf32> to vector<1x256xf32>
    %1006 = vector.broadcast %1005 : vector<1x256xf32> to vector<16x256xf32>
    %1007 = arith.addf %1003, %1006 : vector<16x256xf32>
    %cst_786 = arith.constant 5.000000e-01 : f32
    %1008 = vector.broadcast %cst_786 : f32 to vector<16x256xf32>
    %1009 = arith.mulf %1008, %1007 : vector<16x256xf32>
    %cst_787 = arith.constant 0.707106769 : f32
    %1010 = vector.broadcast %cst_787 : f32 to vector<16x256xf32>
    %1011 = arith.mulf %1007, %1010 : vector<16x256xf32>
    %1012 = math.absf %1011 : vector<16x256xf32>
    %cst_788 = arith.constant 0.327591091 : f32
    %1013 = vector.broadcast %cst_788 : f32 to vector<16x256xf32>
    %1014 = arith.mulf %1013, %1012 : vector<16x256xf32>
    %cst_789 = arith.constant 1.000000e+00 : f32
    %1015 = vector.broadcast %cst_789 : f32 to vector<16x256xf32>
    %1016 = arith.addf %1015, %1014 : vector<16x256xf32>
    %cst_790 = arith.constant 1.000000e+00 : f32
    %1017 = vector.broadcast %cst_790 : f32 to vector<16x256xf32>
    %1018 = arith.divf %1017, %1016 : vector<16x256xf32>
    %cst_791 = arith.constant 1.06140542 : f32
    %1019 = vector.broadcast %cst_791 : f32 to vector<16x256xf32>
    %1020 = arith.mulf %1019, %1018 : vector<16x256xf32>
    %cst_792 = arith.constant -1.45315206 : f32
    %1021 = vector.broadcast %cst_792 : f32 to vector<16x256xf32>
    %1022 = arith.addf %1020, %1021 : vector<16x256xf32>
    %1023 = arith.mulf %1022, %1018 : vector<16x256xf32>
    %cst_793 = arith.constant 1.42141378 : f32
    %1024 = vector.broadcast %cst_793 : f32 to vector<16x256xf32>
    %1025 = arith.addf %1023, %1024 : vector<16x256xf32>
    %1026 = arith.mulf %1025, %1018 : vector<16x256xf32>
    %cst_794 = arith.constant -0.284496725 : f32
    %1027 = vector.broadcast %cst_794 : f32 to vector<16x256xf32>
    %1028 = arith.addf %1026, %1027 : vector<16x256xf32>
    %1029 = arith.mulf %1028, %1018 : vector<16x256xf32>
    %cst_795 = arith.constant 0.254829586 : f32
    %1030 = vector.broadcast %cst_795 : f32 to vector<16x256xf32>
    %1031 = arith.addf %1029, %1030 : vector<16x256xf32>
    %1032 = arith.mulf %1031, %1018 : vector<16x256xf32>
    %cst_796 = arith.constant 0.000000e+00 : f32
    %1033 = vector.broadcast %cst_796 : f32 to vector<16x256xf32>
    %1034 = arith.subf %1033, %1012 : vector<16x256xf32>
    %1035 = arith.mulf %1034, %1012 : vector<16x256xf32>
    %1036 = math.exp %1035 : vector<16x256xf32>
    %1037 = arith.mulf %1032, %1036 : vector<16x256xf32>
    %cst_797 = arith.constant 1.000000e+00 : f32
    %1038 = vector.broadcast %cst_797 : f32 to vector<16x256xf32>
    %1039 = arith.subf %1038, %1037 : vector<16x256xf32>
    %cst_798 = arith.constant 0.000000e+00 : f32
    %1040 = vector.broadcast %cst_798 : f32 to vector<16x256xf32>
    %1041 = arith.cmpf olt, %1011, %1040 : vector<16x256xf32>
    %cst_799 = arith.constant 0.000000e+00 : f32
    %1042 = vector.broadcast %cst_799 : f32 to vector<16x256xf32>
    %1043 = arith.subf %1042, %1039 : vector<16x256xf32>
    %1044 = arith.select %1041, %1043, %1039 : vector<16x256xi1>, vector<16x256xf32>
    %cst_800 = arith.constant 1.000000e+00 : f32
    %1045 = vector.broadcast %cst_800 : f32 to vector<16x256xf32>
    %1046 = arith.addf %1045, %1044 : vector<16x256xf32>
    %1047 = arith.mulf %1009, %1046 : vector<16x256xf32>
    %c1_801 = arith.constant 1 : index
    %c0_802 = arith.constant 0 : index
    %c0_803 = arith.constant 0 : index
    %1048 = vector.load %arg12[%c1_801, %c0_802, %c0_803] : memref<2x256x128xf32, #tpu.memory_space<vmem>>, vector<1x256x128xf32>
    %1049 = vector.shape_cast %1048 : vector<1x256x128xf32> to vector<256x128xf32>
    %cst_804 = arith.constant dense<0.000000e+00> : vector<16x128xf32>
    %1050 = tpu.matmul %1047, %1049, %cst_804 {dimension_numbers = #tpu.dot_dimension_numbers<[1], [0], [0], [1], [0, 0, 1, 1], [], []>} : vector<16x256xf32>, vector<256x128xf32>, vector<16x128xf32> -> vector<16x128xf32>
    %c1_805 = arith.constant 1 : index
    %c0_806 = arith.constant 0 : index
    %c0_807 = arith.constant 0 : index
    %1051 = vector.load %arg13[%c1_805, %c0_806, %c0_807] : memref<2x1x128xf32, #tpu.memory_space<vmem>>, vector<1x1x128xf32>
    %1052 = vector.shape_cast %1051 : vector<1x1x128xf32> to vector<1x128xf32>
    %1053 = vector.broadcast %1052 : vector<1x128xf32> to vector<16x128xf32>
    %1054 = arith.addf %1050, %1053 : vector<16x128xf32>
    %c1_808 = arith.constant 1 : index
    %c0_809 = arith.constant 0 : index
    %c0_810 = arith.constant 0 : index
    %1055 = vector.load %arg16[%c1_808, %c0_809, %c0_810] : memref<2x1x128xf32, #tpu.memory_space<vmem>>, vector<1x1x128xf32>
    %1056 = vector.shape_cast %1055 : vector<1x1x128xf32> to vector<1x128xf32>
    %c1_811 = arith.constant 1 : index
    %c0_812 = arith.constant 0 : index
    %c0_813 = arith.constant 0 : index
    %1057 = vector.load %arg17[%c1_811, %c0_812, %c0_813] : memref<2x1x128xf32, #tpu.memory_space<vmem>>, vector<1x1x128xf32>
    %1058 = vector.shape_cast %1057 : vector<1x1x128xf32> to vector<1x128xf32>
    %1059 = arith.addf %1054, %1000 : vector<16x128xf32>
    %cst_814 = arith.constant dense<0.000000e+00> : vector<16xf32>
    %1060 = vector.multi_reduction <add>, %1059, %cst_814 [1] : vector<16x128xf32> to vector<16xf32>
    %1061 = vector.shape_cast %1060 : vector<16xf32> to vector<16x1xf32>
    %cst_815 = arith.constant 1.280000e+02 : f32
    %1062 = vector.broadcast %cst_815 : f32 to vector<16x1xf32>
    %1063 = arith.divf %1061, %1062 : vector<16x1xf32>
    %1064 = vector.broadcast %1063 : vector<16x1xf32> to vector<16x128xf32>
    %1065 = arith.subf %1059, %1064 : vector<16x128xf32>
    %1066 = arith.mulf %1065, %1065 : vector<16x128xf32>
    %cst_816 = arith.constant dense<0.000000e+00> : vector<16xf32>
    %1067 = vector.multi_reduction <add>, %1066, %cst_816 [1] : vector<16x128xf32> to vector<16xf32>
    %1068 = vector.shape_cast %1067 : vector<16xf32> to vector<16x1xf32>
    %cst_817 = arith.constant 1.280000e+02 : f32
    %1069 = vector.broadcast %cst_817 : f32 to vector<16x1xf32>
    %1070 = arith.divf %1068, %1069 : vector<16x1xf32>
    %cst_818 = arith.constant 9.99999974E-6 : f32
    %1071 = vector.broadcast %cst_818 : f32 to vector<16x1xf32>
    %1072 = arith.addf %1070, %1071 : vector<16x1xf32>
    %1073 = math.rsqrt %1072 : vector<16x1xf32>
    %1074 = vector.broadcast %1073 : vector<16x1xf32> to vector<16x128xf32>
    %1075 = arith.mulf %1065, %1074 : vector<16x128xf32>
    %1076 = vector.broadcast %1056 : vector<1x128xf32> to vector<16x128xf32>
    %1077 = arith.mulf %1075, %1076 : vector<16x128xf32>
    %1078 = vector.broadcast %1058 : vector<1x128xf32> to vector<16x128xf32>
    %1079 = arith.addf %1077, %1078 : vector<16x128xf32>
    %1080 = vector.extract_strided_slice %1079 {offsets = [0, 0], sizes = [1, 128], strides = [1, 1]} : vector<16x128xf32> to vector<1x128xf32>
    %c1_819 = arith.constant 1 : index
    %c0_820 = arith.constant 0 : index
    %1081 = vector.load %arg18[%c1_819, %c0_820] : memref<2x128xf32, #tpu.memory_space<vmem>>, vector<1x128xf32>
    tpu.vector_store %arg18[%c1_819, %c0_820], %1080 {strides = array<i32>} : memref<2x128xf32, #tpu.memory_space<vmem>>, vector<1x128xf32>,
    %1082 = vector.extract_strided_slice %1079 {offsets = [1, 0], sizes = [1, 128], strides = [1, 1]} : vector<16x128xf32> to vector<1x128xf32>
    %c1_821 = arith.constant 1 : index
    %c0_822 = arith.constant 0 : index
    %1083 = vector.load %arg19[%c1_821, %c0_822] : memref<2x128xf32, #tpu.memory_space<vmem>>, vector<1x128xf32>
    tpu.vector_store %arg19[%c1_821, %c0_822], %1082 {strides = array<i32>} : memref<2x128xf32, #tpu.memory_space<vmem>>, vector<1x128xf32>,
    return
  }
}

</mosaic_0001>

<bundles_post_ra>
// kernel: encoder_forward.1
= control target key start
LH: loop header
LB: loop body
LE: loop exit
PB: predicated region body
PF: predicated region fallthrough
CT: control target
= control target key end

     0   :  { %s22229_s0 = inlined_call_operand.vmem [shape: f32[2,16,128], index: 0, kind: input, shape index: {}]   ;;  %s22230_s1 = inlined_call_operand.vmem [shape: f32[2,1,16], index: 1, kind: input, shape index: {}]   ;;  %s22231_s2 = inlined_call_operand.vmem [shape: f32[2,4,128,32], index: 2, kind: input, shape index: {}]   ;;  %s22232_s3 = inlined_call_operand.vmem [shape: f32[2,4,1,32], index: 3, kind: input, shape index: {}]   ;;  %s22233_s4 = inlined_call_operand.vmem [shape: f32[2,4,128,32], index: 4, kind: input, shape index: {}]   ;;  %s22234_s5 = inlined_call_operand.vmem [shape: f32[2,4,1,32], index: 5, kind: input, shape index: {}]   ;;  %s22235_s6 = inlined_call_operand.vmem [shape: f32[2,4,128,32], index: 6, kind: input, shape index: {}]   ;;  %s22236_s7 = inlined_call_operand.vmem [shape: f32[2,4,1,32], index: 7, kind: input, shape index: {}]   ;;  %s22237_s8 = inlined_call_operand.vmem [shape: f32[2,4,32,128], index: 8, kind: input, shape index: {}]   ;;  %s22238_s9 = inlined_call_operand.vmem [shape: f32[2,1,128], index: 9, kind: input, shape index: {}]   ;;  %s22239_s10 = inlined_call_operand.vmem [shape: f32[2,128,256], index: 10, kind: input, shape index: {}]   ;;  %s22240_s11 = inlined_call_operand.vmem [shape: f32[2,1,256], index: 11, kind: input, shape index: {}]   ;;  %s22241_s12 = inlined_call_operand.vmem [shape: f32[2,256,128], index: 12, kind: input, shape index: {}]   ;;  %s22242_s13 = inlined_call_operand.vmem [shape: f32[2,1,128], index: 13, kind: input, shape index: {}]   ;;  %s22243_s14 = inlined_call_operand.vmem [shape: f32[2,1,128], index: 14, kind: input, shape index: {}]   ;;  %s22244_s15 = inlined_call_operand.vmem [shape: f32[2,1,128], index: 15, kind: input, shape index: {}]   ;;  %s22245_s16 = inlined_call_operand.vmem [shape: f32[2,1,128], index: 16, kind: input, shape index: {}]   ;;  %s22246_s17 = inlined_call_operand.vmem [shape: f32[2,1,128], index: 17, kind: input, shape index: {}]   ;;  %s22247_s18 = inlined_call_operand.hbm [shape: f32[2,128], index: 18, kind: output, shape index: {0}]   ;;  %s22248_s19 = inlined_call_operand.hbm [shape: f32[2,128], index: 19, kind: output, shape index: {1}]  }
   0x1   :  { %22253 = sst [smem:[#allocation8_spill]] %s22229_s0 }
   0x2   :  { %22254 = sst [smem:[#allocation9_spill]] %s22230_s1 }
   0x3   :  { %22255 = sst [smem:[#allocation10_spill]] %s22231_s2 }
   0x4   :  { %22256 = sst [smem:[#allocation11_spill]] %s22232_s3 }
   0x5   :  { %25 = vsyncpa [#allocation3], 0  ;;  %v164_v0 = vld [vmem:[%s22233_s4] sm:$0xff]  ;;  %v165_v1 = vld [vmem:[%s22233_s4 + $0x8] sm:$0xff]  ;;  %s22257_s3 = sld [smem:[#allocation10_spill]]  ;;  %s22258_s2 = sld [smem:[#allocation8_spill]] }
   0x6   :  { %v166_v2 = vld [vmem:[%s22233_s4 + $0x10] sm:$0xff]  ;;  %v15543_v3 = vpack.c.bf16 %v165_v1, %v164_v0  ;;  %v167_v4 = vld [vmem:[%s22233_s4 + $0x18] sm:$0xff]  ;;  %v168_v9 = vld [vmem:[%s22233_s4 + $0x20] sm:$0xff] }
   0x7   :  { %v15547_v7 = vpack.c.bf16 %v167_v4, %v166_v2  ;;  %v169_v10 = vld [vmem:[%s22233_s4 + $0x28] sm:$0xff]  ;;  %v170_v17 = vld [vmem:[%s22233_s4 + $0x30] sm:$0xff]  ;;  %v171_v18 = vld [vmem:[%s22233_s4 + $0x38] sm:$0xff] }
   0x8   :  { %15544 = vmatprep.subr.bf16.mxu1 %v15543_v3  ;;  %v15551_v16 = vpack.c.bf16 %v169_v10, %v168_v9  ;;  %v15555_v22 = vpack.c.bf16 %v171_v18, %v170_v17  ;;  %v172_v24 = vld [vmem:[%s22233_s4 + $0x40] sm:$0xff]  ;;  %v173_v25 = vld [vmem:[%s22233_s4 + $0x48] sm:$0xff]  ;;  %v174_v30 = vld [vmem:[%s22233_s4 + $0x50] sm:$0xff] }
   0x9   :  { %15546 = vmatpush3.bf16.msra.mxu1 %v15543_v3  ;;  %v15559_v29 = vpack.c.bf16 %v173_v25, %v172_v24  ;;  %v175_v31 = vld [vmem:[%s22233_s4 + $0x58] sm:$0xff] }
   0xa   :  { %15548 = vmatprep.subr.bf16.mxu1 %v15547_v7 }
   0xb   :  { %v66_v5 = vld [vmem:[%s22257_s3] sm:$0xff]  ;;  %v67_v6 = vld [vmem:[%s22257_s3 + $0x8] sm:$0xff]  ;;  %v68_v11 = vld [vmem:[%s22257_s3 + $0x10] sm:$0xff] }
   0xc   :  { %v15511_v8 = vpack.c.bf16 %v67_v6, %v66_v5  ;;  %v69_v12 = vld [vmem:[%s22257_s3 + $0x18] sm:$0xff]  ;;  %v70_v14 = vld [vmem:[%s22257_s3 + $0x20] sm:$0xff]  ;;  %v71_v15 = vld [vmem:[%s22257_s3 + $0x28] sm:$0xff] }
   0xd   :  { %v15515_v13 = vpack.c.bf16 %v69_v12, %v68_v11  ;;  %v15519_v19 = vpack.c.bf16 %v71_v15, %v70_v14  ;;  %v72_v20 = vld [vmem:[%s22257_s3 + $0x30] sm:$0xff]  ;;  %v73_v21 = vld [vmem:[%s22257_s3 + $0x38] sm:$0xff]  ;;  %15550 = vmatpush3.bf16.msra.mxu1 %v15547_v7  ;;  %v18050_v23 = vld [vmem:[%s22258_s2] sm:$0xff] }
   0xe   :  { %15512 = vmatprep.subr.bf16.mxu0 %v15511_v8  ;;  %15552 = vmatprep.subr.bf16.mxu1 %v15551_v16  ;;  %v15523_v26 = vpack.c.bf16 %v73_v21, %v72_v20  ;;  %v74_v27 = vld [vmem:[%s22257_s3 + $0x40] sm:$0xff]  ;;  %v75_v28 = vld [vmem:[%s22257_s3 + $0x48] sm:$0xff]  ;;  %v76_v33 = vld [vmem:[%s22257_s3 + $0x50] sm:$0xff] }
   0xf   :  { %15514 = vmatpush3.bf16.msra.mxu0 %v15511_v8  ;;  %13498 = vmatprep.mubr.f32.mxu1 %v18050_v23  ;;  %v15527_v32 = vpack.c.bf16 %v75_v28, %v74_v27  ;;  %v77_v34 = vld [vmem:[%s22257_s3 + $0x58] sm:$0xff] }
  0x10   :  { %15516 = vmatprep.subr.bf16.mxu0 %v15515_v13  ;;  %13463 = vmatprep.mubr.f32.mxu0 %v18050_v23 }
  0x11   :  { %15554 = vmatpush3.bf16.msra.mxu1 %v15551_v16 }
  0x12   :  { %15556 = vmatprep.subr.bf16.mxu1 %v15555_v22 }
  0x13   :  { %15518 = vmatpush3.bf16.msra.mxu0 %v15515_v13 }
  0x14   :  { %15520 = vmatprep.subr.bf16.mxu0 %v15519_v19 }
  0x15   :  { %15558 = vmatpush3.bf16.msra.mxu1 %v15555_v22 }
  0x17   :  { %15522 = vmatpush3.bf16.msra.mxu0 %v15519_v19 }
  0x18   :  { %15524 = vmatprep.subr.bf16.mxu0 %v15523_v26 }
  0x19   :  { %26 = vsyncpa [#allocation5], 0  ;;  %15560 = vmatprep.subr.bf16.mxu1 %v15559_v29  ;;  %v15563_v35 = vpack.c.bf16 %v175_v31, %v174_v30  ;;  %v176_v36 = vld [vmem:[%s22233_s4 + $0x60] sm:$0xff]  ;;  %v177_v37 = vld [vmem:[%s22233_s4 + $0x68] sm:$0xff]  ;;  %v15531_v38 = vpack.c.bf16 %v77_v34, %v76_v33  ;;  %vm360_vm0 = vcmask 261120   ;;  %s22259_s28 = sld [smem:[#allocation11_spill]] }
  0x1a   :  { %v78_v39 = vld [vmem:[%s22257_s3 + $0x60] sm:$0xff]  ;;  %v79_v40 = vld [vmem:[%s22257_s3 + $0x68] sm:$0xff]  ;;  %15562 = vmatpush3.bf16.msra.mxu1 %v15559_v29  ;;  %v15567_v41 = vpack.c.bf16 %v177_v37, %v176_v36  ;;  %v178_v42 = vld [vmem:[%s22233_s4 + $0x70] sm:$0xff]  ;;  %s22262_s21 = sld [smem:[#allocation9_spill]]  ;;  %vm458_vm2 = vcmask 130048   ;;  %s17898_s1 = smov [#allocation4]  }
  0x1b   :  { %15526 = vmatpush3.bf16.msra.mxu0 %v15523_v26  ;;  %15564 = vmatprep.subr.bf16.mxu1 %v15563_v35  ;;  %v179_v43 = vld [vmem:[%s22233_s4 + $0x78] sm:$0xff]  ;;  %v15535_v44 = vpack.c.bf16 %v79_v40, %v78_v39  ;;  %v80_v45 = vld [vmem:[%s22257_s3 + $0x70] sm:$0xff]  ;;  %v262_v49 = vld [vmem:[%s22235_s6] sm:$0xff]  ;;  %s11062_s22 = sshll.u32 %s17898_s1, 4  ;;  %s11063_s22 = int_to_ptr.vmem [resolvable:$true] %s11062_s22 }
  0x1c   :  { %15528 = vmatprep.subr.bf16.mxu0 %v15527_v32  ;;  %v81_v46 = vld [vmem:[%s22257_s3 + $0x78] sm:$0xff]  ;;  %v15571_v47 = vpack.c.bf16 %v179_v43, %v178_v42  ;;  %v263_v50 = vld [vmem:[%s22235_s6 + $0x8] sm:$0xff]  ;;  %v264_v52 = vld [vmem:[%s22235_s6 + $0x10] sm:$0xff] }
  0x1d   :  { %v15539_v48 = vpack.c.bf16 %v81_v46, %v80_v45  ;;  %v15575_v51 = vpack.c.bf16 %v263_v50, %v262_v49  ;;  %v265_v53 = vld [vmem:[%s22235_s6 + $0x18] sm:$0xff]  ;;  %v18117_v54 = vld [vmem:[%s22258_s2 + $0x8] sm:$0xff]  ;;  %v266_v56 = vld [vmem:[%s22235_s6 + $0x20] sm:$0xff] }
  0x1e   :  { %15566 = vmatpush3.bf16.msra.mxu1 %v15563_v35  ;;  %v15579_v55 = vpack.c.bf16 %v265_v53, %v264_v52  ;;  %v267_v57 = vld [vmem:[%s22235_s6 + $0x28] sm:$0xff]  ;;  %v268_v59 = vld [vmem:[%s22235_s6 + $0x30] sm:$0xff]  ;;  %v269_v60 = vld [vmem:[%s22235_s6 + $0x38] sm:$0xff] }
  0x1f   :  { %15530 = vmatpush3.bf16.msra.mxu0 %v15527_v32  ;;  %15568 = vmatprep.subr.bf16.mxu1 %v15567_v41  ;;  %v15583_v58 = vpack.c.bf16 %v267_v57, %v266_v56  ;;  %v15587_v61 = vpack.c.bf16 %v269_v60, %v268_v59  ;;  %v270_v62 = vld [vmem:[%s22235_s6 + $0x40] sm:$0xff]  ;;  %v271_v63 = vld [vmem:[%s22235_s6 + $0x48] sm:$0xff]  ;;  %v272_v1 = vld [vmem:[%s22235_s6 + $0x50] sm:$0xff] }
  0x20   :  { %15532 = vmatprep.subr.bf16.mxu0 %v15531_v38  ;;  %v15591_v0 = vpack.c.bf16 %v271_v63, %v270_v62  ;;  %v273_v2 = vld [vmem:[%s22235_s6 + $0x58] sm:$0xff]  ;;  %v274_v4 = vld [vmem:[%s22235_s6 + $0x60] sm:$0xff]  ;;  %v275_v5 = vld [vmem:[%s22235_s6 + $0x68] sm:$0xff] }
  0x21   :  { %v15595_v3 = vpack.c.bf16 %v273_v2, %v272_v1  ;;  %v15599_v6 = vpack.c.bf16 %v275_v5, %v274_v4  ;;  %v276_v7 = vld [vmem:[%s22235_s6 + $0x70] sm:$0xff]  ;;  %v277_v8 = vld [vmem:[%s22235_s6 + $0x78] sm:$0xff]  ;;  %v11075_v10 = vld [vmem:[%s22234_s5] ss:$0 sm:$0xff] }
  0x22   :  { %15570 = vmatpush3.bf16.msra.mxu1 %v15567_v41  ;;  %v15603_v9 = vpack.c.bf16 %v277_v8, %v276_v7  ;;  %v11074_v12 = vld [vmem:[%s22259_s28] ss:$0 sm:$0xff]  ;;  %vm18168_vm1 = vmpackc.low %vm360_vm0, %vm360_vm0  ;;  %v11103_v49 = vld [vmem:[%s22233_s4 + $0x88] sm:$0xff] }
  0x23   :  { %15534 = vmatpush3.bf16.msra.mxu0 %v15531_v38  ;;  %15572 = vmatprep.subr.bf16.mxu1 %v15571_v47  ;;  %v11076_v22 = vld [vmem:[%s22236_s7] ss:$0 sm:$0xff]  ;;  %v11085_v52 = vld [vmem:[%s22257_s3 + $0x88] sm:$0xff]  ;;  %v11087_v56 = vld [vmem:[%s22257_s3 + $0x98] sm:$0xff] }
  0x24   :  { %15536 = vmatprep.subr.bf16.mxu0 %v15535_v44  ;;  %v18184_v31 = vld [vmem:[%s22262_s21] ss:$0 sm:$0xff]  ;;  %v11089_v59 = vld [vmem:[%s22257_s3 + $0xa8] sm:$0xff]  ;;  %v11091_v62 = vld [vmem:[%s22257_s3 + $0xb8] sm:$0xff] }
  0x25   :  { %v11093_v1 = vld [vmem:[%s22257_s3 + $0xc8] sm:$0xff]  ;;  %v11095_v4 = vld [vmem:[%s22257_s3 + $0xd8] sm:$0xff] }
  0x26   :  { %15574 = vmatpush3.bf16.msra.mxu1 %v15571_v47  ;;  %v11097_v7 = vld [vmem:[%s22257_s3 + $0xe8] sm:$0xff] }
  0x27   :  { %15538 = vmatpush3.bf16.msra.mxu0 %v15535_v44 }
  0x28   :  { %15540 = vmatprep.subr.bf16.mxu0 %v15539_v48 }
  0x29   :  { %13499 = vmatmul.mubr.f32.vlgmr.msra.gmra.mrb[0].mxu1 %v18117_v54 }
  0x2a   :  { %13582 = vmatprep.mubr.f32.mxu1 %v18050_v23 }
  0x2b   :  { %15542 = vmatpush3.bf16.msra.mxu0 %v15539_v48  ;;  %v11102_v48 = vld [vmem:[%s22233_s4 + $0x80] sm:$0xff] }
  0x2c   :  { %15576 = vmatprep.subr.bf16.mxu0 %v15575_v51  ;;  %v15649_v50 = vpack.c.bf16 %v11103_v49, %v11102_v48  ;;  %v11119_v49 = vld [vmem:[%s22234_s5 + $0x1] ss:$0 sm:$0xff] }
  0x2e   :  { %13464 = vmatmul.mubr.f32.vlgmr.msra.gmra.mrb[0].mxu0 %v18117_v54 }
  0x2f   :  { %15578 = vmatpush3.bf16.msra.mxu0 %v15575_v51  ;;  %13533 = vmatprep.mubr.f32.mxu0 %v18050_v23  ;;  %v11084_v51 = vld [vmem:[%s22257_s3 + $0x80] sm:$0xff] }
  0x30   :  { %15580 = vmatprep.subr.bf16.mxu0 %v15579_v55  ;;  %v15617_v53 = vpack.c.bf16 %v11085_v52, %v11084_v51 }
  0x32   :  { %15618 = vmatprep.subr.bf16.mxu1 %v15617_v53 }
  0x33   :  { %15582 = vmatpush3.bf16.msra.mxu0 %v15579_v55  ;;  %15620 = vmatpush3.bf16.msra.mxu1 %v15617_v53  ;;  %v11086_v55 = vld [vmem:[%s22257_s3 + $0x90] sm:$0xff] }
  0x34   :  { %15584 = vmatprep.subr.bf16.mxu0 %v15583_v58  ;;  %v15621_v57 = vpack.c.bf16 %v11087_v56, %v11086_v55  ;;  %v11120_v56 = vld [vmem:[%s22235_s6 + $0x80] sm:$0xff] }
  0x36   :  { %15622 = vmatprep.subr.bf16.mxu1 %v15621_v57 }
  0x37   :  { %15586 = vmatpush3.bf16.msra.mxu0 %v15583_v58  ;;  %15624 = vmatpush3.bf16.msra.mxu1 %v15621_v57  ;;  %v11088_v58 = vld [vmem:[%s22257_s3 + $0xa0] sm:$0xff]  ;;  %v11121_v57 = vld [vmem:[%s22235_s6 + $0x88] sm:$0xff] }
  0x38   :  { %15588 = vmatprep.subr.bf16.mxu0 %v15587_v61  ;;  %v15625_v60 = vpack.c.bf16 %v11089_v59, %v11088_v58  ;;  %v11122_v58 = vld [vmem:[%s22235_s6 + $0x90] sm:$0xff]  ;;  %v15681_v59 = vpack.c.bf16 %v11121_v57, %v11120_v56 }
  0x3a   :  { %15626 = vmatprep.subr.bf16.mxu1 %v15625_v60 }
  0x3b   :  { %15590 = vmatpush3.bf16.msra.mxu0 %v15587_v61  ;;  %15628 = vmatpush3.bf16.msra.mxu1 %v15625_v60  ;;  %v11090_v61 = vld [vmem:[%s22257_s3 + $0xb0] sm:$0xff]  ;;  %v11123_v60 = vld [vmem:[%s22235_s6 + $0x98] sm:$0xff] }
  0x3c   :  { %15592 = vmatprep.subr.bf16.mxu0 %v15591_v0  ;;  %v15629_v63 = vpack.c.bf16 %v11091_v62, %v11090_v61  ;;  %v15685_v61 = vpack.c.bf16 %v11123_v60, %v11122_v58  ;;  %v11124_v62 = vld [vmem:[%s22235_s6 + $0xa0] sm:$0xff] }
  0x3d   :  { %v562_v58 = vld [vmem:[%s22237_s8] sm:$0xff] }
  0x3e   :  { %15630 = vmatprep.subr.bf16.mxu1 %v15629_v63 }
  0x3f   :  { %15594 = vmatpush3.bf16.msra.mxu0 %v15591_v0  ;;  %15632 = vmatpush3.bf16.msra.mxu1 %v15629_v63  ;;  %v11092_v0 = vld [vmem:[%s22257_s3 + $0xc0] sm:$0xff]  ;;  %v11125_v63 = vld [vmem:[%s22235_s6 + $0xa8] sm:$0xff] }
  0x40   :  { %15596 = vmatprep.subr.bf16.mxu0 %v15595_v3  ;;  %v15633_v2 = vpack.c.bf16 %v11093_v1, %v11092_v0  ;;  %v15689_v0 = vpack.c.bf16 %v11125_v63, %v11124_v62  ;;  %v11126_v1 = vld [vmem:[%s22235_s6 + $0xb0] sm:$0xff]  ;;  %v11153_v62 = vld [vmem:[%s22257_s3 + $0x108] sm:$0xff] }
  0x42   :  { %15634 = vmatprep.subr.bf16.mxu1 %v15633_v2 }
  0x43   :  { %15598 = vmatpush3.bf16.msra.mxu0 %v15595_v3  ;;  %15636 = vmatpush3.bf16.msra.mxu1 %v15633_v2  ;;  %v11094_v3 = vld [vmem:[%s22257_s3 + $0xd0] sm:$0xff]  ;;  %v11127_v2 = vld [vmem:[%s22235_s6 + $0xb8] sm:$0xff] }
  0x44   :  { %15600 = vmatprep.subr.bf16.mxu0 %v15599_v6  ;;  %v15637_v5 = vpack.c.bf16 %v11095_v4, %v11094_v3  ;;  %v15693_v3 = vpack.c.bf16 %v11127_v2, %v11126_v1  ;;  %v11128_v4 = vld [vmem:[%s22235_s6 + $0xc0] sm:$0xff]  ;;  %v11155_v1 = vld [vmem:[%s22257_s3 + $0x118] sm:$0xff] }
  0x46   :  { %15638 = vmatprep.subr.bf16.mxu1 %v15637_v5 }
  0x47   :  { %15602 = vmatpush3.bf16.msra.mxu0 %v15599_v6  ;;  %15640 = vmatpush3.bf16.msra.mxu1 %v15637_v5  ;;  %v11096_v6 = vld [vmem:[%s22257_s3 + $0xe0] sm:$0xff]  ;;  %v11129_v5 = vld [vmem:[%s22235_s6 + $0xc8] sm:$0xff] }
  0x48   :  { %15604 = vmatprep.subr.bf16.mxu0 %v15603_v9  ;;  %v15641_v8 = vpack.c.bf16 %v11097_v7, %v11096_v6  ;;  %v15697_v6 = vpack.c.bf16 %v11129_v5, %v11128_v4  ;;  %v11130_v7 = vld [vmem:[%s22235_s6 + $0xd0] sm:$0xff]  ;;  %v11157_v4 = vld [vmem:[%s22257_s3 + $0x128] sm:$0xff] }
  0x4a   :  { %15642 = vmatprep.subr.bf16.mxu1 %v15641_v8 }
  0x4b   :  { %15606 = vmatpush3.bf16.msra.mxu0 %v15603_v9  ;;  %v11098_v9 = vld [vmem:[%s22257_s3 + $0xf0] sm:$0xff]  ;;  %15644 = vmatpush3.bf16.msra.mxu1 %v15641_v8  ;;  %v11131_v8 = vld [vmem:[%s22235_s6 + $0xd8] sm:$0xff] }
  0x4e   :  { %13534 = vmatmul.mubr.f32.vlgmr.msra.gmra.mrb[2].mxu0 %v18117_v54 }
  0xfc   :  { %v13500_v11 = vpop.f32.mrb[0].mxu1 }
  0xfd   :  { %v259_v13 = vadd.f32 %v13500_v11, %v11075_v10  ;;  %v253_v14 = vpop.f32.mrb[1].mxu1 }
  0xfe   :  { %v254_v16 = vadd.f32 %v11075_v10, %v253_v14  ;;  %v11099_v10 = vld [vmem:[%s22257_s3 + $0xf8] sm:$0xff] }
  0xff   :  { %v15645_v11 = vpack.c.bf16 %v11099_v10, %v11098_v9  ;;  %v15701_v9 = vpack.c.bf16 %v11131_v8, %v11130_v7  ;;  %v11132_v10 = vld [vmem:[%s22235_s6 + $0xe0] sm:$0xff]  ;;  %v11159_v7 = vld [vmem:[%s22257_s3 + $0x138] sm:$0xff] }
 0x100   :  { %v15607_v20 = vpack.c.bf16 %v259_v13, %v254_v16  ;;  %v11104_v16 = vld [vmem:[%s22233_s4 + $0x90] sm:$0xff] }
 0x101   :  { %v13465_v15 = vpop.f32.mrb[0].mxu0  ;;  %15646 = vmatprep.subr.bf16.mxu1 %v15645_v11 }
 0x102   :  { %v155_v17 = vpop.f32.mrb[1].mxu0  ;;  %15609 = vmatprep.subr.msk.bf16.mxu0 %vm18168_vm1, %v15607_v20  ;;  %v161_v21 = vadd.f32 %v13465_v15, %v11074_v12  ;;  %15648 = vmatpush3.bf16.msra.mxu1 %v15645_v11  ;;  %v11133_v11 = vld [vmem:[%s22235_s6 + $0xe8] sm:$0xff] }
 0x103   :  { %v156_v19 = vadd.f32 %v11074_v12, %v155_v17  ;;  %15612 = vmatpush3.bf16.xpose.msk.msra.mxu0 %vm18168_vm1, %v15607_v20  ;;  %v11105_v17 = vld [vmem:[%s22233_s4 + $0x98] sm:$0xff]  ;;  %15682 = vmatprep.subr.bf16.mxu1 %v15681_v59 }
 0x105   :  { %13540 = vmatprep.mubr.msk.f32.mxu0 %vm360_vm0, %v156_v19  ;;  %13583 = vmatmul.mubr.f32.vlgmr.msra.gmra.mrb[2].mxu1 %v18117_v54 }
 0x106   :  { %13652 = vmatprep.mubr.f32.mxu1 %v18050_v23  ;;  %15684 = vmatpush3.bf16.msra.mxu1 %v15681_v59  ;;  %v563_v59 = vld [vmem:[%s22237_s8 + $0x8] sm:$0xff] }
 0x107   :  { %15686 = vmatprep.subr.bf16.mxu1 %v15685_v61  ;;  %v15731_v60 = vpack.c.bf16 %v563_v59, %v562_v58  ;;  %v11187_v59 = vld [vmem:[%s22234_s5 + $0x2] ss:$0 sm:$0xff] }
 0x10a   :  { %13541 = vmatmul.mubr.msk.f32.vlgmr.msra.gmra.mrb[4].mxu0 %vm360_vm0, %v161_v21  ;;  %v15653_v21 = vpack.c.bf16 %v11105_v17, %v11104_v16  ;;  %15688 = vmatpush3.bf16.msra.mxu1 %v15685_v61  ;;  %v11152_v61 = vld [vmem:[%s22257_s3 + $0x100] sm:$0xff] }
 0x10b   :  { %15690 = vmatprep.subr.bf16.mxu1 %v15689_v0  ;;  %v15739_v63 = vpack.c.bf16 %v11153_v62, %v11152_v61 }
 0x10e   :  { %15692 = vmatpush3.bf16.msra.mxu1 %v15689_v0  ;;  %v11154_v0 = vld [vmem:[%s22257_s3 + $0x110] sm:$0xff] }
 0x10f   :  { %15694 = vmatprep.subr.bf16.mxu1 %v15693_v3  ;;  %v15743_v2 = vpack.c.bf16 %v11155_v1, %v11154_v0  ;;  %v11188_v1 = vld [vmem:[%s22235_s6 + $0x100] sm:$0xff] }
 0x112   :  { %15696 = vmatpush3.bf16.msra.mxu1 %v15693_v3  ;;  %v11156_v3 = vld [vmem:[%s22257_s3 + $0x120] sm:$0xff] }
 0x113   :  { %15698 = vmatprep.subr.bf16.mxu1 %v15697_v6  ;;  %v15747_v5 = vpack.c.bf16 %v11157_v4, %v11156_v3  ;;  %v11190_v3 = vld [vmem:[%s22235_s6 + $0x110] sm:$0xff] }
 0x116   :  { %15700 = vmatpush3.bf16.msra.mxu1 %v15697_v6  ;;  %v11158_v6 = vld [vmem:[%s22257_s3 + $0x130] sm:$0xff] }
 0x117   :  { %15702 = vmatprep.subr.bf16.mxu1 %v15701_v9  ;;  %v15751_v8 = vpack.c.bf16 %v11159_v7, %v11158_v6  ;;  %v11192_v7 = vld [vmem:[%s22235_s6 + $0x120] sm:$0xff] }
 0x11a   :  { %15704 = vmatpush3.bf16.msra.mxu1 %v15701_v9  ;;  %v11160_v9 = vld [vmem:[%s22257_s3 + $0x140] sm:$0xff] }
 0x121   :  { %v13535_v24 = vpop.f32.mrb[2].mxu0 }
 0x122   :  { %v357_v25 = vadd.f32 %v13535_v24, %v11076_v22  ;;  %v351_v26 = vpop.f32.mrb[3].mxu0  ;;  %v11107_v24 = vld [vmem:[%s22233_s4 + $0xa8] sm:$0xff] }
 0x123   :  { %v352_v27 = vadd.f32 %v11076_v22, %v351_v26  ;;  %v11106_v22 = vld [vmem:[%s22233_s4 + $0xa0] sm:$0xff]  ;;  %v11108_v26 = vld [vmem:[%s22233_s4 + $0xb0] sm:$0xff] }
 0x125   :  { %v15613_v28 = vpack.c.bf16 %v357_v25, %v352_v27  ;;  %v15657_v25 = vpack.c.bf16 %v11107_v24, %v11106_v22  ;;  %v11109_v27 = vld [vmem:[%s22233_s4 + $0xb8] sm:$0xff] }
 0x127   :  { %15614 = vmatprep.subr.bf16.mxu0 %v15613_v28 }
 0x128   :  { %15616 = vmatpush3.bf16.msra.mxu0 %v15613_v28  ;;  %v15661_v28 = vpack.c.bf16 %v11109_v27, %v11108_v26 }
 0x129   :  { %15650 = vmatprep.subr.bf16.mxu0 %v15649_v50 }
 0x1dd   :  { %v13542_v29 = vpop.f32.mrb[4].mxu0 }
 0x1de   :  { %v439_v30 = vpop.f32.mrb[5].mxu0  ;;  %v449_v32 = vmul.f32 0.17677669, %v13542_v29  ;;  %v11110_v29 = vld [vmem:[%s22233_s4 + $0xc0] sm:$0xff] }
 0x1df   :  { %v448_v33 = vmul.f32 0.17677669, %v439_v30  ;;  %v11111_v30 = vld [vmem:[%s22233_s4 + $0xc8] sm:$0xff] }
 0x1e0   :  { %v457_v36 = vadd.f32 %v18184_v31, %v449_v32  ;;  %v15665_v32 = vpack.c.bf16 %v11111_v30, %v11110_v29 }
 0x1e1   :  { %v456_v34 = vadd.f32 %v18184_v31, %v448_v33  ;;  %v11112_v33 = vld [vmem:[%s22233_s4 + $0xd0] sm:$0xff] }
 0x1e2   :  { %v462_v37 = vsel %vm458_vm2, %v457_v36, -inf }
 0x1e3   :  { %v459_v35 = vsel %vm458_vm2, %v456_v34, -inf }
 0x1e4   :  { %460 = vmax.xlane.f32.xlu0 %v459_v35 }
 0x1e8   :  { %463 = vmax.xlane.f32.xlu0 %v462_v37  ;;  %v11115_v37 = vld [vmem:[%s22233_s4 + $0xe8] sm:$0xff] }
 0x271   :  { %v461_v38 = vpop.xlane.xlu0 %460 }
 0x272   :  { %v465_v39 = vsub.f32 %v456_v34, %v461_v38  ;;  %v11113_v34 = vld [vmem:[%s22233_s4 + $0xd8] sm:$0xff] }
 0x273   :  { %v15669_v35 = vpack.c.bf16 %v11113_v34, %v11112_v33 }
 0x274   :  { %v467_v40 = vmul.f32 1.442695, %v465_v39  ;;  %v11116_v39 = vld [vmem:[%s22233_s4 + $0xf0] sm:$0xff] }
 0x275   :  { %v464_v41 = vpop.xlane.xlu0 %463 }
 0x276   :  { %17618 = vpow2.f32 %v467_v40  ;;  %v466_v42 = vsub.f32 %v457_v36, %v464_v41  ;;  %v11114_v36 = vld [vmem:[%s22233_s4 + $0xe0] sm:$0xff]  ;;  %v11117_v40 = vld [vmem:[%s22233_s4 + $0xf8] sm:$0xff] }
 0x277   :  { %v15673_v38 = vpack.c.bf16 %v11115_v37, %v11114_v36  ;;  %v15677_v41 = vpack.c.bf16 %v11117_v40, %v11116_v39 }
 0x278   :  { %v469_v43 = vmul.f32 1.442695, %v466_v42  ;;  %v11101_v42 = vld [vmem:[%s22259_s28 + $0x1] ss:$0 sm:$0xff] }
 0x27a   :  { %17620 = vpow2.f32 %v469_v43  ;;  %v13584_v43 = vpop.f32.mrb[2].mxu1 }
 0x280   :  { %v17619_v44 = vpop.eup %17618 }
 0x281   :  { %v471_v45 = vsel %vm458_vm2, %v17619_v44, 0.0 }
 0x282   :  { %472 = vadd.xlane.f32.xlu1 %v471_v45  ;;  %v657_v45 = vpop.f32.mrb[3].mxu1 }
 0x284   :  { %v17621_v46 = vpop.eup %17620 }
 0x285   :  { %v474_v47 = vsel %vm458_vm2, %v17621_v46, 0.0 }
 0x286   :  { %475 = vadd.xlane.f32.xlu1 %v474_v47 }
 0x30f   :  { %v473_v12 = vpop.xlane.xlu1 %472 }
 0x310   :  { %17622 = vrcp.f32 %v473_v12  ;;  %v15705_v12 = vpack.c.bf16 %v11133_v11, %v11132_v10  ;;  %v11161_v10 = vld [vmem:[%s22257_s3 + $0x148] sm:$0xff] }
 0x311   :  { %v15755_v11 = vpack.c.bf16 %v11161_v10, %v11160_v9  ;;  %v11194_v10 = vld [vmem:[%s22235_s6 + $0x130] sm:$0xff] }
 0x312   :  { %15706 = vmatprep.subr.bf16.mxu1 %v15705_v12 }
 0x313   :  { %v476_v13 = vpop.xlane.xlu1 %475  ;;  %15708 = vmatpush3.bf16.msra.mxu1 %v15705_v12  ;;  %v11162_v12 = vld [vmem:[%s22257_s3 + $0x150] sm:$0xff] }
 0x314   :  { %17624 = vrcp.f32 %v476_v13  ;;  %v11134_v13 = vld [vmem:[%s22235_s6 + $0xf0] sm:$0xff] }
 0x31a   :  { %v17623_v14 = vpop.eup %17622 }
 0x31b   :  { %v478_v15 = vmul.f32 %v17623_v14, %v17619_v44  ;;  %v663_v44 = vadd.f32 %v13584_v43, %v11101_v42  ;;  %v11135_v14 = vld [vmem:[%s22235_s6 + $0xf8] sm:$0xff]  ;;  %v11144_v43 = vld [vmem:[%s22237_s8 + $0x20] sm:$0xff] }
 0x31d   :  { %13547 = vmatprep.mubr.msk.f32.mxu0 %vm458_vm2, %v478_v15  ;;  %v15709_v15 = vpack.c.bf16 %v11135_v14, %v11134_v13  ;;  %v11163_v13 = vld [vmem:[%s22257_s3 + $0x158] sm:$0xff] }
 0x31e   :  { %v17625_v19 = vpop.eup %17624  ;;  %v15759_v14 = vpack.c.bf16 %v11163_v13, %v11162_v12  ;;  %v11196_v13 = vld [vmem:[%s22235_s6 + $0x140] sm:$0xff] }
 0x31f   :  { %v480_v20 = vmul.f32 %v17625_v19, %v17621_v46  ;;  %v658_v46 = vadd.f32 %v11101_v42, %v657_v45  ;;  %15710 = vmatprep.subr.bf16.mxu1 %v15709_v15 }
 0x320   :  { %15712 = vmatpush3.bf16.msra.mxu1 %v15709_v15  ;;  %v11164_v15 = vld [vmem:[%s22257_s3 + $0x160] sm:$0xff] }
 0x321   :  { %13548 = vmatmul.mubr.msk.f32.vlgmr.msra.gmra.mrb[6].mxu0 %vm458_vm2, %v480_v20  ;;  %15740 = vmatprep.subr.bf16.mxu1 %v15739_v63 }
 0x322   :  { %15652 = vmatpush3.bf16.msra.mxu0 %v15649_v50  ;;  %13617 = vmatprep.mubr.f32.mxu0 %v18050_v23 }
 0x323   :  { %15654 = vmatprep.subr.bf16.mxu0 %v15653_v21  ;;  %13653 = vmatmul.mubr.f32.vlgmr.msra.gmra.mrb[4].mxu1 %v18117_v54 }
 0x324   :  { %13723 = vmatprep.mubr.f32.mxu1 %v18050_v23  ;;  %15742 = vmatpush3.bf16.msra.mxu1 %v15739_v63 }
 0x325   :  { %15744 = vmatprep.subr.bf16.mxu1 %v15743_v2 }
 0x326   :  { %15656 = vmatpush3.bf16.msra.mxu0 %v15653_v21 }
 0x327   :  { %15658 = vmatprep.subr.bf16.mxu0 %v15657_v25 }
 0x328   :  { %15746 = vmatpush3.bf16.msra.mxu1 %v15743_v2  ;;  %v11189_v2 = vld [vmem:[%s22235_s6 + $0x108] sm:$0xff] }
 0x329   :  { %15748 = vmatprep.subr.bf16.mxu1 %v15747_v5  ;;  %v15803_v4 = vpack.c.bf16 %v11189_v2, %v11188_v1  ;;  %v11218_v1 = vld [vmem:[%s22257_s3 + $0x180] sm:$0xff]  ;;  %v11219_v2 = vld [vmem:[%s22257_s3 + $0x188] sm:$0xff] }
 0x32a   :  { %15660 = vmatpush3.bf16.msra.mxu0 %v15657_v25 }
 0x32b   :  { %15662 = vmatprep.subr.bf16.mxu0 %v15661_v28 }
 0x32c   :  { %15750 = vmatpush3.bf16.msra.mxu1 %v15747_v5  ;;  %v11191_v5 = vld [vmem:[%s22235_s6 + $0x118] sm:$0xff] }
 0x32d   :  { %15752 = vmatprep.subr.bf16.mxu1 %v15751_v8  ;;  %v15807_v6 = vpack.c.bf16 %v11191_v5, %v11190_v3  ;;  %v15853_v3 = vpack.c.bf16 %v11219_v2, %v11218_v1  ;;  %v11221_v5 = vld [vmem:[%s22257_s3 + $0x198] sm:$0xff] }
 0x32e   :  { %15664 = vmatpush3.bf16.msra.mxu0 %v15661_v28  ;;  %v11257_v2 = vld [vmem:[%s22235_s6 + $0x198] sm:$0xff] }
 0x32f   :  { %15666 = vmatprep.subr.bf16.mxu0 %v15665_v32 }
 0x330   :  { %15754 = vmatpush3.bf16.msra.mxu1 %v15751_v8  ;;  %v11193_v8 = vld [vmem:[%s22235_s6 + $0x128] sm:$0xff] }
 0x331   :  { %15756 = vmatprep.subr.bf16.mxu1 %v15755_v11  ;;  %v15811_v9 = vpack.c.bf16 %v11193_v8, %v11192_v7  ;;  %v11222_v7 = vld [vmem:[%s22257_s3 + $0x1a0] sm:$0xff]  ;;  %v11223_v8 = vld [vmem:[%s22257_s3 + $0x1a8] sm:$0xff] }
 0x332   :  { %15668 = vmatpush3.bf16.msra.mxu0 %v15665_v32 }
 0x333   :  { %15670 = vmatprep.subr.bf16.mxu0 %v15669_v35 }
 0x334   :  { %15758 = vmatpush3.bf16.msra.mxu1 %v15755_v11  ;;  %v11195_v11 = vld [vmem:[%s22235_s6 + $0x138] sm:$0xff] }
 0x335   :  { %15760 = vmatprep.subr.bf16.mxu1 %v15759_v14  ;;  %v15815_v12 = vpack.c.bf16 %v11195_v11, %v11194_v10  ;;  %v11224_v10 = vld [vmem:[%s22257_s3 + $0x1b0] sm:$0xff]  ;;  %v11225_v11 = vld [vmem:[%s22257_s3 + $0x1b8] sm:$0xff] }
 0x336   :  { %15672 = vmatpush3.bf16.msra.mxu0 %v15669_v35 }
 0x337   :  { %15674 = vmatprep.subr.bf16.mxu0 %v15673_v38 }
 0x338   :  { %15762 = vmatpush3.bf16.msra.mxu1 %v15759_v14  ;;  %v11197_v14 = vld [vmem:[%s22235_s6 + $0x148] sm:$0xff] }
 0x33a   :  { %15676 = vmatpush3.bf16.msra.mxu0 %v15673_v38  ;;  %v11137_v38 = vld [vmem:[%s22236_s7 + $0x1] ss:$0 sm:$0xff] }
 0x33b   :  { %15678 = vmatprep.subr.bf16.mxu0 %v15677_v41 }
 0x33e   :  { %15680 = vmatpush3.bf16.msra.mxu0 %v15677_v41 }
 0x341   :  { %13618 = vmatmul.mubr.f32.vlgmr.msra.gmra.mrb[8].mxu0 %v18117_v54 }
 0x342   :  { %13659 = vmatprep.mubr.msk.f32.mxu0 %vm360_vm0, %v658_v46 }
 0x3f4   :  { %v18298_v47 = vpop.f32.mrb[6].mxu0 }
 0x3f5   :  { %v18300_v48 = vpop.f32.mrb[7].mxu0 }
 0x3f6   :  { %v13654_v37 = vpop.f32.mrb[4].mxu1 }
 0x3f7   :  { %v857_v39 = vpop.f32.mrb[5].mxu1  ;;  %v863_v40 = vadd.f32 %v13654_v37, %v11137_v38  ;;  %v11176_v37 = vld [vmem:[%s22233_s4 + $0x130] sm:$0xff] }
 0x3f8   :  { %v858_v41 = vadd.f32 %v11137_v38, %v857_v39  ;;  %v11177_v38 = vld [vmem:[%s22233_s4 + $0x138] sm:$0xff] }
 0x3f9   :  { %v15783_v39 = vpack.c.bf16 %v11177_v38, %v11176_v37 }
 0x3fa   :  { %v15719_v42 = vpack.c.bf16 %v863_v40, %v858_v41  ;;  %v11179_v40 = vld [vmem:[%s22233_s4 + $0x148] sm:$0xff] }
 0x414   :  { %v13619_v50 = vpop.f32.mrb[8].mxu0 }
 0x415   :  { %v763_v51 = vadd.f32 %v13619_v50, %v11119_v49  ;;  %v757_v52 = vpop.f32.mrb[9].mxu0 }
 0x416   :  { %v758_v53 = vadd.f32 %v11119_v49, %v757_v52  ;;  %v11147_v52 = vld [vmem:[%s22237_s8 + $0x38] sm:$0xff] }
 0x418   :  { %v15713_v55 = vpack.c.bf16 %v763_v51, %v758_v53  ;;  %v11146_v51 = vld [vmem:[%s22237_s8 + $0x30] sm:$0xff] }
 0x419   :  { %v15727_v57 = vpack.c.bf16 %v11147_v52, %v11146_v51  ;;  %v11185_v51 = vld [vmem:[%s22233_s4 + $0x178] sm:$0xff] }
 0x41a   :  { %15715 = vmatprep.subr.msk.bf16.mxu0 %vm18168_vm1, %v15713_v55 }
 0x41b   :  { %15718 = vmatpush3.bf16.xpose.msk.msra.mxu0 %vm18168_vm1, %v15713_v55 }
 0x41c   :  { %15720 = vmatprep.subr.bf16.mxu0 %v15719_v42 }
 0x422   :  { %13660 = vmatmul.mubr.msk.f32.vlgmr.msra.gmra.mrb[10].mxu0 %vm360_vm0, %v663_v44  ;;  %v11145_v44 = vld [vmem:[%s22237_s8 + $0x28] sm:$0xff] }
 0x423   :  { %15722 = vmatpush3.bf16.msra.mxu0 %v15719_v42  ;;  %v15723_v45 = vpack.c.bf16 %v11145_v44, %v11144_v43  ;;  %v11180_v42 = vld [vmem:[%s22233_s4 + $0x150] sm:$0xff]  ;;  %v11181_v43 = vld [vmem:[%s22233_s4 + $0x158] sm:$0xff] }
 0x424   :  { %v15791_v44 = vpack.c.bf16 %v11181_v43, %v11180_v42  ;;  %v11205_v42 = vld [vmem:[%s22236_s7 + $0x2] ss:$0 sm:$0xff] }
 0x425   :  { %15724 = vmatprep.subr.bf16.mxu0 %v15723_v45 }
 0x4f5   :  { %v13661_v16 = vpop.f32.mrb[10].mxu0 }
 0x4f6   :  { %v954_v17 = vmul.f32 0.17677669, %v13661_v16  ;;  %v944_v19 = vpop.f32.mrb[11].mxu0  ;;  %v11165_v16 = vld [vmem:[%s22257_s3 + $0x168] sm:$0xff] }
 0x4f7   :  { %v953_v20 = vmul.f32 0.17677669, %v944_v19  ;;  %v11166_v19 = vld [vmem:[%s22257_s3 + $0x170] sm:$0xff] }
 0x4f8   :  { %v956_v21 = vadd.f32 %v18184_v31, %v954_v17  ;;  %v15763_v17 = vpack.c.bf16 %v11165_v16, %v11164_v15  ;;  %v15819_v15 = vpack.c.bf16 %v11197_v14, %v11196_v13  ;;  %v11198_v16 = vld [vmem:[%s22235_s6 + $0x150] sm:$0xff]  ;;  %v11226_v13 = vld [vmem:[%s22257_s3 + $0x1c0] sm:$0xff]  ;;  %v11227_v14 = vld [vmem:[%s22257_s3 + $0x1c8] sm:$0xff] }
 0x4f9   :  { %v955_v22 = vadd.f32 %v18184_v31, %v953_v20  ;;  %v11167_v20 = vld [vmem:[%s22257_s3 + $0x178] sm:$0xff] }
 0x4fa   :  { %v960_v24 = vsel %vm458_vm2, %v956_v21, -inf  ;;  %15764 = vmatprep.subr.bf16.mxu1 %v15763_v17 }
 0x4fb   :  { %961 = vmax.xlane.f32.xlu1 %v960_v24  ;;  %v957_v25 = vsel %vm458_vm2, %v955_v22, -inf  ;;  %15766 = vmatpush3.bf16.msra.mxu1 %v15763_v17  ;;  %v565_v24 = vld [vmem:[%s22237_s8 + $0x18] sm:$0xff] }
 0x4fc   :  { %958 = vmax.xlane.f32.xlu0 %v957_v25  ;;  %v11199_v17 = vld [vmem:[%s22235_s6 + $0x158] sm:$0xff] }
 0x588   :  { %v962_v26 = vpop.xlane.xlu1 %961 }
 0x589   :  { %v964_v27 = vsub.f32 %v956_v21, %v962_v26  ;;  %v959_v28 = vpop.xlane.xlu0 %958  ;;  %v15767_v21 = vpack.c.bf16 %v11167_v20, %v11166_v19  ;;  %v15823_v19 = vpack.c.bf16 %v11199_v17, %v11198_v16  ;;  %v11200_v20 = vld [vmem:[%s22235_s6 + $0x160] sm:$0xff]  ;;  %v11228_v16 = vld [vmem:[%s22257_s3 + $0x1d0] sm:$0xff]  ;;  %v11229_v17 = vld [vmem:[%s22257_s3 + $0x1d8] sm:$0xff] }
 0x58a   :  { %v963_v29 = vsub.f32 %v955_v22, %v959_v28  ;;  %v564_v22 = vld [vmem:[%s22237_s8 + $0x10] sm:$0xff]  ;;  %v11170_v28 = vld [vmem:[%s22233_s4 + $0x100] sm:$0xff] }
 0x58b   :  { %v967_v30 = vmul.f32 1.442695, %v964_v27  ;;  %15768 = vmatprep.subr.bf16.mxu1 %v15767_v21  ;;  %v15735_v27 = vpack.c.bf16 %v565_v24, %v564_v22  ;;  %v11202_v24 = vld [vmem:[%s22235_s6 + $0x170] sm:$0xff] }
 0x58c   :  { %v965_v32 = vmul.f32 1.442695, %v963_v29  ;;  %15770 = vmatpush3.bf16.msra.mxu1 %v15767_v21  ;;  %v11171_v29 = vld [vmem:[%s22233_s4 + $0x108] sm:$0xff] }
 0x58d   :  { %17626 = vpow2.f32 %v967_v30  ;;  %v15771_v30 = vpack.c.bf16 %v11171_v29, %v11170_v28  ;;  %15804 = vmatprep.subr.bf16.mxu1 %v15803_v4  ;;  %v11201_v21 = vld [vmem:[%s22235_s6 + $0x168] sm:$0xff] }
 0x58e   :  { %17628 = vpow2.f32 %v965_v32  ;;  %v11172_v32 = vld [vmem:[%s22233_s4 + $0x110] sm:$0xff]  ;;  %v15827_v22 = vpack.c.bf16 %v11201_v21, %v11200_v20  ;;  %v11230_v20 = vld [vmem:[%s22257_s3 + $0x1e0] sm:$0xff]  ;;  %v11231_v21 = vld [vmem:[%s22257_s3 + $0x1e8] sm:$0xff] }
 0x58f   :  { %13724 = vmatmul.mubr.f32.vlgmr.msra.gmra.mrb[6].mxu1 %v18117_v54 }
 0x590   :  { %13793 = vmatprep.mubr.f32.mxu1 %v18050_v23  ;;  %15806 = vmatpush3.bf16.msra.mxu1 %v15803_v4  ;;  %v11220_v4 = vld [vmem:[%s22257_s3 + $0x190] sm:$0xff] }
 0x591   :  { %15808 = vmatprep.subr.bf16.mxu1 %v15807_v6 }
 0x594   :  { %15810 = vmatpush3.bf16.msra.mxu1 %v15807_v6  ;;  %v15857_v6 = vpack.c.bf16 %v11221_v5, %v11220_v4  ;;  %v11258_v4 = vld [vmem:[%s22235_s6 + $0x1a0] sm:$0xff]  ;;  %v11259_v5 = vld [vmem:[%s22235_s6 + $0x1a8] sm:$0xff] }
 0x595   :  { %15812 = vmatprep.subr.bf16.mxu1 %v15811_v9 }
 0x597   :  { %v17627_v33 = vpop.eup %17626 }
 0x598   :  { %v17629_v34 = vpop.eup %17628  ;;  %v972_v35 = vsel %vm458_vm2, %v17627_v33, 0.0  ;;  %15814 = vmatpush3.bf16.msra.mxu1 %v15811_v9  ;;  %v15861_v9 = vpack.c.bf16 %v11223_v8, %v11222_v7  ;;  %v11260_v7 = vld [vmem:[%s22235_s6 + $0x1b0] sm:$0xff]  ;;  %v11261_v8 = vld [vmem:[%s22235_s6 + $0x1b8] sm:$0xff] }
 0x599   :  { %973 = vadd.xlane.f32.xlu1 %v972_v35  ;;  %v969_v36 = vsel %vm458_vm2, %v17629_v34, 0.0  ;;  %v11174_v35 = vld [vmem:[%s22233_s4 + $0x120] sm:$0xff]  ;;  %15816 = vmatprep.subr.bf16.mxu1 %v15815_v12 }
 0x59a   :  { %970 = vadd.xlane.f32.xlu0 %v969_v36 }
 0x59c   :  { %15818 = vmatpush3.bf16.msra.mxu1 %v15815_v12  ;;  %v15865_v12 = vpack.c.bf16 %v11225_v11, %v11224_v10  ;;  %v11262_v10 = vld [vmem:[%s22235_s6 + $0x1c0] sm:$0xff]  ;;  %v11263_v11 = vld [vmem:[%s22235_s6 + $0x1c8] sm:$0xff] }
 0x59d   :  { %15820 = vmatprep.subr.bf16.mxu1 %v15819_v15 }
 0x5a0   :  { %15822 = vmatpush3.bf16.msra.mxu1 %v15819_v15  ;;  %v15869_v15 = vpack.c.bf16 %v11227_v14, %v11226_v13  ;;  %v11264_v13 = vld [vmem:[%s22235_s6 + $0x1d0] sm:$0xff]  ;;  %v11265_v14 = vld [vmem:[%s22235_s6 + $0x1d8] sm:$0xff] }
 0x5a1   :  { %15824 = vmatprep.subr.bf16.mxu1 %v15823_v19 }
 0x5a4   :  { %15826 = vmatpush3.bf16.msra.mxu1 %v15823_v19  ;;  %v15873_v19 = vpack.c.bf16 %v11229_v17, %v11228_v16  ;;  %v11266_v16 = vld [vmem:[%s22235_s6 + $0x1e0] sm:$0xff]  ;;  %v11267_v17 = vld [vmem:[%s22235_s6 + $0x1e8] sm:$0xff] }
 0x5a5   :  { %15828 = vmatprep.subr.bf16.mxu1 %v15827_v22 }
 0x5a8   :  { %15830 = vmatpush3.bf16.msra.mxu1 %v15827_v22  ;;  %v15877_v22 = vpack.c.bf16 %v11231_v21, %v11230_v20  ;;  %v11268_v20 = vld [vmem:[%s22235_s6 + $0x1f0] sm:$0xff]  ;;  %v11269_v21 = vld [vmem:[%s22235_s6 + $0x1f8] sm:$0xff] }
 0x626   :  { %v974_v46 = vpop.xlane.xlu1 %973 }
 0x627   :  { %17630 = vrcp.f32 %v974_v46  ;;  %v971_v49 = vpop.xlane.xlu0 %970  ;;  %v11183_v46 = vld [vmem:[%s22233_s4 + $0x168] sm:$0xff] }
 0x628   :  { %17632 = vrcp.f32 %v971_v49 }
 0x631   :  { %v17631_v50 = vpop.eup %17630 }
 0x632   :  { %v17633_v53 = vpop.eup %17632  ;;  %v978_v56 = vmul.f32 %v17631_v50, %v17627_v33  ;;  %v11173_v33 = vld [vmem:[%s22233_s4 + $0x118] sm:$0xff]  ;;  %v11184_v50 = vld [vmem:[%s22233_s4 + $0x170] sm:$0xff] }
 0x633   :  { %v976_v55 = vmul.f32 %v17633_v53, %v17629_v34  ;;  %v15775_v34 = vpack.c.bf16 %v11173_v33, %v11172_v32  ;;  %v15799_v52 = vpack.c.bf16 %v11185_v51, %v11184_v50  ;;  %v11169_v53 = vld [vmem:[%s22259_s28 + $0x2] ss:$0 sm:$0xff]  ;;  %v11213_v50 = vld [vmem:[%s22237_s8 + $0x48] sm:$0xff] }
 0x635   :  { %13666 = vmatprep.mubr.msk.f32.mxu0 %vm458_vm2, %v976_v55 }
 0x636   :  { %13667 = vmatmul.mubr.msk.f32.vlgmr.msra.gmra.mrb[12].mxu0 %vm458_vm2, %v978_v56 }
 0x637   :  { %15726 = vmatpush3.bf16.msra.mxu0 %v15723_v45  ;;  %v11182_v45 = vld [vmem:[%s22233_s4 + $0x160] sm:$0xff] }
 0x638   :  { %15728 = vmatprep.subr.bf16.mxu0 %v15727_v57  ;;  %v15795_v49 = vpack.c.bf16 %v11183_v46, %v11182_v45 }
 0x63b   :  { %15730 = vmatpush3.bf16.msra.mxu0 %v15727_v57 }
 0x63c   :  { %15732 = vmatprep.subr.bf16.mxu0 %v15731_v60 }
 0x662   :  { %v13725_v55 = vpop.f32.mrb[6].mxu1 }
 0x663   :  { %v1324_v56 = vadd.f32 %v13725_v55, %v11169_v53  ;;  %v1318_v57 = vpop.f32.mrb[7].mxu1 }
 0x664   :  { %v1319_v58 = vadd.f32 %v11169_v53, %v1318_v57  ;;  %v11215_v57 = vld [vmem:[%s22237_s8 + $0x58] sm:$0xff] }
 0x709   :  { %v13668_v25 = vpop.f32.mrb[12].mxu0 }
 0x70a   :  { %v1051_v26 = vpop.f32.mrb[13].mxu0 }
 0x70b   :  { %13677 = vmatprep.mubr.msk.f32.mxu0 %vm360_vm0, %v1051_v26 }
 0x70c   :  { %13678 = vmatmul.mubr.msk.f32.vlgmr.msra.gmra.mrb[14].mxu0 %vm360_vm0, %v13668_v25  ;;  %v11203_v25 = vld [vmem:[%s22235_s6 + $0x178] sm:$0xff] }
 0x70d   :  { %15734 = vmatpush3.bf16.msra.mxu0 %v15731_v60  ;;  %13688 = vmatprep.mubr.msk.f32.mxu0 %vm360_vm0, %v18300_v48  ;;  %v11175_v48 = vld [vmem:[%s22233_s4 + $0x128] sm:$0xff]  ;;  %v15831_v26 = vpack.c.bf16 %v11203_v25, %v11202_v24  ;;  %v11232_v24 = vld [vmem:[%s22257_s3 + $0x1f0] sm:$0xff]  ;;  %v11233_v25 = vld [vmem:[%s22257_s3 + $0x1f8] sm:$0xff] }
 0x70e   :  { %15736 = vmatprep.subr.bf16.mxu0 %v15735_v27  ;;  %v15779_v36 = vpack.c.bf16 %v11175_v48, %v11174_v35 }
 0x70f   :  { %15832 = vmatprep.subr.bf16.mxu1 %v15831_v26 }
 0x710   :  { %15834 = vmatpush3.bf16.msra.mxu1 %v15831_v26  ;;  %v15881_v26 = vpack.c.bf16 %v11233_v25, %v11232_v24 }
 0x711   :  { %15738 = vmatpush3.bf16.msra.mxu0 %v15735_v27  ;;  %15854 = vmatprep.subr.bf16.mxu1 %v15853_v3 }
 0x712   :  { %15772 = vmatprep.subr.bf16.mxu0 %v15771_v30 }
 0x713   :  { %13794 = vmatmul.mubr.f32.vlgmr.msra.gmra.mrb[8].mxu1 %v18117_v54 }
 0x714   :  { %13689 = vmatmul.mubr.msk.f32.vlgmr.msra.gmra.mrb[14].mxu0 %vm360_vm0, %v18298_v47  ;;  %v11178_v47 = vld [vmem:[%s22233_s4 + $0x140] sm:$0xff]  ;;  %13853 = vmatprep.mubr.f32.mxu1 %v18050_v23 }
 0x715   :  { %15774 = vmatpush3.bf16.msra.mxu0 %v15771_v30  ;;  %13758 = vmatprep.mubr.f32.mxu0 %v18050_v23  ;;  %v15787_v41 = vpack.c.bf16 %v11179_v40, %v11178_v47 }
 0x716   :  { %15776 = vmatprep.subr.bf16.mxu0 %v15775_v34  ;;  %15856 = vmatpush3.bf16.msra.mxu1 %v15853_v3 }
 0x717   :  { %15858 = vmatprep.subr.bf16.mxu1 %v15857_v6 }
 0x719   :  { %15778 = vmatpush3.bf16.msra.mxu0 %v15775_v34 }
 0x71a   :  { %15780 = vmatprep.subr.bf16.mxu0 %v15779_v36  ;;  %15860 = vmatpush3.bf16.msra.mxu1 %v15857_v6  ;;  %v15925_v6 = vpack.c.bf16 %v11259_v5, %v11258_v4 }
 0x71b   :  { %15862 = vmatprep.subr.bf16.mxu1 %v15861_v9 }
 0x71d   :  { %15782 = vmatpush3.bf16.msra.mxu0 %v15779_v36 }
 0x71e   :  { %15784 = vmatprep.subr.bf16.mxu0 %v15783_v39  ;;  %15864 = vmatpush3.bf16.msra.mxu1 %v15861_v9  ;;  %v15929_v9 = vpack.c.bf16 %v11261_v8, %v11260_v7  ;;  %v2444_v7 = vld [vmem:[%s22239_s10 + $0x8] sm:$0xff]  ;;  %v2446_v8 = vld [vmem:[%s22239_s10 + $0x18] sm:$0xff] }
 0x71f   :  { %15866 = vmatprep.subr.bf16.mxu1 %v15865_v12 }
 0x721   :  { %15786 = vmatpush3.bf16.msra.mxu0 %v15783_v39 }
 0x722   :  { %15788 = vmatprep.subr.bf16.mxu0 %v15787_v41  ;;  %15868 = vmatpush3.bf16.msra.mxu1 %v15865_v12  ;;  %v15933_v12 = vpack.c.bf16 %v11263_v11, %v11262_v10  ;;  %v15967_v10 = vpack.c.bf16 %v2446_v8, %v2444_v7  ;;  %v2450_v11 = vld [vmem:[%s22239_s10 + $0x38] sm:$0xff] }
 0x723   :  { %15870 = vmatprep.subr.bf16.mxu1 %v15869_v15 }
 0x725   :  { %15790 = vmatpush3.bf16.msra.mxu0 %v15787_v41 }
 0x726   :  { %15792 = vmatprep.subr.bf16.mxu0 %v15791_v44  ;;  %15872 = vmatpush3.bf16.msra.mxu1 %v15869_v15  ;;  %v15937_v15 = vpack.c.bf16 %v11265_v14, %v11264_v13  ;;  %v2447_v14 = vld [vmem:[%s22239_s10 + $0x20] sm:$0xff] }
 0x727   :  { %15874 = vmatprep.subr.bf16.mxu1 %v15873_v19 }
 0x729   :  { %15794 = vmatpush3.bf16.msra.mxu0 %v15791_v44 }
 0x72a   :  { %15796 = vmatprep.subr.bf16.mxu0 %v15795_v49  ;;  %15876 = vmatpush3.bf16.msra.mxu1 %v15873_v19  ;;  %v15941_v19 = vpack.c.bf16 %v11267_v17, %v11266_v16  ;;  %v2452_v16 = vld [vmem:[%s22239_s10 + $0x48] sm:$0xff]  ;;  %v2454_v17 = vld [vmem:[%s22239_s10 + $0x58] sm:$0xff] }
 0x72b   :  { %15878 = vmatprep.subr.bf16.mxu1 %v15877_v22 }
 0x72d   :  { %15798 = vmatpush3.bf16.msra.mxu0 %v15795_v49  ;;  %v11212_v49 = vld [vmem:[%s22237_s8 + $0x40] sm:$0xff] }
 0x72e   :  { %15800 = vmatprep.subr.bf16.mxu0 %v15799_v52  ;;  %v15845_v51 = vpack.c.bf16 %v11213_v50, %v11212_v49  ;;  %15880 = vmatpush3.bf16.msra.mxu1 %v15877_v22  ;;  %v11235_v50 = vld [vmem:[%s22259_s28 + $0x3] ss:$0 sm:$0xff]  ;;  %v15945_v22 = vpack.c.bf16 %v11269_v21, %v11268_v20  ;;  %v15975_v20 = vpack.c.bf16 %v2454_v17, %v2452_v16  ;;  %v2689_v16 = vld [vmem:[%s22241_s12 + $0x88] sm:$0xff] }
 0x72f   :  { %15882 = vmatprep.subr.bf16.mxu1 %v15881_v26  ;;  %v2451_v21 = vld [vmem:[%s22239_s10 + $0x40] sm:$0xff] }
 0x731   :  { %15802 = vmatpush3.bf16.msra.mxu0 %v15799_v52 }
 0x732   :  { %15884 = vmatpush3.bf16.msra.mxu1 %v15881_v26 }
 0x734   :  { %13759 = vmatmul.mubr.f32.vlgmr.msra.gmra.mrb[16].mxu0 %v18117_v54 }
 0x735   :  { %13800 = vmatprep.mubr.msk.f32.mxu0 %vm360_vm0, %v1319_v58 }
 0x7e6   :  { %v13795_v41 = vpop.f32.mrb[8].mxu1 }
 0x7e7   :  { %v1518_v43 = vpop.f32.mrb[9].mxu1  ;;  %v1524_v44 = vadd.f32 %v13795_v41, %v11205_v42 }
 0x7e8   :  { %v1519_v45 = vadd.f32 %v11205_v42, %v1518_v43  ;;  %v11248_v42 = vld [vmem:[%s22233_s4 + $0x1e0] sm:$0xff]  ;;  %v11249_v43 = vld [vmem:[%s22233_s4 + $0x1e8] sm:$0xff] }
 0x7ea   :  { %v15841_v46 = vpack.c.bf16 %v1524_v44, %v1519_v45  ;;  %v15909_v44 = vpack.c.bf16 %v11249_v43, %v11248_v42  ;;  %v11250_v45 = vld [vmem:[%s22233_s4 + $0x1f0] sm:$0xff]  ;;  %v11271_v42 = vld [vmem:[%s22236_s7 + $0x3] ss:$0 sm:$0xff] }
 0x807   :  { %v13760_v60 = vpop.f32.mrb[16].mxu0 }
 0x808   :  { %v1424_v61 = vadd.f32 %v13760_v60, %v11187_v59  ;;  %v1418_v62 = vpop.f32.mrb[17].mxu0 }
 0x809   :  { %v1419_v63 = vadd.f32 %v11187_v59, %v1418_v62  ;;  %v11236_v62 = vld [vmem:[%s22233_s4 + $0x180] sm:$0xff] }
 0x80b   :  { %v15835_v0 = vpack.c.bf16 %v1424_v61, %v1419_v63  ;;  %v11237_v63 = vld [vmem:[%s22233_s4 + $0x188] sm:$0xff] }
 0x80d   :  { %15837 = vmatprep.subr.msk.bf16.mxu0 %vm18168_vm1, %v15835_v0 }
 0x80e   :  { %15840 = vmatpush3.bf16.xpose.msk.msra.mxu0 %vm18168_vm1, %v15835_v0  ;;  %v15885_v0 = vpack.c.bf16 %v11237_v63, %v11236_v62  ;;  %v11254_v62 = vld [vmem:[%s22235_s6 + $0x180] sm:$0xff]  ;;  %v11255_v63 = vld [vmem:[%s22235_s6 + $0x188] sm:$0xff] }
 0x80f   :  { %15842 = vmatprep.subr.bf16.mxu0 %v15841_v46  ;;  %v15917_v1 = vpack.c.bf16 %v11255_v63, %v11254_v62 }
 0x811   :  { %15918 = vmatprep.subr.bf16.mxu1 %v15917_v1 }
 0x815   :  { %13801 = vmatmul.mubr.msk.f32.vlgmr.msra.gmra.mrb[18].mxu0 %vm360_vm0, %v1324_v56  ;;  %v11214_v56 = vld [vmem:[%s22237_s8 + $0x50] sm:$0xff] }
 0x816   :  { %15844 = vmatpush3.bf16.msra.mxu0 %v15841_v46  ;;  %v15849_v61 = vpack.c.bf16 %v11215_v57, %v11214_v56  ;;  %v11251_v46 = vld [vmem:[%s22233_s4 + $0x1f8] sm:$0xff]  ;;  %v11253_v56 = vld [vmem:[%s22234_s5 + $0x3] ss:$0 sm:$0xff] }
 0x817   :  { %15846 = vmatprep.subr.bf16.mxu0 %v15845_v51  ;;  %v15913_v49 = vpack.c.bf16 %v11251_v46, %v11250_v45 }
 0x8e8   :  { %v13802_v27 = vpop.f32.mrb[18].mxu0 }
 0x8e9   :  { %v1615_v28 = vmul.f32 0.17677669, %v13802_v27  ;;  %v1605_v29 = vpop.f32.mrb[19].mxu0  ;;  %v18643_v27 = vld [vmem:[%s22258_s2 + $0x8] sm:$0xff] }
 0x8ea   :  { %v1614_v30 = vmul.f32 0.17677669, %v1605_v29  ;;  %13854 = vmatmul.mubr.f32.vlgmr.msra.gmra.mrb[10].mxu1 %v18643_v27  ;;  %v11238_v29 = vld [vmem:[%s22233_s4 + $0x190] sm:$0xff] }
 0x8eb   :  { %v1617_v32 = vadd.f32 %v18184_v31, %v1615_v28  ;;  %v18649_v28 = vld [vmem:[%s22258_s2] sm:$0xff]  ;;  %15920 = vmatpush3.bf16.msra.mxu1 %v15917_v1 }
 0x8ec   :  { %v1616_v33 = vadd.f32 %v18184_v31, %v1614_v30  ;;  %13923 = vmatprep.mubr.f32.mxu1 %v18649_v28  ;;  %v11239_v30 = vld [vmem:[%s22233_s4 + $0x198] sm:$0xff] }
 0x8ed   :  { %v1621_v34 = vsel %vm458_vm2, %v1617_v32, -inf }
 0x8ee   :  { %1622 = vmax.xlane.f32.xlu1 %v1621_v34  ;;  %v1618_v35 = vsel %vm458_vm2, %v1616_v33, -inf  ;;  %v15889_v34 = vpack.c.bf16 %v11239_v30, %v11238_v29  ;;  %v17840_v30 = vld [vmem:[%s22262_s21] ss:$0 sm:$0xff] }
 0x8ef   :  { %1619 = vmax.xlane.f32.xlu0 %v1618_v35  ;;  %v11240_v35 = vld [vmem:[%s22233_s4 + $0x1a0] sm:$0xff] }
 0x97b   :  { %v1623_v48 = vpop.xlane.xlu1 %1622 }
 0x97c   :  { %v1625_v36 = vsub.f32 %v1617_v32, %v1623_v48  ;;  %v1620_v37 = vpop.xlane.xlu0 %1619  ;;  %v11241_v48 = vld [vmem:[%s22233_s4 + $0x1a8] sm:$0xff] }
 0x97d   :  { %v1624_v54 = vsub.f32 %v1616_v33, %v1620_v37  ;;  %v11242_v37 = vld [vmem:[%s22233_s4 + $0x1b0] sm:$0xff] }
 0x97e   :  { %v1628_v38 = vmul.f32 1.442695, %v1625_v36  ;;  %v15893_v36 = vpack.c.bf16 %v11241_v48, %v11240_v35 }
 0x97f   :  { %v1626_v23 = vmul.f32 1.442695, %v1624_v54  ;;  %v11243_v54 = vld [vmem:[%s22233_s4 + $0x1b8] sm:$0xff] }
 0x980   :  { %17634 = vpow2.f32 %v1628_v38  ;;  %v15897_v38 = vpack.c.bf16 %v11243_v54, %v11242_v37 }
 0x981   :  { %17636 = vpow2.f32 %v1626_v23  ;;  %v11244_v23 = vld [vmem:[%s22233_s4 + $0x1c0] sm:$0xff] }
 0x98a   :  { %v17635_v39 = vpop.eup %17634 }
 0x98b   :  { %v17637_v47 = vpop.eup %17636  ;;  %v1633_v40 = vsel %vm458_vm2, %v17635_v39, 0.0 }
 0x98c   :  { %1634 = vadd.xlane.f32.xlu1 %v1633_v40  ;;  %v1630_v31 = vsel %vm458_vm2, %v17637_v47, 0.0  ;;  %v11246_v40 = vld [vmem:[%s22233_s4 + $0x1d0] sm:$0xff] }
 0x98d   :  { %1631 = vadd.xlane.f32.xlu0 %v1630_v31  ;;  %v11247_v31 = vld [vmem:[%s22233_s4 + $0x1d8] sm:$0xff] }
 0x98e   :  { %v15905_v41 = vpack.c.bf16 %v11247_v31, %v11246_v40 }
 0xa19   :  { %v1635_v52 = vpop.xlane.xlu1 %1634 }
 0xa1a   :  { %17638 = vrcp.f32 %v1635_v52  ;;  %v1632_v53 = vpop.xlane.xlu0 %1631 }
 0xa1b   :  { %17640 = vrcp.f32 %v1632_v53 }
 0xa24   :  { %v17639_v55 = vpop.eup %17638 }
 0xa25   :  { %v17641_v58 = vpop.eup %17640  ;;  %v1639_v60 = vmul.f32 %v17639_v55, %v17635_v39  ;;  %v11245_v39 = vld [vmem:[%s22233_s4 + $0x1c8] sm:$0xff] }
 0xa26   :  { %v1637_v59 = vmul.f32 %v17641_v58, %v17637_v47  ;;  %v15901_v47 = vpack.c.bf16 %v11245_v39, %v11244_v23 }
 0xa28   :  { %13807 = vmatprep.mubr.msk.f32.mxu0 %vm458_vm2, %v1637_v59 }
 0xa29   :  { %13808 = vmatmul.mubr.msk.f32.vlgmr.msra.gmra.mrb[20].mxu0 %vm458_vm2, %v1639_v60 }
 0xa2a   :  { %15848 = vmatpush3.bf16.msra.mxu0 %v15845_v51  ;;  %v13855_v51 = vpop.f32.mrb[10].mxu1 }
 0xa2b   :  { %15850 = vmatprep.subr.bf16.mxu0 %v15849_v61  ;;  %v1906_v52 = vadd.f32 %v13855_v51, %v11235_v50  ;;  %v1900_v53 = vpop.f32.mrb[11].mxu1 }
 0xa2c   :  { %v1901_v55 = vadd.f32 %v11235_v50, %v1900_v53  ;;  %v11279_v50 = vld [vmem:[%s22237_s8 + $0x68] sm:$0xff] }
 0xa2e   :  { %15852 = vmatpush3.bf16.msra.mxu0 %v15849_v61 }
 0xa2f   :  { %15886 = vmatprep.subr.bf16.mxu0 %v15885_v0 }
 0xafc   :  { %v13809_v32 = vpop.f32.mrb[20].mxu0 }
 0xafd   :  { %v1712_v33 = vpop.f32.mrb[21].mxu0 }
 0xafe   :  { %13818 = vmatprep.mubr.msk.f32.mxu0 %vm360_vm0, %v1712_v33 }
 0xaff   :  { %13819 = vmatmul.mubr.msk.f32.vlgmr.msra.gmra.mrb[14].mxu0 %vm360_vm0, %v13809_v32 }
 0xb00   :  { %15888 = vmatpush3.bf16.msra.mxu0 %v15885_v0  ;;  %13888 = vmatprep.mubr.f32.mxu0 %v18649_v28  ;;  %v11256_v0 = vld [vmem:[%s22235_s6 + $0x190] sm:$0xff] }
 0xb01   :  { %15890 = vmatprep.subr.bf16.mxu0 %v15889_v34  ;;  %v15921_v3 = vpack.c.bf16 %v11257_v2, %v11256_v0  ;;  %v11284_v0 = vld [vmem:[%s22238_s9] ss:$0 sm:$0xff] }
 0xb03   :  { %15922 = vmatprep.subr.bf16.mxu1 %v15921_v3 }
 0xb04   :  { %15892 = vmatpush3.bf16.msra.mxu0 %v15889_v34  ;;  %15924 = vmatpush3.bf16.msra.mxu1 %v15921_v3 }
 0xb05   :  { %15894 = vmatprep.subr.bf16.mxu0 %v15893_v36  ;;  %15926 = vmatprep.subr.bf16.mxu1 %v15925_v6 }
 0xb08   :  { %15896 = vmatpush3.bf16.msra.mxu0 %v15893_v36  ;;  %15928 = vmatpush3.bf16.msra.mxu1 %v15925_v6 }
 0xb09   :  { %15898 = vmatprep.subr.bf16.mxu0 %v15897_v38  ;;  %15930 = vmatprep.subr.bf16.mxu1 %v15929_v9 }
 0xb0c   :  { %15900 = vmatpush3.bf16.msra.mxu0 %v15897_v38  ;;  %15932 = vmatpush3.bf16.msra.mxu1 %v15929_v9  ;;  %v2443_v9 = vld [vmem:[%s22239_s10] sm:$0xff] }
 0xb0d   :  { %15902 = vmatprep.subr.bf16.mxu0 %v15901_v47  ;;  %15934 = vmatprep.subr.bf16.mxu1 %v15933_v12 }
 0xb10   :  { %15904 = vmatpush3.bf16.msra.mxu0 %v15901_v47  ;;  %15936 = vmatpush3.bf16.msra.mxu1 %v15933_v12 }
 0xb11   :  { %15906 = vmatprep.subr.bf16.mxu0 %v15905_v41  ;;  %15938 = vmatprep.subr.bf16.mxu1 %v15937_v15 }
 0xb14   :  { %15908 = vmatpush3.bf16.msra.mxu0 %v15905_v41  ;;  %15940 = vmatpush3.bf16.msra.mxu1 %v15937_v15  ;;  %v2449_v15 = vld [vmem:[%s22239_s10 + $0x30] sm:$0xff] }
 0xb15   :  { %15910 = vmatprep.subr.bf16.mxu0 %v15909_v44  ;;  %15942 = vmatprep.subr.bf16.mxu1 %v15941_v19 }
 0xb18   :  { %15912 = vmatpush3.bf16.msra.mxu0 %v15909_v44  ;;  %15944 = vmatpush3.bf16.msra.mxu1 %v15941_v19  ;;  %v15973_v19 = vpack.c.bf16 %v2449_v15, %v2447_v14  ;;  %v2688_v15 = vld [vmem:[%s22241_s12 + $0x80] sm:$0xff] }
 0xb19   :  { %15914 = vmatprep.subr.bf16.mxu0 %v15913_v49  ;;  %15946 = vmatprep.subr.bf16.mxu1 %v15945_v22  ;;  %v15999_v17 = vpack.c.bf16 %v2689_v16, %v2688_v15 }
 0xb1c   :  { %15916 = vmatpush3.bf16.msra.mxu0 %v15913_v49  ;;  %15948 = vmatpush3.bf16.msra.mxu1 %v15945_v22  ;;  %v11278_v49 = vld [vmem:[%s22237_s8 + $0x60] sm:$0xff]  ;;  %v2453_v22 = vld [vmem:[%s22239_s10 + $0x50] sm:$0xff] }
 0xb1d   :  { %v15959_v51 = vpack.c.bf16 %v11279_v50, %v11278_v49  ;;  %v2465_v49 = vld [vmem:[%s22239_s10 + $0xb0] sm:$0xff]  ;;  %v2468_v50 = vld [vmem:[%s22239_s10 + $0xc8] sm:$0xff]  ;;  %16000 = vmatprep.subr.bf16.mxu1 %v15999_v17 }
 0xb1f   :  { %13889 = vmatmul.mubr.f32.vlgmr.msra.gmra.mrb[22].mxu0 %v18643_v27  ;;  %13924 = vmatmul.mubr.f32.vlgmr.msra.gmra.mrb[12].mxu1 %v18643_v27 }
 0xb20   :  { %13930 = vmatprep.mubr.msk.f32.mxu0 %vm360_vm0, %v1901_v55 }
 0xbf2   :  { %v13890_v57 = vpop.f32.mrb[22].mxu0  ;;  %v13925_v41 = vpop.f32.mrb[12].mxu1 }
 0xbf3   :  { %v2006_v58 = vadd.f32 %v13890_v57, %v11253_v56  ;;  %v2000_v59 = vpop.f32.mrb[23].mxu0  ;;  %v2100_v43 = vpop.f32.mrb[13].mxu1  ;;  %v2106_v44 = vadd.f32 %v13925_v41, %v11271_v42  ;;  %v11281_v57 = vld [vmem:[%s22237_s8 + $0x78] sm:$0xff]  ;;  %v2461_v41 = vld [vmem:[%s22239_s10 + $0x90] sm:$0xff] }
 0xbf4   :  { %v2001_v60 = vadd.f32 %v11253_v56, %v2000_v59  ;;  %v2101_v45 = vadd.f32 %v11271_v42, %v2100_v43  ;;  %v11280_v56 = vld [vmem:[%s22237_s8 + $0x70] sm:$0xff]  ;;  %v2464_v43 = vld [vmem:[%s22239_s10 + $0xa8] sm:$0xff] }
 0xbf6   :  { %v15949_v61 = vpack.c.bf16 %v2006_v58, %v2001_v60  ;;  %v15955_v46 = vpack.c.bf16 %v2106_v44, %v2101_v45  ;;  %v2466_v44 = vld [vmem:[%s22239_s10 + $0xb8] sm:$0xff]  ;;  %v2463_v45 = vld [vmem:[%s22239_s10 + $0xa0] sm:$0xff] }
 0xbf8   :  { %15951 = vmatprep.subr.msk.bf16.mxu0 %vm18168_vm1, %v15949_v61 }
 0xbf9   :  { %15954 = vmatpush3.bf16.xpose.msk.msra.mxu0 %vm18168_vm1, %v15949_v61  ;;  %v15963_v61 = vpack.c.bf16 %v11281_v57, %v11280_v56  ;;  %v2467_v56 = vld [vmem:[%s22239_s10 + $0xc0] sm:$0xff]  ;;  %v2469_v57 = vld [vmem:[%s22239_s10 + $0xd0] sm:$0xff] }
 0xbfa   :  { %15956 = vmatprep.subr.bf16.mxu0 %v15955_v46 }
 0xc00   :  { %13931 = vmatmul.mubr.msk.f32.vlgmr.msra.gmra.mrb[24].mxu0 %vm360_vm0, %v1906_v52 }
 0xc01   :  { %15958 = vmatpush3.bf16.msra.mxu0 %v15955_v46  ;;  %v15987_v46 = vpack.c.bf16 %v2466_v44, %v2464_v43  ;;  %v2681_v43 = vld [vmem:[%s22241_s12 + $0x48] sm:$0xff] }
 0xc02   :  { %15960 = vmatprep.subr.bf16.mxu0 %v15959_v51 }
 0xcd3   :  { %v13932_v24 = vpop.f32.mrb[24].mxu0 }
 0xcd4   :  { %v2197_v25 = vmul.f32 0.17677669, %v13932_v24  ;;  %v2187_v26 = vpop.f32.mrb[25].mxu0  ;;  %v15977_v24 = vpack.c.bf16 %v2453_v22, %v2451_v21  ;;  %v2690_v22 = vld [vmem:[%s22241_s12 + $0x90] sm:$0xff] }
 0xcd5   :  { %v2196_v29 = vmul.f32 0.17677669, %v2187_v26 }
 0xcd6   :  { %v2199_v32 = vadd.f32 %v17840_v30, %v2197_v25 }
 0xcd7   :  { %v2198_v33 = vadd.f32 %v17840_v30, %v2196_v29 }
 0xcd8   :  { %v2203_v34 = vsel %vm458_vm2, %v2199_v32, -inf }
 0xcd9   :  { %2204 = vmax.xlane.f32.xlu1 %v2203_v34  ;;  %v2200_v35 = vsel %vm458_vm2, %v2198_v33, -inf }
 0xcda   :  { %2201 = vmax.xlane.f32.xlu0 %v2200_v35 }
 0xd66   :  { %v2205_v48 = vpop.xlane.xlu1 %2204 }
 0xd67   :  { %v2207_v36 = vsub.f32 %v2199_v32, %v2205_v48  ;;  %v2202_v37 = vpop.xlane.xlu0 %2201  ;;  %v2456_v48 = vld [vmem:[%s22239_s10 + $0x68] sm:$0xff] }
 0xd68   :  { %v2206_v54 = vsub.f32 %v2198_v33, %v2202_v37 }
 0xd69   :  { %v2210_v38 = vmul.f32 1.442695, %v2207_v36  ;;  %v2458_v36 = vld [vmem:[%s22239_s10 + $0x78] sm:$0xff] }
 0xd6a   :  { %v2208_v23 = vmul.f32 1.442695, %v2206_v54  ;;  %v15979_v37 = vpack.c.bf16 %v2458_v36, %v2456_v48  ;;  %v2455_v54 = vld [vmem:[%s22239_s10 + $0x60] sm:$0xff]  ;;  %v2677_v48 = vld [vmem:[%s22241_s12 + $0x28] sm:$0xff] }
 0xd6b   :  { %17642 = vpow2.f32 %v2210_v38  ;;  %v2457_v38 = vld [vmem:[%s22239_s10 + $0x70] sm:$0xff] }
 0xd6c   :  { %17644 = vpow2.f32 %v2208_v23  ;;  %v15981_v23 = vpack.c.bf16 %v2457_v38, %v2455_v54  ;;  %v2695_v54 = vld [vmem:[%s22241_s12 + $0xb8] sm:$0xff] }
 0xd75   :  { %v17643_v39 = vpop.eup %17642 }
 0xd76   :  { %v17645_v47 = vpop.eup %17644  ;;  %v2215_v40 = vsel %vm458_vm2, %v17643_v39, 0.0 }
 0xd77   :  { %2216 = vadd.xlane.f32.xlu1 %v2215_v40  ;;  %v2212_v31 = vsel %vm458_vm2, %v17645_v47, 0.0 }
 0xd78   :  { %2213 = vadd.xlane.f32.xlu0 %v2212_v31  ;;  %v2459_v31 = vld [vmem:[%s22239_s10 + $0x80] sm:$0xff] }
 0xd79   :  { %v15985_v42 = vpack.c.bf16 %v2461_v41, %v2459_v31  ;;  %v2697_v31 = vld [vmem:[%s22241_s12 + $0xc8] sm:$0xff] }
 0xe04   :  { %v2217_v52 = vpop.xlane.xlu1 %2216 }
 0xe05   :  { %17646 = vrcp.f32 %v2217_v52  ;;  %v2214_v53 = vpop.xlane.xlu0 %2213  ;;  %v17896_v52 = vmov 0.0  }
 0xe06   :  { %17648 = vrcp.f32 %v2214_v53  ;;  %v15989_v53 = vpack.c.bf16 %v2465_v49, %v2463_v45  ;;  %v2698_v45 = vld [vmem:[%s22241_s12 + $0xd0] sm:$0xff] }
 0xe0f   :  { %v17647_v55 = vpop.eup %17646 }
 0xe10   :  { %v17649_v58 = vpop.eup %17648  ;;  %v2221_v60 = vmul.f32 %v17647_v55, %v17643_v39  ;;  %v2460_v39 = vld [vmem:[%s22239_s10 + $0x88] sm:$0xff] }
 0xe11   :  { %v2219_v59 = vmul.f32 %v17649_v58, %v17645_v47  ;;  %v2462_v47 = vld [vmem:[%s22239_s10 + $0x98] sm:$0xff]  ;;  %v2472_v58 = vld [vmem:[%s22239_s10 + $0xe8] sm:$0xff] }
 0xe12   :  { %v15983_v40 = vpack.c.bf16 %v2462_v47, %v2460_v39  ;;  %v2679_v39 = vld [vmem:[%s22241_s12 + $0x38] sm:$0xff] }
 0xe13   :  { %13937 = vmatprep.mubr.msk.f32.mxu0 %vm458_vm2, %v2219_v59  ;;  %v2474_v59 = vld [vmem:[%s22239_s10 + $0xf8] sm:$0xff] }
 0xe14   :  { %13938 = vmatmul.mubr.msk.f32.vlgmr.msra.gmra.mrb[26].mxu0 %vm458_vm2, %v2221_v60  ;;  %v15993_v60 = vpack.c.bf16 %v2469_v57, %v2467_v56  ;;  %v2701_v56 = vld [vmem:[%s22241_s12 + $0xe8] sm:$0xff] }
 0xe15   :  { %15962 = vmatpush3.bf16.msra.mxu0 %v15959_v51  ;;  %v2470_v51 = vld [vmem:[%s22239_s10 + $0xd8] sm:$0xff] }
 0xe16   :  { %15964 = vmatprep.subr.bf16.mxu0 %v15963_v61  ;;  %v15991_v55 = vpack.c.bf16 %v2470_v51, %v2468_v50  ;;  %v2682_v50 = vld [vmem:[%s22241_s12 + $0x50] sm:$0xff]  ;;  %v2683_v51 = vld [vmem:[%s22241_s12 + $0x58] sm:$0xff] }
 0xe19   :  { %15966 = vmatpush3.bf16.msra.mxu0 %v15963_v61  ;;  %v15995_v61 = vpack.c.bf16 %v2474_v59, %v2472_v58  ;;  %v2684_v58 = vld [vmem:[%s22241_s12 + $0x60] sm:$0xff]  ;;  %v2685_v59 = vld [vmem:[%s22241_s12 + $0x68] sm:$0xff] }
 0xe1a   :  { %15968 = vmatprep.subr.bf16.mxu0 %v15967_v10 }
 0xee7   :  { %v13939_v62 = vpop.f32.mrb[26].mxu0 }
 0xee8   :  { %v2294_v63 = vpop.f32.mrb[27].mxu0 }
 0xee9   :  { %13948 = vmatprep.mubr.msk.f32.mxu0 %vm360_vm0, %v2294_v63  ;;  %v2473_v63 = vld [vmem:[%s22239_s10 + $0xf0] sm:$0xff] }
 0xeea   :  { %13949 = vmatmul.mubr.msk.f32.vlgmr.msra.gmra.mrb[14].mxu0 %vm360_vm0, %v13939_v62  ;;  %v2471_v62 = vld [vmem:[%s22239_s10 + $0xe0] sm:$0xff] }
 0xeeb   :  { %2551 = vmatprep.mubr.f32.mxu0 %v17896_v52 }
 0xfbd   :  { %v13950_v1 = vpop.f32.mrb[14].mxu0 }
 0xfbe   :  { %v2399_v2 = vadd.f32 %v13950_v1, %v11284_v0  ;;  %v2380_v3 = vpop.f32.mrb[15].mxu0 }
 0xfbf   :  { %v2398_v4 = vadd.f32 %v11284_v0, %v2380_v3  ;;  %v15997_v0 = vpack.c.bf16 %v2473_v63, %v2471_v62  ;;  %v2703_v62 = vld [vmem:[%s22241_s12 + $0xf8] sm:$0xff] }
 0xfc0   :  { %v2403_v5 = vadd.f32 %v18643_v27, %v2399_v2  ;;  %v2445_v27 = vld [vmem:[%s22239_s10 + $0x10] sm:$0xff] }
 0xfc1   :  { %v2402_v6 = vadd.f32 %v18649_v28, %v2398_v4  ;;  %v2448_v28 = vld [vmem:[%s22239_s10 + $0x28] sm:$0xff]  ;;  %v15969_v12 = vpack.c.bf16 %v2445_v27, %v2443_v9  ;;  %v11285_v9 = vld [vmem:[%s22243_s14] ss:$0 sm:$0xff] }
 0xfc2   :  { %2406 = vadd.xlane.f32.xlu1 %v2403_v5  ;;  %v15971_v13 = vpack.c.bf16 %v2450_v11, %v2448_v28  ;;  %v11286_v28 = vld [vmem:[%s22244_s15] ss:$0 sm:$0xff] }
 0xfc3   :  { %2404 = vadd.xlane.f32.xlu0 %v2402_v6  ;;  %15970 = vmatpush1.bf16.msra.mxu0 %v15969_v12 }
 0xfc4   :  { %15972 = vmatprep.subr.bf16.mxu0 %v15971_v13 }
 0xfc7   :  { %15974 = vmatpush1.bf16.msra.mxu0 %v15973_v19  ;;  %v2672_v19 = vld [vmem:[%s22241_s12] sm:$0xff] }
 0xfc8   :  { %15976 = vmatprep.subr.bf16.mxu0 %v15975_v20  ;;  %v2673_v20 = vld [vmem:[%s22241_s12 + $0x8] sm:$0xff] }
 0xfc9   :  { %v16001_v21 = vpack.c.bf16 %v2673_v20, %v2672_v19 }
 0xfcb   :  { %15978 = vmatpush1.bf16.msra.mxu0 %v15977_v24  ;;  %16002 = vmatpush3.bf16.msra.mxu1 %v16001_v21  ;;  %v2691_v24 = vld [vmem:[%s22241_s12 + $0x98] sm:$0xff] }
 0xfcc   :  { %15980 = vmatprep.subr.bf16.mxu0 %v15979_v37  ;;  %v2694_v37 = vld [vmem:[%s22241_s12 + $0xb0] sm:$0xff] }
 0xfcd   :  { %v16011_v38 = vpack.c.bf16 %v2695_v54, %v2694_v37 }
 0xfcf   :  { %15982 = vmatpush1.bf16.msra.mxu0 %v15981_v23  ;;  %v2678_v23 = vld [vmem:[%s22241_s12 + $0x30] sm:$0xff] }
 0xfd0   :  { %15984 = vmatprep.subr.bf16.mxu0 %v15983_v40  ;;  %v16013_v47 = vpack.c.bf16 %v2679_v39, %v2678_v23  ;;  %v2696_v40 = vld [vmem:[%s22241_s12 + $0xc0] sm:$0xff] }
 0xfd1   :  { %v16015_v41 = vpack.c.bf16 %v2697_v31, %v2696_v40 }
 0xfd3   :  { %15986 = vmatpush1.bf16.msra.mxu0 %v15985_v42  ;;  %v2680_v42 = vld [vmem:[%s22241_s12 + $0x40] sm:$0xff] }
 0xfd4   :  { %15988 = vmatprep.subr.bf16.mxu0 %v15987_v46  ;;  %v16017_v44 = vpack.c.bf16 %v2681_v43, %v2680_v42  ;;  %v2699_v46 = vld [vmem:[%s22241_s12 + $0xd8] sm:$0xff] }
 0xfd5   :  { %v16019_v49 = vpack.c.bf16 %v2699_v46, %v2698_v45 }
 0xfd7   :  { %15990 = vmatpush1.bf16.msra.mxu0 %v15989_v53  ;;  %v16021_v53 = vpack.c.bf16 %v2683_v51, %v2682_v50 }
 0xfd8   :  { %15992 = vmatprep.subr.bf16.mxu0 %v15991_v55  ;;  %v2700_v55 = vld [vmem:[%s22241_s12 + $0xe0] sm:$0xff] }
 0xfd9   :  { %v16023_v57 = vpack.c.bf16 %v2701_v56, %v2700_v55 }
 0xfdb   :  { %15994 = vmatpush1.bf16.msra.mxu0 %v15993_v60  ;;  %v16025_v60 = vpack.c.bf16 %v2685_v59, %v2684_v58 }
 0xfdc   :  { %15996 = vmatprep.subr.bf16.mxu0 %v15995_v61  ;;  %v2702_v61 = vld [vmem:[%s22241_s12 + $0xf0] sm:$0xff] }
 0xfdd   :  { %v16027_v63 = vpack.c.bf16 %v2703_v62, %v2702_v61 }
 0xfdf   :  { %15998 = vmatpush1.bf16.msra.mxu0 %v15997_v0  ;;  %v2686_v0 = vld [vmem:[%s22241_s12 + $0x70] sm:$0xff] }
0x104f   :  { %v2407_v25 = vpop.xlane.xlu1 %2406 }
0x1050   :  { %v2410_v26 = vmul.f32 0.0078125, %v2407_v25  ;;  %v2405_v29 = vpop.xlane.xlu0 %2404  ;;  %v16003_v25 = vpack.c.bf16 %v2691_v24, %v2690_v22 }
0x1051   :  { %v2409_v30 = vmul.f32 0.0078125, %v2405_v29  ;;  %v2675_v29 = vld [vmem:[%s22241_s12 + $0x18] sm:$0xff] }
0x1052   :  { %v2412_v32 = vsub.f32 %v2403_v5, %v2410_v26  ;;  %v2674_v26 = vld [vmem:[%s22241_s12 + $0x10] sm:$0xff]  ;;  %16004 = vmatprep.subr.bf16.mxu1 %v16003_v25 }
0x1053   :  { %v2411_v33 = vsub.f32 %v2402_v6, %v2409_v30  ;;  %v16005_v30 = vpack.c.bf16 %v2675_v29, %v2674_v26 }
0x1054   :  { %v2414_v34 = vmul.f32 %v2412_v32, %v2412_v32 }
0x1055   :  { %v2413_v35 = vmul.f32 %v2411_v33, %v2411_v33  ;;  %16006 = vmatpush3.bf16.msra.mxu1 %v16005_v30 }
0x1056   :  { %2417 = vadd.xlane.f32.xlu1 %v2414_v34 }
0x1057   :  { %2415 = vadd.xlane.f32.xlu0 %v2413_v35  ;;  %v2676_v35 = vld [vmem:[%s22241_s12 + $0x20] sm:$0xff] }
0x1058   :  { %v16009_v36 = vpack.c.bf16 %v2677_v48, %v2676_v35 }
0x10e3   :  { %v2418_v1 = vpop.xlane.xlu1 %2417 }
0x10e4   :  { %v2420_v2 = vmul.f32 0.0078125, %v2418_v1  ;;  %v2416_v3 = vpop.xlane.xlu0 %2415  ;;  %v2687_v1 = vld [vmem:[%s22241_s12 + $0x78] sm:$0xff] }
0x10e5   :  { %v2419_v4 = vmul.f32 0.0078125, %v2416_v3  ;;  %v2477_v3 = vlaneseq }
0x10e6   :  { %v2422_v5 = vadd.f32 1e-05, %v2420_v2  ;;  %v16029_v2 = vpack.c.bf16 %v2687_v1, %v2686_v0 }
0x10e7   :  { %v2421_v6 = vadd.f32 1e-05, %v2419_v4  ;;  %v2478_v4 = vshrl.u32 %v2477_v3, 7 }
0x10e8   :  { %17650 = vrsqrt.f32 %v2422_v5 }
0x10e9   :  { %17652 = vrsqrt.f32 %v2421_v6  ;;  %v18996_v5 = vsub.s32 0, %v2478_v4  ;;  %v2475_v6 = vld [vmem:[%s22240_s11] sm:$0x3] }
0x10f2   :  { %v17651_v7 = vpop.eup %17650 }
0x10f3   :  { %v17653_v8 = vpop.eup %17652  ;;  %v2426_v27 = vmul.f32 %v17651_v7, %v2412_v32  ;;  %v2692_v32 = vld [vmem:[%s22241_s12 + $0xa0] sm:$0xff]  ;;  %v19001_v7 = vsub.s32 1, %v2478_v4 }
0x10f4   :  { %v2425_v10 = vmul.f32 %v17653_v8, %v2411_v33  ;;  %v2693_v33 = vld [vmem:[%s22241_s12 + $0xa8] sm:$0xff]  ;;  %v2480_v8 = vrot.slane %v2475_v6, %v18996_v5 }
0x10f5   :  { %v2434_v13 = vmul.f32 %v11285_v9, %v2426_v27  ;;  %v16007_v34 = vpack.c.bf16 %v2693_v33, %v2692_v32 }
0x10f6   :  { %v2433_v11 = vmul.f32 %v11285_v9, %v2425_v10  ;;  %v2484_v9 = vrot.slane %v2475_v6, %v19001_v7 }
0x10f7   :  { %v18897_v14 = vadd.f32 %v11286_v28, %v2434_v13  ;;  %16008 = vmatprep.subr.bf16.mxu1 %v16007_v34 }
0x10f8   :  { %v18893_v12 = vadd.f32 %v11286_v28, %v2433_v11  ;;  %16010 = vmatpush3.bf16.msra.mxu1 %v16009_v36 }
0x10f9   :  { %16012 = vmatprep.subr.bf16.mxu1 %v16011_v38 }
0x10fa   :  { %2552 = vmatmul.mubr.f32.vlgmr.msra.gmra.mrb[28].mxu0 %v18893_v12 }
0x10fb   :  { %2557 = vmatprep.mubr.f32.mxu0 %v17896_v52 }
0x10fc   :  { %16014 = vmatpush3.bf16.msra.mxu1 %v16013_v47 }
0x10fd   :  { %16016 = vmatprep.subr.bf16.mxu1 %v16015_v41 }
0x10fe   :  { %2558 = vmatmul.mubr.f32.gmra.mrb[30].mxu0 %v18897_v14 }
0x1100   :  { %16018 = vmatpush3.bf16.msra.mxu1 %v16017_v44 }
0x1101   :  { %16020 = vmatprep.subr.bf16.mxu1 %v16019_v49 }
0x1104   :  { %16022 = vmatpush3.bf16.msra.mxu1 %v16021_v53 }
0x1105   :  { %16024 = vmatprep.subr.bf16.mxu1 %v16023_v57 }
0x1108   :  { %16026 = vmatpush3.bf16.msra.mxu1 %v16025_v60 }
0x1109   :  { %16028 = vmatprep.subr.bf16.mxu1 %v16027_v63 }
0x110c   :  { %16030 = vmatpush3.bf16.msra.mxu1 %v16029_v2 }
0x11cd   :  { %v2553_v10 = vpop.f32.mrb[28].mxu0 }
0x11ce   :  { %v19005_v27 = vadd.f32 %v2553_v10, %v2480_v8  ;;  %v2555_v28 = vpop.f32.mrb[29].mxu0 }
0x11cf   :  { %v19007_v11 = vadd.f32 %v2555_v28, %v2484_v9 }
0x11d0   :  { %v19010_v13 = vmul.f32 0.70710677, %v19005_v27 }
0x11d1   :  { %v19013_v15 = vmul.f32 0.70710677, %v19007_v11  ;;  %v2559_v16 = vpop.f32.mrb[30].mxu0 }
0x11d2   :  { %v2572_v17 = vand.u32 2147483647, %v19010_v13  ;;  %v19016_v19 = vadd.f32 %v2559_v16, %v2480_v8  ;;  %v2561_v20 = vpop.f32.mrb[31].mxu0  ;;  %vm2652_vm3 = vcmp.lt.f32.partialorder %v19010_v13, 0.0 }
0x11d3   :  { %v2573_v21 = vand.u32 2147483647, %v19013_v15  ;;  %v19019_v22 = vadd.f32 %v2561_v20, %v2484_v9  ;;  %vm2653_vm4 = vcmp.lt.f32.partialorder %v19013_v15, 0.0 }
0x11d4   :  { %v2576_v24 = vmul.f32 0.3275911, %v2572_v17  ;;  %v19022_v25 = vmul.f32 0.70710677, %v19016_v19  ;;  %v2628_v54 = vsub.f32 0.0, %v2572_v17 }
0x11d5   :  { %v2577_v26 = vmul.f32 0.3275911, %v2573_v21  ;;  %v19025_v29 = vmul.f32 0.70710677, %v19019_v22  ;;  %v2629_v38 = vsub.f32 0.0, %v2573_v21 }
0x11d6   :  { %v2580_v30 = vadd.f32 1.0, %v2576_v24  ;;  %v2574_v32 = vand.u32 2147483647, %v19022_v25  ;;  %v2632_v39 = vmul.f32 %v2628_v54, %v2572_v17  ;;  %vm2654_vm5 = vcmp.lt.f32.partialorder %v19022_v25, 0.0  ;;  %v11287_v25 = vld [vmem:[%s22242_s13] ss:$0 sm:$0xff] }
0x11d7   :  { %v2581_v33 = vadd.f32 1.0, %v2577_v26  ;;  %v2575_v34 = vand.u32 2147483647, %v19025_v29  ;;  %v2633_v41 = vmul.f32 %v2629_v38, %v2573_v21  ;;  %vm2655_vm6 = vcmp.lt.f32.partialorder %v19025_v29, 0.0 }
0x11d8   :  { %17654 = vrcp.f32 %v2580_v30  ;;  %v2578_v35 = vmul.f32 0.3275911, %v2574_v32  ;;  %v2630_v47 = vsub.f32 0.0, %v2574_v32  ;;  %v2636_v46 = vmul.f32 1.442695, %v2632_v39 }
0x11d9   :  { %17656 = vrcp.f32 %v2581_v33  ;;  %v2579_v48 = vmul.f32 0.3275911, %v2575_v34  ;;  %v2631_v42 = vsub.f32 0.0, %v2575_v34  ;;  %v2638_v55 = vmul.f32 1.442695, %v2633_v41 }
0x11da   :  { %v2582_v36 = vadd.f32 1.0, %v2578_v35  ;;  %v2634_v49 = vmul.f32 %v2630_v47, %v2574_v32 }
0x11db   :  { %v2583_v37 = vadd.f32 1.0, %v2579_v48  ;;  %v2635_v56 = vmul.f32 %v2631_v42, %v2575_v34 }
0x11dc   :  { %17658 = vrcp.f32 %v2582_v36  ;;  %v2640_v62 = vmul.f32 1.442695, %v2634_v49 }
0x11dd   :  { %17660 = vrcp.f32 %v2583_v37  ;;  %v2642_v2 = vmul.f32 1.442695, %v2635_v56 }
0x11de   :  { %17662 = vpow2.f32 %v2636_v46 }
0x11df   :  { %17664 = vpow2.f32 %v2638_v55 }
0x11e0   :  { %17666 = vpow2.f32 %v2640_v62 }
0x11e1   :  { %17668 = vpow2.f32 %v2642_v2 }
0x11e2   :  { %v17655_v23 = vpop.eup %17654 }
0x11e3   :  { %v17657_v40 = vpop.eup %17656  ;;  %v2592_v31 = vmul.f32 1.0614054, %v17655_v23 }
0x11e4   :  { %v2593_v43 = vmul.f32 1.0614054, %v17657_v40 }
0x11e5   :  { %v2596_v44 = vadd.f32 -1.4531521, %v2592_v31 }
0x11e6   :  { %v17659_v45 = vpop.eup %17658  ;;  %v2597_v50 = vadd.f32 -1.4531521, %v2593_v43 }
0x11e7   :  { %v17661_v51 = vpop.eup %17660  ;;  %v2600_v53 = vmul.f32 %v17655_v23, %v2596_v44  ;;  %v2594_v57 = vmul.f32 1.0614054, %v17659_v45 }
0x11e8   :  { %v2601_v58 = vmul.f32 %v17657_v40, %v2597_v50  ;;  %v2595_v59 = vmul.f32 1.0614054, %v17661_v51  ;;  %v17663_v35 = vpop.eup %17662 }
0x11e9   :  { %v2604_v60 = vadd.f32 1.4214138, %v2600_v53  ;;  %v2598_v61 = vadd.f32 -1.4531521, %v2594_v57  ;;  %v17665_v37 = vpop.eup %17664 }
0x11ea   :  { %v2605_v63 = vadd.f32 1.4214138, %v2601_v58  ;;  %v2599_v0 = vadd.f32 -1.4531521, %v2595_v59  ;;  %v17667_v42 = vpop.eup %17666  ;;  %v2565_v59 = vmul.f32 0.5, %v19007_v11  ;;  %v2566_v11 = vmul.f32 0.5, %v19016_v19 }
0x11eb   :  { %v2608_v1 = vmul.f32 %v17655_v23, %v2604_v60  ;;  %v2602_v3 = vmul.f32 %v17659_v45, %v2598_v61  ;;  %v17669_v46 = vpop.eup %17668 }
0x11ec   :  { %v2609_v4 = vmul.f32 %v17657_v40, %v2605_v63  ;;  %v2603_v6 = vmul.f32 %v17661_v51, %v2599_v0 }
0x11ed   :  { %v2612_v8 = vadd.f32 -0.28449672, %v2608_v1  ;;  %v2606_v9 = vadd.f32 1.4214138, %v2602_v3  ;;  %v2567_v1 = vmul.f32 0.5, %v19019_v22 }
0x11ee   :  { %v2613_v10 = vadd.f32 -0.28449672, %v2609_v4  ;;  %v2607_v28 = vadd.f32 1.4214138, %v2603_v6 }
0x11ef   :  { %v2616_v16 = vmul.f32 %v17655_v23, %v2612_v8  ;;  %v2610_v17 = vmul.f32 %v17659_v45, %v2606_v9 }
0x11f0   :  { %v2617_v20 = vmul.f32 %v17657_v40, %v2613_v10  ;;  %v2611_v21 = vmul.f32 %v17661_v51, %v2607_v28 }
0x11f1   :  { %v2620_v24 = vadd.f32 0.2548296, %v2616_v16  ;;  %v2614_v26 = vadd.f32 -0.28449672, %v2610_v17  ;;  %v11290_v17 = vld [vmem:[%s22257_s3 + $0x200] sm:$0xff] }
0x11f2   :  { %v2621_v30 = vadd.f32 0.2548296, %v2617_v20  ;;  %v2615_v32 = vadd.f32 -0.28449672, %v2611_v21  ;;  %v11291_v20 = vld [vmem:[%s22257_s3 + $0x208] sm:$0xff]  ;;  %v11308_v21 = vld [vmem:[%s22233_s4 + $0x200] sm:$0xff] }
0x11f3   :  { %v2624_v33 = vmul.f32 %v17655_v23, %v2620_v24  ;;  %v2618_v34 = vmul.f32 %v17659_v45, %v2614_v26  ;;  %v16031_v24 = vpack.c.bf16 %v11291_v20, %v11290_v17  ;;  %v11293_v26 = vld [vmem:[%s22257_s3 + $0x218] sm:$0xff] }
0x11f4   :  { %v2625_v48 = vmul.f32 %v17657_v40, %v2621_v30  ;;  %v2619_v36 = vmul.f32 %v17661_v51, %v2615_v32 }
0x11f5   :  { %v2644_v54 = vmul.f32 %v17663_v35, %v2624_v33  ;;  %v2622_v38 = vadd.f32 0.2548296, %v2618_v34  ;;  %v11310_v33 = vld [vmem:[%s22233_s4 + $0x210] sm:$0xff]  ;;  %v11311_v34 = vld [vmem:[%s22233_s4 + $0x218] sm:$0xff]  ;;  %16032 = vmatprep.subr.bf16.mxu0 %v16031_v24 }
0x11f6   :  { %v2645_v39 = vmul.f32 %v17665_v37, %v2625_v48  ;;  %v2623_v47 = vadd.f32 0.2548296, %v2619_v36  ;;  %v16067_v35 = vpack.c.bf16 %v11311_v34, %v11310_v33  ;;  %16034 = vmatpush3.bf16.msra.mxu0 %v16031_v24 }
0x11f7   :  { %v2648_v31 = vsub.f32 1.0, %v2644_v54  ;;  %v2626_v41 = vmul.f32 %v17659_v45, %v2622_v38 }
0x11f8   :  { %v2649_v43 = vsub.f32 1.0, %v2645_v39  ;;  %v2627_v44 = vmul.f32 %v17661_v51, %v2623_v47  ;;  %v2564_v51 = vmul.f32 0.5, %v19005_v27 }
0x11f9   :  { %v2656_v49 = vsub.f32 0.0, %v2648_v31  ;;  %v2646_v50 = vmul.f32 %v17667_v42, %v2626_v41  ;;  %v11294_v41 = vld [vmem:[%s22257_s3 + $0x220] sm:$0xff]  ;;  %v11295_v42 = vld [vmem:[%s22257_s3 + $0x228] sm:$0xff] }
0x11fa   :  { %v2657_v23 = vsub.f32 0.0, %v2649_v43  ;;  %v2647_v53 = vmul.f32 %v17669_v46, %v2627_v44  ;;  %v11312_v44 = vld [vmem:[%s22233_s4 + $0x220] sm:$0xff]  ;;  %v11313_v46 = vld [vmem:[%s22233_s4 + $0x228] sm:$0xff] }
0x11fb   :  { %v2660_v55 = vsel %vm2652_vm3, %v2656_v49, %v2648_v31  ;;  %v2650_v40 = vsub.f32 1.0, %v2646_v50  ;;  %v16071_v49 = vpack.c.bf16 %v11313_v46, %v11312_v44  ;;  %v11296_v50 = vld [vmem:[%s22257_s3 + $0x230] sm:$0xff]  ;;  %v11334_v46 = vld [vmem:[%s22235_s6 + $0x240] sm:$0xff] }
0x11fc   :  { %v2664_v56 = vadd.f32 1.0, %v2660_v55  ;;  %v2661_v57 = vsel %vm2653_vm4, %v2657_v23, %v2649_v43  ;;  %v2651_v58 = vsub.f32 1.0, %v2647_v53  ;;  %v16039_v43 = vpack.c.bf16 %v11295_v42, %v11294_v41  ;;  %v11297_v23 = vld [vmem:[%s22257_s3 + $0x238] sm:$0xff]  ;;  %v11314_v55 = vld [vmem:[%s22233_s4 + $0x230] sm:$0xff] }
0x11fd   :  { %v2665_v45 = vadd.f32 1.0, %v2661_v57  ;;  %v2658_v60 = vsub.f32 0.0, %v2650_v40  ;;  %v16043_v53 = vpack.c.bf16 %v11297_v23, %v11296_v50  ;;  %v11298_v57 = vld [vmem:[%s22257_s3 + $0x240] sm:$0xff]  ;;  %v11332_v42 = vld [vmem:[%s22235_s6 + $0x230] sm:$0xff] }
0x11fe   :  { %v2659_v61 = vsub.f32 0.0, %v2651_v58  ;;  %v2668_v63 = vmul.f32 %v2664_v56, %v2564_v51  ;;  %v11336_v23 = vld [vmem:[%s22235_s6 + $0x250] sm:$0xff] }
0x11ff   :  { %v2669_v13 = vmul.f32 %v2665_v45, %v2565_v59  ;;  %v2662_v62 = vsel %vm2654_vm5, %v2658_v60, %v2650_v40  ;;  %v11315_v40 = vld [vmem:[%s22233_s4 + $0x238] sm:$0xff]  ;;  %v11316_v45 = vld [vmem:[%s22233_s4 + $0x240] sm:$0xff]  ;;  %v11317_v60 = vld [vmem:[%s22233_s4 + $0x248] sm:$0xff] }
0x1200   :  { %v2663_v0 = vsel %vm2655_vm6, %v2659_v61, %v2651_v58  ;;  %v2666_v15 = vadd.f32 1.0, %v2662_v62  ;;  %v16075_v56 = vpack.c.bf16 %v11315_v40, %v11314_v55  ;;  %v11299_v58 = vld [vmem:[%s22257_s3 + $0x248] sm:$0xff]  ;;  %v16079_v51 = vpack.c.bf16 %v11317_v60, %v11316_v45  ;;  %v11300_v61 = vld [vmem:[%s22257_s3 + $0x250] sm:$0xff]  ;;  %v11338_v40 = vld [vmem:[%s22235_s6 + $0x260] sm:$0xff] }
0x1201   :  { %2775 = vmatprep.mubr.f32.mxu1 %v2669_v13  ;;  %v2667_v2 = vadd.f32 1.0, %v2663_v0  ;;  %v16047_v59 = vpack.c.bf16 %v11299_v58, %v11298_v57  ;;  %v11301_v13 = vld [vmem:[%s22257_s3 + $0x258] sm:$0xff]  ;;  %v11340_v58 = vld [vmem:[%s22235_s6 + $0x270] sm:$0xff]  ;;  %v11372_v60 = vld [vmem:[%s22233_s4 + $0x280] sm:$0xff] }
0x1202   :  { %2776 = vmatmul.mubr.f32.vlgmr.msra.gmra.mrb[14].mxu1 %v2668_v63  ;;  %v2670_v4 = vmul.f32 %v2666_v15, %v2566_v11  ;;  %v16051_v62 = vpack.c.bf16 %v11301_v13, %v11300_v61  ;;  %v11318_v63 = vld [vmem:[%s22233_s4 + $0x250] sm:$0xff]  ;;  %v11319_v0 = vld [vmem:[%s22233_s4 + $0x258] sm:$0xff] }
0x1203   :  { %v2671_v3 = vmul.f32 %v2667_v2, %v2567_v1  ;;  %v16083_v15 = vpack.c.bf16 %v11319_v0, %v11318_v63  ;;  %v11302_v1 = vld [vmem:[%s22257_s3 + $0x260] sm:$0xff]  ;;  %v11303_v2 = vld [vmem:[%s22257_s3 + $0x268] sm:$0xff]  ;;  %v11374_v13 = vld [vmem:[%s22233_s4 + $0x290] sm:$0xff] }
0x1204   :  { %v16055_v11 = vpack.c.bf16 %v11303_v2, %v11302_v1  ;;  %v11376_v0 = vld [vmem:[%s22233_s4 + $0x2a0] sm:$0xff]  ;;  %v11378_v2 = vld [vmem:[%s22233_s4 + $0x2b0] sm:$0xff] }
0x1205   :  { %2780 = vmatprep.mubr.f32.mxu1 %v2671_v3  ;;  %v11320_v3 = vld [vmem:[%s22233_s4 + $0x260] sm:$0xff] }
0x1206   :  { %2781 = vmatmul.mubr.f32.gmra.mrb[16].mxu1 %v2670_v4  ;;  %v11321_v4 = vld [vmem:[%s22233_s4 + $0x268] sm:$0xff] }
0x12d5   :  { %v12495_v27 = vpop.f32.mrb[14].mxu1 }
0x12d6   :  { %v12496_v29 = vpop.f32.mrb[15].mxu1 }
0x12d7   :  { %v12497_v6 = vadd.f32 %v12496_v29, %v12495_v27  ;;  %v16087_v27 = vpack.c.bf16 %v11321_v4, %v11320_v3  ;;  %v11305_v29 = vld [vmem:[%s22257_s3 + $0x278] sm:$0xff]  ;;  %v11380_v4 = vld [vmem:[%s22233_s4 + $0x2c0] sm:$0xff] }
0x12d9   :  { %v2778_v8 = vadd.f32 %v12497_v6, %v11287_v25  ;;  %v12498_v9 = vpop.f32.mrb[16].mxu1 }
0x12da   :  { %v12499_v10 = vpop.f32.mrb[17].mxu1 }
0x12db   :  { %v12500_v22 = vadd.f32 %v12499_v10, %v12498_v9  ;;  %v2788_v28 = vadd.f32 %v2778_v8, %v18893_v12  ;;  %v11309_v12 = vld [vmem:[%s22233_s4 + $0x208] sm:$0xff]  ;;  %v11322_v8 = vld [vmem:[%s22233_s4 + $0x270] sm:$0xff]  ;;  %v11323_v9 = vld [vmem:[%s22233_s4 + $0x278] sm:$0xff] }
0x12dc   :  { %v16063_v30 = vpack.c.bf16 %v11309_v12, %v11308_v21  ;;  %v16091_v10 = vpack.c.bf16 %v11323_v9, %v11322_v8  ;;  %v11384_v9 = vld [vmem:[%s22233_s4 + $0x2e0] sm:$0xff] }
0x12dd   :  { %v2783_v16 = vadd.f32 %v12500_v22, %v11287_v25  ;;  %2790 = vadd.xlane.f32.xlu0 %v2788_v28  ;;  %v11304_v25 = vld [vmem:[%s22257_s3 + $0x270] sm:$0xff]  ;;  %v11326_v22 = vld [vmem:[%s22235_s6 + $0x200] sm:$0xff] }
0x12de   :  { %16064 = vmatprep.subr.bf16.mxu1 %v16063_v30  ;;  %v16059_v6 = vpack.c.bf16 %v11305_v29, %v11304_v25  ;;  %v11382_v29 = vld [vmem:[%s22233_s4 + $0x2d0] sm:$0xff] }
0x12df   :  { %v2789_v19 = vadd.f32 %v2783_v16, %v18897_v14  ;;  %v11292_v14 = vld [vmem:[%s22257_s3 + $0x210] sm:$0xff]  ;;  %16066 = vmatpush3.bf16.msra.mxu1 %v16063_v30 }
0x12e0   :  { %v16035_v32 = vpack.c.bf16 %v11293_v26, %v11292_v14  ;;  %16068 = vmatprep.subr.bf16.mxu1 %v16067_v35  ;;  %v11288_v26 = vld [vmem:[%s22245_s16] ss:$0 sm:$0xff] }
0x12e1   :  { %2792 = vadd.xlane.f32.xlu1 %v2789_v19 }
0x12e2   :  { %16036 = vmatprep.subr.bf16.mxu0 %v16035_v32 }
0x12e3   :  { %16038 = vmatpush3.bf16.msra.mxu0 %v16035_v32  ;;  %16070 = vmatpush3.bf16.msra.mxu1 %v16067_v35  ;;  %v11289_v32 = vld [vmem:[%s22246_s17] ss:$0 sm:$0xff] }
0x12e4   :  { %16040 = vmatprep.subr.bf16.mxu0 %v16039_v43  ;;  %16072 = vmatprep.subr.bf16.mxu1 %v16071_v49 }
0x12e7   :  { %16042 = vmatpush3.bf16.msra.mxu0 %v16039_v43  ;;  %16074 = vmatpush3.bf16.msra.mxu1 %v16071_v49  ;;  %v11333_v43 = vld [vmem:[%s22235_s6 + $0x238] sm:$0xff]  ;;  %v11335_v49 = vld [vmem:[%s22235_s6 + $0x248] sm:$0xff] }
0x12e8   :  { %16044 = vmatprep.subr.bf16.mxu0 %v16043_v53  ;;  %16076 = vmatprep.subr.bf16.mxu1 %v16075_v56  ;;  %v16107_v44 = vpack.c.bf16 %v11333_v43, %v11332_v42  ;;  %v16111_v50 = vpack.c.bf16 %v11335_v49, %v11334_v46 }
0x12eb   :  { %16046 = vmatpush3.bf16.msra.mxu0 %v16043_v53  ;;  %16078 = vmatpush3.bf16.msra.mxu1 %v16075_v56  ;;  %v11337_v53 = vld [vmem:[%s22235_s6 + $0x258] sm:$0xff]  ;;  %v11339_v56 = vld [vmem:[%s22235_s6 + $0x268] sm:$0xff] }
0x12ec   :  { %16048 = vmatprep.subr.bf16.mxu0 %v16047_v59  ;;  %16080 = vmatprep.subr.bf16.mxu1 %v16079_v51  ;;  %v16115_v55 = vpack.c.bf16 %v11337_v53, %v11336_v23  ;;  %v16119_v57 = vpack.c.bf16 %v11339_v56, %v11338_v40 }
0x12ef   :  { %16050 = vmatpush3.bf16.msra.mxu0 %v16047_v59  ;;  %16082 = vmatpush3.bf16.msra.mxu1 %v16079_v51  ;;  %v11341_v59 = vld [vmem:[%s22235_s6 + $0x278] sm:$0xff]  ;;  %v11373_v51 = vld [vmem:[%s22233_s4 + $0x288] sm:$0xff] }
0x12f0   :  { %16052 = vmatprep.subr.bf16.mxu0 %v16051_v62  ;;  %16084 = vmatprep.subr.bf16.mxu1 %v16083_v15  ;;  %v16123_v45 = vpack.c.bf16 %v11341_v59, %v11340_v58  ;;  %v16169_v61 = vpack.c.bf16 %v11373_v51, %v11372_v60 }
0x12f3   :  { %16054 = vmatpush3.bf16.msra.mxu0 %v16051_v62  ;;  %16086 = vmatpush3.bf16.msra.mxu1 %v16083_v15  ;;  %v11375_v62 = vld [vmem:[%s22233_s4 + $0x298] sm:$0xff]  ;;  %v11377_v15 = vld [vmem:[%s22233_s4 + $0x2a8] sm:$0xff] }
0x12f4   :  { %16056 = vmatprep.subr.bf16.mxu0 %v16055_v11  ;;  %16088 = vmatprep.subr.bf16.mxu1 %v16087_v27  ;;  %v16173_v63 = vpack.c.bf16 %v11375_v62, %v11374_v13  ;;  %v16177_v1 = vpack.c.bf16 %v11377_v15, %v11376_v0 }
0x12f7   :  { %16058 = vmatpush3.bf16.msra.mxu0 %v16055_v11  ;;  %16090 = vmatpush3.bf16.msra.mxu1 %v16087_v27  ;;  %v11379_v11 = vld [vmem:[%s22233_s4 + $0x2b8] sm:$0xff]  ;;  %v11381_v27 = vld [vmem:[%s22233_s4 + $0x2c8] sm:$0xff] }
0x12f8   :  { %16060 = vmatprep.subr.bf16.mxu0 %v16059_v6  ;;  %16092 = vmatprep.subr.bf16.mxu1 %v16091_v10  ;;  %v16181_v3 = vpack.c.bf16 %v11379_v11, %v11378_v2  ;;  %v16185_v25 = vpack.c.bf16 %v11381_v27, %v11380_v4  ;;  %v11355_v2 = vld [vmem:[%s22257_s3 + $0x288] sm:$0xff] }
0x12fb   :  { %16062 = vmatpush3.bf16.msra.mxu0 %v16059_v6  ;;  %16094 = vmatpush3.bf16.msra.mxu1 %v16091_v10  ;;  %v11383_v6 = vld [vmem:[%s22233_s4 + $0x2d8] sm:$0xff]  ;;  %v11385_v10 = vld [vmem:[%s22233_s4 + $0x2e8] sm:$0xff] }
0x12fc   :  { %v16189_v8 = vpack.c.bf16 %v11383_v6, %v11382_v29  ;;  %v11357_v29 = vld [vmem:[%s22257_s3 + $0x298] sm:$0xff] }
0x136a   :  { %v2791_v48 = vpop.xlane.xlu0 %2790 }
0x136b   :  { %v2794_v36 = vmul.f32 0.0078125, %v2791_v48 }
0x136d   :  { %v19066_v37 = vsub.f32 %v2788_v28, %v2794_v36  ;;  %v11327_v28 = vld [vmem:[%s22235_s6 + $0x208] sm:$0xff]  ;;  %v11328_v36 = vld [vmem:[%s22235_s6 + $0x210] sm:$0xff] }
0x136e   :  { %v2793_v54 = vpop.xlane.xlu1 %2792  ;;  %v16095_v16 = vpack.c.bf16 %v11327_v28, %v11326_v22  ;;  %v16193_v22 = vpack.c.bf16 %v11385_v10, %v11384_v9  ;;  %v11386_v28 = vld [vmem:[%s22233_s4 + $0x2f0] sm:$0xff] }
0x136f   :  { %v2795_v38 = vmul.f32 0.0078125, %v2793_v54  ;;  %v2798_v39 = vmul.f32 %v19066_v37, %v19066_v37  ;;  %v11329_v54 = vld [vmem:[%s22235_s6 + $0x218] sm:$0xff] }
0x1370   :  { %16096 = vmatprep.subr.bf16.mxu0 %v16095_v16 }
0x1371   :  { %v19070_v47 = vsub.f32 %v2789_v19, %v2795_v38  ;;  %2800 = vadd.xlane.f32.xlu0 %v2798_v39  ;;  %v16099_v39 = vpack.c.bf16 %v11329_v54, %v11328_v36 }
0x1373   :  { %v2799_v31 = vmul.f32 %v19070_v47, %v19070_v47 }
0x1375   :  { %2802 = vadd.xlane.f32.xlu1 %v2799_v31  ;;  %v11331_v31 = vld [vmem:[%s22235_s6 + $0x228] sm:$0xff] }
0x13fe   :  { %v2801_v19 = vpop.xlane.xlu0 %2800 }
0x13ff   :  { %v2804_v17 = vmul.f32 0.0078125, %v2801_v19 }
0x1401   :  { %v2806_v20 = vadd.f32 1e-05, %v2804_v17  ;;  %v11325_v17 = vld [vmem:[%s22234_s5 + $0x4] ss:$0 sm:$0xff] }
0x1402   :  { %v2803_v21 = vpop.xlane.xlu1 %2802 }
0x1403   :  { %17670 = vrsqrt.f32 %v2806_v20  ;;  %v2805_v24 = vmul.f32 0.0078125, %v2803_v21  ;;  %v11307_v20 = vld [vmem:[%s22259_s28 + $0x4] ss:$0 sm:$0xff] }
0x1405   :  { %v2807_v12 = vadd.f32 1e-05, %v2805_v24 }
0x1407   :  { %17672 = vrsqrt.f32 %v2807_v12 }
0x140d   :  { %v17671_v14 = vpop.eup %17670 }
0x140e   :  { %v2810_v30 = vmul.f32 %v17671_v14, %v19066_v37 }
0x1410   :  { %v2818_v33 = vmul.f32 %v11288_v26, %v2810_v30 }
0x1411   :  { %v17673_v34 = vpop.eup %17672 }
0x1412   :  { %v19159_v35 = vadd.f32 %v11289_v32, %v2818_v33  ;;  %v2811_v48 = vmul.f32 %v17673_v34, %v19070_v47  ;;  %v11330_v47 = vld [vmem:[%s22235_s6 + $0x220] sm:$0xff] }
0x1413   :  { %v16103_v41 = vpack.c.bf16 %v11331_v31, %v11330_v47  ;;  %v11389_v31 = vld [vmem:[%s22234_s5 + $0x5] ss:$0 sm:$0xff] }
0x1414   :  { %v2819_v38 = vmul.f32 %v11288_v26, %v2811_v48  ;;  %13983 = vmatprep.mubr.f32.mxu0 %v19159_v35  ;;  %14018 = vmatprep.mubr.f32.mxu1 %v19159_v35  ;;  %v11343_v48 = vld [vmem:[%s22236_s7 + $0x4] ss:$0 sm:$0xff] }
0x1416   :  { %v19170_v37 = vadd.f32 %v11289_v32, %v2819_v38 }
0x1418   :  { %13984 = vmatmul.mubr.f32.vlgmr.msra.gmra.mrb[32].mxu0 %v19170_v37  ;;  %14019 = vmatmul.mubr.f32.vlgmr.msra.gmra.mrb[18].mxu1 %v19170_v37 }
0x1419   :  { %16098 = vmatpush3.bf16.msra.mxu0 %v16095_v16  ;;  %14053 = vmatprep.mubr.f32.mxu0 %v19159_v35  ;;  %v11387_v16 = vld [vmem:[%s22233_s4 + $0x2f8] sm:$0xff] }
0x141a   :  { %16100 = vmatprep.subr.bf16.mxu0 %v16099_v39  ;;  %v16197_v19 = vpack.c.bf16 %v11387_v16, %v11386_v28  ;;  %v11359_v28 = vld [vmem:[%s22257_s3 + $0x2a8] sm:$0xff] }
0x141d   :  { %16102 = vmatpush3.bf16.msra.mxu0 %v16099_v39 }
0x141e   :  { %16104 = vmatprep.subr.bf16.mxu0 %v16103_v41 }
0x1421   :  { %16106 = vmatpush3.bf16.msra.mxu0 %v16103_v41 }
0x1422   :  { %16108 = vmatprep.subr.bf16.mxu0 %v16107_v44 }
0x1425   :  { %16110 = vmatpush3.bf16.msra.mxu0 %v16107_v44 }
0x1426   :  { %16112 = vmatprep.subr.bf16.mxu0 %v16111_v50 }
0x1429   :  { %16114 = vmatpush3.bf16.msra.mxu0 %v16111_v50 }
0x142a   :  { %16116 = vmatprep.subr.bf16.mxu0 %v16115_v55 }
0x142d   :  { %16118 = vmatpush3.bf16.msra.mxu0 %v16115_v55  ;;  %v19287_v55 = vld [vmem:[%s22262_s21] ss:$0 sm:$0xff] }
0x142e   :  { %16120 = vmatprep.subr.bf16.mxu0 %v16119_v57 }
0x1431   :  { %16122 = vmatpush3.bf16.msra.mxu0 %v16119_v57 }
0x1432   :  { %16124 = vmatprep.subr.bf16.mxu0 %v16123_v45 }
0x1435   :  { %16126 = vmatpush3.bf16.msra.mxu0 %v16123_v45 }
0x1436   :  { %16170 = vmatprep.subr.bf16.mxu0 %v16169_v61 }
0x1438   :  { %14054 = vmatmul.mubr.f32.vlgmr.msra.gmra.mrb[34].mxu0 %v19170_v37 }
0x1439   :  { %16172 = vmatpush3.bf16.msra.mxu0 %v16169_v61  ;;  %14137 = vmatprep.mubr.f32.mxu0 %v19159_v35 }
0x143a   :  { %16174 = vmatprep.subr.bf16.mxu0 %v16173_v63 }
0x143d   :  { %16176 = vmatpush3.bf16.msra.mxu0 %v16173_v63 }
0x143e   :  { %16178 = vmatprep.subr.bf16.mxu0 %v16177_v1 }
0x1441   :  { %16180 = vmatpush3.bf16.msra.mxu0 %v16177_v1  ;;  %v11354_v1 = vld [vmem:[%s22257_s3 + $0x280] sm:$0xff] }
0x1442   :  { %16182 = vmatprep.subr.bf16.mxu0 %v16181_v3  ;;  %v16137_v11 = vpack.c.bf16 %v11355_v2, %v11354_v1  ;;  %v11424_v1 = vld [vmem:[%s22257_s3 + $0x310] sm:$0xff]  ;;  %v11425_v2 = vld [vmem:[%s22257_s3 + $0x318] sm:$0xff] }
0x1445   :  { %16184 = vmatpush3.bf16.msra.mxu0 %v16181_v3 }
0x1446   :  { %16186 = vmatprep.subr.bf16.mxu0 %v16185_v25 }
0x1449   :  { %16188 = vmatpush3.bf16.msra.mxu0 %v16185_v25  ;;  %v11356_v25 = vld [vmem:[%s22257_s3 + $0x290] sm:$0xff] }
0x144a   :  { %16190 = vmatprep.subr.bf16.mxu0 %v16189_v8  ;;  %v16141_v10 = vpack.c.bf16 %v11357_v29, %v11356_v25  ;;  %v11428_v25 = vld [vmem:[%s22257_s3 + $0x330] sm:$0xff]  ;;  %v11429_v29 = vld [vmem:[%s22257_s3 + $0x338] sm:$0xff] }
0x144d   :  { %16192 = vmatpush3.bf16.msra.mxu0 %v16189_v8 }
0x144e   :  { %16194 = vmatprep.subr.bf16.mxu0 %v16193_v22 }
0x1451   :  { %16196 = vmatpush3.bf16.msra.mxu0 %v16193_v22  ;;  %v11358_v22 = vld [vmem:[%s22257_s3 + $0x2a0] sm:$0xff] }
0x1452   :  { %16198 = vmatprep.subr.bf16.mxu0 %v16197_v19  ;;  %v16145_v16 = vpack.c.bf16 %v11359_v28, %v11358_v22  ;;  %v11432_v22 = vld [vmem:[%s22257_s3 + $0x350] sm:$0xff]  ;;  %v11433_v28 = vld [vmem:[%s22257_s3 + $0x358] sm:$0xff] }
0x1455   :  { %16200 = vmatpush3.bf16.msra.mxu0 %v16197_v19  ;;  %v11360_v19 = vld [vmem:[%s22257_s3 + $0x2b0] sm:$0xff] }
0x1458   :  { %14138 = vmatmul.mubr.f32.vlgmr.msra.gmra.mrb[36].mxu0 %v19170_v37 }
0x14eb   :  { %v13985_v21 = vpop.f32.mrb[32].mxu0  ;;  %v14020_v24 = vpop.f32.mrb[18].mxu1 }
0x14ec   :  { %v3025_v12 = vadd.f32 %v14020_v24, %v11325_v17  ;;  %v2919_v14 = vpop.f32.mrb[33].mxu0  ;;  %v3019_v26 = vpop.f32.mrb[19].mxu1  ;;  %v2925_v34 = vadd.f32 %v13985_v21, %v11307_v20  ;;  %v11362_v21 = vld [vmem:[%s22257_s3 + $0x2c0] sm:$0xff]  ;;  %v11363_v24 = vld [vmem:[%s22257_s3 + $0x2c8] sm:$0xff] }
0x14ed   :  { %v2920_v30 = vadd.f32 %v11307_v20, %v2919_v14  ;;  %v3020_v32 = vadd.f32 %v11325_v17, %v3019_v26  ;;  %v11361_v17 = vld [vmem:[%s22257_s3 + $0x2b8] sm:$0xff]  ;;  %v11364_v14 = vld [vmem:[%s22257_s3 + $0x2d0] sm:$0xff] }
0x14ee   :  { %v16149_v20 = vpack.c.bf16 %v11361_v17, %v11360_v19  ;;  %v11365_v26 = vld [vmem:[%s22257_s3 + $0x2d8] sm:$0xff]  ;;  %v11434_v19 = vld [vmem:[%s22257_s3 + $0x360] sm:$0xff]  ;;  %v11435_v17 = vld [vmem:[%s22257_s3 + $0x368] sm:$0xff] }
0x14ef   :  { %v16127_v33 = vpack.c.bf16 %v3025_v12, %v3020_v32  ;;  %14060 = vmatprep.mubr.msk.f32.mxu1 %vm360_vm0, %v2920_v30  ;;  %v16153_v12 = vpack.c.bf16 %v11363_v24, %v11362_v21  ;;  %v16157_v30 = vpack.c.bf16 %v11365_v26, %v11364_v14  ;;  %v11366_v32 = vld [vmem:[%s22257_s3 + $0x2e0] sm:$0xff]  ;;  %v11436_v21 = vld [vmem:[%s22257_s3 + $0x370] sm:$0xff]  ;;  %v11437_v24 = vld [vmem:[%s22257_s3 + $0x378] sm:$0xff] }
0x14f0   :  { %v11458_v14 = vld [vmem:[%s22235_s6 + $0x300] sm:$0xff]  ;;  %v11459_v26 = vld [vmem:[%s22235_s6 + $0x308] sm:$0xff] }
0x14f1   :  { %16129 = vmatprep.subr.msk.bf16.mxu1 %vm18168_vm1, %v16127_v33 }
0x14f2   :  { %16132 = vmatpush3.bf16.xpose.msk.msra.mxu1 %vm18168_vm1, %v16127_v33  ;;  %v11367_v33 = vld [vmem:[%s22257_s3 + $0x2e8] sm:$0xff] }
0x14f9   :  { %14061 = vmatmul.mubr.msk.f32.vlgmr.msra.gmra.mrb[20].mxu1 %vm360_vm0, %v2925_v34  ;;  %v16161_v34 = vpack.c.bf16 %v11367_v33, %v11366_v32  ;;  %v11460_v32 = vld [vmem:[%s22235_s6 + $0x310] sm:$0xff]  ;;  %v11461_v33 = vld [vmem:[%s22235_s6 + $0x318] sm:$0xff] }
0x150b   :  { %v14055_v36 = vpop.f32.mrb[34].mxu0 }
0x150c   :  { %v3125_v54 = vadd.f32 %v14055_v36, %v11343_v48  ;;  %v3119_v38 = vpop.f32.mrb[35].mxu0  ;;  %v11369_v36 = vld [vmem:[%s22257_s3 + $0x2f8] sm:$0xff] }
0x150d   :  { %v3120_v39 = vadd.f32 %v11343_v48, %v3119_v38  ;;  %v11368_v48 = vld [vmem:[%s22257_s3 + $0x2f0] sm:$0xff]  ;;  %v11390_v38 = vld [vmem:[%s22235_s6 + $0x280] sm:$0xff] }
0x150f   :  { %v16133_v47 = vpack.c.bf16 %v3125_v54, %v3120_v39  ;;  %v16165_v54 = vpack.c.bf16 %v11369_v36, %v11368_v48  ;;  %v11391_v39 = vld [vmem:[%s22235_s6 + $0x288] sm:$0xff]  ;;  %v11462_v48 = vld [vmem:[%s22235_s6 + $0x320] sm:$0xff] }
0x1510   :  { %v11463_v36 = vld [vmem:[%s22235_s6 + $0x328] sm:$0xff] }
0x1511   :  { %16134 = vmatprep.subr.bf16.mxu1 %v16133_v47 }
0x1512   :  { %16136 = vmatpush3.bf16.msra.mxu1 %v16133_v47  ;;  %v16201_v47 = vpack.c.bf16 %v11391_v39, %v11390_v38  ;;  %v11464_v38 = vld [vmem:[%s22235_s6 + $0x330] sm:$0xff]  ;;  %v11465_v39 = vld [vmem:[%s22235_s6 + $0x338] sm:$0xff] }
0x1513   :  { %16138 = vmatprep.subr.bf16.mxu1 %v16137_v11 }
0x152b   :  { %v14139_v41 = vpop.f32.mrb[36].mxu0 }
0x152c   :  { %v3524_v42 = vadd.f32 %v14139_v41, %v11389_v31  ;;  %v3518_v43 = vpop.f32.mrb[37].mxu0  ;;  %v11393_v41 = vld [vmem:[%s22235_s6 + $0x298] sm:$0xff] }
0x152d   :  { %v3519_v44 = vadd.f32 %v11389_v31, %v3518_v43  ;;  %v11392_v31 = vld [vmem:[%s22235_s6 + $0x290] sm:$0xff]  ;;  %v11394_v43 = vld [vmem:[%s22235_s6 + $0x2a0] sm:$0xff] }
0x152f   :  { %v16233_v46 = vpack.c.bf16 %v3524_v42, %v3519_v44  ;;  %v16205_v42 = vpack.c.bf16 %v11393_v41, %v11392_v31  ;;  %v11395_v44 = vld [vmem:[%s22235_s6 + $0x2a8] sm:$0xff]  ;;  %v11466_v31 = vld [vmem:[%s22235_s6 + $0x340] sm:$0xff] }
0x1530   :  { %v11467_v41 = vld [vmem:[%s22235_s6 + $0x348] sm:$0xff] }
0x1531   :  { %16235 = vmatprep.subr.msk.bf16.mxu0 %vm18168_vm1, %v16233_v46 }
0x1532   :  { %16238 = vmatpush3.bf16.xpose.msk.msra.mxu0 %vm18168_vm1, %v16233_v46  ;;  %v16209_v46 = vpack.c.bf16 %v11395_v44, %v11394_v43  ;;  %v11468_v43 = vld [vmem:[%s22235_s6 + $0x350] sm:$0xff]  ;;  %v11469_v44 = vld [vmem:[%s22235_s6 + $0x358] sm:$0xff] }
0x15cc   :  { %v14062_v49 = vpop.f32.mrb[20].mxu1 }
0x15cd   :  { %v3216_v50 = vmul.f32 0.17677669, %v14062_v49  ;;  %v3206_v23 = vpop.f32.mrb[21].mxu1  ;;  %v11396_v49 = vld [vmem:[%s22235_s6 + $0x2b0] sm:$0xff] }
0x15ce   :  { %v3215_v53 = vmul.f32 0.17677669, %v3206_v23 }
0x15cf   :  { %v3218_v40 = vadd.f32 %v19287_v55, %v3216_v50  ;;  %v11397_v50 = vld [vmem:[%s22235_s6 + $0x2b8] sm:$0xff] }
0x15d0   :  { %v3217_v56 = vadd.f32 %v19287_v55, %v3215_v53  ;;  %v16213_v23 = vpack.c.bf16 %v11397_v50, %v11396_v49  ;;  %v11398_v53 = vld [vmem:[%s22235_s6 + $0x2c0] sm:$0xff]  ;;  %v11471_v50 = vld [vmem:[%s22235_s6 + $0x368] sm:$0xff] }
0x15d1   :  { %v3222_v57 = vsel %vm458_vm2, %v3218_v40, -inf  ;;  %v11470_v49 = vld [vmem:[%s22235_s6 + $0x360] sm:$0xff] }
0x15d2   :  { %3223 = vmax.xlane.f32.xlu1 %v3222_v57  ;;  %v3219_v58 = vsel %vm458_vm2, %v3217_v56, -inf  ;;  %v11400_v57 = vld [vmem:[%s22235_s6 + $0x2d0] sm:$0xff] }
0x15d3   :  { %3220 = vmax.xlane.f32.xlu0 %v3219_v58  ;;  %v11401_v58 = vld [vmem:[%s22235_s6 + $0x2d8] sm:$0xff] }
0x165f   :  { %v3224_v59 = vpop.xlane.xlu1 %3223 }
0x1660   :  { %v3226_v45 = vsub.f32 %v3218_v40, %v3224_v59  ;;  %v3221_v60 = vpop.xlane.xlu0 %3220  ;;  %v11399_v40 = vld [vmem:[%s22235_s6 + $0x2c8] sm:$0xff]  ;;  %v16221_v59 = vpack.c.bf16 %v11401_v58, %v11400_v57  ;;  %v11506_v57 = vld [vmem:[%s22233_s4 + $0x380] sm:$0xff] }
0x1661   :  { %v3225_v51 = vsub.f32 %v3217_v56, %v3221_v60  ;;  %v16217_v56 = vpack.c.bf16 %v11399_v40, %v11398_v53  ;;  %v11403_v60 = vld [vmem:[%s22235_s6 + $0x2e8] sm:$0xff]  ;;  %v11472_v53 = vld [vmem:[%s22235_s6 + $0x370] sm:$0xff]  ;;  %v11473_v40 = vld [vmem:[%s22235_s6 + $0x378] sm:$0xff] }
0x1662   :  { %v3229_v61 = vmul.f32 1.442695, %v3226_v45  ;;  %v11402_v45 = vld [vmem:[%s22235_s6 + $0x2e0] sm:$0xff]  ;;  %v11507_v58 = vld [vmem:[%s22233_s4 + $0x388] sm:$0xff] }
0x1663   :  { %v3227_v13 = vmul.f32 1.442695, %v3225_v51  ;;  %v16225_v51 = vpack.c.bf16 %v11403_v60, %v11402_v45  ;;  %v11508_v45 = vld [vmem:[%s22233_s4 + $0x390] sm:$0xff]  ;;  %v11509_v60 = vld [vmem:[%s22233_s4 + $0x398] sm:$0xff] }
0x1664   :  { %17674 = vpow2.f32 %v3229_v61  ;;  %v11404_v61 = vld [vmem:[%s22235_s6 + $0x2f0] sm:$0xff] }
0x1665   :  { %17676 = vpow2.f32 %v3227_v13  ;;  %v11405_v13 = vld [vmem:[%s22235_s6 + $0x2f8] sm:$0xff] }
0x166e   :  { %v17675_v62 = vpop.eup %17674 }
0x166f   :  { %v17677_v63 = vpop.eup %17676  ;;  %v3234_v0 = vsel %vm458_vm2, %v17675_v62, 0.0 }
0x1670   :  { %3235 = vadd.xlane.f32.xlu1 %v3234_v0  ;;  %v3231_v15 = vsel %vm458_vm2, %v17677_v63, 0.0  ;;  %v11423_v0 = vld [vmem:[%s22257_s3 + $0x308] sm:$0xff] }
0x1671   :  { %3232 = vadd.xlane.f32.xlu0 %v3231_v15 }
0x16fd   :  { %v3236_v3 = vpop.xlane.xlu1 %3235 }
0x16fe   :  { %17678 = vrcp.f32 %v3236_v3  ;;  %v3233_v4 = vpop.xlane.xlu0 %3232  ;;  %v11426_v3 = vld [vmem:[%s22257_s3 + $0x320] sm:$0xff] }
0x16ff   :  { %17680 = vrcp.f32 %v3233_v4  ;;  %v11427_v4 = vld [vmem:[%s22257_s3 + $0x328] sm:$0xff] }
0x1708   :  { %v17679_v27 = vpop.eup %17678 }
0x1709   :  { %v17681_v6 = vpop.eup %17680  ;;  %v3240_v9 = vmul.f32 %v17679_v27, %v17675_v62  ;;  %v16229_v62 = vpack.c.bf16 %v11405_v13, %v11404_v61  ;;  %v16267_v27 = vpack.c.bf16 %v11427_v4, %v11426_v3  ;;  %v11510_v61 = vld [vmem:[%s22233_s4 + $0x3a0] sm:$0xff]  ;;  %v11511_v13 = vld [vmem:[%s22233_s4 + $0x3a8] sm:$0xff]  ;;  %v11516_v3 = vld [vmem:[%s22233_s4 + $0x3d0] sm:$0xff] }
0x170a   :  { %v3238_v8 = vmul.f32 %v17681_v6, %v17677_v63  ;;  %v11422_v63 = vld [vmem:[%s22257_s3 + $0x300] sm:$0xff]  ;;  %v16271_v6 = vpack.c.bf16 %v11429_v29, %v11428_v25  ;;  %v11517_v4 = vld [vmem:[%s22233_s4 + $0x3d8] sm:$0xff]  ;;  %v11519_v29 = vld [vmem:[%s22233_s4 + $0x3e8] sm:$0xff] }
0x170b   :  { %v16259_v15 = vpack.c.bf16 %v11423_v0, %v11422_v63  ;;  %v11512_v63 = vld [vmem:[%s22233_s4 + $0x3b0] sm:$0xff]  ;;  %v11513_v0 = vld [vmem:[%s22233_s4 + $0x3b8] sm:$0xff]  ;;  %v11518_v25 = vld [vmem:[%s22233_s4 + $0x3e0] sm:$0xff] }
0x170c   :  { %14067 = vmatprep.mubr.msk.f32.mxu1 %vm458_vm2, %v3238_v8  ;;  %v11430_v8 = vld [vmem:[%s22257_s3 + $0x340] sm:$0xff] }
0x170d   :  { %14068 = vmatmul.mubr.msk.f32.vlgmr.msra.gmra.mrb[22].mxu1 %vm458_vm2, %v3240_v9  ;;  %v11431_v9 = vld [vmem:[%s22257_s3 + $0x348] sm:$0xff] }
0x170e   :  { %16140 = vmatpush3.bf16.msra.mxu1 %v16137_v11  ;;  %14102 = vmatprep.mubr.f32.mxu1 %v19159_v35  ;;  %v16263_v11 = vpack.c.bf16 %v11425_v2, %v11424_v1  ;;  %v11514_v1 = vld [vmem:[%s22233_s4 + $0x3c0] sm:$0xff]  ;;  %v11515_v2 = vld [vmem:[%s22233_s4 + $0x3c8] sm:$0xff] }
0x170f   :  { %16142 = vmatprep.subr.bf16.mxu1 %v16141_v10 }
0x1712   :  { %16144 = vmatpush3.bf16.msra.mxu1 %v16141_v10  ;;  %v16275_v10 = vpack.c.bf16 %v11431_v9, %v11430_v8  ;;  %v11520_v8 = vld [vmem:[%s22233_s4 + $0x3f0] sm:$0xff]  ;;  %v11521_v9 = vld [vmem:[%s22233_s4 + $0x3f8] sm:$0xff] }
0x1713   :  { %16146 = vmatprep.subr.bf16.mxu1 %v16145_v16 }
0x1716   :  { %16148 = vmatpush3.bf16.msra.mxu1 %v16145_v16  ;;  %v16279_v16 = vpack.c.bf16 %v11433_v28, %v11432_v22 }
0x1717   :  { %16150 = vmatprep.subr.bf16.mxu1 %v16149_v20 }
0x171a   :  { %16152 = vmatpush3.bf16.msra.mxu1 %v16149_v20  ;;  %v16283_v20 = vpack.c.bf16 %v11435_v17, %v11434_v19 }
0x171b   :  { %16154 = vmatprep.subr.bf16.mxu1 %v16153_v12 }
0x171e   :  { %16156 = vmatpush3.bf16.msra.mxu1 %v16153_v12  ;;  %v16287_v12 = vpack.c.bf16 %v11437_v24, %v11436_v21  ;;  %v11407_v24 = vld [vmem:[%s22236_s7 + $0x5] ss:$0 sm:$0xff] }
0x171f   :  { %16158 = vmatprep.subr.bf16.mxu1 %v16157_v30 }
0x1722   :  { %16160 = vmatpush3.bf16.msra.mxu1 %v16157_v30  ;;  %v16323_v30 = vpack.c.bf16 %v11459_v26, %v11458_v14 }
0x1723   :  { %16162 = vmatprep.subr.bf16.mxu1 %v16161_v34 }
0x1726   :  { %16164 = vmatpush3.bf16.msra.mxu1 %v16161_v34  ;;  %v16327_v34 = vpack.c.bf16 %v11461_v33, %v11460_v32  ;;  %v19562_v33 = vld [vmem:[%s22259_s28 + $0x6] ss:$0 sm:$0xff] }
0x1727   :  { %16166 = vmatprep.subr.bf16.mxu1 %v16165_v54 }
0x172a   :  { %16168 = vmatpush3.bf16.msra.mxu1 %v16165_v54  ;;  %v16331_v54 = vpack.c.bf16 %v11463_v36, %v11462_v48 }
0x172b   :  { %16202 = vmatprep.subr.bf16.mxu1 %v16201_v47 }
0x172d   :  { %14103 = vmatmul.mubr.f32.vlgmr.msra.gmra.mrb[24].mxu1 %v19170_v37 }
0x172e   :  { %16204 = vmatpush3.bf16.msra.mxu1 %v16201_v47  ;;  %14172 = vmatprep.mubr.f32.mxu1 %v19159_v35  ;;  %v16335_v47 = vpack.c.bf16 %v11465_v39, %v11464_v38 }
0x172f   :  { %16206 = vmatprep.subr.bf16.mxu1 %v16205_v42 }
0x1732   :  { %16208 = vmatpush3.bf16.msra.mxu1 %v16205_v42  ;;  %v16339_v42 = vpack.c.bf16 %v11467_v41, %v11466_v31 }
0x1733   :  { %16210 = vmatprep.subr.bf16.mxu1 %v16209_v46 }
0x1736   :  { %16212 = vmatpush3.bf16.msra.mxu1 %v16209_v46  ;;  %v16343_v46 = vpack.c.bf16 %v11469_v44, %v11468_v43 }
0x1737   :  { %16214 = vmatprep.subr.bf16.mxu1 %v16213_v23 }
0x173a   :  { %16216 = vmatpush3.bf16.msra.mxu1 %v16213_v23  ;;  %v16347_v23 = vpack.c.bf16 %v11471_v50, %v11470_v49 }
0x173b   :  { %16218 = vmatprep.subr.bf16.mxu1 %v16217_v56 }
0x173e   :  { %16220 = vmatpush3.bf16.msra.mxu1 %v16217_v56  ;;  %v16351_v56 = vpack.c.bf16 %v11473_v40, %v11472_v53 }
0x173f   :  { %16222 = vmatprep.subr.bf16.mxu1 %v16221_v59 }
0x1742   :  { %16224 = vmatpush3.bf16.msra.mxu1 %v16221_v59  ;;  %v16405_v59 = vpack.c.bf16 %v11507_v58, %v11506_v57 }
0x1743   :  { %16226 = vmatprep.subr.bf16.mxu1 %v16225_v51 }
0x1746   :  { %16228 = vmatpush3.bf16.msra.mxu1 %v16225_v51  ;;  %v16409_v51 = vpack.c.bf16 %v11509_v60, %v11508_v45 }
0x1747   :  { %16230 = vmatprep.subr.bf16.mxu1 %v16229_v62 }
0x174a   :  { %16232 = vmatpush3.bf16.msra.mxu1 %v16229_v62  ;;  %v16413_v62 = vpack.c.bf16 %v11511_v13, %v11510_v61 }
0x174b   :  { %16260 = vmatprep.subr.bf16.mxu1 %v16259_v15 }
0x174d   :  { %14173 = vmatmul.mubr.f32.vlgmr.msra.gmra.mrb[26].mxu1 %v19170_v37 }
0x174e   :  { %16262 = vmatpush3.bf16.msra.mxu1 %v16259_v15  ;;  %14243 = vmatprep.mubr.f32.mxu1 %v19159_v35  ;;  %v16417_v15 = vpack.c.bf16 %v11513_v0, %v11512_v63 }
0x174f   :  { %16264 = vmatprep.subr.bf16.mxu1 %v16263_v11 }
0x1752   :  { %16266 = vmatpush3.bf16.msra.mxu1 %v16263_v11  ;;  %v16421_v11 = vpack.c.bf16 %v11515_v2, %v11514_v1 }
0x1753   :  { %16268 = vmatprep.subr.bf16.mxu1 %v16267_v27 }
0x1756   :  { %16270 = vmatpush3.bf16.msra.mxu1 %v16267_v27  ;;  %v16425_v27 = vpack.c.bf16 %v11517_v4, %v11516_v3  ;;  %v11415_v3 = vld [vmem:[%s22237_s8 + $0xa8] sm:$0xff] }
0x1757   :  { %16272 = vmatprep.subr.bf16.mxu1 %v16271_v6 }
0x175a   :  { %16274 = vmatpush3.bf16.msra.mxu1 %v16271_v6  ;;  %v16429_v6 = vpack.c.bf16 %v11519_v29, %v11518_v25 }
0x175b   :  { %16276 = vmatprep.subr.bf16.mxu1 %v16275_v10 }
0x175e   :  { %16278 = vmatpush3.bf16.msra.mxu1 %v16275_v10  ;;  %v16433_v10 = vpack.c.bf16 %v11521_v9, %v11520_v8  ;;  %v11417_v8 = vld [vmem:[%s22237_s8 + $0xb8] sm:$0xff] }
0x175f   :  { %16280 = vmatprep.subr.bf16.mxu1 %v16279_v16 }
0x1762   :  { %16282 = vmatpush3.bf16.msra.mxu1 %v16279_v16  ;;  %v11371_v16 = vld [vmem:[%s22259_s28 + $0x5] ss:$0 sm:$0xff] }
0x1763   :  { %16284 = vmatprep.subr.bf16.mxu1 %v16283_v20 }
0x1766   :  { %16286 = vmatpush3.bf16.msra.mxu1 %v16283_v20 }
0x1767   :  { %16288 = vmatprep.subr.bf16.mxu1 %v16287_v12 }
0x176a   :  { %16290 = vmatpush3.bf16.msra.mxu1 %v16287_v12 }
0x176b   :  { %16324 = vmatprep.subr.bf16.mxu1 %v16323_v30 }
0x176d   :  { %14244 = vmatmul.mubr.f32.vlgmr.msra.gmra.mrb[28].mxu1 %v19170_v37 }
0x176e   :  { %16326 = vmatpush3.bf16.msra.mxu1 %v16323_v30  ;;  %14313 = vmatprep.mubr.f32.mxu1 %v19159_v35 }
0x176f   :  { %16328 = vmatprep.subr.bf16.mxu1 %v16327_v34 }
0x1772   :  { %16330 = vmatpush3.bf16.msra.mxu1 %v16327_v34 }
0x1773   :  { %16332 = vmatprep.subr.bf16.mxu1 %v16331_v54 }
0x1776   :  { %16334 = vmatpush3.bf16.msra.mxu1 %v16331_v54  ;;  %v11475_v54 = vld [vmem:[%s22236_s7 + $0x6] ss:$0 sm:$0xff] }
0x1777   :  { %16336 = vmatprep.subr.bf16.mxu1 %v16335_v47 }
0x177a   :  { %16338 = vmatpush3.bf16.msra.mxu1 %v16335_v47 }
0x177b   :  { %16340 = vmatprep.subr.bf16.mxu1 %v16339_v42 }
0x177e   :  { %16342 = vmatpush3.bf16.msra.mxu1 %v16339_v42  ;;  %v11523_v42 = vld [vmem:[%s22234_s5 + $0x7] ss:$0 sm:$0xff] }
0x177f   :  { %16344 = vmatprep.subr.bf16.mxu1 %v16343_v46 }
0x1782   :  { %16346 = vmatpush3.bf16.msra.mxu1 %v16343_v46 }
0x1783   :  { %16348 = vmatprep.subr.bf16.mxu1 %v16347_v23 }
0x1786   :  { %16350 = vmatpush3.bf16.msra.mxu1 %v16347_v23 }
0x1787   :  { %16352 = vmatprep.subr.bf16.mxu1 %v16351_v56 }
0x178a   :  { %16354 = vmatpush3.bf16.msra.mxu1 %v16351_v56 }
0x178b   :  { %16406 = vmatprep.subr.bf16.mxu1 %v16405_v59 }
0x178d   :  { %14314 = vmatmul.mubr.f32.vlgmr.msra.gmra.mrb[30].mxu1 %v19170_v37 }
0x178e   :  { %16408 = vmatpush3.bf16.msra.mxu1 %v16405_v59  ;;  %14408 = vmatprep.mubr.f32.mxu1 %v19159_v35 }
0x178f   :  { %16410 = vmatprep.subr.bf16.mxu1 %v16409_v51 }
0x1792   :  { %16412 = vmatpush3.bf16.msra.mxu1 %v16409_v51 }
0x1793   :  { %16414 = vmatprep.subr.bf16.mxu1 %v16413_v62 }
0x1796   :  { %16416 = vmatpush3.bf16.msra.mxu1 %v16413_v62 }
0x1797   :  { %16418 = vmatprep.subr.bf16.mxu1 %v16417_v15 }
0x179a   :  { %16420 = vmatpush3.bf16.msra.mxu1 %v16417_v15 }
0x179b   :  { %16422 = vmatprep.subr.bf16.mxu1 %v16421_v11 }
0x179e   :  { %16424 = vmatpush3.bf16.msra.mxu1 %v16421_v11  ;;  %v11414_v11 = vld [vmem:[%s22237_s8 + $0xa0] sm:$0xff] }
0x179f   :  { %16426 = vmatprep.subr.bf16.mxu1 %v16425_v27  ;;  %v16243_v4 = vpack.c.bf16 %v11415_v3, %v11414_v11 }
0x17a2   :  { %16428 = vmatpush3.bf16.msra.mxu1 %v16425_v27 }
0x17a3   :  { %16430 = vmatprep.subr.bf16.mxu1 %v16429_v6 }
0x17a6   :  { %16432 = vmatpush3.bf16.msra.mxu1 %v16429_v6  ;;  %v11416_v6 = vld [vmem:[%s22237_s8 + $0xb0] sm:$0xff] }
0x17a7   :  { %16434 = vmatprep.subr.bf16.mxu1 %v16433_v10 }
0x17aa   :  { %16436 = vmatpush3.bf16.msra.mxu1 %v16433_v10 }
0x17ad   :  { %14409 = vmatmul.mubr.f32.vlgmr.msra.gmra.mrb[32].mxu1 %v19170_v37 }
0x17e0   :  { %v19547_v22 = vpop.f32.mrb[22].mxu1 }
0x17e1   :  { %v19549_v28 = vpop.f32.mrb[23].mxu1 }
0x1800   :  { %v14104_v19 = vpop.f32.mrb[24].mxu1 }
0x1801   :  { %v3418_v17 = vpop.f32.mrb[25].mxu1  ;;  %v3424_v21 = vadd.f32 %v14104_v19, %v11371_v16  ;;  %v16247_v19 = vpack.c.bf16 %v11417_v8, %v11416_v6 }
0x1802   :  { %v3419_v20 = vadd.f32 %v11371_v16, %v3418_v17  ;;  %v11350_v17 = vld [vmem:[%s22237_s8 + $0x80] sm:$0xff] }
0x1804   :  { %14179 = vmatprep.mubr.msk.f32.mxu0 %vm360_vm0, %v3419_v20  ;;  %v11351_v20 = vld [vmem:[%s22237_s8 + $0x88] sm:$0xff] }
0x1805   :  { %14180 = vmatmul.mubr.msk.f32.vlgmr.msra.gmra.mrb[38].mxu0 %vm360_vm0, %v3424_v21  ;;  %v16251_v21 = vpack.c.bf16 %v11351_v20, %v11350_v17  ;;  %v11483_v17 = vld [vmem:[%s22237_s8 + $0xc8] sm:$0xff] }
0x1820   :  { %v14174_v12 = vpop.f32.mrb[26].mxu1 }
0x1821   :  { %v3624_v14 = vadd.f32 %v14174_v12, %v11407_v24  ;;  %v3618_v26 = vpop.f32.mrb[27].mxu1  ;;  %v11353_v12 = vld [vmem:[%s22237_s8 + $0x98] sm:$0xff] }
0x1822   :  { %v3619_v30 = vadd.f32 %v11407_v24, %v3618_v26  ;;  %v11352_v24 = vld [vmem:[%s22237_s8 + $0x90] sm:$0xff] }
0x1824   :  { %v16239_v32 = vpack.c.bf16 %v3624_v14, %v3619_v30  ;;  %v16255_v30 = vpack.c.bf16 %v11353_v12, %v11352_v24 }
0x1826   :  { %16240 = vmatprep.subr.bf16.mxu0 %v16239_v32 }
0x1827   :  { %16242 = vmatpush3.bf16.msra.mxu0 %v16239_v32  ;;  %v11440_v32 = vld [vmem:[%s22233_s4 + $0x300] sm:$0xff] }
0x1828   :  { %16244 = vmatprep.subr.bf16.mxu0 %v16243_v4 }
0x1840   :  { %v14245_v34 = vpop.f32.mrb[28].mxu1 }
0x1841   :  { %v19565_v48 = vadd.f32 %v14245_v34, %v19562_v33  ;;  %v19567_v36 = vpop.f32.mrb[29].mxu1  ;;  %v11441_v34 = vld [vmem:[%s22233_s4 + $0x308] sm:$0xff] }
0x1860   :  { %v14315_v38 = vpop.f32.mrb[30].mxu1 }
0x1861   :  { %v4285_v39 = vadd.f32 %v14315_v38, %v11475_v54  ;;  %v4279_v47 = vpop.f32.mrb[31].mxu1  ;;  %v11442_v38 = vld [vmem:[%s22233_s4 + $0x310] sm:$0xff] }
0x1862   :  { %v4280_v31 = vadd.f32 %v11475_v54, %v4279_v47  ;;  %v16291_v54 = vpack.c.bf16 %v11441_v34, %v11440_v32 }
0x1864   :  { %v19572_v41 = vpack.c.bf16 %v4285_v39, %v4280_v31  ;;  %v11443_v39 = vld [vmem:[%s22233_s4 + $0x318] sm:$0xff]  ;;  %v11444_v31 = vld [vmem:[%s22233_s4 + $0x320] sm:$0xff] }
0x1865   :  { %v16295_v47 = vpack.c.bf16 %v11443_v39, %v11442_v38  ;;  %v11488_v38 = vld [vmem:[%s22257_s3 + $0x380] sm:$0xff]  ;;  %v11489_v39 = vld [vmem:[%s22257_s3 + $0x388] sm:$0xff] }
0x1880   :  { %v14410_v43 = vpop.f32.mrb[32].mxu1 }
0x1881   :  { %v4767_v44 = vadd.f32 %v14410_v43, %v11523_v42  ;;  %v4761_v46 = vpop.f32.mrb[33].mxu1  ;;  %v11446_v43 = vld [vmem:[%s22233_s4 + $0x330] sm:$0xff] }
0x1882   :  { %v4762_v49 = vadd.f32 %v11523_v42, %v4761_v46 }
0x1884   :  { %v16469_v50 = vpack.c.bf16 %v4767_v44, %v4762_v49  ;;  %v11447_v44 = vld [vmem:[%s22233_s4 + $0x338] sm:$0xff]  ;;  %v11449_v49 = vld [vmem:[%s22233_s4 + $0x348] sm:$0xff] }
0x1885   :  { %v16303_v46 = vpack.c.bf16 %v11447_v44, %v11446_v43 }
0x1886   :  { %16471 = vmatprep.subr.msk.bf16.mxu1 %vm18168_vm1, %v16469_v50 }
0x1887   :  { %16474 = vmatpush3.bf16.xpose.msk.msra.mxu1 %vm18168_vm1, %v16469_v50 }
0x18d8   :  { %v14181_v23 = vpop.f32.mrb[38].mxu0 }
0x18d9   :  { %v3715_v53 = vmul.f32 0.17677669, %v14181_v23  ;;  %v3705_v40 = vpop.f32.mrb[39].mxu0  ;;  %v11450_v23 = vld [vmem:[%s22233_s4 + $0x350] sm:$0xff] }
0x18da   :  { %v3714_v56 = vmul.f32 0.17677669, %v3705_v40 }
0x18db   :  { %v3717_v57 = vadd.f32 %v19287_v55, %v3715_v53  ;;  %v11451_v53 = vld [vmem:[%s22233_s4 + $0x358] sm:$0xff] }
0x18dc   :  { %v3716_v58 = vadd.f32 %v19287_v55, %v3714_v56  ;;  %v16311_v40 = vpack.c.bf16 %v11451_v53, %v11450_v23  ;;  %v11452_v56 = vld [vmem:[%s22233_s4 + $0x360] sm:$0xff]  ;;  %v11495_v23 = vld [vmem:[%s22257_s3 + $0x3b8] sm:$0xff] }
0x18dd   :  { %v3721_v59 = vsel %vm458_vm2, %v3717_v57, -inf }
0x18de   :  { %3722 = vmax.xlane.f32.xlu1 %v3721_v59  ;;  %v3718_v45 = vsel %vm458_vm2, %v3716_v58, -inf  ;;  %v11454_v59 = vld [vmem:[%s22233_s4 + $0x370] sm:$0xff] }
0x18df   :  { %3719 = vmax.xlane.f32.xlu0 %v3718_v45  ;;  %v11455_v45 = vld [vmem:[%s22233_s4 + $0x378] sm:$0xff] }
0x196b   :  { %v3723_v60 = vpop.xlane.xlu1 %3722 }
0x196c   :  { %v3725_v51 = vsub.f32 %v3717_v57, %v3723_v60  ;;  %v3720_v61 = vpop.xlane.xlu0 %3719  ;;  %v11453_v57 = vld [vmem:[%s22233_s4 + $0x368] sm:$0xff]  ;;  %v16319_v60 = vpack.c.bf16 %v11455_v45, %v11454_v59  ;;  %v11499_v59 = vld [vmem:[%s22257_s3 + $0x3d8] sm:$0xff] }
0x196d   :  { %v3724_v13 = vsub.f32 %v3716_v58, %v3720_v61  ;;  %v16315_v58 = vpack.c.bf16 %v11453_v57, %v11452_v56  ;;  %v11457_v61 = vld [vmem:[%s22234_s5 + $0x6] ss:$0 sm:$0xff]  ;;  %v11497_v56 = vld [vmem:[%s22257_s3 + $0x3c8] sm:$0xff] }
0x196e   :  { %v3728_v62 = vmul.f32 1.442695, %v3725_v51  ;;  %v4080_v51 = vadd.f32 %v19562_v33, %v19567_v36 }
0x196f   :  { %v3726_v63 = vmul.f32 1.442695, %v3724_v13 }
0x1970   :  { %17682 = vpow2.f32 %v3728_v62 }
0x1971   :  { %17684 = vpow2.f32 %v3726_v63 }
0x197a   :  { %v17683_v0 = vpop.eup %17682 }
0x197b   :  { %v17685_v15 = vpop.eup %17684  ;;  %v3733_v1 = vsel %vm458_vm2, %v17683_v0, 0.0 }
0x197c   :  { %3734 = vadd.xlane.f32.xlu1 %v3733_v1  ;;  %v3730_v2 = vsel %vm458_vm2, %v17685_v15, 0.0 }
0x197d   :  { %3731 = vadd.xlane.f32.xlu0 %v3730_v2 }
0x1a09   :  { %v3735_v27 = vpop.xlane.xlu1 %3734 }
0x1a0a   :  { %17686 = vrcp.f32 %v3735_v27  ;;  %v3732_v25 = vpop.xlane.xlu0 %3731 }
0x1a0b   :  { %17688 = vrcp.f32 %v3732_v25 }
0x1a14   :  { %v17687_v29 = vpop.eup %17686 }
0x1a15   :  { %v17689_v9 = vpop.eup %17688  ;;  %v3739_v16 = vmul.f32 %v17687_v29, %v17683_v0 }
0x1a16   :  { %v3737_v10 = vmul.f32 %v17689_v9, %v17685_v15 }
0x1a18   :  { %14186 = vmatprep.mubr.msk.f32.mxu0 %vm458_vm2, %v3737_v10 }
0x1a19   :  { %14187 = vmatmul.mubr.msk.f32.vlgmr.msra.gmra.mrb[40].mxu0 %vm458_vm2, %v3739_v16 }
0x1a1a   :  { %16246 = vmatpush3.bf16.msra.mxu0 %v16243_v4 }
0x1a1b   :  { %16248 = vmatprep.subr.bf16.mxu0 %v16247_v19 }
0x1a1e   :  { %16250 = vmatpush3.bf16.msra.mxu0 %v16247_v19  ;;  %v11482_v19 = vld [vmem:[%s22237_s8 + $0xc0] sm:$0xff] }
0x1a1f   :  { %16252 = vmatprep.subr.bf16.mxu0 %v16251_v21  ;;  %v16365_v20 = vpack.c.bf16 %v11483_v17, %v11482_v19  ;;  %v11538_v17 = vld [vmem:[%s22235_s6 + $0x3f0] sm:$0xff] }
0x1aec   :  { %v14188_v14 = vpop.f32.mrb[40].mxu0 }
0x1aed   :  { %v3812_v26 = vpop.f32.mrb[41].mxu0 }
0x1aee   :  { %14197 = vmatprep.mubr.msk.f32.mxu0 %vm360_vm0, %v3812_v26  ;;  %v11485_v26 = vld [vmem:[%s22237_s8 + $0xd8] sm:$0xff] }
0x1aef   :  { %14198 = vmatmul.mubr.msk.f32.vlgmr.msra.gmra.mrb[42].mxu0 %vm360_vm0, %v14188_v14  ;;  %v11484_v14 = vld [vmem:[%s22237_s8 + $0xd0] sm:$0xff] }
0x1af0   :  { %16254 = vmatpush3.bf16.msra.mxu0 %v16251_v21  ;;  %14208 = vmatprep.mubr.msk.f32.mxu0 %vm360_vm0, %v19549_v28  ;;  %v11445_v28 = vld [vmem:[%s22233_s4 + $0x328] sm:$0xff] }
0x1af1   :  { %16256 = vmatprep.subr.bf16.mxu0 %v16255_v30  ;;  %v16299_v42 = vpack.c.bf16 %v11445_v28, %v11444_v31  ;;  %v11490_v31 = vld [vmem:[%s22257_s3 + $0x390] sm:$0xff]  ;;  %v11491_v28 = vld [vmem:[%s22257_s3 + $0x398] sm:$0xff] }
0x1af2   :  { %v16377_v44 = vpack.c.bf16 %v11491_v28, %v11490_v31 }
0x1af4   :  { %16258 = vmatpush3.bf16.msra.mxu0 %v16255_v30 }
0x1af5   :  { %16292 = vmatprep.subr.bf16.mxu0 %v16291_v54 }
0x1af7   :  { %14209 = vmatmul.mubr.msk.f32.vlgmr.msra.gmra.mrb[42].mxu0 %vm360_vm0, %v19547_v22  ;;  %v11448_v22 = vld [vmem:[%s22233_s4 + $0x340] sm:$0xff] }
0x1af8   :  { %16294 = vmatpush3.bf16.msra.mxu0 %v16291_v54  ;;  %14278 = vmatprep.mubr.f32.mxu0 %v19159_v35  ;;  %v16307_v50 = vpack.c.bf16 %v11449_v49, %v11448_v22  ;;  %v16369_v54 = vpack.c.bf16 %v11485_v26, %v11484_v14  ;;  %v11493_v22 = vld [vmem:[%s22257_s3 + $0x3a8] sm:$0xff] }
0x1af9   :  { %16296 = vmatprep.subr.bf16.mxu0 %v16295_v47 }
0x1afc   :  { %16298 = vmatpush3.bf16.msra.mxu0 %v16295_v47  ;;  %v16373_v47 = vpack.c.bf16 %v11489_v39, %v11488_v38 }
0x1afd   :  { %16300 = vmatprep.subr.bf16.mxu0 %v16299_v42 }
0x1b00   :  { %16302 = vmatpush3.bf16.msra.mxu0 %v16299_v42 }
0x1b01   :  { %16304 = vmatprep.subr.bf16.mxu0 %v16303_v46 }
0x1b04   :  { %16306 = vmatpush3.bf16.msra.mxu0 %v16303_v46  ;;  %v11492_v46 = vld [vmem:[%s22257_s3 + $0x3a0] sm:$0xff] }
0x1b05   :  { %16308 = vmatprep.subr.bf16.mxu0 %v16307_v50  ;;  %v16381_v49 = vpack.c.bf16 %v11493_v22, %v11492_v46 }
0x1b08   :  { %16310 = vmatpush3.bf16.msra.mxu0 %v16307_v50  ;;  %v11494_v50 = vld [vmem:[%s22257_s3 + $0x3b0] sm:$0xff] }
0x1b09   :  { %16312 = vmatprep.subr.bf16.mxu0 %v16311_v40  ;;  %v16385_v53 = vpack.c.bf16 %v11495_v23, %v11494_v50 }
0x1b0c   :  { %16314 = vmatpush3.bf16.msra.mxu0 %v16311_v40  ;;  %v11496_v40 = vld [vmem:[%s22257_s3 + $0x3c0] sm:$0xff] }
0x1b0d   :  { %16316 = vmatprep.subr.bf16.mxu0 %v16315_v58  ;;  %v16389_v57 = vpack.c.bf16 %v11497_v56, %v11496_v40 }
0x1b10   :  { %16318 = vmatpush3.bf16.msra.mxu0 %v16315_v58  ;;  %v11498_v58 = vld [vmem:[%s22257_s3 + $0x3d0] sm:$0xff] }
0x1b11   :  { %16320 = vmatprep.subr.bf16.mxu0 %v16319_v60  ;;  %v16393_v45 = vpack.c.bf16 %v11499_v59, %v11498_v58 }
0x1b14   :  { %16322 = vmatpush3.bf16.msra.mxu0 %v16319_v60  ;;  %v11500_v60 = vld [vmem:[%s22257_s3 + $0x3e0] sm:$0xff] }
0x1b17   :  { %14279 = vmatmul.mubr.f32.vlgmr.msra.gmra.mrb[44].mxu0 %v19170_v37 }
0x1b18   :  { %14320 = vmatprep.mubr.msk.f32.mxu0 %vm360_vm0, %v4080_v51  ;;  %v11501_v51 = vld [vmem:[%s22257_s3 + $0x3e8] sm:$0xff] }
0x1bea   :  { %v14280_v13 = vpop.f32.mrb[44].mxu0 }
0x1beb   :  { %v4185_v62 = vadd.f32 %v14280_v13, %v11457_v61  ;;  %v4179_v63 = vpop.f32.mrb[45].mxu0  ;;  %v11502_v13 = vld [vmem:[%s22257_s3 + $0x3f0] sm:$0xff] }
0x1bec   :  { %v4180_v0 = vadd.f32 %v11457_v61, %v4179_v63  ;;  %v16397_v61 = vpack.c.bf16 %v11501_v51, %v11500_v60 }
0x1bee   :  { %v16355_v15 = vpack.c.bf16 %v4185_v62, %v4180_v0  ;;  %v11503_v62 = vld [vmem:[%s22257_s3 + $0x3f8] sm:$0xff]  ;;  %v11524_v0 = vld [vmem:[%s22235_s6 + $0x380] sm:$0xff] }
0x1bef   :  { %v16401_v63 = vpack.c.bf16 %v11503_v62, %v11502_v13  ;;  %v11549_v13 = vld [vmem:[%s22237_s8 + $0xe8] sm:$0xff]  ;;  %v11550_v62 = vld [vmem:[%s22237_s8 + $0xf0] sm:$0xff] }
0x1bf0   :  { %16357 = vmatprep.subr.msk.bf16.mxu0 %vm18168_vm1, %v16355_v15 }
0x1bf1   :  { %16360 = vmatpush3.bf16.xpose.msk.msra.mxu0 %vm18168_vm1, %v16355_v15  ;;  %v11525_v15 = vld [vmem:[%s22235_s6 + $0x388] sm:$0xff] }
0x1bf2   :  { %16362 = vmatprep.subr.bf16.mxu0 %v19572_v41 }
0x1bf8   :  { %14321 = vmatmul.mubr.msk.f32.vlgmr.msra.gmra.mrb[46].mxu0 %vm360_vm0, %v19565_v48 }
0x1bf9   :  { %16364 = vmatpush3.bf16.msra.mxu0 %v19572_v41 }
0x1bfa   :  { %16366 = vmatprep.subr.bf16.mxu0 %v16365_v20 }
0x1ccb   :  { %v14322_v33 = vpop.f32.mrb[46].mxu0 }
0x1ccc   :  { %v4376_v36 = vmul.f32 0.17677669, %v14322_v33  ;;  %v4366_v1 = vpop.f32.mrb[47].mxu0  ;;  %v16437_v33 = vpack.c.bf16 %v11525_v15, %v11524_v0  ;;  %v11551_v0 = vld [vmem:[%s22237_s8 + $0xf8] sm:$0xff] }
0x1ccd   :  { %v4375_v2 = vmul.f32 0.17677669, %v4366_v1  ;;  %v11527_v1 = vld [vmem:[%s22235_s6 + $0x398] sm:$0xff]  ;;  %v16483_v15 = vpack.c.bf16 %v11551_v0, %v11550_v62  ;;  %v11585_v0 = vld [vmem:[%s22239_s10 + $0x1c8] sm:$0xff] }
0x1cce   :  { %v4378_v11 = vadd.f32 %v19287_v55, %v4376_v36  ;;  %v11526_v36 = vld [vmem:[%s22235_s6 + $0x390] sm:$0xff] }
0x1ccf   :  { %v4377_v3 = vadd.f32 %v19287_v55, %v4375_v2  ;;  %v16441_v2 = vpack.c.bf16 %v11527_v1, %v11526_v36 }
0x1cd0   :  { %v4382_v4 = vsel %vm458_vm2, %v4378_v11, -inf }
0x1cd1   :  { %4383 = vmax.xlane.f32.xlu1 %v4382_v4  ;;  %v4379_v27 = vsel %vm458_vm2, %v4377_v3, -inf }
0x1cd2   :  { %4380 = vmax.xlane.f32.xlu0 %v4379_v27  ;;  %v11530_v27 = vld [vmem:[%s22235_s6 + $0x3b0] sm:$0xff] }
0x1d5e   :  { %v4384_v25 = vpop.xlane.xlu1 %4383 }
0x1d5f   :  { %v4386_v29 = vsub.f32 %v4378_v11, %v4384_v25  ;;  %v4381_v6 = vpop.xlane.xlu0 %4380  ;;  %v11528_v11 = vld [vmem:[%s22235_s6 + $0x3a0] sm:$0xff]  ;;  %v11531_v25 = vld [vmem:[%s22235_s6 + $0x3b8] sm:$0xff] }
0x1d60   :  { %v4385_v48 = vsub.f32 %v4377_v3, %v4381_v6  ;;  %v11529_v3 = vld [vmem:[%s22235_s6 + $0x3a8] sm:$0xff]  ;;  %v11532_v6 = vld [vmem:[%s22235_s6 + $0x3c0] sm:$0xff] }
0x1d61   :  { %v4389_v8 = vmul.f32 1.442695, %v4386_v29  ;;  %v16445_v4 = vpack.c.bf16 %v11529_v3, %v11528_v11  ;;  %v16449_v29 = vpack.c.bf16 %v11531_v25, %v11530_v27  ;;  %v11555_v25 = vld [vmem:[%s22238_s9 + $0x1] ss:$0 sm:$0xff] }
0x1d62   :  { %v4387_v41 = vmul.f32 1.442695, %v4385_v48  ;;  %v11533_v48 = vld [vmem:[%s22235_s6 + $0x3c8] sm:$0xff] }
0x1d63   :  { %17690 = vpow2.f32 %v4389_v8  ;;  %v16453_v8 = vpack.c.bf16 %v11533_v48, %v11532_v6 }
0x1d64   :  { %17692 = vpow2.f32 %v4387_v41  ;;  %v11534_v41 = vld [vmem:[%s22235_s6 + $0x3d0] sm:$0xff] }
0x1d6d   :  { %v17691_v9 = vpop.eup %17690 }
0x1d6e   :  { %v17693_v10 = vpop.eup %17692  ;;  %v4394_v16 = vsel %vm458_vm2, %v17691_v9, 0.0 }
0x1d6f   :  { %4395 = vadd.xlane.f32.xlu1 %v4394_v16  ;;  %v4391_v55 = vsel %vm458_vm2, %v17693_v10, 0.0  ;;  %v11536_v16 = vld [vmem:[%s22235_s6 + $0x3e0] sm:$0xff] }
0x1d70   :  { %4392 = vadd.xlane.f32.xlu0 %v4391_v55  ;;  %v11537_v55 = vld [vmem:[%s22235_s6 + $0x3e8] sm:$0xff] }
0x1d71   :  { %v16461_v19 = vpack.c.bf16 %v11537_v55, %v11536_v16  ;;  %v11563_v16 = vld [vmem:[%s22239_s10 + $0x118] sm:$0xff]  ;;  %v11560_v55 = vld [vmem:[%s22239_s10 + $0x100] sm:$0xff] }
0x1dfc   :  { %v4396_v21 = vpop.xlane.xlu1 %4395 }
0x1dfd   :  { %17694 = vrcp.f32 %v4396_v21  ;;  %v4393_v24 = vpop.xlane.xlu0 %4392 }
0x1dfe   :  { %17696 = vrcp.f32 %v4393_v24  ;;  %v11505_v24 = vld [vmem:[%s22259_s28 + $0x7] ss:$0 sm:$0xff] }
0x1e07   :  { %v17695_v12 = vpop.eup %17694 }
0x1e08   :  { %v17697_v30 = vpop.eup %17696  ;;  %v4400_v34 = vmul.f32 %v17695_v12, %v17691_v9  ;;  %v11535_v9 = vld [vmem:[%s22235_s6 + $0x3d8] sm:$0xff] }
0x1e09   :  { %v4398_v32 = vmul.f32 %v17697_v30, %v17693_v10  ;;  %v16457_v10 = vpack.c.bf16 %v11535_v9, %v11534_v41 }
0x1e0b   :  { %14327 = vmatprep.mubr.msk.f32.mxu0 %vm458_vm2, %v4398_v32  ;;  %v11541_v32 = vld [vmem:[%s22236_s7 + $0x7] ss:$0 sm:$0xff] }
0x1e0c   :  { %14328 = vmatmul.mubr.msk.f32.vlgmr.msra.gmra.mrb[48].mxu0 %vm458_vm2, %v4400_v34 }
0x1e0d   :  { %16368 = vmatpush3.bf16.msra.mxu0 %v16365_v20  ;;  %v11539_v20 = vld [vmem:[%s22235_s6 + $0x3f8] sm:$0xff] }
0x1e0e   :  { %16370 = vmatprep.subr.bf16.mxu0 %v16369_v54  ;;  %v16465_v21 = vpack.c.bf16 %v11539_v20, %v11538_v17  ;;  %v11567_v17 = vld [vmem:[%s22239_s10 + $0x138] sm:$0xff] }
0x1e11   :  { %16372 = vmatpush3.bf16.msra.mxu0 %v16369_v54 }
0x1e12   :  { %16374 = vmatprep.subr.bf16.mxu0 %v16373_v47 }
0x1edf   :  { %v14329_v42 = vpop.f32.mrb[48].mxu0 }
0x1ee0   :  { %v4473_v43 = vpop.f32.mrb[49].mxu0 }
0x1ee1   :  { %14338 = vmatprep.mubr.msk.f32.mxu0 %vm360_vm0, %v4473_v43 }
0x1ee2   :  { %14339 = vmatmul.mubr.msk.f32.vlgmr.msra.gmra.mrb[42].mxu0 %vm360_vm0, %v14329_v42 }
0x1ee3   :  { %16376 = vmatpush3.bf16.msra.mxu0 %v16373_v47  ;;  %14373 = vmatprep.mubr.f32.mxu0 %v19159_v35 }
0x1ee4   :  { %16378 = vmatprep.subr.bf16.mxu0 %v16377_v44 }
0x1ee7   :  { %16380 = vmatpush3.bf16.msra.mxu0 %v16377_v44  ;;  %v17842_v44 = vld [vmem:[%s22262_s21] ss:$0 sm:$0xff] }
0x1ee8   :  { %16382 = vmatprep.subr.bf16.mxu0 %v16381_v49 }
0x1eeb   :  { %16384 = vmatpush3.bf16.msra.mxu0 %v16381_v49 }
0x1eec   :  { %16386 = vmatprep.subr.bf16.mxu0 %v16385_v53 }
0x1eef   :  { %16388 = vmatpush3.bf16.msra.mxu0 %v16385_v53 }
0x1ef0   :  { %16390 = vmatprep.subr.bf16.mxu0 %v16389_v57 }
0x1ef3   :  { %16392 = vmatpush3.bf16.msra.mxu0 %v16389_v57 }
0x1ef4   :  { %16394 = vmatprep.subr.bf16.mxu0 %v16393_v45 }
0x1ef7   :  { %16396 = vmatpush3.bf16.msra.mxu0 %v16393_v45 }
0x1ef8   :  { %16398 = vmatprep.subr.bf16.mxu0 %v16397_v61 }
0x1efb   :  { %16400 = vmatpush3.bf16.msra.mxu0 %v16397_v61  ;;  %v11548_v61 = vld [vmem:[%s22237_s8 + $0xe0] sm:$0xff] }
0x1efc   :  { %16402 = vmatprep.subr.bf16.mxu0 %v16401_v63 }
0x1eff   :  { %16404 = vmatpush3.bf16.msra.mxu0 %v16401_v63  ;;  %v16479_v63 = vpack.c.bf16 %v11549_v13, %v11548_v61  ;;  %v11583_v61 = vld [vmem:[%s22239_s10 + $0x1b8] sm:$0xff]  ;;  %v11580_v13 = vld [vmem:[%s22239_s10 + $0x1a0] sm:$0xff] }
0x1f00   :  { %16438 = vmatprep.subr.bf16.mxu0 %v16437_v33 }
0x1f02   :  { %14374 = vmatmul.mubr.f32.vlgmr.msra.gmra.mrb[50].mxu0 %v19170_v37 }
0x1f03   :  { %16440 = vmatpush3.bf16.msra.mxu0 %v16437_v33  ;;  %14443 = vmatprep.mubr.f32.mxu0 %v19159_v35 }
0x1f04   :  { %16442 = vmatprep.subr.bf16.mxu0 %v16441_v2 }
0x1f07   :  { %16444 = vmatpush3.bf16.msra.mxu0 %v16441_v2 }
0x1f08   :  { %16446 = vmatprep.subr.bf16.mxu0 %v16445_v4 }
0x1f0b   :  { %16448 = vmatpush3.bf16.msra.mxu0 %v16445_v4 }
0x1f0c   :  { %16450 = vmatprep.subr.bf16.mxu0 %v16449_v29 }
0x1f0f   :  { %16452 = vmatpush3.bf16.msra.mxu0 %v16449_v29 }
0x1f10   :  { %16454 = vmatprep.subr.bf16.mxu0 %v16453_v8 }
0x1f13   :  { %16456 = vmatpush3.bf16.msra.mxu0 %v16453_v8 }
0x1f14   :  { %16458 = vmatprep.subr.bf16.mxu0 %v16457_v10 }
0x1f17   :  { %16460 = vmatpush3.bf16.msra.mxu0 %v16457_v10  ;;  %v11561_v10 = vld [vmem:[%s22239_s10 + $0x108] sm:$0xff] }
0x1f18   :  { %16462 = vmatprep.subr.bf16.mxu0 %v16461_v19 }
0x1f1b   :  { %16464 = vmatpush3.bf16.msra.mxu0 %v16461_v19  ;;  %v16487_v19 = vpack.c.bf16 %v11563_v16, %v11561_v10 }
0x1f1c   :  { %16466 = vmatprep.subr.bf16.mxu0 %v16465_v21 }
0x1f1f   :  { %16468 = vmatpush3.bf16.msra.mxu0 %v16465_v21 }
0x1f20   :  { %16480 = vmatprep.subr.bf16.mxu0 %v16479_v63 }
0x1f22   :  { %14444 = vmatmul.mubr.f32.vlgmr.msra.gmra.mrb[52].mxu0 %v19170_v37 }
0x1f23   :  { %16482 = vmatpush3.bf16.msra.mxu0 %v16479_v63  ;;  %v11582_v63 = vld [vmem:[%s22239_s10 + $0x1b0] sm:$0xff] }
0x1f24   :  { %16484 = vmatprep.subr.bf16.mxu0 %v16483_v15 }
0x1f27   :  { %16486 = vmatpush3.bf16.msra.mxu0 %v16483_v15  ;;  %v11587_v15 = vld [vmem:[%s22239_s10 + $0x1d8] sm:$0xff] }
0x1fd5   :  { %v14375_v12 = vpop.f32.mrb[50].mxu0 }
0x1fd6   :  { %v4661_v14 = vpop.f32.mrb[51].mxu0  ;;  %v4667_v30 = vadd.f32 %v14375_v12, %v11505_v24  ;;  %v11566_v12 = vld [vmem:[%s22239_s10 + $0x130] sm:$0xff] }
0x1fd7   :  { %v4662_v26 = vadd.f32 %v11505_v24, %v4661_v14  ;;  %v11564_v24 = vld [vmem:[%s22239_s10 + $0x120] sm:$0xff]  ;;  %v11569_v14 = vld [vmem:[%s22239_s10 + $0x148] sm:$0xff] }
0x1fd9   :  { %14450 = vmatprep.mubr.msk.f32.mxu1 %vm360_vm0, %v4662_v26  ;;  %v11571_v26 = vld [vmem:[%s22239_s10 + $0x158] sm:$0xff] }
0x1fda   :  { %14451 = vmatmul.mubr.msk.f32.vlgmr.msra.gmra.mrb[34].mxu1 %vm360_vm0, %v4667_v30  ;;  %v16493_v30 = vpack.c.bf16 %v11566_v12, %v11564_v24 }
0x1ff5   :  { %v14445_v34 = vpop.f32.mrb[52].mxu0 }
0x1ff6   :  { %v4867_v54 = vadd.f32 %v14445_v34, %v11541_v32  ;;  %v4861_v38 = vpop.f32.mrb[53].mxu0  ;;  %v11568_v34 = vld [vmem:[%s22239_s10 + $0x140] sm:$0xff] }
0x1ff7   :  { %v4862_v39 = vadd.f32 %v11541_v32, %v4861_v38  ;;  %v16495_v32 = vpack.c.bf16 %v11571_v26, %v11569_v14  ;;  %v11609_v26 = vld [vmem:[%s22241_s12 + $0x180] sm:$0xff] }
0x1ff9   :  { %v16475_v47 = vpack.c.bf16 %v4867_v54, %v4862_v39  ;;  %v11570_v54 = vld [vmem:[%s22239_s10 + $0x150] sm:$0xff] }
0x1ffa   :  { %v16497_v38 = vpack.c.bf16 %v11570_v54, %v11568_v34  ;;  %v11593_v34 = vld [vmem:[%s22241_s12 + $0x100] sm:$0xff]  ;;  %v11594_v54 = vld [vmem:[%s22241_s12 + $0x108] sm:$0xff] }
0x1ffb   :  { %16476 = vmatprep.subr.bf16.mxu1 %v16475_v47 }
0x1ffc   :  { %16478 = vmatpush3.bf16.msra.mxu1 %v16475_v47 }
0x1ffd   :  { %16488 = vmatprep.subr.bf16.mxu1 %v16487_v19 }
0x20ad   :  { %v14452_v31 = vpop.f32.mrb[34].mxu1 }
0x20ae   :  { %v4958_v28 = vmul.f32 0.17677669, %v14452_v31  ;;  %v4948_v42 = vpop.f32.mrb[35].mxu1 }
0x20af   :  { %v4957_v43 = vmul.f32 0.17677669, %v4948_v42 }
0x20b0   :  { %v4960_v46 = vadd.f32 %v17842_v44, %v4958_v28 }
0x20b1   :  { %v4959_v22 = vadd.f32 %v17842_v44, %v4957_v43 }
0x20b2   :  { %v4964_v49 = vsel %vm458_vm2, %v4960_v46, -inf }
0x20b3   :  { %4965 = vmax.xlane.f32.xlu1 %v4964_v49  ;;  %v4961_v50 = vsel %vm458_vm2, %v4959_v22, -inf  ;;  %v11575_v49 = vld [vmem:[%s22239_s10 + $0x178] sm:$0xff] }
0x20b4   :  { %4962 = vmax.xlane.f32.xlu0 %v4961_v50 }
0x2140   :  { %v4966_v23 = vpop.xlane.xlu1 %4965 }
0x2141   :  { %v4968_v53 = vsub.f32 %v4960_v46, %v4966_v23  ;;  %v4963_v40 = vpop.xlane.xlu0 %4962  ;;  %v11572_v23 = vld [vmem:[%s22239_s10 + $0x160] sm:$0xff] }
0x2142   :  { %v4967_v56 = vsub.f32 %v4959_v22, %v4963_v40  ;;  %v11573_v22 = vld [vmem:[%s22239_s10 + $0x168] sm:$0xff] }
0x2143   :  { %v4971_v57 = vmul.f32 1.442695, %v4968_v53  ;;  %v16499_v50 = vpack.c.bf16 %v11575_v49, %v11573_v22  ;;  %v11574_v53 = vld [vmem:[%s22239_s10 + $0x170] sm:$0xff]  ;;  %v11597_v49 = vld [vmem:[%s22241_s12 + $0x120] sm:$0xff] }
0x2144   :  { %v4969_v58 = vmul.f32 1.442695, %v4967_v56  ;;  %v16501_v40 = vpack.c.bf16 %v11574_v53, %v11572_v23  ;;  %v11577_v56 = vld [vmem:[%s22239_s10 + $0x188] sm:$0xff]  ;;  %v11615_v53 = vld [vmem:[%s22241_s12 + $0x1b0] sm:$0xff] }
0x2145   :  { %17698 = vpow2.f32 %v4971_v57  ;;  %v11579_v57 = vld [vmem:[%s22239_s10 + $0x198] sm:$0xff] }
0x2146   :  { %17700 = vpow2.f32 %v4969_v58  ;;  %v16503_v58 = vpack.c.bf16 %v11579_v57, %v11577_v56  ;;  %v11599_v57 = vld [vmem:[%s22241_s12 + $0x130] sm:$0xff] }
0x214f   :  { %v17699_v59 = vpop.eup %17698 }
0x2150   :  { %v17701_v45 = vpop.eup %17700  ;;  %v4976_v60 = vsel %vm458_vm2, %v17699_v59, 0.0 }
0x2151   :  { %4977 = vadd.xlane.f32.xlu1 %v4976_v60  ;;  %v4973_v51 = vsel %vm458_vm2, %v17701_v45, 0.0 }
0x2152   :  { %4974 = vadd.xlane.f32.xlu0 %v4973_v51  ;;  %v11581_v51 = vld [vmem:[%s22239_s10 + $0x1a8] sm:$0xff] }
0x2153   :  { %v16507_v62 = vpack.c.bf16 %v11583_v61, %v11581_v51  ;;  %v11601_v61 = vld [vmem:[%s22241_s12 + $0x140] sm:$0xff] }
0x21de   :  { %v4978_v33 = vpop.xlane.xlu1 %4977 }
0x21df   :  { %17702 = vrcp.f32 %v4978_v33  ;;  %v4975_v36 = vpop.xlane.xlu0 %4974  ;;  %v16509_v33 = vpack.c.bf16 %v11582_v63, %v11580_v13  ;;  %v11602_v13 = vld [vmem:[%s22241_s12 + $0x148] sm:$0xff]  ;;  %v11619_v63 = vld [vmem:[%s22241_s12 + $0x1d0] sm:$0xff] }
0x21e0   :  { %17704 = vrcp.f32 %v4975_v36  ;;  %v16511_v36 = vpack.c.bf16 %v11587_v15, %v11585_v0  ;;  %v11620_v0 = vld [vmem:[%s22241_s12 + $0x1d8] sm:$0xff] }
0x21e1   :  { %v16539_v15 = vpack.c.bf16 %v11620_v0, %v11619_v63 }
0x21e9   :  { %v17703_v1 = vpop.eup %17702 }
0x21ea   :  { %v17705_v2 = vpop.eup %17704  ;;  %v4982_v3 = vmul.f32 %v17703_v1, %v17699_v59  ;;  %v11576_v59 = vld [vmem:[%s22239_s10 + $0x180] sm:$0xff] }
0x21eb   :  { %v4980_v11 = vmul.f32 %v17705_v2, %v17701_v45  ;;  %v11578_v45 = vld [vmem:[%s22239_s10 + $0x190] sm:$0xff]  ;;  %v11584_v1 = vld [vmem:[%s22239_s10 + $0x1c0] sm:$0xff] }
0x21ec   :  { %v16505_v60 = vpack.c.bf16 %v11578_v45, %v11576_v59  ;;  %v11586_v2 = vld [vmem:[%s22239_s10 + $0x1d0] sm:$0xff]  ;;  %v11617_v45 = vld [vmem:[%s22241_s12 + $0x1c0] sm:$0xff] }
0x21ed   :  { %14457 = vmatprep.mubr.msk.f32.mxu1 %vm458_vm2, %v4980_v11  ;;  %v11589_v11 = vld [vmem:[%s22239_s10 + $0x1e8] sm:$0xff] }
0x21ee   :  { %14458 = vmatmul.mubr.msk.f32.vlgmr.msra.gmra.mrb[36].mxu1 %vm458_vm2, %v4982_v3  ;;  %v11591_v3 = vld [vmem:[%s22239_s10 + $0x1f8] sm:$0xff] }
0x21ef   :  { %5316 = vmatprep.mubr.f32.mxu1 %v17896_v52 }
0x22c1   :  { %v14459_v4 = vpop.f32.mrb[36].mxu1 }
0x22c2   :  { %v5055_v27 = vpop.f32.mrb[37].mxu1 }
0x22c3   :  { %14468 = vmatprep.mubr.msk.f32.mxu0 %vm360_vm0, %v5055_v27  ;;  %v16515_v27 = vpack.c.bf16 %v11591_v3, %v11589_v11  ;;  %v11622_v11 = vld [vmem:[%s22241_s12 + $0x1e8] sm:$0xff] }
0x22c4   :  { %14469 = vmatmul.mubr.msk.f32.vlgmr.msra.gmra.mrb[42].mxu0 %vm360_vm0, %v14459_v4  ;;  %v16513_v4 = vpack.c.bf16 %v11586_v2, %v11584_v1  ;;  %v11621_v2 = vld [vmem:[%s22241_s12 + $0x1e0] sm:$0xff] }
0x22c5   :  { %v16543_v3 = vpack.c.bf16 %v11622_v11, %v11621_v2 }
0x2397   :  { %v14470_v29 = vpop.f32.mrb[42].mxu0 }
0x2398   :  { %v5161_v6 = vadd.f32 %v14470_v29, %v11555_v25  ;;  %v5141_v48 = vpop.f32.mrb[43].mxu0  ;;  %v11590_v29 = vld [vmem:[%s22239_s10 + $0x1f0] sm:$0xff] }
0x2399   :  { %v5160_v8 = vadd.f32 %v11555_v25, %v5141_v48  ;;  %v11588_v25 = vld [vmem:[%s22239_s10 + $0x1e0] sm:$0xff] }
0x239a   :  { %v5167_v41 = vadd.f32 %v5161_v6, %v19170_v37  ;;  %v11562_v37 = vld [vmem:[%s22239_s10 + $0x110] sm:$0xff]  ;;  %v16517_v6 = vpack.c.bf16 %v11590_v29, %v11588_v25 }
0x239b   :  { %v5166_v9 = vadd.f32 %v5160_v8, %v19159_v35  ;;  %v11565_v35 = vld [vmem:[%s22239_s10 + $0x128] sm:$0xff]  ;;  %v16489_v20 = vpack.c.bf16 %v11562_v37, %v11560_v55  ;;  %v11558_v37 = vld [vmem:[%s22243_s14 + $0x1] ss:$0 sm:$0xff]  ;;  %v11623_v29 = vld [vmem:[%s22241_s12 + $0x1f0] sm:$0xff] }
0x239c   :  { %5170 = vadd.xlane.f32.xlu1 %v5167_v41  ;;  %v16491_v21 = vpack.c.bf16 %v11567_v17, %v11565_v35 }
0x239d   :  { %5168 = vadd.xlane.f32.xlu0 %v5166_v9  ;;  %16490 = vmatpush1.bf16.msra.mxu1 %v16489_v20  ;;  %v11559_v20 = vld [vmem:[%s22244_s15 + $0x1] ss:$0 sm:$0xff] }
0x239e   :  { %16492 = vmatprep.subr.bf16.mxu1 %v16491_v21 }
0x23a1   :  { %16494 = vmatpush1.bf16.msra.mxu1 %v16493_v30  ;;  %v11610_v30 = vld [vmem:[%s22241_s12 + $0x188] sm:$0xff] }
0x23a2   :  { %16496 = vmatprep.subr.bf16.mxu1 %v16495_v32  ;;  %v16519_v32 = vpack.c.bf16 %v11610_v30, %v11609_v26  ;;  %v5595_v30 = vld [vmem:[%s22257_s3 + $0x30] sm:$0xff] }
0x23a4   :  { %16520 = vmatprep.subr.bf16.mxu0 %v16519_v32  ;;  %v5596_v32 = vld [vmem:[%s22257_s3 + $0x38] sm:$0xff] }
0x23a5   :  { %16498 = vmatpush1.bf16.msra.mxu1 %v16497_v38  ;;  %v16521_v38 = vpack.c.bf16 %v11594_v54, %v11593_v34  ;;  %v16563_v34 = vpack.c.bf16 %v5596_v32, %v5595_v30  ;;  %v5597_v54 = vld [vmem:[%s22257_s3 + $0x40] sm:$0xff] }
0x23a6   :  { %16500 = vmatprep.subr.bf16.mxu1 %v16499_v50  ;;  %v11598_v50 = vld [vmem:[%s22241_s12 + $0x128] sm:$0xff] }
0x23a7   :  { %16522 = vmatpush3.bf16.msra.mxu0 %v16521_v38  ;;  %v16529_v23 = vpack.c.bf16 %v11598_v50, %v11597_v49  ;;  %v5598_v38 = vld [vmem:[%s22257_s3 + $0x48] sm:$0xff]  ;;  %v5604_v49 = vld [vmem:[%s22257_s3 + $0x78] sm:$0xff] }
0x23a9   :  { %16502 = vmatpush1.bf16.msra.mxu1 %v16501_v40  ;;  %v11616_v40 = vld [vmem:[%s22241_s12 + $0x1b8] sm:$0xff] }
0x23aa   :  { %16504 = vmatprep.subr.bf16.mxu1 %v16503_v58  ;;  %v16531_v56 = vpack.c.bf16 %v11616_v40, %v11615_v53  ;;  %v11600_v58 = vld [vmem:[%s22241_s12 + $0x138] sm:$0xff]  ;;  %v11592_v53 = vld [vmem:[%s22240_s11 + $0x2] sm:$0x3] }
0x23ab   :  { %v16533_v59 = vpack.c.bf16 %v11600_v58, %v11599_v57  ;;  %v5245_v40 = vrot.slane %v11592_v53, %v18996_v5 }
0x23ad   :  { %16506 = vmatpush1.bf16.msra.mxu1 %v16505_v60  ;;  %v11618_v60 = vld [vmem:[%s22241_s12 + $0x1c8] sm:$0xff] }
0x23ae   :  { %16508 = vmatprep.subr.bf16.mxu1 %v16507_v62  ;;  %v16535_v51 = vpack.c.bf16 %v11618_v60, %v11617_v45  ;;  %v16537_v62 = vpack.c.bf16 %v11602_v13, %v11601_v61 }
0x23b1   :  { %16510 = vmatpush1.bf16.msra.mxu1 %v16509_v33  ;;  %v11603_v33 = vld [vmem:[%s22241_s12 + $0x150] sm:$0xff] }
0x23b2   :  { %16512 = vmatprep.subr.bf16.mxu1 %v16511_v36  ;;  %v11604_v36 = vld [vmem:[%s22241_s12 + $0x158] sm:$0xff] }
0x23b3   :  { %v16541_v1 = vpack.c.bf16 %v11604_v36, %v11603_v33 }
0x23b5   :  { %16514 = vmatpush1.bf16.msra.mxu1 %v16513_v4  ;;  %v11605_v4 = vld [vmem:[%s22241_s12 + $0x160] sm:$0xff] }
0x23b6   :  { %16516 = vmatprep.subr.bf16.mxu1 %v16515_v27  ;;  %v11606_v27 = vld [vmem:[%s22241_s12 + $0x168] sm:$0xff] }
0x23b7   :  { %v16545_v25 = vpack.c.bf16 %v11606_v27, %v11605_v4 }
0x23b9   :  { %16518 = vmatpush1.bf16.msra.mxu1 %v16517_v6  ;;  %v11624_v6 = vld [vmem:[%s22241_s12 + $0x1f8] sm:$0xff] }
0x2429   :  { %v5171_v39 = vpop.xlane.xlu1 %5170 }
0x242a   :  { %v5173_v47 = vmul.f32 0.0078125, %v5171_v39  ;;  %v5169_v31 = vpop.xlane.xlu0 %5168  ;;  %v11611_v39 = vld [vmem:[%s22241_s12 + $0x190] sm:$0xff] }
0x242b   :  { %v5172_v28 = vmul.f32 0.0078125, %v5169_v31 }
0x242c   :  { %v5175_v42 = vsub.f32 %v5167_v41, %v5173_v47  ;;  %v11612_v47 = vld [vmem:[%s22241_s12 + $0x198] sm:$0xff] }
0x242d   :  { %v5174_v43 = vsub.f32 %v5166_v9, %v5172_v28  ;;  %v16523_v31 = vpack.c.bf16 %v11612_v47, %v11611_v39  ;;  %v11595_v28 = vld [vmem:[%s22241_s12 + $0x110] sm:$0xff]  ;;  %v16567_v39 = vpack.c.bf16 %v5598_v38, %v5597_v54 }
0x242e   :  { %v5177_v44 = vmul.f32 %v5175_v42, %v5175_v42  ;;  %v5599_v47 = vld [vmem:[%s22257_s3 + $0x50] sm:$0xff] }
0x242f   :  { %v5176_v46 = vmul.f32 %v5174_v43, %v5174_v43  ;;  %16524 = vmatprep.subr.bf16.mxu0 %v16523_v31  ;;  %v5600_v31 = vld [vmem:[%s22257_s3 + $0x58] sm:$0xff] }
0x2430   :  { %5180 = vadd.xlane.f32.xlu1 %v5177_v44  ;;  %v11613_v44 = vld [vmem:[%s22241_s12 + $0x1a0] sm:$0xff] }
0x2431   :  { %5178 = vadd.xlane.f32.xlu0 %v5176_v46  ;;  %v11614_v46 = vld [vmem:[%s22241_s12 + $0x1a8] sm:$0xff] }
0x2432   :  { %v16527_v22 = vpack.c.bf16 %v11614_v46, %v11613_v44  ;;  %v5602_v44 = vld [vmem:[%s22257_s3 + $0x68] sm:$0xff] }
0x24bd   :  { %v5181_v48 = vpop.xlane.xlu1 %5180 }
0x24be   :  { %v5183_v8 = vmul.f32 0.0078125, %v5181_v48  ;;  %v5179_v41 = vpop.xlane.xlu0 %5178  ;;  %v16547_v48 = vpack.c.bf16 %v11624_v6, %v11623_v29 }
0x24bf   :  { %v5182_v9 = vmul.f32 0.0078125, %v5179_v41  ;;  %v11608_v41 = vld [vmem:[%s22241_s12 + $0x178] sm:$0xff] }
0x24c0   :  { %v5185_v10 = vadd.f32 1e-05, %v5183_v8  ;;  %v11607_v8 = vld [vmem:[%s22241_s12 + $0x170] sm:$0xff] }
0x24c1   :  { %v5184_v16 = vadd.f32 1e-05, %v5182_v9  ;;  %v16549_v9 = vpack.c.bf16 %v11608_v41, %v11607_v8 }
0x24c2   :  { %17706 = vrsqrt.f32 %v5185_v10  ;;  %v5687_v10 = vld [vmem:[%s22233_s4] sm:$0xff] }
0x24c3   :  { %17708 = vrsqrt.f32 %v5184_v16  ;;  %v5688_v16 = vld [vmem:[%s22233_s4 + $0x8] sm:$0xff] }
0x24cc   :  { %v17707_v55 = vpop.eup %17706 }
0x24cd   :  { %v17709_v19 = vpop.eup %17708  ;;  %v5189_v17 = vmul.f32 %v17707_v55, %v5175_v42  ;;  %v11596_v42 = vld [vmem:[%s22241_s12 + $0x118] sm:$0xff]  ;;  %v20050_v55 = vpack.c.bf16 %v5688_v16, %v5687_v10 }
0x24ce   :  { %v5188_v35 = vmul.f32 %v17709_v19, %v5174_v43  ;;  %v16525_v43 = vpack.c.bf16 %v11596_v42, %v11595_v28  ;;  %v5589_v19 = vld [vmem:[%s22257_s3] sm:$0xff]  ;;  %v16571_v28 = vpack.c.bf16 %v5600_v31, %v5599_v47  ;;  %v20092_v42 = vld [vmem:[%s22258_s2 + $0x10] sm:$0xff] }
0x24cf   :  { %v5197_v12 = vmul.f32 %v11558_v37, %v5189_v17  ;;  %v5591_v17 = vld [vmem:[%s22257_s3 + $0x10] sm:$0xff] }
0x24d0   :  { %v5196_v21 = vmul.f32 %v11558_v37, %v5188_v35  ;;  %16526 = vmatpush3.bf16.msra.mxu0 %v16525_v43  ;;  %v5590_v37 = vld [vmem:[%s22257_s3 + $0x8] sm:$0xff]  ;;  %v5601_v43 = vld [vmem:[%s22257_s3 + $0x60] sm:$0xff] }
0x24d1   :  { %v5205_v14 = vadd.f32 %v11559_v20, %v5197_v12  ;;  %16528 = vmatprep.subr.bf16.mxu0 %v16527_v22  ;;  %v16551_v35 = vpack.c.bf16 %v5590_v37, %v5589_v19  ;;  %v5593_v12 = vld [vmem:[%s22257_s3 + $0x20] sm:$0xff]  ;;  %v16575_v46 = vpack.c.bf16 %v5602_v44, %v5601_v43  ;;  %v5603_v22 = vld [vmem:[%s22257_s3 + $0x70] sm:$0xff] }
0x24d2   :  { %v19944_v24 = vadd.f32 %v11559_v20, %v5196_v21  ;;  %v5592_v20 = vld [vmem:[%s22257_s3 + $0x18] sm:$0xff]  ;;  %v16579_v50 = vpack.c.bf16 %v5604_v49, %v5603_v22 }
0x24d3   :  { %16552 = vmatprep.subr.bf16.mxu1 %v16551_v35  ;;  %v16555_v21 = vpack.c.bf16 %v5592_v20, %v5591_v17 }
0x24d4   :  { %5317 = vmatmul.mubr.f32.vlgmr.msra.gmra.mrb[38].mxu1 %v19944_v24  ;;  %16530 = vmatpush3.bf16.msra.mxu0 %v16529_v23  ;;  %v20110_v23 = vld [vmem:[%s22258_s2 + $0x18] sm:$0xff] }
0x24d5   :  { %5322 = vmatprep.mubr.f32.mxu1 %v17896_v52  ;;  %16532 = vmatprep.subr.bf16.mxu0 %v16531_v56  ;;  %v5249_v56 = vrot.slane %v11592_v53, %v19001_v7 }
0x24d6   :  { %16554 = vmatpush3.bf16.msra.mxu1 %v16551_v35 }
0x24d7   :  { %16556 = vmatprep.subr.bf16.mxu1 %v16555_v21 }
0x24d8   :  { %5323 = vmatmul.mubr.f32.gmra.mrb[40].mxu1 %v5205_v14  ;;  %16534 = vmatpush3.bf16.msra.mxu0 %v16533_v59  ;;  %v5594_v14 = vld [vmem:[%s22257_s3 + $0x28] sm:$0xff] }
0x24d9   :  { %16536 = vmatprep.subr.bf16.mxu0 %v16535_v51  ;;  %v16559_v26 = vpack.c.bf16 %v5594_v14, %v5593_v12  ;;  %14503 = vmatprep.mubr.f32.mxu1 %v20092_v42 }
0x24da   :  { %16558 = vmatpush3.bf16.msra.mxu1 %v16555_v21 }
0x24db   :  { %16560 = vmatprep.subr.bf16.mxu1 %v16559_v26 }
0x24dc   :  { %16538 = vmatpush3.bf16.msra.mxu0 %v16537_v62 }
0x24dd   :  { %16540 = vmatprep.subr.bf16.mxu0 %v16539_v15 }
0x24de   :  { %16562 = vmatpush3.bf16.msra.mxu1 %v16559_v26 }
0x24df   :  { %16564 = vmatprep.subr.bf16.mxu1 %v16563_v34 }
0x24e0   :  { %16542 = vmatpush3.bf16.msra.mxu0 %v16541_v1 }
0x24e1   :  { %16544 = vmatprep.subr.bf16.mxu0 %v16543_v3 }
0x24e2   :  { %16566 = vmatpush3.bf16.msra.mxu1 %v16563_v34 }
0x24e3   :  { %16568 = vmatprep.subr.bf16.mxu1 %v16567_v39 }
0x24e4   :  { %16546 = vmatpush3.bf16.msra.mxu0 %v16545_v25 }
0x24e5   :  { %16548 = vmatprep.subr.bf16.mxu0 %v16547_v48 }
0x24e6   :  { %16570 = vmatpush3.bf16.msra.mxu1 %v16567_v39 }
0x24e7   :  { %16572 = vmatprep.subr.bf16.mxu1 %v16571_v28 }
0x24e8   :  { %16550 = vmatpush3.bf16.msra.mxu0 %v16549_v9 }
0x24e9   :  { %16584 = vmatprep.subr.bf16.mxu0 %v20050_v55 }
0x24ea   :  { %16574 = vmatpush3.bf16.msra.mxu1 %v16571_v28 }
0x24eb   :  { %16576 = vmatprep.subr.bf16.mxu1 %v16575_v46 }
0x24ee   :  { %16578 = vmatpush3.bf16.msra.mxu1 %v16575_v46 }
0x24ef   :  { %16580 = vmatprep.subr.bf16.mxu1 %v16579_v50 }
0x24f2   :  { %16582 = vmatpush3.bf16.msra.mxu1 %v16579_v50 }
0x24f5   :  { %14504 = vmatmul.mubr.f32.vlgmr.msra.gmra.mrb[42].mxu1 %v20110_v23 }
0x24f6   :  { %14573 = vmatprep.mubr.f32.mxu1 %v20092_v42 }
0x25a7   :  { %v5318_v57 = vpop.f32.mrb[38].mxu1 }
0x25a8   :  { %v20119_v58 = vadd.f32 %v5318_v57, %v5245_v40  ;;  %v5320_v59 = vpop.f32.mrb[39].mxu1 }
0x25a9   :  { %v20121_v45 = vadd.f32 %v5320_v59, %v5249_v56 }
0x25aa   :  { %v20124_v60 = vmul.f32 0.70710677, %v20119_v58 }
0x25ab   :  { %v20127_v51 = vmul.f32 0.70710677, %v20121_v45  ;;  %v5324_v61 = vpop.f32.mrb[40].mxu1 }
0x25ac   :  { %v5337_v13 = vand.u32 2147483647, %v20124_v60  ;;  %v20130_v62 = vadd.f32 %v5324_v61, %v5245_v40  ;;  %v5326_v63 = vpop.f32.mrb[41].mxu1  ;;  %vm5417_vm7 = vcmp.lt.f32.partialorder %v20124_v60, 0.0  ;;  %v5690_v60 = vld [vmem:[%s22233_s4 + $0x18] sm:$0xff] }
0x25ad   :  { %v5338_v0 = vand.u32 2147483647, %v20127_v51  ;;  %v20133_v15 = vadd.f32 %v5326_v63, %v5249_v56  ;;  %vm5418_vm8 = vcmp.lt.f32.partialorder %v20127_v51, 0.0 }
0x25ae   :  { %v5341_v33 = vmul.f32 0.3275911, %v5337_v13  ;;  %v20136_v36 = vmul.f32 0.70710677, %v20130_v62  ;;  %v5393_v8 = vsub.f32 0.0, %v5337_v13 }
0x25af   :  { %v5342_v1 = vmul.f32 0.3275911, %v5338_v0  ;;  %v20139_v2 = vmul.f32 0.70710677, %v20133_v15  ;;  %v5394_v41 = vsub.f32 0.0, %v5338_v0 }
0x25b0   :  { %v5345_v11 = vadd.f32 1.0, %v5341_v33  ;;  %v5339_v3 = vand.u32 2147483647, %v20136_v36  ;;  %v5397_v10 = vmul.f32 %v5393_v8, %v5337_v13  ;;  %vm5419_vm9 = vcmp.lt.f32.partialorder %v20136_v36, 0.0 }
0x25b1   :  { %v5346_v4 = vadd.f32 1.0, %v5342_v1  ;;  %v5340_v27 = vand.u32 2147483647, %v20139_v2  ;;  %v5398_v35 = vmul.f32 %v5394_v41, %v5338_v0  ;;  %vm5420_vm10 = vcmp.lt.f32.partialorder %v20139_v2, 0.0 }
0x25b2   :  { %17710 = vrcp.f32 %v5345_v11  ;;  %v5343_v25 = vmul.f32 0.3275911, %v5339_v3  ;;  %v5395_v16 = vsub.f32 0.0, %v5339_v3  ;;  %v5401_v14 = vmul.f32 1.442695, %v5397_v10 }
0x25b3   :  { %17712 = vrcp.f32 %v5346_v4  ;;  %v5344_v29 = vmul.f32 0.3275911, %v5340_v27  ;;  %v5396_v17 = vsub.f32 0.0, %v5340_v27  ;;  %v5403_v54 = vmul.f32 1.442695, %v5398_v35 }
0x25b4   :  { %v5347_v6 = vadd.f32 1.0, %v5343_v25  ;;  %v5399_v26 = vmul.f32 %v5395_v16, %v5339_v3  ;;  %v5331_v36 = vmul.f32 0.5, %v20130_v62 }
0x25b5   :  { %v5348_v48 = vadd.f32 1.0, %v5344_v29  ;;  %v5400_v38 = vmul.f32 %v5396_v17, %v5340_v27 }
0x25b6   :  { %17714 = vrcp.f32 %v5347_v6  ;;  %v5405_v44 = vmul.f32 1.442695, %v5399_v26 }
0x25b7   :  { %17716 = vrcp.f32 %v5348_v48  ;;  %v5407_v50 = vmul.f32 1.442695, %v5400_v38 }
0x25b8   :  { %17718 = vpow2.f32 %v5401_v14 }
0x25b9   :  { %17720 = vpow2.f32 %v5403_v54 }
0x25ba   :  { %17722 = vpow2.f32 %v5405_v44 }
0x25bb   :  { %17724 = vpow2.f32 %v5407_v50 }
0x25bc   :  { %v17711_v9 = vpop.eup %17710 }
0x25bd   :  { %v17713_v19 = vpop.eup %17712  ;;  %v5357_v37 = vmul.f32 1.0614054, %v17711_v9 }
0x25be   :  { %v5358_v20 = vmul.f32 1.0614054, %v17713_v19 }
0x25bf   :  { %v5361_v21 = vadd.f32 -1.4531521, %v5357_v37 }
0x25c0   :  { %v17715_v12 = vpop.eup %17714  ;;  %v5362_v30 = vadd.f32 -1.4531521, %v5358_v20 }
0x25c1   :  { %v17717_v32 = vpop.eup %17716  ;;  %v5365_v34 = vmul.f32 %v17711_v9, %v5361_v21  ;;  %v5359_v39 = vmul.f32 1.0614054, %v17715_v12 }
0x25c2   :  { %v5366_v47 = vmul.f32 %v17713_v19, %v5362_v30  ;;  %v5360_v31 = vmul.f32 1.0614054, %v17717_v32  ;;  %v17719_v6 = vpop.eup %17718 }
0x25c3   :  { %v5369_v28 = vadd.f32 1.4214138, %v5365_v34  ;;  %v5363_v43 = vadd.f32 -1.4531521, %v5359_v39  ;;  %v17721_v41 = vpop.eup %17720 }
0x25c4   :  { %v5370_v46 = vadd.f32 1.4214138, %v5366_v47  ;;  %v5364_v22 = vadd.f32 -1.4531521, %v5360_v31  ;;  %v17723_v21 = vpop.eup %17722 }
0x25c5   :  { %v5373_v49 = vmul.f32 %v17711_v9, %v5369_v28  ;;  %v5367_v53 = vmul.f32 %v17715_v12, %v5363_v43  ;;  %v17725_v30 = vpop.eup %17724  ;;  %v5330_v43 = vmul.f32 0.5, %v20121_v45 }
0x25c6   :  { %v5374_v40 = vmul.f32 %v17713_v19, %v5370_v46  ;;  %v5368_v56 = vmul.f32 %v17717_v32, %v5364_v22  ;;  %v5329_v46 = vmul.f32 0.5, %v20119_v58  ;;  %v5692_v58 = vld [vmem:[%s22233_s4 + $0x28] sm:$0xff] }
0x25c7   :  { %v5377_v57 = vadd.f32 -0.28449672, %v5373_v49  ;;  %v5371_v59 = vadd.f32 1.4214138, %v5367_v53 }
0x25c8   :  { %v5378_v61 = vadd.f32 -0.28449672, %v5374_v40  ;;  %v5372_v13 = vadd.f32 1.4214138, %v5368_v56  ;;  %v5332_v56 = vmul.f32 0.5, %v20133_v15  ;;  %v5693_v15 = vld [vmem:[%s22233_s4 + $0x30] sm:$0xff] }
0x25c9   :  { %v5381_v63 = vmul.f32 %v17711_v9, %v5377_v57  ;;  %v5375_v0 = vmul.f32 %v17715_v12, %v5371_v59  ;;  %v5691_v59 = vld [vmem:[%s22233_s4 + $0x20] sm:$0xff] }
0x25ca   :  { %v5382_v33 = vmul.f32 %v17713_v19, %v5378_v61  ;;  %v5376_v1 = vmul.f32 %v17717_v32, %v5372_v13  ;;  %v16591_v13 = vpack.c.bf16 %v5692_v58, %v5691_v59  ;;  %v5799_v58 = vld [vmem:[%s22235_s6 + $0x70] sm:$0xff] }
0x25cb   :  { %v5385_v11 = vadd.f32 0.2548296, %v5381_v63  ;;  %v5379_v3 = vadd.f32 -0.28449672, %v5375_v0  ;;  %v5694_v63 = vld [vmem:[%s22233_s4 + $0x38] sm:$0xff]  ;;  %v5696_v0 = vld [vmem:[%s22233_s4 + $0x48] sm:$0xff] }
0x25cc   :  { %v5386_v4 = vadd.f32 0.2548296, %v5382_v33  ;;  %v5380_v27 = vadd.f32 -0.28449672, %v5376_v1  ;;  %v16595_v62 = vpack.c.bf16 %v5694_v63, %v5693_v15  ;;  %v5697_v1 = vld [vmem:[%s22233_s4 + $0x50] sm:$0xff] }
0x25cd   :  { %v5389_v25 = vmul.f32 %v17711_v9, %v5385_v11  ;;  %v5383_v29 = vmul.f32 %v17715_v12, %v5379_v3  ;;  %v5698_v11 = vld [vmem:[%s22233_s4 + $0x58] sm:$0xff] }
0x25ce   :  { %v5390_v48 = vmul.f32 %v17713_v19, %v5386_v4  ;;  %v5384_v8 = vmul.f32 %v17717_v32, %v5380_v27  ;;  %v16603_v3 = vpack.c.bf16 %v5698_v11, %v5697_v1  ;;  %v5699_v4 = vld [vmem:[%s22233_s4 + $0x60] sm:$0xff]  ;;  %v5700_v27 = vld [vmem:[%s22233_s4 + $0x68] sm:$0xff] }
0x25cf   :  { %v5409_v10 = vmul.f32 %v17719_v6, %v5389_v25  ;;  %v5387_v16 = vadd.f32 0.2548296, %v5383_v29  ;;  %v16607_v25 = vpack.c.bf16 %v5700_v27, %v5699_v4  ;;  %v5701_v29 = vld [vmem:[%s22233_s4 + $0x70] sm:$0xff]  ;;  %v5702_v6 = vld [vmem:[%s22233_s4 + $0x78] sm:$0xff] }
0x25d0   :  { %v5410_v37 = vmul.f32 %v17721_v41, %v5390_v48  ;;  %v5388_v35 = vadd.f32 0.2548296, %v5384_v8  ;;  %v16611_v48 = vpack.c.bf16 %v5702_v6, %v5701_v29  ;;  %v11634_v8 = vld [vmem:[%s22259_s28] ss:$0 sm:$0xff]  ;;  %v14505_v41 = vpop.f32.mrb[42].mxu1 }
0x25d1   :  { %v5413_v17 = vsub.f32 1.0, %v5409_v10  ;;  %v5391_v20 = vmul.f32 %v17715_v12, %v5387_v16  ;;  %v5684_v10 = vadd.f32 %v14505_v41, %v11634_v8  ;;  %v5678_v16 = vpop.f32.mrb[43].mxu1 }
0x25d2   :  { %v5414_v14 = vsub.f32 1.0, %v5410_v37  ;;  %v5392_v26 = vmul.f32 %v17717_v32, %v5388_v35  ;;  %v5689_v32 = vld [vmem:[%s22233_s4 + $0x10] sm:$0xff]  ;;  %v5679_v37 = vadd.f32 %v11634_v8, %v5678_v16  ;;  %v11636_v16 = vld [vmem:[%s22236_s7] ss:$0 sm:$0xff] }
0x25d3   :  { %v5421_v34 = vsub.f32 0.0, %v5413_v17  ;;  %v5411_v54 = vmul.f32 %v17723_v21, %v5391_v20  ;;  %v16587_v53 = vpack.c.bf16 %v5690_v60, %v5689_v32  ;;  %v5790_v32 = vld [vmem:[%s22235_s6 + $0x28] sm:$0xff] }
0x25d4   :  { %v5422_v9 = vsub.f32 0.0, %v5414_v14  ;;  %v5412_v38 = vmul.f32 %v17725_v30, %v5392_v26  ;;  %v11635_v26 = vld [vmem:[%s22234_s5] ss:$0 sm:$0xff] }
0x25d5   :  { %v5425_v39 = vsel %vm5417_vm7, %v5421_v34, %v5413_v17  ;;  %v5415_v19 = vsub.f32 1.0, %v5411_v54 }
0x25d6   :  { %v5429_v47 = vadd.f32 1.0, %v5425_v39  ;;  %v5426_v31 = vsel %vm5418_vm8, %v5422_v9, %v5414_v14  ;;  %v5416_v28 = vsub.f32 1.0, %v5412_v38  ;;  %v5785_v39 = vld [vmem:[%s22235_s6] sm:$0xff] }
0x25d7   :  { %v5430_v12 = vadd.f32 1.0, %v5426_v31  ;;  %v5423_v44 = vsub.f32 0.0, %v5415_v19 }
0x25d8   :  { %v5424_v51 = vsub.f32 0.0, %v5416_v28  ;;  %v5433_v45 = vmul.f32 %v5429_v47, %v5329_v46  ;;  %v5787_v47 = vld [vmem:[%s22235_s6 + $0x10] sm:$0xff]  ;;  %v5792_v46 = vld [vmem:[%s22235_s6 + $0x38] sm:$0xff] }
0x25d9   :  { %v5434_v22 = vmul.f32 %v5430_v12, %v5330_v43  ;;  %v5427_v49 = vsel %vm5419_vm9, %v5423_v44, %v5415_v19  ;;  %v5786_v19 = vld [vmem:[%s22235_s6 + $0x8] sm:$0xff]  ;;  %v5789_v12 = vld [vmem:[%s22235_s6 + $0x20] sm:$0xff]  ;;  %v5791_v44 = vld [vmem:[%s22235_s6 + $0x30] sm:$0xff] }
0x25da   :  { %v5428_v50 = vsel %vm5420_vm10, %v5424_v51, %v5416_v28  ;;  %v5431_v40 = vadd.f32 1.0, %v5427_v49  ;;  %v16615_v31 = vpack.c.bf16 %v5786_v19, %v5785_v39  ;;  %v5788_v28 = vld [vmem:[%s22235_s6 + $0x18] sm:$0xff]  ;;  %v16623_v60 = vpack.c.bf16 %v5790_v32, %v5789_v12  ;;  %v5794_v49 = vld [vmem:[%s22235_s6 + $0x48] sm:$0xff] }
0x25db   :  { %5542 = vmatprep.mubr.f32.mxu0 %v5434_v22  ;;  %v5432_v57 = vadd.f32 1.0, %v5428_v50  ;;  %v16619_v43 = vpack.c.bf16 %v5788_v28, %v5787_v47  ;;  %v16627_v51 = vpack.c.bf16 %v5792_v46, %v5791_v44  ;;  %v5793_v22 = vld [vmem:[%s22235_s6 + $0x40] sm:$0xff]  ;;  %v5795_v50 = vld [vmem:[%s22235_s6 + $0x50] sm:$0xff]  ;;  %v11647_v39 = vld [vmem:[%s22257_s3 + $0x98] sm:$0xff] }
0x25dc   :  { %5543 = vmatmul.mubr.f32.vlgmr.msra.gmra.mrb[54].mxu0 %v5433_v45  ;;  %v5435_v61 = vmul.f32 %v5431_v40, %v5331_v36  ;;  %16616 = vmatprep.subr.bf16.mxu1 %v16615_v31  ;;  %v16631_v45 = vpack.c.bf16 %v5794_v49, %v5793_v22  ;;  %v5800_v36 = vld [vmem:[%s22235_s6 + $0x78] sm:$0xff]  ;;  %v11648_v47 = vld [vmem:[%s22257_s3 + $0xa0] sm:$0xff]  ;;  %v11653_v44 = vld [vmem:[%s22257_s3 + $0xc8] sm:$0xff] }
0x25dd   :  { %16586 = vmatpush3.bf16.msra.mxu0 %v20050_v55  ;;  %v5436_v2 = vmul.f32 %v5432_v57, %v5332_v56  ;;  %v5695_v55 = vld [vmem:[%s22233_s4 + $0x40] sm:$0xff]  ;;  %16618 = vmatpush3.bf16.msra.mxu1 %v16615_v31  ;;  %v5798_v57 = vld [vmem:[%s22235_s6 + $0x68] sm:$0xff]  ;;  %v11651_v12 = vld [vmem:[%s22257_s3 + $0xb8] sm:$0xff] }
0x25de   :  { %16588 = vmatprep.subr.bf16.mxu0 %v16587_v53  ;;  %v16599_v33 = vpack.c.bf16 %v5696_v0, %v5695_v55  ;;  %16620 = vmatprep.subr.bf16.mxu1 %v16619_v43  ;;  %v5797_v56 = vld [vmem:[%s22235_s6 + $0x60] sm:$0xff]  ;;  %v11649_v31 = vld [vmem:[%s22257_s3 + $0xa8] sm:$0xff]  ;;  %v11655_v22 = vld [vmem:[%s22257_s3 + $0xd8] sm:$0xff] }
0x25df   :  { %5547 = vmatprep.mubr.f32.mxu0 %v5436_v2  ;;  %v16639_v59 = vpack.c.bf16 %v5798_v57, %v5797_v56  ;;  %v16643_v2 = vpack.c.bf16 %v5800_v36, %v5799_v58  ;;  %v16665_v28 = vpack.c.bf16 %v11649_v31, %v11648_v47  ;;  %v11659_v56 = vld [vmem:[%s22257_s3 + $0xf8] sm:$0xff] }
0x25e0   :  { %5548 = vmatmul.mubr.f32.gmra.mrb[56].mxu0 %v5435_v61 }
0x25e1   :  { %16590 = vmatpush3.bf16.msra.mxu0 %v16587_v53  ;;  %14538 = vmatprep.mubr.f32.mxu0 %v20092_v42  ;;  %v5796_v53 = vld [vmem:[%s22235_s6 + $0x58] sm:$0xff] }
0x25e2   :  { %16592 = vmatprep.subr.bf16.mxu0 %v16591_v13  ;;  %16622 = vmatpush3.bf16.msra.mxu1 %v16619_v43  ;;  %v16635_v40 = vpack.c.bf16 %v5796_v53, %v5795_v50  ;;  %v11650_v43 = vld [vmem:[%s22257_s3 + $0xb0] sm:$0xff]  ;;  %v11657_v50 = vld [vmem:[%s22257_s3 + $0xe8] sm:$0xff] }
0x25e3   :  { %16624 = vmatprep.subr.bf16.mxu1 %v16623_v60  ;;  %v16669_v32 = vpack.c.bf16 %v11651_v12, %v11650_v43  ;;  %v11680_v43 = vld [vmem:[%s22235_s6 + $0x80] sm:$0xff]  ;;  %v11681_v12 = vld [vmem:[%s22235_s6 + $0x88] sm:$0xff] }
0x25e5   :  { %16594 = vmatpush3.bf16.msra.mxu0 %v16591_v13  ;;  %v20263_v13 = vld [vmem:[%s22262_s21 + $0x1] ss:$0 sm:$0xff] }
0x25e6   :  { %16596 = vmatprep.subr.bf16.mxu0 %v16595_v62  ;;  %16626 = vmatpush3.bf16.msra.mxu1 %v16623_v60  ;;  %v11652_v60 = vld [vmem:[%s22257_s3 + $0xc0] sm:$0xff] }
0x25e7   :  { %16628 = vmatprep.subr.bf16.mxu1 %v16627_v51  ;;  %v16673_v46 = vpack.c.bf16 %v11653_v44, %v11652_v60  ;;  %v16721_v60 = vpack.c.bf16 %v11681_v12, %v11680_v43  ;;  %v11683_v44 = vld [vmem:[%s22235_s6 + $0x98] sm:$0xff] }
0x25e9   :  { %16598 = vmatpush3.bf16.msra.mxu0 %v16595_v62 }
0x25ea   :  { %16600 = vmatprep.subr.bf16.mxu0 %v16599_v33  ;;  %16630 = vmatpush3.bf16.msra.mxu1 %v16627_v51  ;;  %v11654_v51 = vld [vmem:[%s22257_s3 + $0xd0] sm:$0xff] }
0x25eb   :  { %16632 = vmatprep.subr.bf16.mxu1 %v16631_v45  ;;  %v16677_v49 = vpack.c.bf16 %v11655_v22, %v11654_v51  ;;  %v11684_v51 = vld [vmem:[%s22235_s6 + $0xa0] sm:$0xff]  ;;  %v11685_v22 = vld [vmem:[%s22235_s6 + $0xa8] sm:$0xff] }
0x25ed   :  { %16602 = vmatpush3.bf16.msra.mxu0 %v16599_v33 }
0x25ee   :  { %16604 = vmatprep.subr.bf16.mxu0 %v16603_v3  ;;  %16634 = vmatpush3.bf16.msra.mxu1 %v16631_v45  ;;  %v11656_v45 = vld [vmem:[%s22257_s3 + $0xe0] sm:$0xff] }
0x25ef   :  { %16636 = vmatprep.subr.bf16.mxu1 %v16635_v40  ;;  %v16681_v53 = vpack.c.bf16 %v11657_v50, %v11656_v45  ;;  %v11686_v45 = vld [vmem:[%s22235_s6 + $0xb0] sm:$0xff]  ;;  %v11687_v50 = vld [vmem:[%s22235_s6 + $0xb8] sm:$0xff] }
0x25f1   :  { %16606 = vmatpush3.bf16.msra.mxu0 %v16603_v3 }
0x25f2   :  { %16608 = vmatprep.subr.bf16.mxu0 %v16607_v25  ;;  %16638 = vmatpush3.bf16.msra.mxu1 %v16635_v40  ;;  %v11658_v40 = vld [vmem:[%s22257_s3 + $0xf0] sm:$0xff] }
0x25f3   :  { %16640 = vmatprep.subr.bf16.mxu1 %v16639_v59  ;;  %v16685_v57 = vpack.c.bf16 %v11659_v56, %v11658_v40  ;;  %v11688_v40 = vld [vmem:[%s22235_s6 + $0xc0] sm:$0xff]  ;;  %v11689_v56 = vld [vmem:[%s22235_s6 + $0xc8] sm:$0xff] }
0x25f5   :  { %16610 = vmatpush3.bf16.msra.mxu0 %v16607_v25 }
0x25f6   :  { %16612 = vmatprep.subr.bf16.mxu0 %v16611_v48  ;;  %16642 = vmatpush3.bf16.msra.mxu1 %v16639_v59 }
0x25f7   :  { %16644 = vmatprep.subr.bf16.mxu1 %v16643_v2 }
0x25f9   :  { %16614 = vmatpush3.bf16.msra.mxu0 %v16611_v48 }
0x25fa   :  { %16646 = vmatpush3.bf16.msra.mxu1 %v16643_v2  ;;  %v11664_v2 = vld [vmem:[%s22233_s4 + $0x90] sm:$0xff] }
0x25fc   :  { %14539 = vmatmul.mubr.f32.vlgmr.msra.gmra.mrb[58].mxu0 %v20110_v23 }
0x25fd   :  { %14580 = vmatprep.mubr.msk.f32.mxu0 %vm360_vm0, %v5679_v37  ;;  %14574 = vmatmul.mubr.f32.vlgmr.msra.gmra.mrb[44].mxu1 %v20110_v23 }
0x25fe   :  { %14622 = vmatprep.mubr.f32.mxu1 %v20092_v42 }
0x26af   :  { %v12805_v35 = vpop.f32.mrb[54].mxu0 }
0x26b0   :  { %v12806_v17 = vpop.f32.mrb[55].mxu0 }
0x26b1   :  { %v20200_v20 = vadd.f32 %v12806_v17, %v12805_v35 }
0x26b3   :  { %v12808_v21 = vpop.f32.mrb[56].mxu0 }
0x26b4   :  { %v12809_v14 = vpop.f32.mrb[57].mxu0 }
0x26b5   :  { %v11662_v14 = vld [vmem:[%s22233_s4 + $0x80] sm:$0xff] }
0x26cf   :  { %v14540_v30 = vpop.f32.mrb[58].mxu0 }
0x26d0   :  { %v5782_v34 = vadd.f32 %v14540_v30, %v11635_v26  ;;  %v5776_v54 = vpop.f32.mrb[59].mxu0 }
0x26d1   :  { %v5777_v9 = vadd.f32 %v11635_v26, %v5776_v54  ;;  %v11663_v26 = vld [vmem:[%s22233_s4 + $0x88] sm:$0xff] }
0x26d2   :  { %v16689_v30 = vpack.c.bf16 %v11663_v26, %v11662_v14  ;;  %v11645_v54 = vld [vmem:[%s22257_s3 + $0x88] sm:$0xff] }
0x26d3   :  { %v16647_v38 = vpack.c.bf16 %v5782_v34, %v5777_v9  ;;  %v11644_v34 = vld [vmem:[%s22257_s3 + $0x80] sm:$0xff] }
0x26d4   :  { %v16657_v9 = vpack.c.bf16 %v11645_v54, %v11644_v34 }
0x26d5   :  { %16649 = vmatprep.subr.msk.bf16.mxu0 %vm18168_vm1, %v16647_v38 }
0x26d6   :  { %16652 = vmatpush3.bf16.xpose.msk.msra.mxu0 %vm18168_vm1, %v16647_v38  ;;  %16658 = vmatprep.subr.bf16.mxu1 %v16657_v9  ;;  %v11646_v38 = vld [vmem:[%s22257_s3 + $0x90] sm:$0xff] }
0x26d7   :  { %16660 = vmatpush3.bf16.msra.mxu1 %v16657_v9  ;;  %v16661_v19 = vpack.c.bf16 %v11647_v39, %v11646_v38  ;;  %v11679_v38 = vld [vmem:[%s22234_s5 + $0x1] ss:$0 sm:$0xff] }
0x26d9   :  { %16662 = vmatprep.subr.bf16.mxu1 %v16661_v19 }
0x26db   :  { %16664 = vmatpush3.bf16.msra.mxu1 %v16661_v19 }
0x26dc   :  { %16666 = vmatprep.subr.bf16.mxu1 %v16665_v28 }
0x26dd   :  { %14581 = vmatmul.mubr.msk.f32.vlgmr.msra.gmra.mrb[60].mxu0 %vm360_vm0, %v5684_v10  ;;  %v14575_v10 = vpop.f32.mrb[44].mxu1 }
0x26de   :  { %v5874_v37 = vpop.f32.mrb[45].mxu1  ;;  %v5880_v35 = vadd.f32 %v14575_v10, %v11636_v16  ;;  %v11675_v10 = vld [vmem:[%s22233_s4 + $0xe8] sm:$0xff] }
0x26df   :  { %v5875_v17 = vadd.f32 %v11636_v16, %v5874_v37  ;;  %16668 = vmatpush3.bf16.msra.mxu1 %v16665_v28  ;;  %v11676_v37 = vld [vmem:[%s22233_s4 + $0xf0] sm:$0xff] }
0x26e0   :  { %16670 = vmatprep.subr.bf16.mxu1 %v16669_v32 }
0x26e1   :  { %v16653_v21 = vpack.c.bf16 %v5880_v35, %v5875_v17  ;;  %v11677_v35 = vld [vmem:[%s22233_s4 + $0xf8] sm:$0xff] }
0x26e2   :  { %v16717_v17 = vpack.c.bf16 %v11677_v35, %v11676_v37 }
0x26e3   :  { %16654 = vmatprep.subr.bf16.mxu0 %v16653_v21  ;;  %16672 = vmatpush3.bf16.msra.mxu1 %v16669_v32  ;;  %v11682_v32 = vld [vmem:[%s22235_s6 + $0x90] sm:$0xff] }
0x26e4   :  { %16656 = vmatpush3.bf16.msra.mxu0 %v16653_v21  ;;  %16674 = vmatprep.subr.bf16.mxu1 %v16673_v46  ;;  %v11661_v21 = vld [vmem:[%s22259_s28 + $0x1] ss:$0 sm:$0xff] }
0x26e5   :  { %16690 = vmatprep.subr.bf16.mxu0 %v16689_v30 }
0x26e7   :  { %16676 = vmatpush3.bf16.msra.mxu1 %v16673_v46  ;;  %v16725_v46 = vpack.c.bf16 %v11683_v44, %v11682_v32  ;;  %v11706_v32 = vld [vmem:[%s22237_s8 + $0x30] sm:$0xff] }
0x26e8   :  { %16678 = vmatprep.subr.bf16.mxu1 %v16677_v49 }
0x26eb   :  { %16680 = vmatpush3.bf16.msra.mxu1 %v16677_v49  ;;  %v16729_v49 = vpack.c.bf16 %v11685_v22, %v11684_v51 }
0x26ec   :  { %16682 = vmatprep.subr.bf16.mxu1 %v16681_v53 }
0x26ef   :  { %16684 = vmatpush3.bf16.msra.mxu1 %v16681_v53  ;;  %v16733_v53 = vpack.c.bf16 %v11687_v50, %v11686_v45  ;;  %v6084_v45 = vld [vmem:[%s22237_s8 + $0x8] sm:$0xff] }
0x26f0   :  { %16686 = vmatprep.subr.bf16.mxu1 %v16685_v57 }
0x26f3   :  { %16688 = vmatpush3.bf16.msra.mxu1 %v16685_v57  ;;  %v16737_v57 = vpack.c.bf16 %v11689_v56, %v11688_v40  ;;  %v11733_v40 = vld [vmem:[%s22233_s4 + $0x118] sm:$0xff] }
0x26f4   :  { %16722 = vmatprep.subr.bf16.mxu1 %v16721_v60 }
0x26f6   :  { %14623 = vmatmul.mubr.f32.vlgmr.msra.gmra.mrb[46].mxu1 %v20110_v23 }
0x26f7   :  { %14692 = vmatprep.mubr.f32.mxu1 %v20092_v42  ;;  %16724 = vmatpush3.bf16.msra.mxu1 %v16721_v60  ;;  %v11707_v60 = vld [vmem:[%s22237_s8 + $0x38] sm:$0xff] }
0x26f8   :  { %16726 = vmatprep.subr.bf16.mxu1 %v16725_v46  ;;  %v16767_v22 = vpack.c.bf16 %v11707_v60, %v11706_v32  ;;  %v11726_v60 = vld [vmem:[%s22257_s3 + $0x170] sm:$0xff] }
0x26fb   :  { %16728 = vmatpush3.bf16.msra.mxu1 %v16725_v46 }
0x26fc   :  { %16730 = vmatprep.subr.bf16.mxu1 %v16729_v49 }
0x26ff   :  { %16732 = vmatpush3.bf16.msra.mxu1 %v16729_v49  ;;  %v6083_v49 = vld [vmem:[%s22237_s8] sm:$0xff] }
0x2700   :  { %16734 = vmatprep.subr.bf16.mxu1 %v16733_v53  ;;  %v16771_v50 = vpack.c.bf16 %v6084_v45, %v6083_v49 }
0x2703   :  { %16736 = vmatpush3.bf16.msra.mxu1 %v16733_v53  ;;  %v11732_v53 = vld [vmem:[%s22233_s4 + $0x110] sm:$0xff] }
0x2704   :  { %16738 = vmatprep.subr.bf16.mxu1 %v16737_v57  ;;  %v16815_v56 = vpack.c.bf16 %v11733_v40, %v11732_v53  ;;  %v11729_v40 = vld [vmem:[%s22259_s28 + $0x2] ss:$0 sm:$0xff] }
0x2707   :  { %16740 = vmatpush3.bf16.msra.mxu1 %v16737_v57  ;;  %v11734_v57 = vld [vmem:[%s22233_s4 + $0x120] sm:$0xff] }
0x27b0   :  { %v14582_v61 = vpop.f32.mrb[60].mxu0 }
0x27b1   :  { %v5971_v15 = vmul.f32 0.17677669, %v14582_v61  ;;  %v5961_v63 = vpop.f32.mrb[61].mxu0  ;;  %v11665_v61 = vld [vmem:[%s22233_s4 + $0x98] sm:$0xff] }
0x27b2   :  { %v5970_v62 = vmul.f32 0.17677669, %v5961_v63 }
0x27b3   :  { %v5979_v55 = vadd.f32 %v20263_v13, %v5971_v15 }
0x27b4   :  { %v5978_v0 = vadd.f32 %v20263_v13, %v5970_v62 }
0x27b5   :  { %v5983_v33 = vsel %vm458_vm2, %v5979_v55, -inf }
0x27b6   :  { %5984 = vmax.xlane.f32.xlu1 %v5983_v33  ;;  %v5980_v1 = vsel %vm458_vm2, %v5978_v0, -inf  ;;  %v11667_v33 = vld [vmem:[%s22233_s4 + $0xa8] sm:$0xff] }
0x27b7   :  { %5981 = vmax.xlane.f32.xlu0 %v5980_v1 }
0x27c9   :  { %v14624_v14 = vpop.f32.mrb[46].mxu1 }
0x27ca   :  { %v6182_v26 = vadd.f32 %v14624_v14, %v11661_v21 }
0x2843   :  { %v5985_v11 = vpop.xlane.xlu1 %5984 }
0x2844   :  { %v5987_v3 = vsub.f32 %v5979_v55, %v5985_v11  ;;  %v5982_v4 = vpop.xlane.xlu0 %5981  ;;  %v16693_v55 = vpack.c.bf16 %v11665_v61, %v11664_v2  ;;  %v11668_v11 = vld [vmem:[%s22233_s4 + $0xb0] sm:$0xff]  ;;  %v11692_v2 = vld [vmem:[%s22235_s6 + $0xe0] sm:$0xff]  ;;  %v11693_v61 = vld [vmem:[%s22235_s6 + $0xe8] sm:$0xff] }
0x2845   :  { %v5986_v27 = vsub.f32 %v5978_v0, %v5982_v4  ;;  %v11666_v0 = vld [vmem:[%s22233_s4 + $0xa0] sm:$0xff] }
0x2846   :  { %v5990_v25 = vmul.f32 1.442695, %v5987_v3  ;;  %v16697_v1 = vpack.c.bf16 %v11667_v33, %v11666_v0  ;;  %v11669_v3 = vld [vmem:[%s22233_s4 + $0xb8] sm:$0xff] }
0x2847   :  { %v5988_v29 = vmul.f32 1.442695, %v5986_v27  ;;  %v16701_v4 = vpack.c.bf16 %v11669_v3, %v11668_v11  ;;  %v11670_v27 = vld [vmem:[%s22233_s4 + $0xc0] sm:$0xff] }
0x2848   :  { %17726 = vpow2.f32 %v5990_v25  ;;  %v11671_v25 = vld [vmem:[%s22233_s4 + $0xc8] sm:$0xff] }
0x2849   :  { %17728 = vpow2.f32 %v5988_v29  ;;  %v16705_v29 = vpack.c.bf16 %v11671_v25, %v11670_v27 }
0x2852   :  { %v20269_v6 = vpop.eup %17726 }
0x2853   :  { %v20271_v48 = vpop.eup %17728  ;;  %v5995_v8 = vsel %vm458_vm2, %v20269_v6, 0.0 }
0x2854   :  { %5996 = vadd.xlane.f32.xlu1 %v5995_v8  ;;  %v5992_v41 = vsel %vm458_vm2, %v20271_v48, 0.0 }
0x2855   :  { %5993 = vadd.xlane.f32.xlu0 %v5992_v41  ;;  %v11674_v41 = vld [vmem:[%s22233_s4 + $0xe0] sm:$0xff] }
0x2856   :  { %v16713_v16 = vpack.c.bf16 %v11675_v10, %v11674_v41 }
0x28e1   :  { %v5997_v59 = vpop.xlane.xlu1 %5996 }
0x28e2   :  { %17730 = vrcp.f32 %v5997_v59  ;;  %v5994_v58 = vpop.xlane.xlu0 %5993  ;;  %v11690_v59 = vld [vmem:[%s22235_s6 + $0xd0] sm:$0xff] }
0x28e3   :  { %17732 = vrcp.f32 %v5994_v58  ;;  %v11691_v58 = vld [vmem:[%s22235_s6 + $0xd8] sm:$0xff] }
0x28ec   :  { %v17731_v36 = vpop.eup %17730 }
0x28ed   :  { %v17733_v15 = vpop.eup %17732  ;;  %v6001_v62 = vmul.f32 %v17731_v36, %v20269_v6  ;;  %v11672_v6 = vld [vmem:[%s22233_s4 + $0xd0] sm:$0xff]  ;;  %v16741_v36 = vpack.c.bf16 %v11691_v58, %v11690_v59  ;;  %v11735_v59 = vld [vmem:[%s22233_s4 + $0x128] sm:$0xff] }
0x28ee   :  { %v5999_v63 = vmul.f32 %v17733_v15, %v20271_v48  ;;  %v11673_v48 = vld [vmem:[%s22233_s4 + $0xd8] sm:$0xff]  ;;  %v16745_v15 = vpack.c.bf16 %v11693_v61, %v11692_v2  ;;  %v16819_v58 = vpack.c.bf16 %v11735_v59, %v11734_v57 }
0x28ef   :  { %v16709_v8 = vpack.c.bf16 %v11673_v48, %v11672_v6  ;;  %16742 = vmatprep.subr.bf16.mxu1 %v16741_v36  ;;  %v11737_v2 = vld [vmem:[%s22233_s4 + $0x138] sm:$0xff] }
0x28f0   :  { %14587 = vmatprep.mubr.msk.f32.mxu0 %vm458_vm2, %v5999_v63  ;;  %v11694_v63 = vld [vmem:[%s22235_s6 + $0xf0] sm:$0xff]  ;;  %16744 = vmatpush3.bf16.msra.mxu1 %v16741_v36 }
0x28f1   :  { %14588 = vmatmul.mubr.msk.f32.vlgmr.msra.gmra.mrb[62].mxu0 %vm458_vm2, %v6001_v62  ;;  %v11695_v62 = vld [vmem:[%s22235_s6 + $0xf8] sm:$0xff]  ;;  %16746 = vmatprep.subr.bf16.mxu1 %v16745_v15  ;;  %v11736_v36 = vld [vmem:[%s22233_s4 + $0x130] sm:$0xff] }
0x28f2   :  { %16692 = vmatpush3.bf16.msra.mxu0 %v16689_v30  ;;  %14657 = vmatprep.mubr.f32.mxu0 %v20092_v42  ;;  %v6176_v30 = vpop.f32.mrb[47].mxu1  ;;  %v16823_v61 = vpack.c.bf16 %v11737_v2, %v11736_v36  ;;  %v11748_v36 = vld [vmem:[%s22235_s6 + $0x100] sm:$0xff]  ;;  %v11749_v2 = vld [vmem:[%s22235_s6 + $0x108] sm:$0xff] }
0x28f3   :  { %16694 = vmatprep.subr.bf16.mxu0 %v16693_v55  ;;  %v6177_v34 = vadd.f32 %v11661_v21, %v6176_v30 }
0x28f4   :  { %16748 = vmatpush3.bf16.msra.mxu1 %v16745_v15  ;;  %v11738_v15 = vld [vmem:[%s22233_s4 + $0x140] sm:$0xff] }
0x28f6   :  { %16696 = vmatpush3.bf16.msra.mxu0 %v16693_v55  ;;  %v16749_v55 = vpack.c.bf16 %v11695_v62, %v11694_v63  ;;  %v11739_v63 = vld [vmem:[%s22233_s4 + $0x148] sm:$0xff] }
0x28f7   :  { %16698 = vmatprep.subr.bf16.mxu0 %v16697_v1  ;;  %v16827_v62 = vpack.c.bf16 %v11739_v63, %v11738_v15  ;;  %v16843_v15 = vpack.c.bf16 %v11749_v2, %v11748_v36  ;;  %v11751_v63 = vld [vmem:[%s22235_s6 + $0x118] sm:$0xff] }
0x28f8   :  { %16750 = vmatprep.subr.bf16.mxu1 %v16749_v55 }
0x28f9   :  { %16752 = vmatpush3.bf16.msra.mxu1 %v16749_v55  ;;  %v11740_v55 = vld [vmem:[%s22233_s4 + $0x150] sm:$0xff] }
0x28fa   :  { %16700 = vmatpush3.bf16.msra.mxu0 %v16697_v1 }
0x28fb   :  { %16702 = vmatprep.subr.bf16.mxu0 %v16701_v4 }
0x28fc   :  { %14693 = vmatmul.mubr.f32.vlgmr.msra.gmra.mrb[48].mxu1 %v20110_v23 }
0x28fd   :  { %14798 = vmatprep.mubr.f32.mxu1 %v20092_v42 }
0x28fe   :  { %16704 = vmatpush3.bf16.msra.mxu0 %v16701_v4 }
0x28ff   :  { %16706 = vmatprep.subr.bf16.mxu0 %v16705_v29 }
0x2902   :  { %16708 = vmatpush3.bf16.msra.mxu0 %v16705_v29 }
0x2903   :  { %16710 = vmatprep.subr.bf16.mxu0 %v16709_v8 }
0x2906   :  { %16712 = vmatpush3.bf16.msra.mxu0 %v16709_v8 }
0x2907   :  { %16714 = vmatprep.subr.bf16.mxu0 %v16713_v16 }
0x290a   :  { %16716 = vmatpush3.bf16.msra.mxu0 %v16713_v16 }
0x290b   :  { %16718 = vmatprep.subr.bf16.mxu0 %v16717_v17 }
0x290e   :  { %16720 = vmatpush3.bf16.msra.mxu0 %v16717_v17  ;;  %v11697_v17 = vld [vmem:[%s22236_s7 + $0x1] ss:$0 sm:$0xff] }
0x2911   :  { %14658 = vmatmul.mubr.f32.vlgmr.msra.gmra.mrb[64].mxu0 %v20110_v23 }
0x2912   :  { %14699 = vmatprep.mubr.msk.f32.mxu0 %vm360_vm0, %v6177_v34  ;;  %v11704_v34 = vld [vmem:[%s22237_s8 + $0x20] sm:$0xff] }
0x29c4   :  { %v20388_v54 = vpop.f32.mrb[62].mxu0 }
0x29c5   :  { %v20390_v9 = vpop.f32.mrb[63].mxu0 }
0x29cf   :  { %v14694_v35 = vpop.f32.mrb[48].mxu1 }
0x29d0   :  { %v6372_v21 = vpop.f32.mrb[49].mxu1  ;;  %v6378_v14 = vadd.f32 %v14694_v35, %v11697_v17  ;;  %v11715_v35 = vld [vmem:[%s22257_s3 + $0x118] sm:$0xff] }
0x29e4   :  { %v14659_v39 = vpop.f32.mrb[64].mxu0 }
0x29e5   :  { %v6280_v19 = vadd.f32 %v14659_v39, %v11679_v38  ;;  %v6274_v47 = vpop.f32.mrb[65].mxu0 }
0x29e6   :  { %v6275_v31 = vadd.f32 %v11679_v38, %v6274_v47  ;;  %v11705_v38 = vld [vmem:[%s22237_s8 + $0x28] sm:$0xff] }
0x29e7   :  { %v16763_v39 = vpack.c.bf16 %v11705_v38, %v11704_v34  ;;  %v11731_v47 = vld [vmem:[%s22233_s4 + $0x108] sm:$0xff]  ;;  %v11719_v34 = vld [vmem:[%s22257_s3 + $0x138] sm:$0xff]  ;;  %v11720_v38 = vld [vmem:[%s22257_s3 + $0x140] sm:$0xff] }
0x29e8   :  { %v16753_v28 = vpack.c.bf16 %v6280_v19, %v6275_v31  ;;  %v11730_v19 = vld [vmem:[%s22233_s4 + $0x100] sm:$0xff] }
0x29e9   :  { %v16811_v31 = vpack.c.bf16 %v11731_v47, %v11730_v19  ;;  %v11722_v47 = vld [vmem:[%s22257_s3 + $0x150] sm:$0xff] }
0x29ea   :  { %16755 = vmatprep.subr.msk.bf16.mxu0 %vm18168_vm1, %v16753_v28 }
0x29eb   :  { %16758 = vmatpush3.bf16.xpose.msk.msra.mxu0 %vm18168_vm1, %v16753_v28  ;;  %16812 = vmatprep.subr.bf16.mxu1 %v16811_v31 }
0x29ec   :  { %16814 = vmatpush3.bf16.msra.mxu1 %v16811_v31  ;;  %v11723_v31 = vld [vmem:[%s22257_s3 + $0x158] sm:$0xff] }
0x29ed   :  { %16816 = vmatprep.subr.bf16.mxu1 %v16815_v56 }
0x29f0   :  { %16818 = vmatpush3.bf16.msra.mxu1 %v16815_v56 }
0x29f1   :  { %16820 = vmatprep.subr.bf16.mxu1 %v16819_v58 }
0x29f2   :  { %14700 = vmatmul.mubr.msk.f32.vlgmr.msra.gmra.mrb[66].mxu0 %vm360_vm0, %v6182_v26  ;;  %v6373_v26 = vadd.f32 %v11697_v17, %v6372_v21  ;;  %v11716_v21 = vld [vmem:[%s22257_s3 + $0x120] sm:$0xff] }
0x29f4   :  { %v16759_v30 = vpack.c.bf16 %v6378_v14, %v6373_v26  ;;  %16822 = vmatpush3.bf16.msra.mxu1 %v16819_v58  ;;  %v20566_v14 = vld [vmem:[%s22258_s2 + $0x10] sm:$0xff] }
0x29f5   :  { %16824 = vmatprep.subr.bf16.mxu1 %v16823_v61 }
0x29f6   :  { %16760 = vmatprep.subr.bf16.mxu0 %v16759_v30 }
0x29f7   :  { %16762 = vmatpush3.bf16.msra.mxu0 %v16759_v30  ;;  %v11718_v30 = vld [vmem:[%s22257_s3 + $0x130] sm:$0xff] }
0x29f8   :  { %16764 = vmatprep.subr.bf16.mxu0 %v16763_v39  ;;  %16826 = vmatpush3.bf16.msra.mxu1 %v16823_v61  ;;  %v11750_v61 = vld [vmem:[%s22235_s6 + $0x110] sm:$0xff] }
0x29f9   :  { %16828 = vmatprep.subr.bf16.mxu1 %v16827_v62 }
0x29fc   :  { %16830 = vmatpush3.bf16.msra.mxu1 %v16827_v62  ;;  %v16847_v62 = vpack.c.bf16 %v11751_v63, %v11750_v61  ;;  %v11796_v63 = vld [vmem:[%s22233_s4 + $0x180] sm:$0xff] }
0x2ac5   :  { %v14701_v0 = vpop.f32.mrb[66].mxu0 }
0x2ac6   :  { %v6469_v33 = vmul.f32 0.17677669, %v14701_v0  ;;  %v6459_v1 = vpop.f32.mrb[67].mxu0  ;;  %v11741_v0 = vld [vmem:[%s22233_s4 + $0x158] sm:$0xff] }
0x2ac7   :  { %v6468_v11 = vmul.f32 0.17677669, %v6459_v1  ;;  %v11742_v1 = vld [vmem:[%s22233_s4 + $0x160] sm:$0xff] }
0x2ac8   :  { %v6471_v3 = vadd.f32 %v20263_v13, %v6469_v33  ;;  %v16831_v33 = vpack.c.bf16 %v11741_v0, %v11740_v55  ;;  %v11752_v55 = vld [vmem:[%s22235_s6 + $0x120] sm:$0xff]  ;;  %v11753_v0 = vld [vmem:[%s22235_s6 + $0x128] sm:$0xff] }
0x2ac9   :  { %v6470_v4 = vadd.f32 %v20263_v13, %v6468_v11  ;;  %v11743_v11 = vld [vmem:[%s22233_s4 + $0x168] sm:$0xff] }
0x2aca   :  { %v6475_v27 = vsel %vm458_vm2, %v6471_v3, -inf  ;;  %16832 = vmatprep.subr.bf16.mxu1 %v16831_v33 }
0x2acb   :  { %6476 = vmax.xlane.f32.xlu1 %v6475_v27  ;;  %v6472_v25 = vsel %vm458_vm2, %v6470_v4, -inf  ;;  %16834 = vmatpush3.bf16.msra.mxu1 %v16831_v33  ;;  %v11745_v27 = vld [vmem:[%s22233_s4 + $0x178] sm:$0xff]  ;;  %v16851_v33 = vpack.c.bf16 %v11753_v0, %v11752_v55  ;;  %v11778_v0 = vld [vmem:[%s22257_s3 + $0x180] sm:$0xff] }
0x2acc   :  { %6473 = vmax.xlane.f32.xlu0 %v6472_v25 }
0x2b58   :  { %v6477_v29 = vpop.xlane.xlu1 %6476 }
0x2b59   :  { %v6479_v6 = vsub.f32 %v6471_v3, %v6477_v29  ;;  %v6474_v48 = vpop.xlane.xlu0 %6473  ;;  %v16835_v3 = vpack.c.bf16 %v11743_v11, %v11742_v1  ;;  %v20530_v29 = vld [vmem:[%s22258_s2 + $0x18] sm:$0xff]  ;;  %v11754_v1 = vld [vmem:[%s22235_s6 + $0x130] sm:$0xff] }
0x2b5a   :  { %v6478_v23 = vsub.f32 %v6470_v4, %v6474_v48  ;;  %v11744_v4 = vld [vmem:[%s22233_s4 + $0x170] sm:$0xff]  ;;  %v6086_v48 = vld [vmem:[%s22237_s8 + $0x18] sm:$0xff] }
0x2b5b   :  { %v6482_v8 = vmul.f32 1.442695, %v6479_v6  ;;  %16836 = vmatprep.subr.bf16.mxu1 %v16835_v3  ;;  %v16839_v25 = vpack.c.bf16 %v11745_v27, %v11744_v4  ;;  %v6085_v6 = vld [vmem:[%s22237_s8 + $0x10] sm:$0xff]  ;;  %v11755_v11 = vld [vmem:[%s22235_s6 + $0x138] sm:$0xff]  ;;  %v11756_v4 = vld [vmem:[%s22235_s6 + $0x140] sm:$0xff] }
0x2b5c   :  { %v6480_v42 = vmul.f32 1.442695, %v6478_v23  ;;  %16838 = vmatpush3.bf16.msra.mxu1 %v16835_v3  ;;  %v16855_v3 = vpack.c.bf16 %v11755_v11, %v11754_v1  ;;  %v11757_v27 = vld [vmem:[%s22235_s6 + $0x148] sm:$0xff]  ;;  %v11780_v11 = vld [vmem:[%s22257_s3 + $0x190] sm:$0xff] }
0x2b5d   :  { %17734 = vpow2.f32 %v6482_v8  ;;  %16840 = vmatprep.subr.bf16.mxu1 %v16839_v25 }
0x2b5e   :  { %17736 = vpow2.f32 %v6480_v42  ;;  %v16775_v42 = vpack.c.bf16 %v6086_v48, %v6085_v6  ;;  %v11758_v6 = vld [vmem:[%s22235_s6 + $0x150] sm:$0xff]  ;;  %v11759_v48 = vld [vmem:[%s22235_s6 + $0x158] sm:$0xff] }
0x2b60   :  { %16842 = vmatpush3.bf16.msra.mxu1 %v16839_v25  ;;  %v16859_v25 = vpack.c.bf16 %v11757_v27, %v11756_v4  ;;  %v11782_v27 = vld [vmem:[%s22257_s3 + $0x1a0] sm:$0xff] }
0x2b63   :  { %14799 = vmatmul.mubr.f32.vlgmr.msra.gmra.mrb[50].mxu1 %v20530_v29 }
0x2b67   :  { %v17735_v41 = vpop.eup %17734 }
0x2b68   :  { %v17737_v10 = vpop.eup %17736  ;;  %v6487_v16 = vsel %vm458_vm2, %v17735_v41, 0.0 }
0x2b69   :  { %6488 = vadd.xlane.f32.xlu1 %v6487_v16  ;;  %v6484_v37 = vsel %vm458_vm2, %v17737_v10, 0.0 }
0x2b6a   :  { %6485 = vadd.xlane.f32.xlu0 %v6484_v37  ;;  %v11714_v37 = vld [vmem:[%s22257_s3 + $0x110] sm:$0xff] }
0x2b6b   :  { %v16783_v17 = vpack.c.bf16 %v11715_v35, %v11714_v37 }
0x2bf6   :  { %v6489_v28 = vpop.xlane.xlu1 %6488 }
0x2bf7   :  { %17738 = vrcp.f32 %v6489_v28  ;;  %v6486_v43 = vpop.xlane.xlu0 %6485  ;;  %v16799_v28 = vpack.c.bf16 %v11723_v31, %v11722_v47 }
0x2bf8   :  { %17740 = vrcp.f32 %v6486_v43  ;;  %v11724_v43 = vld [vmem:[%s22257_s3 + $0x160] sm:$0xff] }
0x2c01   :  { %v17739_v12 = vpop.eup %17738 }
0x2c02   :  { %v17741_v44 = vpop.eup %17740  ;;  %v6493_v51 = vmul.f32 %v17739_v12, %v17735_v41  ;;  %v11712_v41 = vld [vmem:[%s22257_s3 + $0x100] sm:$0xff]  ;;  %v11725_v12 = vld [vmem:[%s22257_s3 + $0x168] sm:$0xff] }
0x2c03   :  { %v6491_v46 = vmul.f32 %v17741_v44, %v17737_v10  ;;  %v11713_v10 = vld [vmem:[%s22257_s3 + $0x108] sm:$0xff]  ;;  %v16803_v32 = vpack.c.bf16 %v11725_v12, %v11724_v43  ;;  %v11727_v44 = vld [vmem:[%s22257_s3 + $0x178] sm:$0xff] }
0x2c04   :  { %v16779_v16 = vpack.c.bf16 %v11713_v10, %v11712_v41  ;;  %v11762_v10 = vld [vmem:[%s22235_s6 + $0x170] sm:$0xff] }
0x2c05   :  { %14706 = vmatprep.mubr.msk.f32.mxu0 %vm458_vm2, %v6491_v46  ;;  %v16807_v46 = vpack.c.bf16 %v11727_v44, %v11726_v60  ;;  %v11765_v44 = vld [vmem:[%s22236_s7 + $0x2] ss:$0 sm:$0xff] }
0x2c06   :  { %14707 = vmatmul.mubr.msk.f32.vlgmr.msra.gmra.mrb[68].mxu0 %vm458_vm2, %v6493_v51  ;;  %v11747_v51 = vld [vmem:[%s22234_s5 + $0x2] ss:$0 sm:$0xff] }
0x2c07   :  { %16766 = vmatpush3.bf16.msra.mxu0 %v16763_v39  ;;  %v11721_v39 = vld [vmem:[%s22257_s3 + $0x148] sm:$0xff] }
0x2c08   :  { %16768 = vmatprep.subr.bf16.mxu0 %v16767_v22  ;;  %v16795_v19 = vpack.c.bf16 %v11721_v39, %v11720_v38 }
0x2c0b   :  { %16770 = vmatpush3.bf16.msra.mxu0 %v16767_v22 }
0x2c0c   :  { %16772 = vmatprep.subr.bf16.mxu0 %v16771_v50 }
0x2c36   :  { %v14800_v22 = vpop.f32.mrb[50].mxu1 }
0x2c37   :  { %v6934_v49 = vadd.f32 %v14800_v22, %v11747_v51  ;;  %v6928_v45 = vpop.f32.mrb[51].mxu1 }
0x2cd9   :  { %v14708_v23 = vpop.f32.mrb[68].mxu0 }
0x2cda   :  { %v6566_v8 = vpop.f32.mrb[69].mxu0 }
0x2cdb   :  { %14717 = vmatprep.mubr.msk.f32.mxu0 %vm360_vm0, %v6566_v8  ;;  %v11760_v8 = vld [vmem:[%s22235_s6 + $0x160] sm:$0xff] }
0x2cdc   :  { %14718 = vmatmul.mubr.msk.f32.vlgmr.msra.gmra.mrb[70].mxu0 %vm360_vm0, %v14708_v23  ;;  %v16863_v23 = vpack.c.bf16 %v11759_v48, %v11758_v6  ;;  %v11784_v48 = vld [vmem:[%s22257_s3 + $0x1b0] sm:$0xff] }
0x2cdd   :  { %16774 = vmatpush3.bf16.msra.mxu0 %v16771_v50  ;;  %14728 = vmatprep.mubr.msk.f32.mxu0 %vm360_vm0, %v20390_v9  ;;  %v11717_v9 = vld [vmem:[%s22257_s3 + $0x128] sm:$0xff]  ;;  %v6929_v50 = vadd.f32 %v11747_v51, %v6928_v45  ;;  %v11772_v45 = vld [vmem:[%s22237_s8 + $0x40] sm:$0xff] }
0x2cde   :  { %16776 = vmatprep.subr.bf16.mxu0 %v16775_v42  ;;  %v16787_v26 = vpack.c.bf16 %v11717_v9, %v11716_v21 }
0x2cdf   :  { %v16875_v53 = vpack.c.bf16 %v6934_v49, %v6929_v50  ;;  %v11773_v50 = vld [vmem:[%s22237_s8 + $0x48] sm:$0xff] }
0x2ce1   :  { %16778 = vmatpush3.bf16.msra.mxu0 %v16775_v42  ;;  %16877 = vmatprep.subr.msk.bf16.mxu1 %vm18168_vm1, %v16875_v53  ;;  %v11761_v42 = vld [vmem:[%s22235_s6 + $0x168] sm:$0xff] }
0x2ce2   :  { %16780 = vmatprep.subr.bf16.mxu0 %v16779_v16  ;;  %16880 = vmatpush3.bf16.xpose.msk.msra.mxu1 %vm18168_vm1, %v16875_v53  ;;  %v16867_v41 = vpack.c.bf16 %v11761_v42, %v11760_v8  ;;  %v11774_v53 = vld [vmem:[%s22237_s8 + $0x50] sm:$0xff]  ;;  %v11786_v42 = vld [vmem:[%s22257_s3 + $0x1c0] sm:$0xff] }
0x2ce4   :  { %14729 = vmatmul.mubr.msk.f32.vlgmr.msra.gmra.mrb[70].mxu0 %vm360_vm0, %v20388_v54  ;;  %v16791_v54 = vpack.c.bf16 %v11719_v34, %v11718_v30 }
0x2ce5   :  { %16782 = vmatpush3.bf16.msra.mxu0 %v16779_v16  ;;  %14763 = vmatprep.mubr.f32.mxu0 %v20566_v14  ;;  %v11763_v16 = vld [vmem:[%s22235_s6 + $0x178] sm:$0xff] }
0x2ce6   :  { %16784 = vmatprep.subr.bf16.mxu0 %v16783_v17  ;;  %v16871_v37 = vpack.c.bf16 %v11763_v16, %v11762_v10  ;;  %v11788_v16 = vld [vmem:[%s22257_s3 + $0x1d0] sm:$0xff] }
0x2ce9   :  { %16786 = vmatpush3.bf16.msra.mxu0 %v16783_v17 }
0x2cea   :  { %16788 = vmatprep.subr.bf16.mxu0 %v16787_v26 }
0x2ced   :  { %16790 = vmatpush3.bf16.msra.mxu0 %v16787_v26 }
0x2cee   :  { %16792 = vmatprep.subr.bf16.mxu0 %v16791_v54 }
0x2cf1   :  { %16794 = vmatpush3.bf16.msra.mxu0 %v16791_v54 }
0x2cf2   :  { %16796 = vmatprep.subr.bf16.mxu0 %v16795_v19 }
0x2cf5   :  { %16798 = vmatpush3.bf16.msra.mxu0 %v16795_v19 }
0x2cf6   :  { %16800 = vmatprep.subr.bf16.mxu0 %v16799_v28 }
0x2cf9   :  { %16802 = vmatpush3.bf16.msra.mxu0 %v16799_v28 }
0x2cfa   :  { %16804 = vmatprep.subr.bf16.mxu0 %v16803_v32 }
0x2cfd   :  { %16806 = vmatpush3.bf16.msra.mxu0 %v16803_v32 }
0x2cfe   :  { %16808 = vmatprep.subr.bf16.mxu0 %v16807_v46 }
0x2d01   :  { %16810 = vmatpush3.bf16.msra.mxu0 %v16807_v46 }
0x2d02   :  { %16844 = vmatprep.subr.bf16.mxu0 %v16843_v15 }
0x2d04   :  { %14764 = vmatmul.mubr.f32.vlgmr.msra.gmra.mrb[72].mxu0 %v20530_v29 }
0x2d05   :  { %14833 = vmatprep.mubr.f32.mxu0 %v20566_v14  ;;  %16846 = vmatpush3.bf16.msra.mxu0 %v16843_v15 }
0x2d06   :  { %16848 = vmatprep.subr.bf16.mxu0 %v16847_v62 }
0x2d09   :  { %16850 = vmatpush3.bf16.msra.mxu0 %v16847_v62  ;;  %v11797_v62 = vld [vmem:[%s22233_s4 + $0x188] sm:$0xff] }
0x2d0a   :  { %16852 = vmatprep.subr.bf16.mxu0 %v16851_v33  ;;  %v16925_v55 = vpack.c.bf16 %v11797_v62, %v11796_v63 }
0x2d0d   :  { %16854 = vmatpush3.bf16.msra.mxu0 %v16851_v33  ;;  %v11779_v33 = vld [vmem:[%s22257_s3 + $0x188] sm:$0xff] }
0x2d0e   :  { %16856 = vmatprep.subr.bf16.mxu0 %v16855_v3  ;;  %v16893_v1 = vpack.c.bf16 %v11779_v33, %v11778_v0 }
0x2d11   :  { %16858 = vmatpush3.bf16.msra.mxu0 %v16855_v3  ;;  %v11781_v3 = vld [vmem:[%s22257_s3 + $0x198] sm:$0xff] }
0x2d12   :  { %16860 = vmatprep.subr.bf16.mxu0 %v16859_v25  ;;  %v16897_v4 = vpack.c.bf16 %v11781_v3, %v11780_v11  ;;  %v11815_v11 = vld [vmem:[%s22235_s6 + $0x188] sm:$0xff]  ;;  %v11816_v3 = vld [vmem:[%s22235_s6 + $0x190] sm:$0xff] }
0x2d15   :  { %16862 = vmatpush3.bf16.msra.mxu0 %v16859_v25  ;;  %v11783_v25 = vld [vmem:[%s22257_s3 + $0x1a8] sm:$0xff] }
0x2d16   :  { %16864 = vmatprep.subr.bf16.mxu0 %v16863_v23  ;;  %v16901_v6 = vpack.c.bf16 %v11783_v25, %v11782_v27  ;;  %v11817_v27 = vld [vmem:[%s22235_s6 + $0x198] sm:$0xff] }
0x2d17   :  { %v16961_v25 = vpack.c.bf16 %v11817_v27, %v11816_v3 }
0x2d19   :  { %16866 = vmatpush3.bf16.msra.mxu0 %v16863_v23  ;;  %v11785_v23 = vld [vmem:[%s22257_s3 + $0x1b8] sm:$0xff] }
0x2d1a   :  { %16868 = vmatprep.subr.bf16.mxu0 %v16867_v41  ;;  %v16905_v8 = vpack.c.bf16 %v11785_v23, %v11784_v48  ;;  %v11819_v48 = vld [vmem:[%s22235_s6 + $0x1a8] sm:$0xff] }
0x2d1d   :  { %16870 = vmatpush3.bf16.msra.mxu0 %v16867_v41  ;;  %v11787_v41 = vld [vmem:[%s22257_s3 + $0x1c8] sm:$0xff] }
0x2d1e   :  { %16872 = vmatprep.subr.bf16.mxu0 %v16871_v37  ;;  %v16909_v10 = vpack.c.bf16 %v11787_v41, %v11786_v42  ;;  %v11821_v42 = vld [vmem:[%s22235_s6 + $0x1b8] sm:$0xff] }
0x2d21   :  { %16874 = vmatpush3.bf16.msra.mxu0 %v16871_v37  ;;  %v11789_v37 = vld [vmem:[%s22257_s3 + $0x1d8] sm:$0xff] }
0x2d24   :  { %14834 = vmatmul.mubr.f32.vlgmr.msra.gmra.mrb[74].mxu0 %v20530_v29 }
0x2dd7   :  { %v14765_v56 = vpop.f32.mrb[72].mxu0 }
0x2dd8   :  { %v6830_v57 = vpop.f32.mrb[73].mxu0  ;;  %v6836_v58 = vadd.f32 %v14765_v56, %v11729_v40  ;;  %v11775_v56 = vld [vmem:[%s22237_s8 + $0x58] sm:$0xff] }
0x2dd9   :  { %v6831_v59 = vadd.f32 %v11729_v40, %v6830_v57  ;;  %v16885_v40 = vpack.c.bf16 %v11773_v50, %v11772_v45  ;;  %v16889_v57 = vpack.c.bf16 %v11775_v56, %v11774_v53  ;;  %v11808_v45 = vld [vmem:[%s22233_s4 + $0x1e0] sm:$0xff]  ;;  %v11809_v50 = vld [vmem:[%s22233_s4 + $0x1e8] sm:$0xff]  ;;  %v11811_v56 = vld [vmem:[%s22233_s4 + $0x1f8] sm:$0xff] }
0x2dda   :  { %v16949_v53 = vpack.c.bf16 %v11809_v50, %v11808_v45 }
0x2ddb   :  { %14840 = vmatprep.mubr.msk.f32.mxu1 %vm360_vm0, %v6831_v59  ;;  %16886 = vmatprep.subr.bf16.mxu0 %v16885_v40 }
0x2ddc   :  { %14841 = vmatmul.mubr.msk.f32.vlgmr.msra.gmra.mrb[52].mxu1 %vm360_vm0, %v6836_v58  ;;  %16888 = vmatpush3.bf16.msra.mxu0 %v16885_v40  ;;  %v11810_v40 = vld [vmem:[%s22233_s4 + $0x1f0] sm:$0xff] }
0x2ddd   :  { %16890 = vmatprep.subr.bf16.mxu0 %v16889_v57 }
0x2de0   :  { %16892 = vmatpush3.bf16.msra.mxu0 %v16889_v57  ;;  %v16953_v57 = vpack.c.bf16 %v11811_v56, %v11810_v40 }
0x2de1   :  { %16926 = vmatprep.subr.bf16.mxu0 %v16925_v55 }
0x2df7   :  { %v14835_v60 = vpop.f32.mrb[74].mxu0 }
0x2df8   :  { %v7026_v46 = vpop.f32.mrb[75].mxu0  ;;  %v7032_v51 = vadd.f32 %v14835_v60, %v11765_v44  ;;  %v11804_v60 = vld [vmem:[%s22233_s4 + $0x1c0] sm:$0xff] }
0x2df9   :  { %v7027_v22 = vadd.f32 %v11765_v44, %v7026_v46  ;;  %v11805_v44 = vld [vmem:[%s22233_s4 + $0x1c8] sm:$0xff] }
0x2dfa   :  { %v16941_v46 = vpack.c.bf16 %v11805_v44, %v11804_v60 }
0x2dfb   :  { %v16881_v49 = vpack.c.bf16 %v7032_v51, %v7027_v22  ;;  %v11806_v51 = vld [vmem:[%s22233_s4 + $0x1d0] sm:$0xff]  ;;  %v11807_v22 = vld [vmem:[%s22233_s4 + $0x1d8] sm:$0xff] }
0x2dfd   :  { %16882 = vmatprep.subr.bf16.mxu1 %v16881_v49 }
0x2dfe   :  { %16884 = vmatpush3.bf16.msra.mxu1 %v16881_v49  ;;  %v16945_v49 = vpack.c.bf16 %v11807_v22, %v11806_v51 }
0x2dff   :  { %16894 = vmatprep.subr.bf16.mxu1 %v16893_v1 }
0x2eaf   :  { %v14842_v35 = vpop.f32.mrb[52].mxu1 }
0x2eb0   :  { %v7123_v17 = vmul.f32 0.17677669, %v14842_v35  ;;  %v7113_v21 = vpop.f32.mrb[53].mxu1  ;;  %v16913_v35 = vpack.c.bf16 %v11789_v37, %v11788_v16  ;;  %v11823_v16 = vld [vmem:[%s22235_s6 + $0x1c8] sm:$0xff] }
0x2eb1   :  { %v7122_v9 = vmul.f32 0.17677669, %v7113_v21  ;;  %v11791_v21 = vld [vmem:[%s22257_s3 + $0x1e8] sm:$0xff] }
0x2eb2   :  { %v7125_v26 = vadd.f32 %v20263_v13, %v7123_v17  ;;  %v11790_v17 = vld [vmem:[%s22257_s3 + $0x1e0] sm:$0xff] }
0x2eb3   :  { %v7124_v30 = vadd.f32 %v20263_v13, %v7122_v9  ;;  %v16917_v9 = vpack.c.bf16 %v11791_v21, %v11790_v17  ;;  %v11825_v17 = vld [vmem:[%s22235_s6 + $0x1d8] sm:$0xff] }
0x2eb4   :  { %v7129_v34 = vsel %vm458_vm2, %v7125_v26, -inf }
0x2eb5   :  { %7130 = vmax.xlane.f32.xlu1 %v7129_v34  ;;  %v7126_v54 = vsel %vm458_vm2, %v7124_v30, -inf }
0x2eb6   :  { %7127 = vmax.xlane.f32.xlu0 %v7126_v54  ;;  %v11798_v54 = vld [vmem:[%s22233_s4 + $0x190] sm:$0xff] }
0x2f42   :  { %v7131_v38 = vpop.xlane.xlu1 %7130 }
0x2f43   :  { %v7133_v39 = vsub.f32 %v7125_v26, %v7131_v38  ;;  %v7128_v19 = vpop.xlane.xlu0 %7127  ;;  %v11792_v26 = vld [vmem:[%s22257_s3 + $0x1f0] sm:$0xff]  ;;  %v11799_v38 = vld [vmem:[%s22233_s4 + $0x198] sm:$0xff] }
0x2f44   :  { %v7132_v47 = vsub.f32 %v7124_v30, %v7128_v19  ;;  %v11793_v30 = vld [vmem:[%s22257_s3 + $0x1f8] sm:$0xff] }
0x2f45   :  { %v7136_v31 = vmul.f32 1.442695, %v7133_v39  ;;  %v16921_v34 = vpack.c.bf16 %v11793_v30, %v11792_v26  ;;  %v11827_v26 = vld [vmem:[%s22235_s6 + $0x1e8] sm:$0xff] }
0x2f46   :  { %v7134_v28 = vmul.f32 1.442695, %v7132_v47  ;;  %v16929_v47 = vpack.c.bf16 %v11799_v38, %v11798_v54  ;;  %v11829_v54 = vld [vmem:[%s22235_s6 + $0x1f8] sm:$0xff] }
0x2f47   :  { %17742 = vpow2.f32 %v7136_v31  ;;  %v11800_v31 = vld [vmem:[%s22233_s4 + $0x1a0] sm:$0xff] }
0x2f48   :  { %17744 = vpow2.f32 %v7134_v28  ;;  %v11801_v28 = vld [vmem:[%s22233_s4 + $0x1a8] sm:$0xff] }
0x2f51   :  { %v17743_v43 = vpop.eup %17742 }
0x2f52   :  { %v17745_v12 = vpop.eup %17744  ;;  %v7141_v32 = vsel %vm458_vm2, %v17743_v43, 0.0 }
0x2f53   :  { %7142 = vadd.xlane.f32.xlu1 %v7141_v32  ;;  %v7138_v13 = vsel %vm458_vm2, %v17745_v12, 0.0  ;;  %v11803_v32 = vld [vmem:[%s22233_s4 + $0x1b8] sm:$0xff] }
0x2f54   :  { %7139 = vadd.xlane.f32.xlu0 %v7138_v13 }
0x2fe0   :  { %v7143_v59 = vpop.xlane.xlu1 %7142 }
0x2fe1   :  { %17746 = vrcp.f32 %v7143_v59  ;;  %v7140_v58 = vpop.xlane.xlu0 %7139  ;;  %v11795_v59 = vld [vmem:[%s22259_s28 + $0x3] ss:$0 sm:$0xff] }
0x2fe2   :  { %17748 = vrcp.f32 %v7140_v58 }
0x2feb   :  { %v17747_v36 = vpop.eup %17746 }
0x2fec   :  { %v17749_v2 = vpop.eup %17748  ;;  %v7147_v15 = vmul.f32 %v17747_v36, %v17743_v43  ;;  %v16933_v43 = vpack.c.bf16 %v11801_v28, %v11800_v31  ;;  %v17845_v28 = vld [vmem:[%s22262_s21 + $0x1] ss:$0 sm:$0xff] }
0x2fed   :  { %v7145_v61 = vmul.f32 %v17749_v2, %v17745_v12  ;;  %v11802_v12 = vld [vmem:[%s22233_s4 + $0x1b0] sm:$0xff] }
0x2fee   :  { %v16937_v13 = vpack.c.bf16 %v11803_v32, %v11802_v12 }
0x2fef   :  { %14847 = vmatprep.mubr.msk.f32.mxu1 %vm458_vm2, %v7145_v61 }
0x2ff0   :  { %14848 = vmatmul.mubr.msk.f32.vlgmr.msra.gmra.mrb[54].mxu1 %vm458_vm2, %v7147_v15  ;;  %v11813_v15 = vld [vmem:[%s22234_s5 + $0x3] ss:$0 sm:$0xff] }
0x2ff1   :  { %14893 = vmatprep.mubr.f32.mxu1 %v20566_v14  ;;  %16896 = vmatpush3.bf16.msra.mxu1 %v16893_v1  ;;  %v11814_v1 = vld [vmem:[%s22235_s6 + $0x180] sm:$0xff] }
0x2ff2   :  { %16898 = vmatprep.subr.bf16.mxu1 %v16897_v4 }
0x2ff5   :  { %16900 = vmatpush3.bf16.msra.mxu1 %v16897_v4  ;;  %v16957_v4 = vpack.c.bf16 %v11815_v11, %v11814_v1 }
0x2ff6   :  { %16902 = vmatprep.subr.bf16.mxu1 %v16901_v6 }
0x2ff9   :  { %16904 = vmatpush3.bf16.msra.mxu1 %v16901_v6  ;;  %v11818_v6 = vld [vmem:[%s22235_s6 + $0x1a0] sm:$0xff] }
0x2ffa   :  { %16906 = vmatprep.subr.bf16.mxu1 %v16905_v8  ;;  %v16965_v23 = vpack.c.bf16 %v11819_v48, %v11818_v6  ;;  %v11844_v48 = vld [vmem:[%s22238_s9] ss:$0 sm:$0xff] }
0x2ffd   :  { %16908 = vmatpush3.bf16.msra.mxu1 %v16905_v8  ;;  %v11820_v8 = vld [vmem:[%s22235_s6 + $0x1b0] sm:$0xff] }
0x2ffe   :  { %16910 = vmatprep.subr.bf16.mxu1 %v16909_v10  ;;  %v16969_v41 = vpack.c.bf16 %v11821_v42, %v11820_v8 }
0x3001   :  { %16912 = vmatpush3.bf16.msra.mxu1 %v16909_v10  ;;  %v11822_v10 = vld [vmem:[%s22235_s6 + $0x1c0] sm:$0xff] }
0x3002   :  { %16914 = vmatprep.subr.bf16.mxu1 %v16913_v35  ;;  %v16973_v37 = vpack.c.bf16 %v11823_v16, %v11822_v10 }
0x3005   :  { %16916 = vmatpush3.bf16.msra.mxu1 %v16913_v35  ;;  %v11824_v35 = vld [vmem:[%s22235_s6 + $0x1d0] sm:$0xff] }
0x3006   :  { %16918 = vmatprep.subr.bf16.mxu1 %v16917_v9  ;;  %v16977_v21 = vpack.c.bf16 %v11825_v17, %v11824_v35  ;;  %v7945_v35 = vld [vmem:[%s22239_s10 + $0x18] sm:$0xff]  ;;  %v7942_v17 = vld [vmem:[%s22239_s10] sm:$0xff] }
0x3009   :  { %16920 = vmatpush3.bf16.msra.mxu1 %v16917_v9  ;;  %v11826_v9 = vld [vmem:[%s22235_s6 + $0x1e0] sm:$0xff] }
0x300a   :  { %16922 = vmatprep.subr.bf16.mxu1 %v16921_v34  ;;  %v16981_v30 = vpack.c.bf16 %v11827_v26, %v11826_v9  ;;  %v7949_v9 = vld [vmem:[%s22239_s10 + $0x38] sm:$0xff] }
0x300d   :  { %16924 = vmatpush3.bf16.msra.mxu1 %v16921_v34  ;;  %v11828_v34 = vld [vmem:[%s22235_s6 + $0x1f0] sm:$0xff] }
0x300e   :  { %16958 = vmatprep.subr.bf16.mxu1 %v16957_v4  ;;  %v16985_v38 = vpack.c.bf16 %v11829_v54, %v11828_v34  ;;  %v7946_v34 = vld [vmem:[%s22239_s10 + $0x20] sm:$0xff]  ;;  %v7948_v54 = vld [vmem:[%s22239_s10 + $0x30] sm:$0xff] }
0x3010   :  { %14894 = vmatmul.mubr.f32.vlgmr.msra.gmra.mrb[56].mxu1 %v20530_v29 }
0x3011   :  { %14963 = vmatprep.mubr.f32.mxu1 %v20566_v14  ;;  %16960 = vmatpush3.bf16.msra.mxu1 %v16957_v4 }
0x3012   :  { %16962 = vmatprep.subr.bf16.mxu1 %v16961_v25 }
0x3015   :  { %16964 = vmatpush3.bf16.msra.mxu1 %v16961_v25 }
0x3016   :  { %16966 = vmatprep.subr.bf16.mxu1 %v16965_v23 }
0x3019   :  { %16968 = vmatpush3.bf16.msra.mxu1 %v16965_v23 }
0x301a   :  { %16970 = vmatprep.subr.bf16.mxu1 %v16969_v41 }
0x301d   :  { %16972 = vmatpush3.bf16.msra.mxu1 %v16969_v41 }
0x301e   :  { %16974 = vmatprep.subr.bf16.mxu1 %v16973_v37 }
0x3021   :  { %16976 = vmatpush3.bf16.msra.mxu1 %v16973_v37  ;;  %v7943_v37 = vld [vmem:[%s22239_s10 + $0x8] sm:$0xff] }
0x3022   :  { %16978 = vmatprep.subr.bf16.mxu1 %v16977_v21 }
0x3025   :  { %16980 = vmatpush3.bf16.msra.mxu1 %v16977_v21  ;;  %v17007_v21 = vpack.c.bf16 %v7945_v35, %v7943_v37 }
0x3026   :  { %16982 = vmatprep.subr.bf16.mxu1 %v16981_v30 }
0x3029   :  { %16984 = vmatpush3.bf16.msra.mxu1 %v16981_v30 }
0x302a   :  { %16986 = vmatprep.subr.bf16.mxu1 %v16985_v38 }
0x302d   :  { %16988 = vmatpush3.bf16.msra.mxu1 %v16985_v38  ;;  %v7951_v38 = vld [vmem:[%s22239_s10 + $0x48] sm:$0xff] }
0x3030   :  { %14964 = vmatmul.mubr.f32.vlgmr.msra.gmra.mrb[58].mxu1 %v20530_v29 }
0x30c3   :  { %v14849_v39 = vpop.f32.mrb[54].mxu1 }
0x30c4   :  { %v7220_v19 = vpop.f32.mrb[55].mxu1 }
0x30c5   :  { %14858 = vmatprep.mubr.msk.f32.mxu0 %vm360_vm0, %v7220_v19 }
0x30c6   :  { %14859 = vmatmul.mubr.msk.f32.vlgmr.msra.gmra.mrb[70].mxu0 %vm360_vm0, %v14849_v39 }
0x30c7   :  { %16928 = vmatpush3.bf16.msra.mxu0 %v16925_v55  ;;  %14928 = vmatprep.mubr.f32.mxu0 %v20566_v14 }
0x30c8   :  { %16930 = vmatprep.subr.bf16.mxu0 %v16929_v47 }
0x30cb   :  { %16932 = vmatpush3.bf16.msra.mxu0 %v16929_v47 }
0x30cc   :  { %16934 = vmatprep.subr.bf16.mxu0 %v16933_v43 }
0x30cf   :  { %16936 = vmatpush3.bf16.msra.mxu0 %v16933_v43 }
0x30d0   :  { %16938 = vmatprep.subr.bf16.mxu0 %v16937_v13 }
0x30d3   :  { %16940 = vmatpush3.bf16.msra.mxu0 %v16937_v13 }
0x30d4   :  { %16942 = vmatprep.subr.bf16.mxu0 %v16941_v46 }
0x30d7   :  { %16944 = vmatpush3.bf16.msra.mxu0 %v16941_v46 }
0x30d8   :  { %16946 = vmatprep.subr.bf16.mxu0 %v16945_v49 }
0x30db   :  { %16948 = vmatpush3.bf16.msra.mxu0 %v16945_v49 }
0x30dc   :  { %16950 = vmatprep.subr.bf16.mxu0 %v16949_v53 }
0x30df   :  { %16952 = vmatpush3.bf16.msra.mxu0 %v16949_v53 }
0x30e0   :  { %16954 = vmatprep.subr.bf16.mxu0 %v16953_v57 }
0x30e3   :  { %16956 = vmatpush3.bf16.msra.mxu0 %v16953_v57  ;;  %v14895_v58 = vpop.f32.mrb[56].mxu1  ;;  %v11831_v57 = vld [vmem:[%s22236_s7 + $0x3] ss:$0 sm:$0xff] }
0x30e4   :  { %v7411_v36 = vadd.f32 %v14895_v58, %v11795_v59  ;;  %v7405_v2 = vpop.f32.mrb[57].mxu1 }
0x30e5   :  { %v7406_v61 = vadd.f32 %v11795_v59, %v7405_v2 }
0x30e6   :  { %14929 = vmatmul.mubr.f32.vlgmr.msra.gmra.mrb[76].mxu0 %v20530_v29 }
0x30e7   :  { %14970 = vmatprep.mubr.msk.f32.mxu0 %vm360_vm0, %v7406_v61  ;;  %v11838_v61 = vld [vmem:[%s22237_s8 + $0x60] sm:$0xff] }
0x3103   :  { %v14965_v56 = vpop.f32.mrb[58].mxu1 }
0x3104   :  { %v7601_v59 = vpop.f32.mrb[59].mxu1  ;;  %v7607_v58 = vadd.f32 %v14965_v56, %v11831_v57 }
0x31b9   :  { %v14930_v63 = vpop.f32.mrb[76].mxu0 }
0x31ba   :  { %v7509_v62 = vadd.f32 %v14930_v63, %v11813_v15  ;;  %v7503_v55 = vpop.f32.mrb[77].mxu0  ;;  %v11840_v63 = vld [vmem:[%s22237_s8 + $0x70] sm:$0xff] }
0x31bb   :  { %v7504_v0 = vadd.f32 %v11813_v15, %v7503_v55  ;;  %v11839_v15 = vld [vmem:[%s22237_s8 + $0x68] sm:$0xff]  ;;  %v11841_v55 = vld [vmem:[%s22237_s8 + $0x78] sm:$0xff] }
0x31bd   :  { %v16989_v33 = vpack.c.bf16 %v7509_v62, %v7504_v0  ;;  %v16999_v62 = vpack.c.bf16 %v11839_v15, %v11838_v61  ;;  %v17003_v0 = vpack.c.bf16 %v11841_v55, %v11840_v63  ;;  %v7963_v15 = vld [vmem:[%s22239_s10 + $0xa8] sm:$0xff]  ;;  %v7965_v63 = vld [vmem:[%s22239_s10 + $0xb8] sm:$0xff] }
0x31be   :  { %v17027_v55 = vpack.c.bf16 %v7965_v63, %v7963_v15  ;;  %v8195_v15 = vld [vmem:[%s22241_s12 + $0xc0] sm:$0xff]  ;;  %v8196_v63 = vld [vmem:[%s22241_s12 + $0xc8] sm:$0xff] }
0x31bf   :  { %16991 = vmatprep.subr.msk.bf16.mxu0 %vm18168_vm1, %v16989_v33 }
0x31c0   :  { %16994 = vmatpush3.bf16.xpose.msk.msra.mxu0 %vm18168_vm1, %v16989_v33 }
0x31c1   :  { %17000 = vmatprep.subr.bf16.mxu0 %v16999_v62 }
0x31c7   :  { %14971 = vmatmul.mubr.msk.f32.vlgmr.msra.gmra.mrb[78].mxu0 %vm360_vm0, %v7411_v36  ;;  %v7602_v36 = vadd.f32 %v11831_v57, %v7601_v59  ;;  %v7959_v57 = vld [vmem:[%s22239_s10 + $0x88] sm:$0xff]  ;;  %v7961_v59 = vld [vmem:[%s22239_s10 + $0x98] sm:$0xff] }
0x31c8   :  { %17002 = vmatpush3.bf16.msra.mxu0 %v16999_v62  ;;  %v7962_v62 = vld [vmem:[%s22239_s10 + $0xa0] sm:$0xff] }
0x31c9   :  { %v16995_v2 = vpack.c.bf16 %v7607_v58, %v7602_v36  ;;  %17004 = vmatprep.subr.bf16.mxu0 %v17003_v0  ;;  %v17023_v58 = vpack.c.bf16 %v7961_v59, %v7959_v57  ;;  %v7958_v36 = vld [vmem:[%s22239_s10 + $0x80] sm:$0xff]  ;;  %v8193_v57 = vld [vmem:[%s22241_s12 + $0xb0] sm:$0xff]  ;;  %v8194_v59 = vld [vmem:[%s22241_s12 + $0xb8] sm:$0xff] }
0x31cb   :  { %16996 = vmatprep.subr.bf16.mxu1 %v16995_v2 }
0x31cc   :  { %16998 = vmatpush3.bf16.msra.mxu1 %v16995_v2  ;;  %17006 = vmatpush3.bf16.msra.mxu0 %v17003_v0  ;;  %v7960_v2 = vld [vmem:[%s22239_s10 + $0x90] sm:$0xff] }
0x31cd   :  { %17008 = vmatprep.subr.bf16.mxu1 %v17007_v21  ;;  %v17025_v61 = vpack.c.bf16 %v7960_v2, %v7958_v36  ;;  %v7964_v0 = vld [vmem:[%s22239_s10 + $0xb0] sm:$0xff]  ;;  %v8178_v2 = vld [vmem:[%s22241_s12 + $0x38] sm:$0xff] }
0x31ce   :  { %v8177_v36 = vld [vmem:[%s22241_s12 + $0x30] sm:$0xff] }
0x329a   :  { %v14972_v39 = vpop.f32.mrb[78].mxu0 }
0x329b   :  { %v7698_v19 = vmul.f32 0.17677669, %v14972_v39  ;;  %v7688_v47 = vpop.f32.mrb[79].mxu0  ;;  %v7953_v39 = vld [vmem:[%s22239_s10 + $0x58] sm:$0xff] }
0x329c   :  { %v7697_v31 = vmul.f32 0.17677669, %v7688_v47  ;;  %v17015_v47 = vpack.c.bf16 %v7953_v39, %v7951_v38 }
0x329d   :  { %v7700_v43 = vadd.f32 %v17845_v28, %v7698_v19  ;;  %v17013_v19 = vpack.c.bf16 %v7948_v54, %v7946_v34  ;;  %v11846_v34 = vld [vmem:[%s22244_s15] ss:$0 sm:$0xff] }
0x329e   :  { %v7699_v12 = vadd.f32 %v17845_v28, %v7697_v31  ;;  %v7950_v31 = vld [vmem:[%s22239_s10 + $0x40] sm:$0xff]  ;;  %v7952_v28 = vld [vmem:[%s22239_s10 + $0x50] sm:$0xff] }
0x329f   :  { %v7704_v32 = vsel %vm458_vm2, %v7700_v43, -inf }
0x32a0   :  { %7705 = vmax.xlane.f32.xlu1 %v7704_v32  ;;  %v7701_v13 = vsel %vm458_vm2, %v7699_v12, -inf }
0x32a1   :  { %7702 = vmax.xlane.f32.xlu0 %v7701_v13 }
0x332d   :  { %v7706_v60 = vpop.xlane.xlu1 %7705 }
0x332e   :  { %v7708_v44 = vsub.f32 %v7700_v43, %v7706_v60  ;;  %v7703_v46 = vpop.xlane.xlu0 %7702  ;;  %v17017_v43 = vpack.c.bf16 %v7952_v28, %v7950_v31  ;;  %v8188_v31 = vld [vmem:[%s22241_s12 + $0x88] sm:$0xff] }
0x332f   :  { %v7707_v51 = vsub.f32 %v7699_v12, %v7703_v46 }
0x3330   :  { %v7711_v22 = vmul.f32 1.442695, %v7708_v44 }
0x3331   :  { %v7709_v49 = vmul.f32 1.442695, %v7707_v51 }
0x3332   :  { %17750 = vpow2.f32 %v7711_v22 }
0x3333   :  { %17752 = vpow2.f32 %v7709_v49  ;;  %v7955_v49 = vld [vmem:[%s22239_s10 + $0x68] sm:$0xff] }
0x333c   :  { %v17751_v45 = vpop.eup %17750 }
0x333d   :  { %v17753_v50 = vpop.eup %17752  ;;  %v7716_v53 = vsel %vm458_vm2, %v17751_v45, 0.0 }
0x333e   :  { %7717 = vadd.xlane.f32.xlu1 %v7716_v53  ;;  %v7713_v40 = vsel %vm458_vm2, %v17753_v50, 0.0  ;;  %v7954_v53 = vld [vmem:[%s22239_s10 + $0x60] sm:$0xff] }
0x333f   :  { %7714 = vadd.xlane.f32.xlu0 %v7713_v40  ;;  %v7956_v40 = vld [vmem:[%s22239_s10 + $0x70] sm:$0xff] }
0x3340   :  { %v17021_v56 = vpack.c.bf16 %v7956_v40, %v7954_v53  ;;  %v8175_v53 = vld [vmem:[%s22241_s12 + $0x20] sm:$0xff]  ;;  %v8176_v40 = vld [vmem:[%s22241_s12 + $0x28] sm:$0xff] }
0x33cb   :  { %v7718_v33 = vpop.xlane.xlu1 %7717 }
0x33cc   :  { %17754 = vrcp.f32 %v7718_v33  ;;  %v7715_v1 = vpop.xlane.xlu0 %7714  ;;  %v7967_v33 = vld [vmem:[%s22239_s10 + $0xc8] sm:$0xff] }
0x33cd   :  { %17756 = vrcp.f32 %v7715_v1  ;;  %v7969_v1 = vld [vmem:[%s22239_s10 + $0xd8] sm:$0xff] }
0x33d6   :  { %v17755_v11 = vpop.eup %17754 }
0x33d7   :  { %v17757_v3 = vpop.eup %17756  ;;  %v7722_v27 = vmul.f32 %v17755_v11, %v17751_v45  ;;  %v7957_v45 = vld [vmem:[%s22239_s10 + $0x78] sm:$0xff]  ;;  %v17029_v11 = vpack.c.bf16 %v7964_v0, %v7962_v62  ;;  %v17055_v62 = vpack.c.bf16 %v8196_v63, %v8195_v15  ;;  %v8180_v0 = vld [vmem:[%s22241_s12 + $0x48] sm:$0xff] }
0x33d8   :  { %v7720_v4 = vmul.f32 %v17757_v3, %v17753_v50  ;;  %v17019_v50 = vpack.c.bf16 %v7957_v45, %v7955_v49  ;;  %v17031_v3 = vpack.c.bf16 %v7969_v1, %v7967_v33  ;;  %v8191_v49 = vld [vmem:[%s22241_s12 + $0xa0] sm:$0xff]  ;;  %v8192_v45 = vld [vmem:[%s22241_s12 + $0xa8] sm:$0xff]  ;;  %v8197_v1 = vld [vmem:[%s22241_s12 + $0xd0] sm:$0xff] }
0x33da   :  { %14977 = vmatprep.mubr.msk.f32.mxu1 %vm458_vm2, %v7720_v4  ;;  %v7966_v4 = vld [vmem:[%s22239_s10 + $0xc0] sm:$0xff] }
0x33db   :  { %14978 = vmatmul.mubr.msk.f32.vlgmr.msra.gmra.mrb[60].mxu1 %vm458_vm2, %v7722_v27  ;;  %v7968_v27 = vld [vmem:[%s22239_s10 + $0xd0] sm:$0xff] }
0x33dc   :  { %8050 = vmatprep.mubr.f32.mxu1 %v17896_v52 }
0x34ae   :  { %v14979_v25 = vpop.f32.mrb[60].mxu1 }
0x34af   :  { %v7795_v6 = vpop.f32.mrb[61].mxu1 }
0x34b0   :  { %14988 = vmatprep.mubr.msk.f32.mxu0 %vm360_vm0, %v7795_v6  ;;  %v7973_v6 = vld [vmem:[%s22239_s10 + $0xf8] sm:$0xff] }
0x34b1   :  { %14989 = vmatmul.mubr.msk.f32.vlgmr.msra.gmra.mrb[70].mxu0 %vm360_vm0, %v14979_v25  ;;  %v7971_v25 = vld [vmem:[%s22239_s10 + $0xe8] sm:$0xff] }
0x3584   :  { %v14990_v23 = vpop.f32.mrb[70].mxu0 }
0x3585   :  { %v7899_v8 = vadd.f32 %v14990_v23, %v11844_v48  ;;  %v7880_v42 = vpop.f32.mrb[71].mxu0  ;;  %v17035_v23 = vpack.c.bf16 %v7973_v6, %v7971_v25  ;;  %v8199_v6 = vld [vmem:[%s22241_s12 + $0xe0] sm:$0xff] }
0x3586   :  { %v7898_v41 = vadd.f32 %v11844_v48, %v7880_v42  ;;  %v17033_v48 = vpack.c.bf16 %v7968_v27, %v7966_v4  ;;  %v7972_v42 = vld [vmem:[%s22239_s10 + $0xf0] sm:$0xff]  ;;  %v8182_v27 = vld [vmem:[%s22241_s12 + $0x58] sm:$0xff] }
0x3587   :  { %v7903_v10 = vadd.f32 %v20530_v29, %v7899_v8  ;;  %v7944_v29 = vld [vmem:[%s22239_s10 + $0x10] sm:$0xff]  ;;  %v7970_v8 = vld [vmem:[%s22239_s10 + $0xe0] sm:$0xff] }
0x3588   :  { %v7902_v16 = vadd.f32 %v20566_v14, %v7898_v41  ;;  %v7947_v14 = vld [vmem:[%s22239_s10 + $0x28] sm:$0xff]  ;;  %v17009_v26 = vpack.c.bf16 %v7944_v29, %v7942_v17  ;;  %v17037_v41 = vpack.c.bf16 %v7972_v42, %v7970_v8  ;;  %v8181_v4 = vld [vmem:[%s22241_s12 + $0x50] sm:$0xff]  ;;  %v8183_v8 = vld [vmem:[%s22241_s12 + $0x60] sm:$0xff] }
0x3589   :  { %7906 = vadd.xlane.f32.xlu1 %v7903_v10  ;;  %v17011_v30 = vpack.c.bf16 %v7949_v9, %v7947_v14  ;;  %v11845_v9 = vld [vmem:[%s22243_s14] ss:$0 sm:$0xff]  ;;  %v17061_v25 = vpack.c.bf16 %v8182_v27, %v8181_v4  ;;  %v8184_v42 = vld [vmem:[%s22241_s12 + $0x68] sm:$0xff] }
0x358a   :  { %7904 = vadd.xlane.f32.xlu0 %v7902_v16  ;;  %17010 = vmatpush1.bf16.msra.mxu1 %v17009_v26 }
0x358b   :  { %17012 = vmatprep.subr.bf16.mxu1 %v17011_v30 }
0x358e   :  { %17014 = vmatpush1.bf16.msra.mxu1 %v17013_v19 }
0x358f   :  { %17016 = vmatprep.subr.bf16.mxu1 %v17015_v47  ;;  %v8187_v47 = vld [vmem:[%s22241_s12 + $0x80] sm:$0xff] }
0x3590   :  { %v17039_v28 = vpack.c.bf16 %v8188_v31, %v8187_v47 }
0x3592   :  { %17018 = vmatpush1.bf16.msra.mxu1 %v17017_v43  ;;  %v8171_v43 = vld [vmem:[%s22241_s12] sm:$0xff]  ;;  %17040 = vmatprep.subr.bf16.mxu0 %v17039_v28 }
0x3593   :  { %17020 = vmatprep.subr.bf16.mxu1 %v17019_v50  ;;  %v17047_v50 = vpack.c.bf16 %v8192_v45, %v8191_v49 }
0x3596   :  { %17022 = vmatpush1.bf16.msra.mxu1 %v17021_v56  ;;  %v17049_v56 = vpack.c.bf16 %v8176_v40, %v8175_v53 }
0x3597   :  { %17024 = vmatprep.subr.bf16.mxu1 %v17023_v58  ;;  %v17051_v58 = vpack.c.bf16 %v8194_v59, %v8193_v57 }
0x359a   :  { %17026 = vmatpush1.bf16.msra.mxu1 %v17025_v61  ;;  %v17053_v61 = vpack.c.bf16 %v8178_v2, %v8177_v36 }
0x359b   :  { %17028 = vmatprep.subr.bf16.mxu1 %v17027_v55  ;;  %v8179_v55 = vld [vmem:[%s22241_s12 + $0x40] sm:$0xff] }
0x359c   :  { %v17057_v33 = vpack.c.bf16 %v8180_v0, %v8179_v55 }
0x359e   :  { %17030 = vmatpush1.bf16.msra.mxu1 %v17029_v11  ;;  %v8198_v11 = vld [vmem:[%s22241_s12 + $0xd8] sm:$0xff] }
0x359f   :  { %17032 = vmatprep.subr.bf16.mxu1 %v17031_v3  ;;  %v17059_v3 = vpack.c.bf16 %v8198_v11, %v8197_v1 }
0x35a2   :  { %17034 = vmatpush1.bf16.msra.mxu1 %v17033_v48  ;;  %v8200_v48 = vld [vmem:[%s22241_s12 + $0xe8] sm:$0xff] }
0x35a3   :  { %17036 = vmatprep.subr.bf16.mxu1 %v17035_v23  ;;  %v17063_v23 = vpack.c.bf16 %v8200_v48, %v8199_v6 }
0x35a6   :  { %17038 = vmatpush1.bf16.msra.mxu1 %v17037_v41  ;;  %v17065_v41 = vpack.c.bf16 %v8184_v42, %v8183_v8 }
0x3616   :  { %v7907_v12 = vpop.xlane.xlu1 %7906 }
0x3617   :  { %v7909_v32 = vmul.f32 0.0078125, %v7907_v12  ;;  %v7905_v13 = vpop.xlane.xlu0 %7904  ;;  %v8172_v12 = vld [vmem:[%s22241_s12 + $0x8] sm:$0xff] }
0x3618   :  { %v7908_v60 = vmul.f32 0.0078125, %v7905_v13  ;;  %v8189_v13 = vld [vmem:[%s22241_s12 + $0x90] sm:$0xff] }
0x3619   :  { %v7911_v44 = vsub.f32 %v7903_v10, %v7909_v32  ;;  %v17041_v32 = vpack.c.bf16 %v8172_v12, %v8171_v43 }
0x361a   :  { %v7910_v46 = vsub.f32 %v7902_v16, %v7908_v60  ;;  %v8190_v60 = vld [vmem:[%s22241_s12 + $0x98] sm:$0xff] }
0x361b   :  { %v7913_v51 = vmul.f32 %v7911_v44, %v7911_v44  ;;  %17042 = vmatpush3.bf16.msra.mxu0 %v17041_v32 }
0x361c   :  { %v7912_v22 = vmul.f32 %v7910_v46, %v7910_v46 }
0x361d   :  { %7916 = vadd.xlane.f32.xlu1 %v7913_v51  ;;  %v8174_v51 = vld [vmem:[%s22241_s12 + $0x18] sm:$0xff] }
0x361e   :  { %7914 = vadd.xlane.f32.xlu0 %v7912_v22 }
0x36aa   :  { %v7917_v10 = vpop.xlane.xlu1 %7916 }
0x36ab   :  { %v7919_v16 = vmul.f32 0.0078125, %v7917_v10  ;;  %v7915_v37 = vpop.xlane.xlu0 %7914  ;;  %v8201_v10 = vld [vmem:[%s22241_s12 + $0xf0] sm:$0xff] }
0x36ac   :  { %v7918_v35 = vmul.f32 0.0078125, %v7915_v37 }
0x36ad   :  { %v7921_v17 = vadd.f32 1e-05, %v7919_v16  ;;  %v8202_v16 = vld [vmem:[%s22241_s12 + $0xf8] sm:$0xff] }
0x36ae   :  { %v7920_v21 = vadd.f32 1e-05, %v7918_v35  ;;  %v17067_v37 = vpack.c.bf16 %v8202_v16, %v8201_v10  ;;  %v8185_v35 = vld [vmem:[%s22241_s12 + $0x70] sm:$0xff] }
0x36af   :  { %17758 = vrsqrt.f32 %v7921_v17  ;;  %v8186_v17 = vld [vmem:[%s22241_s12 + $0x78] sm:$0xff] }
0x36b0   :  { %17760 = vrsqrt.f32 %v7920_v21  ;;  %v17069_v21 = vpack.c.bf16 %v8186_v17, %v8185_v35 }
0x36b9   :  { %v17759_v29 = vpop.eup %17758 }
0x36ba   :  { %v17761_v14 = vpop.eup %17760  ;;  %v7925_v30 = vmul.f32 %v17759_v29, %v7911_v44  ;;  %v17043_v44 = vpack.c.bf16 %v8190_v60, %v8189_v13  ;;  %v7974_v29 = vld [vmem:[%s22240_s11] sm:$0x3] }
0x36bb   :  { %v7924_v26 = vmul.f32 %v17761_v14, %v7910_v46  ;;  %v8173_v46 = vld [vmem:[%s22241_s12 + $0x10] sm:$0xff]  ;;  %v7979_v14 = vrot.slane %v7974_v29, %v18996_v5 }
0x36bc   :  { %v7933_v39 = vmul.f32 %v11845_v9, %v7925_v30  ;;  %v17045_v22 = vpack.c.bf16 %v8174_v51, %v8173_v46  ;;  %17044 = vmatprep.subr.bf16.mxu0 %v17043_v44 }
0x36bd   :  { %v7932_v54 = vmul.f32 %v11845_v9, %v7924_v26  ;;  %v7983_v9 = vrot.slane %v7974_v29, %v19001_v7 }
0x36be   :  { %v20987_v19 = vadd.f32 %v11846_v34, %v7933_v39  ;;  %17046 = vmatpush3.bf16.msra.mxu0 %v17045_v22 }
0x36bf   :  { %v20983_v38 = vadd.f32 %v11846_v34, %v7932_v54  ;;  %17048 = vmatprep.subr.bf16.mxu0 %v17047_v50 }
0x36c1   :  { %8051 = vmatmul.mubr.f32.vlgmr.msra.gmra.mrb[62].mxu1 %v20983_v38 }
0x36c2   :  { %8056 = vmatprep.mubr.f32.mxu1 %v17896_v52  ;;  %17050 = vmatpush3.bf16.msra.mxu0 %v17049_v56 }
0x36c3   :  { %17052 = vmatprep.subr.bf16.mxu0 %v17051_v58 }
0x36c5   :  { %8057 = vmatmul.mubr.f32.gmra.mrb[64].mxu1 %v20987_v19 }
0x36c6   :  { %17054 = vmatpush3.bf16.msra.mxu0 %v17053_v61 }
0x36c7   :  { %17056 = vmatprep.subr.bf16.mxu0 %v17055_v62 }
0x36ca   :  { %17058 = vmatpush3.bf16.msra.mxu0 %v17057_v33 }
0x36cb   :  { %17060 = vmatprep.subr.bf16.mxu0 %v17059_v3 }
0x36ce   :  { %17062 = vmatpush3.bf16.msra.mxu0 %v17061_v25 }
0x36cf   :  { %17064 = vmatprep.subr.bf16.mxu0 %v17063_v23 }
0x36d2   :  { %17066 = vmatpush3.bf16.msra.mxu0 %v17065_v41 }
0x36d3   :  { %17068 = vmatprep.subr.bf16.mxu0 %v17067_v37 }
0x36d6   :  { %17070 = vmatpush3.bf16.msra.mxu0 %v17069_v21 }
0x3794   :  { %v8052_v26 = vpop.f32.mrb[62].mxu1 }
0x3795   :  { %v21091_v30 = vadd.f32 %v8052_v26, %v7979_v14  ;;  %v8054_v34 = vpop.f32.mrb[63].mxu1 }
0x3796   :  { %v21093_v54 = vadd.f32 %v8054_v34, %v7983_v9 }
0x3797   :  { %v21096_v39 = vmul.f32 0.70710677, %v21091_v30 }
0x3798   :  { %v21099_v47 = vmul.f32 0.70710677, %v21093_v54  ;;  %v8058_v31 = vpop.f32.mrb[64].mxu1 }
0x3799   :  { %v8071_v28 = vand.u32 2147483647, %v21096_v39  ;;  %v21102_v43 = vadd.f32 %v8058_v31, %v7979_v14  ;;  %v8060_v12 = vpop.f32.mrb[65].mxu1  ;;  %vm8151_vm11 = vcmp.lt.f32.partialorder %v21096_v39, 0.0 }
0x379a   :  { %v8072_v32 = vand.u32 2147483647, %v21099_v47  ;;  %v21105_v13 = vadd.f32 %v8060_v12, %v7983_v9  ;;  %vm8152_vm12 = vcmp.lt.f32.partialorder %v21099_v47, 0.0 }
0x379b   :  { %v8075_v60 = vmul.f32 0.3275911, %v8071_v28  ;;  %v21108_v44 = vmul.f32 0.70710677, %v21102_v43  ;;  %v8127_v59 = vsub.f32 0.0, %v8071_v28 }
0x379c   :  { %v8076_v46 = vmul.f32 0.3275911, %v8072_v32  ;;  %v21111_v51 = vmul.f32 0.70710677, %v21105_v13  ;;  %v8128_v58 = vsub.f32 0.0, %v8072_v32 }
0x379d   :  { %v8079_v22 = vadd.f32 1.0, %v8075_v60  ;;  %v8073_v49 = vand.u32 2147483647, %v21108_v44  ;;  %v8131_v2 = vmul.f32 %v8127_v59, %v8071_v28  ;;  %vm8153_vm13 = vcmp.lt.f32.partialorder %v21108_v44, 0.0  ;;  %v11847_v44 = vld [vmem:[%s22242_s13] ss:$0 sm:$0xff] }
0x379e   :  { %v8080_v45 = vadd.f32 1.0, %v8076_v46  ;;  %v8074_v50 = vand.u32 2147483647, %v21111_v51  ;;  %v8132_v62 = vmul.f32 %v8128_v58, %v8072_v32  ;;  %vm8154_vm14 = vcmp.lt.f32.partialorder %v21111_v51, 0.0 }
0x379f   :  { %17762 = vrcp.f32 %v8079_v22  ;;  %v8077_v53 = vmul.f32 0.3275911, %v8073_v49  ;;  %v8129_v61 = vsub.f32 0.0, %v8073_v49  ;;  %v8135_v11 = vmul.f32 1.442695, %v8131_v2 }
0x37a0   :  { %17764 = vrcp.f32 %v8080_v45  ;;  %v8078_v40 = vmul.f32 0.3275911, %v8074_v50  ;;  %v8130_v55 = vsub.f32 0.0, %v8074_v50  ;;  %v8137_v6 = vmul.f32 1.442695, %v8132_v62 }
0x37a1   :  { %v8081_v56 = vadd.f32 1.0, %v8077_v53  ;;  %v8133_v3 = vmul.f32 %v8129_v61, %v8073_v49 }
0x37a2   :  { %v8082_v57 = vadd.f32 1.0, %v8078_v40  ;;  %v8134_v48 = vmul.f32 %v8130_v55, %v8074_v50 }
0x37a3   :  { %17766 = vrcp.f32 %v8081_v56  ;;  %v8139_v16 = vmul.f32 1.442695, %v8133_v3 }
0x37a4   :  { %17768 = vrcp.f32 %v8082_v57  ;;  %v8141_v21 = vmul.f32 1.442695, %v8134_v48 }
0x37a5   :  { %17770 = vpow2.f32 %v8135_v11 }
0x37a6   :  { %17772 = vpow2.f32 %v8137_v6 }
0x37a7   :  { %17774 = vpow2.f32 %v8139_v16 }
0x37a8   :  { %17776 = vpow2.f32 %v8141_v21 }
0x37a9   :  { %v17763_v36 = vpop.eup %17762 }
0x37aa   :  { %v17765_v15 = vpop.eup %17764  ;;  %v8091_v63 = vmul.f32 1.0614054, %v17763_v36 }
0x37ab   :  { %v8092_v0 = vmul.f32 1.0614054, %v17765_v15 }
0x37ac   :  { %v8095_v33 = vadd.f32 -1.4531521, %v8091_v63 }
0x37ad   :  { %v17767_v1 = vpop.eup %17766  ;;  %v8096_v4 = vadd.f32 -1.4531521, %v8092_v0 }
0x37ae   :  { %v17769_v27 = vpop.eup %17768  ;;  %v8099_v25 = vmul.f32 %v17763_v36, %v8095_v33  ;;  %v8093_v23 = vmul.f32 1.0614054, %v17767_v1 }
0x37af   :  { %v8100_v8 = vmul.f32 %v17765_v15, %v8096_v4  ;;  %v8094_v42 = vmul.f32 1.0614054, %v17769_v27  ;;  %v17771_v56 = vpop.eup %17770 }
0x37b0   :  { %v8103_v41 = vadd.f32 1.4214138, %v8099_v25  ;;  %v8097_v10 = vadd.f32 -1.4531521, %v8093_v23  ;;  %v17773_v58 = vpop.eup %17772 }
0x37b1   :  { %v8104_v37 = vadd.f32 1.4214138, %v8100_v8  ;;  %v8098_v35 = vadd.f32 -1.4531521, %v8094_v42  ;;  %v17775_v33 = vpop.eup %17774 }
0x37b2   :  { %v8107_v17 = vmul.f32 %v17763_v36, %v8103_v41  ;;  %v8101_v29 = vmul.f32 %v17767_v1, %v8097_v10  ;;  %v17777_v4 = vpop.eup %17776  ;;  %v8064_v10 = vmul.f32 0.5, %v21093_v54  ;;  %v8065_v54 = vmul.f32 0.5, %v21102_v43 }
0x37b3   :  { %v8108_v14 = vmul.f32 %v17765_v15, %v8104_v37  ;;  %v8102_v9 = vmul.f32 %v17769_v27, %v8098_v35 }
0x37b4   :  { %v8111_v26 = vadd.f32 -0.28449672, %v8107_v17  ;;  %v8105_v34 = vadd.f32 1.4214138, %v8101_v29  ;;  %v8066_v29 = vmul.f32 0.5, %v21105_v13 }
0x37b5   :  { %v8112_v31 = vadd.f32 -0.28449672, %v8108_v14  ;;  %v8106_v28 = vadd.f32 1.4214138, %v8102_v9 }
0x37b6   :  { %v8115_v12 = vmul.f32 %v17763_v36, %v8111_v26  ;;  %v8109_v32 = vmul.f32 %v17767_v1, %v8105_v34 }
0x37b7   :  { %v8116_v60 = vmul.f32 %v17765_v15, %v8112_v31  ;;  %v8110_v46 = vmul.f32 %v17769_v27, %v8106_v28 }
0x37b8   :  { %v8119_v22 = vadd.f32 0.2548296, %v8115_v12  ;;  %v8113_v49 = vadd.f32 -0.28449672, %v8109_v32 }
0x37b9   :  { %v8120_v45 = vadd.f32 0.2548296, %v8116_v60  ;;  %v8114_v50 = vadd.f32 -0.28449672, %v8110_v46  ;;  %v11850_v46 = vld [vmem:[%s22257_s3 + $0x200] sm:$0xff] }
0x37ba   :  { %v8123_v53 = vmul.f32 %v17763_v36, %v8119_v22  ;;  %v8117_v40 = vmul.f32 %v17767_v1, %v8113_v49  ;;  %v11851_v22 = vld [vmem:[%s22257_s3 + $0x208] sm:$0xff]  ;;  %v11868_v49 = vld [vmem:[%s22233_s4 + $0x200] sm:$0xff] }
0x37bb   :  { %v8124_v57 = vmul.f32 %v17765_v15, %v8120_v45  ;;  %v8118_v59 = vmul.f32 %v17769_v27, %v8114_v50  ;;  %v17071_v45 = vpack.c.bf16 %v11851_v22, %v11850_v46  ;;  %v11853_v50 = vld [vmem:[%s22257_s3 + $0x218] sm:$0xff] }
0x37bc   :  { %v8143_v2 = vmul.f32 %v17771_v56, %v8123_v53  ;;  %v8121_v61 = vadd.f32 0.2548296, %v8117_v40  ;;  %v11870_v56 = vld [vmem:[%s22233_s4 + $0x210] sm:$0xff] }
0x37bd   :  { %v8144_v63 = vmul.f32 %v17773_v58, %v8124_v57  ;;  %v8122_v62 = vadd.f32 0.2548296, %v8118_v59  ;;  %v11871_v57 = vld [vmem:[%s22233_s4 + $0x218] sm:$0xff]  ;;  %17072 = vmatprep.subr.bf16.mxu1 %v17071_v45 }
0x37be   :  { %v8147_v55 = vsub.f32 1.0, %v8143_v2  ;;  %v8125_v0 = vmul.f32 %v17767_v1, %v8121_v61  ;;  %v17107_v59 = vpack.c.bf16 %v11871_v57, %v11870_v56  ;;  %17074 = vmatpush3.bf16.msra.mxu1 %v17071_v45  ;;  %v11849_v57 = vld [vmem:[%s22246_s17] ss:$0 sm:$0xff] }
0x37bf   :  { %v8148_v11 = vsub.f32 1.0, %v8144_v63  ;;  %v8126_v3 = vmul.f32 %v17769_v27, %v8122_v62  ;;  %v8063_v27 = vmul.f32 0.5, %v21091_v30 }
0x37c0   :  { %v8155_v25 = vsub.f32 0.0, %v8147_v55  ;;  %v8145_v6 = vmul.f32 %v17775_v33, %v8125_v0 }
0x37c1   :  { %v8156_v36 = vsub.f32 0.0, %v8148_v11  ;;  %v8146_v48 = vmul.f32 %v17777_v4, %v8126_v3  ;;  %v11855_v3 = vld [vmem:[%s22257_s3 + $0x228] sm:$0xff] }
0x37c2   :  { %v8159_v23 = vsel %vm8151_vm11, %v8155_v25, %v8147_v55  ;;  %v8149_v15 = vsub.f32 1.0, %v8145_v6  ;;  %v11872_v25 = vld [vmem:[%s22233_s4 + $0x220] sm:$0xff]  ;;  %v11873_v6 = vld [vmem:[%s22233_s4 + $0x228] sm:$0xff] }
0x37c3   :  { %v8163_v8 = vadd.f32 1.0, %v8159_v23  ;;  %v8160_v42 = vsel %vm8152_vm12, %v8156_v36, %v8148_v11  ;;  %v8150_v41 = vsub.f32 1.0, %v8146_v48  ;;  %v11854_v11 = vld [vmem:[%s22257_s3 + $0x220] sm:$0xff]  ;;  %v17111_v36 = vpack.c.bf16 %v11873_v6, %v11872_v25  ;;  %v11856_v48 = vld [vmem:[%s22257_s3 + $0x230] sm:$0xff]  ;;  %v11857_v23 = vld [vmem:[%s22257_s3 + $0x238] sm:$0xff] }
0x37c4   :  { %v8164_v1 = vadd.f32 1.0, %v8160_v42  ;;  %v8157_v16 = vsub.f32 0.0, %v8149_v15  ;;  %v17079_v4 = vpack.c.bf16 %v11855_v3, %v11854_v11  ;;  %v11875_v42 = vld [vmem:[%s22233_s4 + $0x238] sm:$0xff]  ;;  %v11891_v3 = vld [vmem:[%s22235_s6 + $0x228] sm:$0xff]  ;;  %v11892_v25 = vld [vmem:[%s22235_s6 + $0x230] sm:$0xff] }
0x37c5   :  { %v8158_v37 = vsub.f32 0.0, %v8150_v41  ;;  %v8167_v17 = vmul.f32 %v8163_v8, %v8063_v27  ;;  %v11874_v8 = vld [vmem:[%s22233_s4 + $0x230] sm:$0xff]  ;;  %v11876_v27 = vld [vmem:[%s22233_s4 + $0x240] sm:$0xff]  ;;  %v11893_v6 = vld [vmem:[%s22235_s6 + $0x238] sm:$0xff] }
0x37c6   :  { %v8168_v39 = vmul.f32 %v8164_v1, %v8064_v10  ;;  %v8161_v35 = vsel %vm8153_vm13, %v8157_v16, %v8149_v15  ;;  %v17083_v15 = vpack.c.bf16 %v11857_v23, %v11856_v48  ;;  %v11858_v10 = vld [vmem:[%s22257_s3 + $0x240] sm:$0xff]  ;;  %v11859_v1 = vld [vmem:[%s22257_s3 + $0x248] sm:$0xff] }
0x37c7   :  { %v8162_v21 = vsel %vm8154_vm14, %v8158_v37, %v8150_v41  ;;  %v8165_v47 = vadd.f32 1.0, %v8161_v35  ;;  %v17115_v41 = vpack.c.bf16 %v11875_v42, %v11874_v8  ;;  %v17087_v16 = vpack.c.bf16 %v11859_v1, %v11858_v10  ;;  %v11877_v37 = vld [vmem:[%s22233_s4 + $0x248] sm:$0xff]  ;;  %v11860_v35 = vld [vmem:[%s22257_s3 + $0x250] sm:$0xff]  ;;  %v11894_v48 = vld [vmem:[%s22235_s6 + $0x240] sm:$0xff] }
0x37c8   :  { %8274 = vmatprep.mubr.f32.mxu0 %v8168_v39  ;;  %v8166_v14 = vadd.f32 1.0, %v8162_v21  ;;  %v17119_v39 = vpack.c.bf16 %v11877_v37, %v11876_v27  ;;  %v11895_v23 = vld [vmem:[%s22235_s6 + $0x248] sm:$0xff]  ;;  %v11896_v8 = vld [vmem:[%s22235_s6 + $0x250] sm:$0xff]  ;;  %v11897_v42 = vld [vmem:[%s22235_s6 + $0x258] sm:$0xff] }
0x37c9   :  { %8275 = vmatmul.mubr.f32.vlgmr.msra.gmra.mrb[80].mxu0 %v8167_v17  ;;  %v8169_v26 = vmul.f32 %v8165_v47, %v8065_v54  ;;  %v11861_v17 = vld [vmem:[%s22257_s3 + $0x258] sm:$0xff]  ;;  %v11878_v47 = vld [vmem:[%s22233_s4 + $0x250] sm:$0xff]  ;;  %v11862_v54 = vld [vmem:[%s22257_s3 + $0x260] sm:$0xff] }
0x37ca   :  { %v8170_v9 = vmul.f32 %v8166_v14, %v8066_v29  ;;  %v17091_v21 = vpack.c.bf16 %v11861_v17, %v11860_v35  ;;  %v11879_v29 = vld [vmem:[%s22233_s4 + $0x258] sm:$0xff]  ;;  %v11898_v10 = vld [vmem:[%s22235_s6 + $0x260] sm:$0xff]  ;;  %v11899_v1 = vld [vmem:[%s22235_s6 + $0x268] sm:$0xff] }
0x37cb   :  { %v17123_v14 = vpack.c.bf16 %v11879_v29, %v11878_v47  ;;  %v11900_v27 = vld [vmem:[%s22235_s6 + $0x270] sm:$0xff]  ;;  %v11901_v37 = vld [vmem:[%s22235_s6 + $0x278] sm:$0xff]  ;;  %v11932_v35 = vld [vmem:[%s22233_s4 + $0x280] sm:$0xff] }
0x37cc   :  { %8279 = vmatprep.mubr.f32.mxu0 %v8170_v9  ;;  %v11863_v9 = vld [vmem:[%s22257_s3 + $0x268] sm:$0xff]  ;;  %v11934_v47 = vld [vmem:[%s22233_s4 + $0x290] sm:$0xff]  ;;  %v11935_v29 = vld [vmem:[%s22233_s4 + $0x298] sm:$0xff] }
0x37cd   :  { %8280 = vmatmul.mubr.f32.gmra.mrb[82].mxu0 %v8169_v26  ;;  %v17095_v26 = vpack.c.bf16 %v11863_v9, %v11862_v54  ;;  %v11933_v17 = vld [vmem:[%s22233_s4 + $0x288] sm:$0xff]  ;;  %v11936_v54 = vld [vmem:[%s22233_s4 + $0x2a0] sm:$0xff] }
0x37ce   :  { %v11937_v9 = vld [vmem:[%s22233_s4 + $0x2a8] sm:$0xff] }
0x389c   :  { %v13115_v30 = vpop.f32.mrb[80].mxu0 }
0x389d   :  { %v13116_v51 = vpop.f32.mrb[81].mxu0 }
0x389e   :  { %v13117_v34 = vadd.f32 %v13116_v51, %v13115_v30  ;;  %v11880_v30 = vld [vmem:[%s22233_s4 + $0x260] sm:$0xff] }
0x38a0   :  { %v8277_v31 = vadd.f32 %v13117_v34, %v11847_v44  ;;  %v13118_v28 = vpop.f32.mrb[82].mxu0  ;;  %v11864_v34 = vld [vmem:[%s22257_s3 + $0x270] sm:$0xff] }
0x38a1   :  { %v13119_v12 = vpop.f32.mrb[83].mxu0 }
0x38a2   :  { %v13120_v13 = vadd.f32 %v13119_v12, %v13118_v28  ;;  %v8287_v32 = vadd.f32 %v8277_v31, %v20983_v38  ;;  %v11869_v38 = vld [vmem:[%s22233_s4 + $0x208] sm:$0xff]  ;;  %v11865_v31 = vld [vmem:[%s22257_s3 + $0x278] sm:$0xff]  ;;  %v11882_v12 = vld [vmem:[%s22233_s4 + $0x270] sm:$0xff] }
0x38a3   :  { %v17103_v53 = vpack.c.bf16 %v11869_v38, %v11868_v49  ;;  %v17099_v28 = vpack.c.bf16 %v11865_v31, %v11864_v34  ;;  %v11940_v34 = vld [vmem:[%s22233_s4 + $0x2c0] sm:$0xff]  ;;  %v11941_v31 = vld [vmem:[%s22233_s4 + $0x2c8] sm:$0xff] }
0x38a4   :  { %v8282_v60 = vadd.f32 %v13120_v13, %v11847_v44  ;;  %8289 = vadd.xlane.f32.xlu0 %v8287_v32  ;;  %v11881_v44 = vld [vmem:[%s22233_s4 + $0x268] sm:$0xff]  ;;  %v11883_v13 = vld [vmem:[%s22233_s4 + $0x278] sm:$0xff] }
0x38a5   :  { %17104 = vmatprep.subr.bf16.mxu0 %v17103_v53  ;;  %v17127_v51 = vpack.c.bf16 %v11881_v44, %v11880_v30  ;;  %v11938_v30 = vld [vmem:[%s22233_s4 + $0x2b0] sm:$0xff]  ;;  %v11939_v44 = vld [vmem:[%s22233_s4 + $0x2b8] sm:$0xff] }
0x38a6   :  { %v8288_v43 = vadd.f32 %v8282_v60, %v20987_v19  ;;  %v11852_v19 = vld [vmem:[%s22257_s3 + $0x210] sm:$0xff]  ;;  %17106 = vmatpush3.bf16.msra.mxu0 %v17103_v53  ;;  %v11886_v60 = vld [vmem:[%s22235_s6 + $0x200] sm:$0xff] }
0x38a7   :  { %v17075_v40 = vpack.c.bf16 %v11853_v50, %v11852_v19  ;;  %17108 = vmatprep.subr.bf16.mxu0 %v17107_v59 }
0x38a8   :  { %8291 = vadd.xlane.f32.xlu1 %v8288_v43 }
0x38a9   :  { %17076 = vmatprep.subr.bf16.mxu1 %v17075_v40 }
0x38aa   :  { %17078 = vmatpush3.bf16.msra.mxu1 %v17075_v40  ;;  %17110 = vmatpush3.bf16.msra.mxu0 %v17107_v59  ;;  %v11848_v40 = vld [vmem:[%s22245_s16] ss:$0 sm:$0xff] }
0x38ab   :  { %17080 = vmatprep.subr.bf16.mxu1 %v17079_v4  ;;  %17112 = vmatprep.subr.bf16.mxu0 %v17111_v36 }
0x38ae   :  { %17082 = vmatpush3.bf16.msra.mxu1 %v17079_v4  ;;  %17114 = vmatpush3.bf16.msra.mxu0 %v17111_v36  ;;  %v17147_v36 = vpack.c.bf16 %v11893_v6, %v11892_v25  ;;  %v11949_v25 = vld [vmem:[%s22234_s5 + $0x5] ss:$0 sm:$0xff] }
0x38af   :  { %17084 = vmatprep.subr.bf16.mxu1 %v17083_v15  ;;  %17116 = vmatprep.subr.bf16.mxu0 %v17115_v41 }
0x38b2   :  { %17086 = vmatpush3.bf16.msra.mxu1 %v17083_v15  ;;  %17118 = vmatpush3.bf16.msra.mxu0 %v17115_v41  ;;  %v17151_v15 = vpack.c.bf16 %v11895_v23, %v11894_v48  ;;  %v17155_v41 = vpack.c.bf16 %v11897_v42, %v11896_v8 }
0x38b3   :  { %17088 = vmatprep.subr.bf16.mxu1 %v17087_v16  ;;  %17120 = vmatprep.subr.bf16.mxu0 %v17119_v39 }
0x38b6   :  { %17090 = vmatpush3.bf16.msra.mxu1 %v17087_v16  ;;  %17122 = vmatpush3.bf16.msra.mxu0 %v17119_v39  ;;  %v17159_v16 = vpack.c.bf16 %v11899_v1, %v11898_v10  ;;  %v17163_v39 = vpack.c.bf16 %v11901_v37, %v11900_v27  ;;  %v21373_v1 = vld [vmem:[%s22262_s21 + $0x1] ss:$0 sm:$0xff] }
0x38b7   :  { %17092 = vmatprep.subr.bf16.mxu1 %v17091_v21  ;;  %17124 = vmatprep.subr.bf16.mxu0 %v17123_v14 }
0x38ba   :  { %17094 = vmatpush3.bf16.msra.mxu1 %v17091_v21  ;;  %17126 = vmatpush3.bf16.msra.mxu0 %v17123_v14  ;;  %v17209_v21 = vpack.c.bf16 %v11933_v17, %v11932_v35  ;;  %v17213_v14 = vpack.c.bf16 %v11935_v29, %v11934_v47 }
0x38bb   :  { %17096 = vmatprep.subr.bf16.mxu1 %v17095_v26  ;;  %17128 = vmatprep.subr.bf16.mxu0 %v17127_v51 }
0x38be   :  { %17098 = vmatpush3.bf16.msra.mxu1 %v17095_v26  ;;  %17130 = vmatpush3.bf16.msra.mxu0 %v17127_v51  ;;  %v17217_v26 = vpack.c.bf16 %v11937_v9, %v11936_v54  ;;  %v17221_v51 = vpack.c.bf16 %v11939_v44, %v11938_v30  ;;  %v11914_v44 = vld [vmem:[%s22257_s3 + $0x280] sm:$0xff] }
0x38bf   :  { %17100 = vmatprep.subr.bf16.mxu1 %v17099_v28 }
0x38c2   :  { %17102 = vmatpush3.bf16.msra.mxu1 %v17099_v28  ;;  %v17225_v28 = vpack.c.bf16 %v11941_v31, %v11940_v34 }
0x3931   :  { %v8290_v58 = vpop.xlane.xlu0 %8289 }
0x3932   :  { %v8293_v2 = vmul.f32 0.0078125, %v8290_v58 }
0x3934   :  { %v21152_v61 = vsub.f32 %v8287_v32, %v8293_v2  ;;  %v17131_v32 = vpack.c.bf16 %v11883_v13, %v11882_v12  ;;  %v11942_v12 = vld [vmem:[%s22233_s4 + $0x2d0] sm:$0xff]  ;;  %v11943_v13 = vld [vmem:[%s22233_s4 + $0x2d8] sm:$0xff] }
0x3935   :  { %v8292_v63 = vpop.xlane.xlu1 %8291 }
0x3936   :  { %v8294_v62 = vmul.f32 0.0078125, %v8292_v63  ;;  %v8297_v55 = vmul.f32 %v21152_v61, %v21152_v61  ;;  %17132 = vmatprep.subr.bf16.mxu0 %v17131_v32 }
0x3937   :  { %17134 = vmatpush3.bf16.msra.mxu0 %v17131_v32  ;;  %v17229_v32 = vpack.c.bf16 %v11943_v13, %v11942_v12  ;;  %v11916_v13 = vld [vmem:[%s22257_s3 + $0x290] sm:$0xff] }
0x3938   :  { %v21156_v0 = vsub.f32 %v8288_v43, %v8294_v62  ;;  %8299 = vadd.xlane.f32.xlu0 %v8297_v55  ;;  %v11887_v43 = vld [vmem:[%s22235_s6 + $0x208] sm:$0xff]  ;;  %v11888_v62 = vld [vmem:[%s22235_s6 + $0x210] sm:$0xff]  ;;  %v11889_v55 = vld [vmem:[%s22235_s6 + $0x218] sm:$0xff] }
0x3939   :  { %v17135_v46 = vpack.c.bf16 %v11887_v43, %v11886_v60  ;;  %v17139_v11 = vpack.c.bf16 %v11889_v55, %v11888_v62  ;;  %v11944_v60 = vld [vmem:[%s22233_s4 + $0x2e0] sm:$0xff]  ;;  %v11945_v43 = vld [vmem:[%s22233_s4 + $0x2e8] sm:$0xff] }
0x393a   :  { %v8298_v33 = vmul.f32 %v21156_v0, %v21156_v0  ;;  %v11903_v55 = vld [vmem:[%s22236_s7 + $0x4] ss:$0 sm:$0xff] }
0x393b   :  { %17136 = vmatprep.subr.bf16.mxu1 %v17135_v46 }
0x393c   :  { %8301 = vadd.xlane.f32.xlu1 %v8298_v33 }
0x39c5   :  { %v8300_v22 = vpop.xlane.xlu0 %8299 }
0x39c6   :  { %v8303_v49 = vmul.f32 0.0078125, %v8300_v22  ;;  %v11946_v22 = vld [vmem:[%s22233_s4 + $0x2f0] sm:$0xff] }
0x39c8   :  { %v8305_v45 = vadd.f32 1e-05, %v8303_v49  ;;  %v11947_v49 = vld [vmem:[%s22233_s4 + $0x2f8] sm:$0xff] }
0x39c9   :  { %v8302_v38 = vpop.xlane.xlu1 %8301 }
0x39ca   :  { %17778 = vrsqrt.f32 %v8305_v45  ;;  %v8304_v19 = vmul.f32 0.0078125, %v8302_v38  ;;  %v17237_v45 = vpack.c.bf16 %v11947_v49, %v11946_v22  ;;  %v11885_v38 = vld [vmem:[%s22234_s5 + $0x4] ss:$0 sm:$0xff] }
0x39cb   :  { %v11918_v49 = vld [vmem:[%s22257_s3 + $0x2a0] sm:$0xff] }
0x39cc   :  { %v8306_v50 = vadd.f32 1e-05, %v8304_v19  ;;  %v11867_v19 = vld [vmem:[%s22259_s28 + $0x4] ss:$0 sm:$0xff] }
0x39ce   :  { %17780 = vrsqrt.f32 %v8306_v50 }
0x39d4   :  { %v17779_v53 = vpop.eup %17778 }
0x39d5   :  { %v8309_v56 = vmul.f32 %v17779_v53, %v21152_v61 }
0x39d7   :  { %v8317_v59 = vmul.f32 %v11848_v40, %v8309_v56 }
0x39d8   :  { %v17781_v58 = vpop.eup %17780 }
0x39d9   :  { %v21245_v2 = vadd.f32 %v11849_v57, %v8317_v59  ;;  %v8310_v63 = vmul.f32 %v17781_v58, %v21156_v0  ;;  %v11890_v0 = vld [vmem:[%s22235_s6 + $0x220] sm:$0xff] }
0x39da   :  { %v17143_v4 = vpack.c.bf16 %v11891_v3, %v11890_v0 }
0x39db   :  { %v8318_v33 = vmul.f32 %v11848_v40, %v8310_v63  ;;  %15023 = vmatprep.mubr.f32.mxu1 %v21245_v2  ;;  %15058 = vmatprep.mubr.f32.mxu0 %v21245_v2 }
0x39dd   :  { %v21256_v61 = vadd.f32 %v11849_v57, %v8318_v33 }
0x39df   :  { %15024 = vmatmul.mubr.f32.vlgmr.msra.gmra.mrb[66].mxu1 %v21256_v61  ;;  %15059 = vmatmul.mubr.f32.vlgmr.msra.gmra.mrb[84].mxu0 %v21256_v61 }
0x39e0   :  { %17138 = vmatpush3.bf16.msra.mxu1 %v17135_v46  ;;  %15093 = vmatprep.mubr.f32.mxu1 %v21245_v2  ;;  %v17233_v46 = vpack.c.bf16 %v11945_v43, %v11944_v60 }
0x39e1   :  { %17140 = vmatprep.subr.bf16.mxu1 %v17139_v11 }
0x39e4   :  { %17142 = vmatpush3.bf16.msra.mxu1 %v17139_v11 }
0x39e5   :  { %17144 = vmatprep.subr.bf16.mxu1 %v17143_v4 }
0x39e8   :  { %17146 = vmatpush3.bf16.msra.mxu1 %v17143_v4 }
0x39e9   :  { %17148 = vmatprep.subr.bf16.mxu1 %v17147_v36 }
0x39ec   :  { %17150 = vmatpush3.bf16.msra.mxu1 %v17147_v36 }
0x39ed   :  { %17152 = vmatprep.subr.bf16.mxu1 %v17151_v15 }
0x39f0   :  { %17154 = vmatpush3.bf16.msra.mxu1 %v17151_v15 }
0x39f1   :  { %17156 = vmatprep.subr.bf16.mxu1 %v17155_v41 }
0x39f4   :  { %17158 = vmatpush3.bf16.msra.mxu1 %v17155_v41 }
0x39f5   :  { %17160 = vmatprep.subr.bf16.mxu1 %v17159_v16 }
0x39f8   :  { %17162 = vmatpush3.bf16.msra.mxu1 %v17159_v16 }
0x39f9   :  { %17164 = vmatprep.subr.bf16.mxu1 %v17163_v39 }
0x39fc   :  { %17166 = vmatpush3.bf16.msra.mxu1 %v17163_v39 }
0x39fd   :  { %17210 = vmatprep.subr.bf16.mxu1 %v17209_v21 }
0x39ff   :  { %15094 = vmatmul.mubr.f32.vlgmr.msra.gmra.mrb[68].mxu1 %v21256_v61 }
0x3a00   :  { %17212 = vmatpush3.bf16.msra.mxu1 %v17209_v21  ;;  %15177 = vmatprep.mubr.f32.mxu1 %v21245_v2 }
0x3a01   :  { %17214 = vmatprep.subr.bf16.mxu1 %v17213_v14 }
0x3a04   :  { %17216 = vmatpush3.bf16.msra.mxu1 %v17213_v14 }
0x3a05   :  { %17218 = vmatprep.subr.bf16.mxu1 %v17217_v26 }
0x3a08   :  { %17220 = vmatpush3.bf16.msra.mxu1 %v17217_v26 }
0x3a09   :  { %17222 = vmatprep.subr.bf16.mxu1 %v17221_v51 }
0x3a0c   :  { %17224 = vmatpush3.bf16.msra.mxu1 %v17221_v51  ;;  %v11915_v51 = vld [vmem:[%s22257_s3 + $0x288] sm:$0xff] }
0x3a0d   :  { %17226 = vmatprep.subr.bf16.mxu1 %v17225_v28  ;;  %v17177_v34 = vpack.c.bf16 %v11915_v51, %v11914_v44  ;;  %v11983_v44 = vld [vmem:[%s22257_s3 + $0x308] sm:$0xff] }
0x3a10   :  { %17228 = vmatpush3.bf16.msra.mxu1 %v17225_v28 }
0x3a11   :  { %17230 = vmatprep.subr.bf16.mxu1 %v17229_v32 }
0x3a14   :  { %17232 = vmatpush3.bf16.msra.mxu1 %v17229_v32  ;;  %v11917_v32 = vld [vmem:[%s22257_s3 + $0x298] sm:$0xff] }
0x3a15   :  { %17234 = vmatprep.subr.bf16.mxu1 %v17233_v46  ;;  %v17181_v22 = vpack.c.bf16 %v11917_v32, %v11916_v13  ;;  %v11987_v13 = vld [vmem:[%s22257_s3 + $0x328] sm:$0xff] }
0x3a18   :  { %17236 = vmatpush3.bf16.msra.mxu1 %v17233_v46 }
0x3a19   :  { %17238 = vmatprep.subr.bf16.mxu1 %v17237_v45 }
0x3a1c   :  { %17240 = vmatpush3.bf16.msra.mxu1 %v17237_v45  ;;  %v11919_v45 = vld [vmem:[%s22257_s3 + $0x2a8] sm:$0xff] }
0x3a1f   :  { %15178 = vmatmul.mubr.f32.vlgmr.msra.gmra.mrb[70].mxu1 %v21256_v61 }
0x3ab2   :  { %v15025_v50 = vpop.f32.mrb[66].mxu1  ;;  %v15060_v53 = vpop.f32.mrb[84].mxu0 }
0x3ab3   :  { %v8520_v40 = vadd.f32 %v15060_v53, %v11885_v38  ;;  %v8416_v56 = vpop.f32.mrb[67].mxu1  ;;  %v8514_v57 = vpop.f32.mrb[85].mxu0  ;;  %v8422_v62 = vadd.f32 %v15025_v50, %v11867_v19  ;;  %v11921_v50 = vld [vmem:[%s22257_s3 + $0x2b8] sm:$0xff] }
0x3ab4   :  { %v8417_v59 = vadd.f32 %v11867_v19, %v8416_v56  ;;  %v8515_v58 = vadd.f32 %v11885_v38, %v8514_v57  ;;  %v17185_v38 = vpack.c.bf16 %v11919_v45, %v11918_v49  ;;  %v11920_v19 = vld [vmem:[%s22257_s3 + $0x2b0] sm:$0xff]  ;;  %v11923_v56 = vld [vmem:[%s22257_s3 + $0x2c8] sm:$0xff] }
0x3ab5   :  { %v17189_v53 = vpack.c.bf16 %v11921_v50, %v11920_v19  ;;  %v11991_v49 = vld [vmem:[%s22257_s3 + $0x348] sm:$0xff]  ;;  %v11993_v19 = vld [vmem:[%s22257_s3 + $0x358] sm:$0xff] }
0x3ab6   :  { %v17167_v63 = vpack.c.bf16 %v8520_v40, %v8515_v58  ;;  %15100 = vmatprep.mubr.msk.f32.mxu0 %vm360_vm0, %v8417_v59  ;;  %v11922_v40 = vld [vmem:[%s22257_s3 + $0x2c0] sm:$0xff]  ;;  %v11924_v59 = vld [vmem:[%s22257_s3 + $0x2d0] sm:$0xff]  ;;  %v11925_v58 = vld [vmem:[%s22257_s3 + $0x2d8] sm:$0xff] }
0x3ab7   :  { %v17193_v57 = vpack.c.bf16 %v11923_v56, %v11922_v40  ;;  %v11995_v40 = vld [vmem:[%s22257_s3 + $0x368] sm:$0xff] }
0x3ab8   :  { %17169 = vmatprep.subr.msk.bf16.mxu0 %vm18168_vm1, %v17167_v63 }
0x3ab9   :  { %17172 = vmatpush3.bf16.xpose.msk.msra.mxu0 %vm18168_vm1, %v17167_v63  ;;  %v17197_v63 = vpack.c.bf16 %v11925_v58, %v11924_v59  ;;  %v11997_v59 = vld [vmem:[%s22257_s3 + $0x378] sm:$0xff] }
0x3ac0   :  { %15101 = vmatmul.mubr.msk.f32.vlgmr.msra.gmra.mrb[86].mxu0 %vm360_vm0, %v8422_v62  ;;  %v11926_v62 = vld [vmem:[%s22257_s3 + $0x2e0] sm:$0xff] }
0x3ad2   :  { %v15095_v33 = vpop.f32.mrb[68].mxu1 }
0x3ad3   :  { %v8618_v11 = vadd.f32 %v15095_v33, %v11903_v55  ;;  %v8612_v0 = vpop.f32.mrb[69].mxu1 }
0x3ad4   :  { %v8613_v3 = vadd.f32 %v11903_v55, %v8612_v0  ;;  %v11927_v55 = vld [vmem:[%s22257_s3 + $0x2e8] sm:$0xff]  ;;  %v11929_v0 = vld [vmem:[%s22257_s3 + $0x2f8] sm:$0xff] }
0x3ad5   :  { %v17201_v33 = vpack.c.bf16 %v11927_v55, %v11926_v62  ;;  %v12019_v62 = vld [vmem:[%s22235_s6 + $0x308] sm:$0xff] }
0x3ad6   :  { %v17173_v4 = vpack.c.bf16 %v8618_v11, %v8613_v3  ;;  %v11928_v11 = vld [vmem:[%s22257_s3 + $0x2f0] sm:$0xff] }
0x3ad7   :  { %v17205_v3 = vpack.c.bf16 %v11929_v0, %v11928_v11  ;;  %v12021_v11 = vld [vmem:[%s22235_s6 + $0x318] sm:$0xff] }
0x3ad8   :  { %17174 = vmatprep.subr.bf16.mxu0 %v17173_v4 }
0x3ad9   :  { %17176 = vmatpush3.bf16.msra.mxu0 %v17173_v4  ;;  %v11950_v4 = vld [vmem:[%s22235_s6 + $0x280] sm:$0xff] }
0x3ada   :  { %17178 = vmatprep.subr.bf16.mxu0 %v17177_v34 }
0x3af2   :  { %v15179_v6 = vpop.f32.mrb[70].mxu1 }
0x3af3   :  { %v9012_v36 = vadd.f32 %v15179_v6, %v11949_v25  ;;  %v9006_v48 = vpop.f32.mrb[71].mxu1 }
0x3af4   :  { %v9007_v23 = vadd.f32 %v11949_v25, %v9006_v48  ;;  %v11951_v25 = vld [vmem:[%s22235_s6 + $0x288] sm:$0xff]  ;;  %v11953_v48 = vld [vmem:[%s22235_s6 + $0x298] sm:$0xff] }
0x3af5   :  { %v17241_v6 = vpack.c.bf16 %v11951_v25, %v11950_v4  ;;  %v12023_v4 = vld [vmem:[%s22235_s6 + $0x328] sm:$0xff] }
0x3af6   :  { %v17273_v15 = vpack.c.bf16 %v9012_v36, %v9007_v23  ;;  %v11952_v36 = vld [vmem:[%s22235_s6 + $0x290] sm:$0xff] }
0x3af7   :  { %v17245_v23 = vpack.c.bf16 %v11953_v48, %v11952_v36  ;;  %v12025_v36 = vld [vmem:[%s22235_s6 + $0x338] sm:$0xff] }
0x3af8   :  { %17275 = vmatprep.subr.msk.bf16.mxu1 %vm18168_vm1, %v17273_v15 }
0x3af9   :  { %17278 = vmatpush3.bf16.xpose.msk.msra.mxu1 %vm18168_vm1, %v17273_v15  ;;  %v11954_v15 = vld [vmem:[%s22235_s6 + $0x2a0] sm:$0xff] }
0x3b93   :  { %v15102_v8 = vpop.f32.mrb[86].mxu0 }
0x3b94   :  { %v8709_v42 = vmul.f32 0.17677669, %v15102_v8  ;;  %v8699_v41 = vpop.f32.mrb[87].mxu0  ;;  %v11955_v8 = vld [vmem:[%s22235_s6 + $0x2a8] sm:$0xff] }
0x3b95   :  { %v8708_v10 = vmul.f32 0.17677669, %v8699_v41  ;;  %v11956_v41 = vld [vmem:[%s22235_s6 + $0x2b0] sm:$0xff] }
0x3b96   :  { %v8711_v16 = vadd.f32 %v21373_v1, %v8709_v42  ;;  %v17249_v42 = vpack.c.bf16 %v11955_v8, %v11954_v15  ;;  %v12027_v15 = vld [vmem:[%s22235_s6 + $0x348] sm:$0xff] }
0x3b97   :  { %v8710_v27 = vadd.f32 %v21373_v1, %v8708_v10  ;;  %v11957_v10 = vld [vmem:[%s22235_s6 + $0x2b8] sm:$0xff] }
0x3b98   :  { %v8715_v37 = vsel %vm458_vm2, %v8711_v16, -inf }
0x3b99   :  { %8716 = vmax.xlane.f32.xlu1 %v8715_v37  ;;  %v8712_v39 = vsel %vm458_vm2, %v8710_v27, -inf  ;;  %v11959_v37 = vld [vmem:[%s22235_s6 + $0x2c8] sm:$0xff] }
0x3b9a   :  { %8713 = vmax.xlane.f32.xlu0 %v8712_v39 }
0x3c26   :  { %v8717_v35 = vpop.xlane.xlu1 %8716 }
0x3c27   :  { %v8719_v17 = vsub.f32 %v8711_v16, %v8717_v35  ;;  %v8714_v21 = vpop.xlane.xlu0 %8713  ;;  %v17253_v16 = vpack.c.bf16 %v11957_v10, %v11956_v41  ;;  %v11960_v35 = vld [vmem:[%s22235_s6 + $0x2d0] sm:$0xff]  ;;  %v12029_v41 = vld [vmem:[%s22235_s6 + $0x358] sm:$0xff] }
0x3c28   :  { %v8718_v47 = vsub.f32 %v8710_v27, %v8714_v21  ;;  %v11958_v27 = vld [vmem:[%s22235_s6 + $0x2c0] sm:$0xff] }
0x3c29   :  { %v8722_v29 = vmul.f32 1.442695, %v8719_v17  ;;  %v17257_v39 = vpack.c.bf16 %v11959_v37, %v11958_v27  ;;  %v11961_v17 = vld [vmem:[%s22235_s6 + $0x2d8] sm:$0xff]  ;;  %v12031_v27 = vld [vmem:[%s22235_s6 + $0x368] sm:$0xff] }
0x3c2a   :  { %v8720_v14 = vmul.f32 1.442695, %v8718_v47  ;;  %v17261_v21 = vpack.c.bf16 %v11961_v17, %v11960_v35  ;;  %v11962_v47 = vld [vmem:[%s22235_s6 + $0x2e0] sm:$0xff]  ;;  %v12033_v35 = vld [vmem:[%s22235_s6 + $0x378] sm:$0xff] }
0x3c2b   :  { %17782 = vpow2.f32 %v8722_v29  ;;  %v11963_v29 = vld [vmem:[%s22235_s6 + $0x2e8] sm:$0xff] }
0x3c2c   :  { %17784 = vpow2.f32 %v8720_v14  ;;  %v17265_v14 = vpack.c.bf16 %v11963_v29, %v11962_v47  ;;  %v12067_v47 = vld [vmem:[%s22233_s4 + $0x388] sm:$0xff] }
0x3c35   :  { %v17783_v54 = vpop.eup %17782 }
0x3c36   :  { %v17785_v9 = vpop.eup %17784  ;;  %v8727_v26 = vsel %vm458_vm2, %v17783_v54, 0.0 }
0x3c37   :  { %8728 = vadd.xlane.f32.xlu1 %v8727_v26  ;;  %v8724_v30 = vsel %vm458_vm2, %v17785_v9, 0.0 }
0x3c38   :  { %8725 = vadd.xlane.f32.xlu0 %v8724_v30  ;;  %v11982_v30 = vld [vmem:[%s22257_s3 + $0x300] sm:$0xff] }
0x3c39   :  { %v17299_v51 = vpack.c.bf16 %v11983_v44, %v11982_v30  ;;  %v12071_v30 = vld [vmem:[%s22233_s4 + $0x3a8] sm:$0xff] }
0x3cc4   :  { %v8729_v31 = vpop.xlane.xlu1 %8728 }
0x3cc5   :  { %17786 = vrcp.f32 %v8729_v31  ;;  %v8726_v28 = vpop.xlane.xlu0 %8725  ;;  %v11985_v31 = vld [vmem:[%s22257_s3 + $0x318] sm:$0xff] }
0x3cc6   :  { %17788 = vrcp.f32 %v8726_v28 }
0x3ccf   :  { %v17787_v12 = vpop.eup %17786 }
0x3cd0   :  { %v17789_v60 = vpop.eup %17788  ;;  %v8733_v46 = vmul.f32 %v17787_v12, %v17783_v54  ;;  %v11964_v54 = vld [vmem:[%s22235_s6 + $0x2f0] sm:$0xff]  ;;  %v11986_v12 = vld [vmem:[%s22257_s3 + $0x320] sm:$0xff] }
0x3cd1   :  { %v8731_v43 = vmul.f32 %v17789_v60, %v17785_v9  ;;  %v11965_v9 = vld [vmem:[%s22235_s6 + $0x2f8] sm:$0xff]  ;;  %v17307_v32 = vpack.c.bf16 %v11987_v13, %v11986_v12  ;;  %v11988_v60 = vld [vmem:[%s22257_s3 + $0x330] sm:$0xff]  ;;  %v12075_v12 = vld [vmem:[%s22233_s4 + $0x3c8] sm:$0xff] }
0x3cd2   :  { %v17269_v26 = vpack.c.bf16 %v11965_v9, %v11964_v54  ;;  %v12069_v54 = vld [vmem:[%s22233_s4 + $0x398] sm:$0xff] }
0x3cd3   :  { %15107 = vmatprep.mubr.msk.f32.mxu0 %vm458_vm2, %v8731_v43  ;;  %v11989_v43 = vld [vmem:[%s22257_s3 + $0x338] sm:$0xff] }
0x3cd4   :  { %15108 = vmatmul.mubr.msk.f32.vlgmr.msra.gmra.mrb[88].mxu0 %vm458_vm2, %v8733_v46  ;;  %v17311_v46 = vpack.c.bf16 %v11989_v43, %v11988_v60  ;;  %v12077_v60 = vld [vmem:[%s22233_s4 + $0x3d8] sm:$0xff] }
0x3cd5   :  { %17180 = vmatpush3.bf16.msra.mxu0 %v17177_v34  ;;  %15142 = vmatprep.mubr.f32.mxu0 %v21245_v2  ;;  %v11984_v34 = vld [vmem:[%s22257_s3 + $0x310] sm:$0xff] }
0x3cd6   :  { %17182 = vmatprep.subr.bf16.mxu0 %v17181_v22  ;;  %v17303_v28 = vpack.c.bf16 %v11985_v31, %v11984_v34  ;;  %v12073_v34 = vld [vmem:[%s22233_s4 + $0x3b8] sm:$0xff] }
0x3cd9   :  { %17184 = vmatpush3.bf16.msra.mxu0 %v17181_v22  ;;  %v11990_v22 = vld [vmem:[%s22257_s3 + $0x340] sm:$0xff] }
0x3cda   :  { %17186 = vmatprep.subr.bf16.mxu0 %v17185_v38  ;;  %v17315_v45 = vpack.c.bf16 %v11991_v49, %v11990_v22  ;;  %v12079_v22 = vld [vmem:[%s22233_s4 + $0x3e8] sm:$0xff] }
0x3cdd   :  { %17188 = vmatpush3.bf16.msra.mxu0 %v17185_v38  ;;  %v11992_v38 = vld [vmem:[%s22257_s3 + $0x350] sm:$0xff] }
0x3cde   :  { %17190 = vmatprep.subr.bf16.mxu0 %v17189_v53  ;;  %v17319_v50 = vpack.c.bf16 %v11993_v19, %v11992_v38  ;;  %v12081_v38 = vld [vmem:[%s22233_s4 + $0x3f8] sm:$0xff] }
0x3ce1   :  { %17192 = vmatpush3.bf16.msra.mxu0 %v17189_v53  ;;  %v11994_v53 = vld [vmem:[%s22257_s3 + $0x360] sm:$0xff] }
0x3ce2   :  { %17194 = vmatprep.subr.bf16.mxu0 %v17193_v57  ;;  %v17323_v56 = vpack.c.bf16 %v11995_v40, %v11994_v53  ;;  %v11931_v40 = vld [vmem:[%s22259_s28 + $0x5] ss:$0 sm:$0xff] }
0x3ce5   :  { %17196 = vmatpush3.bf16.msra.mxu0 %v17193_v57  ;;  %v11996_v57 = vld [vmem:[%s22257_s3 + $0x370] sm:$0xff] }
0x3ce6   :  { %17198 = vmatprep.subr.bf16.mxu0 %v17197_v63  ;;  %v17327_v58 = vpack.c.bf16 %v11997_v59, %v11996_v57 }
0x3ce9   :  { %17200 = vmatpush3.bf16.msra.mxu0 %v17197_v63  ;;  %v12018_v63 = vld [vmem:[%s22235_s6 + $0x300] sm:$0xff] }
0x3cea   :  { %17202 = vmatprep.subr.bf16.mxu0 %v17201_v33  ;;  %v17363_v55 = vpack.c.bf16 %v12019_v62, %v12018_v63  ;;  %v11967_v63 = vld [vmem:[%s22236_s7 + $0x5] ss:$0 sm:$0xff] }
0x3ced   :  { %17204 = vmatpush3.bf16.msra.mxu0 %v17201_v33  ;;  %v12020_v33 = vld [vmem:[%s22235_s6 + $0x310] sm:$0xff] }
0x3cee   :  { %17206 = vmatprep.subr.bf16.mxu0 %v17205_v3  ;;  %v17367_v0 = vpack.c.bf16 %v12021_v11, %v12020_v33 }
0x3cf1   :  { %17208 = vmatpush3.bf16.msra.mxu0 %v17205_v3  ;;  %v12022_v3 = vld [vmem:[%s22235_s6 + $0x320] sm:$0xff] }
0x3cf2   :  { %17242 = vmatprep.subr.bf16.mxu0 %v17241_v6  ;;  %v17371_v25 = vpack.c.bf16 %v12023_v4, %v12022_v3  ;;  %v21648_v3 = vld [vmem:[%s22259_s28 + $0x6] ss:$0 sm:$0xff] }
0x3cf4   :  { %15143 = vmatmul.mubr.f32.vlgmr.msra.gmra.mrb[90].mxu0 %v21256_v61 }
0x3cf5   :  { %17244 = vmatpush3.bf16.msra.mxu0 %v17241_v6  ;;  %15212 = vmatprep.mubr.f32.mxu0 %v21245_v2  ;;  %v12024_v6 = vld [vmem:[%s22235_s6 + $0x330] sm:$0xff] }
0x3cf6   :  { %17246 = vmatprep.subr.bf16.mxu0 %v17245_v23  ;;  %v17375_v48 = vpack.c.bf16 %v12025_v36, %v12024_v6  ;;  %v12035_v36 = vld [vmem:[%s22236_s7 + $0x6] ss:$0 sm:$0xff] }
0x3cf9   :  { %17248 = vmatpush3.bf16.msra.mxu0 %v17245_v23  ;;  %v12026_v23 = vld [vmem:[%s22235_s6 + $0x340] sm:$0xff] }
0x3cfa   :  { %17250 = vmatprep.subr.bf16.mxu0 %v17249_v42  ;;  %v17379_v8 = vpack.c.bf16 %v12027_v15, %v12026_v23 }
0x3cfd   :  { %17252 = vmatpush3.bf16.msra.mxu0 %v17249_v42  ;;  %v12028_v42 = vld [vmem:[%s22235_s6 + $0x350] sm:$0xff] }
0x3cfe   :  { %17254 = vmatprep.subr.bf16.mxu0 %v17253_v16  ;;  %v17383_v10 = vpack.c.bf16 %v12029_v41, %v12028_v42  ;;  %v12083_v41 = vld [vmem:[%s22234_s5 + $0x7] ss:$0 sm:$0xff] }
0x3d01   :  { %17256 = vmatpush3.bf16.msra.mxu0 %v17253_v16  ;;  %v12030_v16 = vld [vmem:[%s22235_s6 + $0x360] sm:$0xff] }
0x3d02   :  { %17258 = vmatprep.subr.bf16.mxu0 %v17257_v39  ;;  %v17387_v37 = vpack.c.bf16 %v12031_v27, %v12030_v16 }
0x3d05   :  { %17260 = vmatpush3.bf16.msra.mxu0 %v17257_v39  ;;  %v12032_v39 = vld [vmem:[%s22235_s6 + $0x370] sm:$0xff] }
0x3d06   :  { %17262 = vmatprep.subr.bf16.mxu0 %v17261_v21  ;;  %v17391_v17 = vpack.c.bf16 %v12033_v35, %v12032_v39 }
0x3d09   :  { %17264 = vmatpush3.bf16.msra.mxu0 %v17261_v21  ;;  %v12066_v21 = vld [vmem:[%s22233_s4 + $0x380] sm:$0xff] }
0x3d0a   :  { %17266 = vmatprep.subr.bf16.mxu0 %v17265_v14  ;;  %v17445_v29 = vpack.c.bf16 %v12067_v47, %v12066_v21 }
0x3d0d   :  { %17268 = vmatpush3.bf16.msra.mxu0 %v17265_v14  ;;  %v12068_v14 = vld [vmem:[%s22233_s4 + $0x390] sm:$0xff] }
0x3d0e   :  { %17270 = vmatprep.subr.bf16.mxu0 %v17269_v26  ;;  %v17449_v9 = vpack.c.bf16 %v12069_v54, %v12068_v14 }
0x3d11   :  { %17272 = vmatpush3.bf16.msra.mxu0 %v17269_v26  ;;  %v12070_v26 = vld [vmem:[%s22233_s4 + $0x3a0] sm:$0xff] }
0x3d12   :  { %17300 = vmatprep.subr.bf16.mxu0 %v17299_v51  ;;  %v17453_v44 = vpack.c.bf16 %v12071_v30, %v12070_v26 }
0x3d14   :  { %15213 = vmatmul.mubr.f32.vlgmr.msra.gmra.mrb[92].mxu0 %v21256_v61 }
0x3d15   :  { %17302 = vmatpush3.bf16.msra.mxu0 %v17299_v51  ;;  %15283 = vmatprep.mubr.f32.mxu0 %v21245_v2  ;;  %v12072_v51 = vld [vmem:[%s22233_s4 + $0x3b0] sm:$0xff] }
0x3d16   :  { %17304 = vmatprep.subr.bf16.mxu0 %v17303_v28  ;;  %v17457_v31 = vpack.c.bf16 %v12073_v34, %v12072_v51 }
0x3d19   :  { %17306 = vmatpush3.bf16.msra.mxu0 %v17303_v28  ;;  %v12074_v28 = vld [vmem:[%s22233_s4 + $0x3c0] sm:$0xff] }
0x3d1a   :  { %17308 = vmatprep.subr.bf16.mxu0 %v17307_v32  ;;  %v17461_v13 = vpack.c.bf16 %v12075_v12, %v12074_v28 }
0x3d1d   :  { %17310 = vmatpush3.bf16.msra.mxu0 %v17307_v32  ;;  %v12076_v32 = vld [vmem:[%s22233_s4 + $0x3d0] sm:$0xff] }
0x3d1e   :  { %17312 = vmatprep.subr.bf16.mxu0 %v17311_v46  ;;  %v17465_v43 = vpack.c.bf16 %v12077_v60, %v12076_v32  ;;  %v11974_v60 = vld [vmem:[%s22237_s8 + $0xa0] sm:$0xff] }
0x3d21   :  { %17314 = vmatpush3.bf16.msra.mxu0 %v17311_v46  ;;  %v12078_v46 = vld [vmem:[%s22233_s4 + $0x3e0] sm:$0xff] }
0x3d22   :  { %17316 = vmatprep.subr.bf16.mxu0 %v17315_v45  ;;  %v17469_v49 = vpack.c.bf16 %v12079_v22, %v12078_v46 }
0x3d25   :  { %17318 = vmatpush3.bf16.msra.mxu0 %v17315_v45  ;;  %v12080_v45 = vld [vmem:[%s22233_s4 + $0x3f0] sm:$0xff] }
0x3d26   :  { %17320 = vmatprep.subr.bf16.mxu0 %v17319_v50  ;;  %v17473_v19 = vpack.c.bf16 %v12081_v38, %v12080_v45  ;;  %v11976_v38 = vld [vmem:[%s22237_s8 + $0xb0] sm:$0xff] }
0x3d29   :  { %17322 = vmatpush3.bf16.msra.mxu0 %v17319_v50 }
0x3d2a   :  { %17324 = vmatprep.subr.bf16.mxu0 %v17323_v56 }
0x3d2d   :  { %17326 = vmatpush3.bf16.msra.mxu0 %v17323_v56 }
0x3d2e   :  { %17328 = vmatprep.subr.bf16.mxu0 %v17327_v58 }
0x3d31   :  { %17330 = vmatpush3.bf16.msra.mxu0 %v17327_v58 }
0x3d32   :  { %17364 = vmatprep.subr.bf16.mxu0 %v17363_v55 }
0x3d34   :  { %15284 = vmatmul.mubr.f32.vlgmr.msra.gmra.mrb[94].mxu0 %v21256_v61 }
0x3d35   :  { %17366 = vmatpush3.bf16.msra.mxu0 %v17363_v55  ;;  %15353 = vmatprep.mubr.f32.mxu0 %v21245_v2 }
0x3d36   :  { %17368 = vmatprep.subr.bf16.mxu0 %v17367_v0 }
0x3d39   :  { %17370 = vmatpush3.bf16.msra.mxu0 %v17367_v0 }
0x3d3a   :  { %17372 = vmatprep.subr.bf16.mxu0 %v17371_v25 }
0x3d3d   :  { %17374 = vmatpush3.bf16.msra.mxu0 %v17371_v25 }
0x3d3e   :  { %17376 = vmatprep.subr.bf16.mxu0 %v17375_v48 }
0x3d41   :  { %17378 = vmatpush3.bf16.msra.mxu0 %v17375_v48 }
0x3d42   :  { %17380 = vmatprep.subr.bf16.mxu0 %v17379_v8 }
0x3d45   :  { %17382 = vmatpush3.bf16.msra.mxu0 %v17379_v8 }
0x3d46   :  { %17384 = vmatprep.subr.bf16.mxu0 %v17383_v10 }
0x3d49   :  { %17386 = vmatpush3.bf16.msra.mxu0 %v17383_v10 }
0x3d4a   :  { %17388 = vmatprep.subr.bf16.mxu0 %v17387_v37 }
0x3d4d   :  { %17390 = vmatpush3.bf16.msra.mxu0 %v17387_v37 }
0x3d4e   :  { %17392 = vmatprep.subr.bf16.mxu0 %v17391_v17 }
0x3d51   :  { %17394 = vmatpush3.bf16.msra.mxu0 %v17391_v17 }
0x3d52   :  { %17446 = vmatprep.subr.bf16.mxu0 %v17445_v29 }
0x3d54   :  { %15354 = vmatmul.mubr.f32.vlgmr.msra.gmra.mrb[96].mxu0 %v21256_v61 }
0x3d55   :  { %17448 = vmatpush3.bf16.msra.mxu0 %v17445_v29  ;;  %15448 = vmatprep.mubr.f32.mxu0 %v21245_v2 }
0x3d56   :  { %17450 = vmatprep.subr.bf16.mxu0 %v17449_v9 }
0x3d59   :  { %17452 = vmatpush3.bf16.msra.mxu0 %v17449_v9 }
0x3d5a   :  { %17454 = vmatprep.subr.bf16.mxu0 %v17453_v44 }
0x3d5d   :  { %17456 = vmatpush3.bf16.msra.mxu0 %v17453_v44 }
0x3d5e   :  { %17458 = vmatprep.subr.bf16.mxu0 %v17457_v31 }
0x3d61   :  { %17460 = vmatpush3.bf16.msra.mxu0 %v17457_v31 }
0x3d62   :  { %17462 = vmatprep.subr.bf16.mxu0 %v17461_v13 }
0x3d65   :  { %17464 = vmatpush3.bf16.msra.mxu0 %v17461_v13 }
0x3d66   :  { %17466 = vmatprep.subr.bf16.mxu0 %v17465_v43 }
0x3d69   :  { %17468 = vmatpush3.bf16.msra.mxu0 %v17465_v43  ;;  %v11975_v43 = vld [vmem:[%s22237_s8 + $0xa8] sm:$0xff] }
0x3d6a   :  { %17470 = vmatprep.subr.bf16.mxu0 %v17469_v49  ;;  %v17283_v46 = vpack.c.bf16 %v11975_v43, %v11974_v60 }
0x3d6d   :  { %17472 = vmatpush3.bf16.msra.mxu0 %v17469_v49 }
0x3d6e   :  { %17474 = vmatprep.subr.bf16.mxu0 %v17473_v19 }
0x3d71   :  { %17476 = vmatpush3.bf16.msra.mxu0 %v17473_v19  ;;  %v11977_v19 = vld [vmem:[%s22237_s8 + $0xb8] sm:$0xff] }
0x3d74   :  { %15449 = vmatmul.mubr.f32.vlgmr.msra.gmra.mrb[98].mxu0 %v21256_v61 }
0x3da7   :  { %v21633_v50 = vpop.f32.mrb[88].mxu0 }
0x3da8   :  { %v21635_v53 = vpop.f32.mrb[89].mxu0 }
0x3dc7   :  { %v15144_v56 = vpop.f32.mrb[90].mxu0 }
0x3dc8   :  { %v8908_v57 = vpop.f32.mrb[91].mxu0  ;;  %v8914_v58 = vadd.f32 %v15144_v56, %v11931_v40 }
0x3dc9   :  { %v8909_v59 = vadd.f32 %v11931_v40, %v8908_v57 }
0x3dcb   :  { %15219 = vmatprep.mubr.msk.f32.mxu1 %vm360_vm0, %v8909_v59  ;;  %v17287_v59 = vpack.c.bf16 %v11977_v19, %v11976_v38 }
0x3dcc   :  { %15220 = vmatmul.mubr.msk.f32.vlgmr.msra.gmra.mrb[72].mxu1 %vm360_vm0, %v8914_v58  ;;  %v11910_v58 = vld [vmem:[%s22237_s8 + $0x80] sm:$0xff] }
0x3de7   :  { %v15214_v62 = vpop.f32.mrb[92].mxu0 }
0x3de8   :  { %v9110_v55 = vadd.f32 %v15214_v62, %v11967_v63  ;;  %v9104_v33 = vpop.f32.mrb[93].mxu0 }
0x3de9   :  { %v9105_v11 = vadd.f32 %v11967_v63, %v9104_v33  ;;  %v11911_v63 = vld [vmem:[%s22237_s8 + $0x88] sm:$0xff]  ;;  %v11913_v33 = vld [vmem:[%s22237_s8 + $0x98] sm:$0xff] }
0x3dea   :  { %v17291_v62 = vpack.c.bf16 %v11911_v63, %v11910_v58  ;;  %v12042_v58 = vld [vmem:[%s22237_s8 + $0xc0] sm:$0xff]  ;;  %v12043_v63 = vld [vmem:[%s22237_s8 + $0xc8] sm:$0xff] }
0x3deb   :  { %v17279_v0 = vpack.c.bf16 %v9110_v55, %v9105_v11  ;;  %v11912_v55 = vld [vmem:[%s22237_s8 + $0x90] sm:$0xff] }
0x3ded   :  { %17280 = vmatprep.subr.bf16.mxu1 %v17279_v0 }
0x3dee   :  { %17282 = vmatpush3.bf16.msra.mxu1 %v17279_v0 }
0x3def   :  { %17284 = vmatprep.subr.bf16.mxu1 %v17283_v46 }
0x3e07   :  { %v15285_v4 = vpop.f32.mrb[94].mxu0 }
0x3e08   :  { %v21651_v25 = vadd.f32 %v15285_v4, %v21648_v3  ;;  %v21653_v6 = vpop.f32.mrb[95].mxu0  ;;  %v17295_v4 = vpack.c.bf16 %v11913_v33, %v11912_v55 }
0x3e27   :  { %v15355_v48 = vpop.f32.mrb[96].mxu0 }
0x3e28   :  { %v9764_v23 = vadd.f32 %v15355_v48, %v12035_v36  ;;  %v9758_v15 = vpop.f32.mrb[97].mxu0  ;;  %v12001_v48 = vld [vmem:[%s22233_s4 + $0x308] sm:$0xff] }
0x3e29   :  { %v9759_v8 = vadd.f32 %v12035_v36, %v9758_v15  ;;  %v12000_v36 = vld [vmem:[%s22233_s4 + $0x300] sm:$0xff]  ;;  %v12002_v15 = vld [vmem:[%s22233_s4 + $0x310] sm:$0xff] }
0x3e2b   :  { %v21658_v42 = vpack.c.bf16 %v9764_v23, %v9759_v8  ;;  %v17331_v23 = vpack.c.bf16 %v12001_v48, %v12000_v36  ;;  %v12003_v8 = vld [vmem:[%s22233_s4 + $0x318] sm:$0xff] }
0x3e47   :  { %v15450_v10 = vpop.f32.mrb[98].mxu0 }
0x3e48   :  { %v10241_v16 = vadd.f32 %v15450_v10, %v12083_v41  ;;  %v10235_v27 = vpop.f32.mrb[99].mxu0  ;;  %v12004_v10 = vld [vmem:[%s22233_s4 + $0x320] sm:$0xff] }
0x3e49   :  { %v10236_v37 = vadd.f32 %v12083_v41, %v10235_v27  ;;  %v17335_v41 = vpack.c.bf16 %v12003_v8, %v12002_v15  ;;  %v12006_v27 = vld [vmem:[%s22233_s4 + $0x330] sm:$0xff]  ;;  %v12048_v8 = vld [vmem:[%s22257_s3 + $0x380] sm:$0xff] }
0x3e4b   :  { %v17509_v39 = vpack.c.bf16 %v10241_v16, %v10236_v37  ;;  %v12007_v37 = vld [vmem:[%s22233_s4 + $0x338] sm:$0xff] }
0x3e4d   :  { %17511 = vmatprep.subr.msk.bf16.mxu0 %vm18168_vm1, %v17509_v39 }
0x3e4e   :  { %17514 = vmatpush3.bf16.xpose.msk.msra.mxu0 %vm18168_vm1, %v17509_v39  ;;  %v17343_v39 = vpack.c.bf16 %v12007_v37, %v12006_v27 }
0x3e9f   :  { %v15221_v35 = vpop.f32.mrb[72].mxu1 }
0x3ea0   :  { %v9201_v17 = vmul.f32 0.17677669, %v15221_v35  ;;  %v9191_v21 = vpop.f32.mrb[73].mxu1  ;;  %v12009_v35 = vld [vmem:[%s22233_s4 + $0x348] sm:$0xff] }
0x3ea1   :  { %v9200_v47 = vmul.f32 0.17677669, %v9191_v21  ;;  %v12010_v21 = vld [vmem:[%s22233_s4 + $0x350] sm:$0xff] }
0x3ea2   :  { %v9203_v29 = vadd.f32 %v21373_v1, %v9201_v17 }
0x3ea3   :  { %v9202_v14 = vadd.f32 %v21373_v1, %v9200_v47  ;;  %v12011_v47 = vld [vmem:[%s22233_s4 + $0x358] sm:$0xff] }
0x3ea4   :  { %v9207_v54 = vsel %vm458_vm2, %v9203_v29, -inf }
0x3ea5   :  { %9208 = vmax.xlane.f32.xlu1 %v9207_v54  ;;  %v9204_v9 = vsel %vm458_vm2, %v9202_v14, -inf  ;;  %v12013_v54 = vld [vmem:[%s22233_s4 + $0x368] sm:$0xff] }
0x3ea6   :  { %9205 = vmax.xlane.f32.xlu0 %v9204_v9 }
0x3f32   :  { %v9209_v26 = vpop.xlane.xlu1 %9208 }
0x3f33   :  { %v9211_v30 = vsub.f32 %v9203_v29, %v9209_v26  ;;  %v9206_v44 = vpop.xlane.xlu0 %9205  ;;  %v17351_v29 = vpack.c.bf16 %v12011_v47, %v12010_v21  ;;  %v12014_v26 = vld [vmem:[%s22233_s4 + $0x370] sm:$0xff]  ;;  %v12055_v47 = vld [vmem:[%s22257_s3 + $0x3b8] sm:$0xff] }
0x3f34   :  { %v9210_v51 = vsub.f32 %v9202_v14, %v9206_v44  ;;  %v12012_v14 = vld [vmem:[%s22233_s4 + $0x360] sm:$0xff]  ;;  %v12054_v21 = vld [vmem:[%s22257_s3 + $0x3b0] sm:$0xff] }
0x3f35   :  { %v9214_v34 = vmul.f32 1.442695, %v9211_v30  ;;  %v17355_v9 = vpack.c.bf16 %v12013_v54, %v12012_v14  ;;  %v12015_v30 = vld [vmem:[%s22233_s4 + $0x378] sm:$0xff]  ;;  %v12056_v14 = vld [vmem:[%s22257_s3 + $0x3c0] sm:$0xff]  ;;  %v12057_v54 = vld [vmem:[%s22257_s3 + $0x3c8] sm:$0xff] }
0x3f36   :  { %v9212_v31 = vmul.f32 1.442695, %v9210_v51  ;;  %v17359_v44 = vpack.c.bf16 %v12015_v30, %v12014_v26  ;;  %v9563_v51 = vadd.f32 %v21648_v3, %v21653_v6  ;;  %v12058_v26 = vld [vmem:[%s22257_s3 + $0x3d0] sm:$0xff]  ;;  %v12059_v30 = vld [vmem:[%s22257_s3 + $0x3d8] sm:$0xff] }
0x3f37   :  { %17790 = vpow2.f32 %v9214_v34  ;;  %v12017_v34 = vld [vmem:[%s22234_s5 + $0x6] ss:$0 sm:$0xff] }
0x3f38   :  { %17792 = vpow2.f32 %v9212_v31 }
0x3f41   :  { %v17791_v28 = vpop.eup %17790 }
0x3f42   :  { %v17793_v12 = vpop.eup %17792  ;;  %v9219_v13 = vsel %vm458_vm2, %v17791_v28, 0.0 }
0x3f43   :  { %9220 = vadd.xlane.f32.xlu1 %v9219_v13  ;;  %v9216_v32 = vsel %vm458_vm2, %v17793_v12, 0.0 }
0x3f44   :  { %9217 = vadd.xlane.f32.xlu0 %v9216_v32 }
0x3fd0   :  { %v9221_v22 = vpop.xlane.xlu1 %9220 }
0x3fd1   :  { %17794 = vrcp.f32 %v9221_v22  ;;  %v9218_v49 = vpop.xlane.xlu0 %9217 }
0x3fd2   :  { %17796 = vrcp.f32 %v9218_v49 }
0x3fdb   :  { %v17795_v45 = vpop.eup %17794 }
0x3fdc   :  { %v17797_v40 = vpop.eup %17796  ;;  %v9225_v57 = vmul.f32 %v17795_v45, %v17791_v28 }
0x3fdd   :  { %v9223_v56 = vmul.f32 %v17797_v40, %v17793_v12 }
0x3fdf   :  { %15226 = vmatprep.mubr.msk.f32.mxu1 %vm458_vm2, %v9223_v56 }
0x3fe0   :  { %15227 = vmatmul.mubr.msk.f32.vlgmr.msra.gmra.mrb[74].mxu1 %vm458_vm2, %v9225_v57 }
0x3fe1   :  { %17286 = vmatpush3.bf16.msra.mxu1 %v17283_v46 }
0x3fe2   :  { %17288 = vmatprep.subr.bf16.mxu1 %v17287_v59 }
0x3fe5   :  { %17290 = vmatpush3.bf16.msra.mxu1 %v17287_v59 }
0x3fe6   :  { %17292 = vmatprep.subr.bf16.mxu1 %v17291_v62 }
0x40b3   :  { %v15228_v11 = vpop.f32.mrb[74].mxu1 }
0x40b4   :  { %v9298_v0 = vpop.f32.mrb[75].mxu1 }
0x40b5   :  { %15237 = vmatprep.mubr.msk.f32.mxu1 %vm360_vm0, %v9298_v0  ;;  %v12044_v0 = vld [vmem:[%s22237_s8 + $0xd0] sm:$0xff] }
0x40b6   :  { %15238 = vmatmul.mubr.msk.f32.vlgmr.msra.gmra.mrb[76].mxu1 %vm360_vm0, %v15228_v11 }
0x40b7   :  { %17294 = vmatpush3.bf16.msra.mxu1 %v17291_v62  ;;  %15248 = vmatprep.mubr.msk.f32.mxu1 %vm360_vm0, %v21635_v53  ;;  %v12005_v53 = vld [vmem:[%s22233_s4 + $0x328] sm:$0xff]  ;;  %v17405_v62 = vpack.c.bf16 %v12043_v63, %v12042_v58 }
0x40b8   :  { %17296 = vmatprep.subr.bf16.mxu1 %v17295_v4  ;;  %v17339_v16 = vpack.c.bf16 %v12005_v53, %v12004_v10  ;;  %v12050_v53 = vld [vmem:[%s22257_s3 + $0x390] sm:$0xff]  ;;  %v12097_v58 = vld [vmem:[%s22235_s6 + $0x3e8] sm:$0xff] }
0x40bb   :  { %17298 = vmatpush3.bf16.msra.mxu1 %v17295_v4  ;;  %v12045_v4 = vld [vmem:[%s22237_s8 + $0xd8] sm:$0xff] }
0x40bc   :  { %17332 = vmatprep.subr.bf16.mxu1 %v17331_v23  ;;  %v17409_v15 = vpack.c.bf16 %v12045_v4, %v12044_v0 }
0x40be   :  { %15249 = vmatmul.mubr.msk.f32.vlgmr.msra.gmra.mrb[76].mxu1 %vm360_vm0, %v21633_v50  ;;  %v12008_v50 = vld [vmem:[%s22233_s4 + $0x340] sm:$0xff] }
0x40bf   :  { %17334 = vmatpush3.bf16.msra.mxu1 %v17331_v23  ;;  %15318 = vmatprep.mubr.f32.mxu1 %v21245_v2  ;;  %v17347_v17 = vpack.c.bf16 %v12009_v35, %v12008_v50  ;;  %v12052_v50 = vld [vmem:[%s22257_s3 + $0x3a0] sm:$0xff]  ;;  %v12053_v35 = vld [vmem:[%s22257_s3 + $0x3a8] sm:$0xff] }
0x40c0   :  { %17336 = vmatprep.subr.bf16.mxu1 %v17335_v41 }
0x40c3   :  { %17338 = vmatpush3.bf16.msra.mxu1 %v17335_v41  ;;  %v12049_v41 = vld [vmem:[%s22257_s3 + $0x388] sm:$0xff] }
0x40c4   :  { %17340 = vmatprep.subr.bf16.mxu1 %v17339_v16  ;;  %v17413_v10 = vpack.c.bf16 %v12049_v41, %v12048_v8 }
0x40c7   :  { %17342 = vmatpush3.bf16.msra.mxu1 %v17339_v16  ;;  %v12051_v16 = vld [vmem:[%s22257_s3 + $0x398] sm:$0xff] }
0x40c8   :  { %17344 = vmatprep.subr.bf16.mxu1 %v17343_v39 }
0x40cb   :  { %17346 = vmatpush3.bf16.msra.mxu1 %v17343_v39  ;;  %v17417_v39 = vpack.c.bf16 %v12051_v16, %v12050_v53 }
0x40cc   :  { %17348 = vmatprep.subr.bf16.mxu1 %v17347_v17 }
0x40cf   :  { %17350 = vmatpush3.bf16.msra.mxu1 %v17347_v17  ;;  %v17421_v17 = vpack.c.bf16 %v12053_v35, %v12052_v50  ;;  %v17847_v50 = vld [vmem:[%s22262_s21 + $0x1] ss:$0 sm:$0xff] }
0x40d0   :  { %17352 = vmatprep.subr.bf16.mxu1 %v17351_v29 }
0x40d3   :  { %17354 = vmatpush3.bf16.msra.mxu1 %v17351_v29  ;;  %v17425_v29 = vpack.c.bf16 %v12055_v47, %v12054_v21 }
0x40d4   :  { %17356 = vmatprep.subr.bf16.mxu1 %v17355_v9 }
0x40d7   :  { %17358 = vmatpush3.bf16.msra.mxu1 %v17355_v9  ;;  %v17429_v9 = vpack.c.bf16 %v12057_v54, %v12056_v14 }
0x40d8   :  { %17360 = vmatprep.subr.bf16.mxu1 %v17359_v44 }
0x40db   :  { %17362 = vmatpush3.bf16.msra.mxu1 %v17359_v44  ;;  %v17433_v44 = vpack.c.bf16 %v12059_v30, %v12058_v26 }
0x40de   :  { %15319 = vmatmul.mubr.f32.vlgmr.msra.gmra.mrb[78].mxu1 %v21256_v61 }
0x40df   :  { %15360 = vmatprep.mubr.msk.f32.mxu1 %vm360_vm0, %v9563_v51  ;;  %v12060_v51 = vld [vmem:[%s22257_s3 + $0x3e0] sm:$0xff] }
0x41b1   :  { %v15320_v31 = vpop.f32.mrb[78].mxu1 }
0x41b2   :  { %v9666_v28 = vadd.f32 %v15320_v31, %v12017_v34  ;;  %v9660_v12 = vpop.f32.mrb[79].mxu1 }
0x41b3   :  { %v9661_v13 = vadd.f32 %v12017_v34, %v9660_v12  ;;  %v12061_v34 = vld [vmem:[%s22257_s3 + $0x3e8] sm:$0xff]  ;;  %v12063_v12 = vld [vmem:[%s22257_s3 + $0x3f8] sm:$0xff] }
0x41b4   :  { %v17437_v31 = vpack.c.bf16 %v12061_v34, %v12060_v51 }
0x41b5   :  { %v17395_v32 = vpack.c.bf16 %v9666_v28, %v9661_v13  ;;  %v12062_v28 = vld [vmem:[%s22257_s3 + $0x3f0] sm:$0xff] }
0x41b6   :  { %v17441_v13 = vpack.c.bf16 %v12063_v12, %v12062_v28  ;;  %v12108_v28 = vld [vmem:[%s22237_s8 + $0xe0] sm:$0xff]  ;;  %v12109_v12 = vld [vmem:[%s22237_s8 + $0xe8] sm:$0xff] }
0x41b7   :  { %17397 = vmatprep.subr.msk.bf16.mxu1 %vm18168_vm1, %v17395_v32 }
0x41b8   :  { %17400 = vmatpush3.bf16.xpose.msk.msra.mxu1 %vm18168_vm1, %v17395_v32  ;;  %v12084_v32 = vld [vmem:[%s22235_s6 + $0x380] sm:$0xff] }
0x41b9   :  { %17402 = vmatprep.subr.bf16.mxu1 %v21658_v42 }
0x41bf   :  { %15361 = vmatmul.mubr.msk.f32.vlgmr.msra.gmra.mrb[80].mxu1 %vm360_vm0, %v21651_v25 }
0x41c0   :  { %17404 = vmatpush3.bf16.msra.mxu1 %v21658_v42 }
0x41c1   :  { %17406 = vmatprep.subr.bf16.mxu1 %v17405_v62 }
0x4292   :  { %v15362_v3 = vpop.f32.mrb[80].mxu1 }
0x4293   :  { %v9855_v6 = vmul.f32 0.17677669, %v15362_v3  ;;  %v9845_v60 = vpop.f32.mrb[81].mxu1  ;;  %v12085_v3 = vld [vmem:[%s22235_s6 + $0x388] sm:$0xff] }
0x4294   :  { %v9854_v43 = vmul.f32 0.17677669, %v9845_v60  ;;  %v12086_v60 = vld [vmem:[%s22235_s6 + $0x390] sm:$0xff] }
0x4295   :  { %v9857_v46 = vadd.f32 %v21373_v1, %v9855_v6  ;;  %v17477_v6 = vpack.c.bf16 %v12085_v3, %v12084_v32  ;;  %v17519_v32 = vpack.c.bf16 %v12109_v12, %v12108_v28  ;;  %v12111_v3 = vld [vmem:[%s22237_s8 + $0xf8] sm:$0xff] }
0x4296   :  { %v9856_v22 = vadd.f32 %v21373_v1, %v9854_v43  ;;  %v12087_v43 = vld [vmem:[%s22235_s6 + $0x398] sm:$0xff] }
0x4297   :  { %v9861_v49 = vsel %vm458_vm2, %v9857_v46, -inf  ;;  %v12139_v28 = vld [vmem:[%s22239_s10 + $0x198] sm:$0xff] }
0x4298   :  { %9862 = vmax.xlane.f32.xlu1 %v9861_v49  ;;  %v9858_v18 = vsel %vm458_vm2, %v9856_v22, -inf  ;;  %v12089_v49 = vld [vmem:[%s22235_s6 + $0x3a8] sm:$0xff] }
0x4299   :  { %9859 = vmax.xlane.f32.xlu0 %v9858_v18 }
0x4325   :  { %v9863_v45 = vpop.xlane.xlu1 %9862 }
0x4326   :  { %v9865_v38 = vsub.f32 %v9857_v46, %v9863_v45  ;;  %v9860_v19 = vpop.xlane.xlu0 %9859  ;;  %v17481_v46 = vpack.c.bf16 %v12087_v43, %v12086_v60  ;;  %v12090_v45 = vld [vmem:[%s22235_s6 + $0x3b0] sm:$0xff] }
0x4327   :  { %v9864_v25 = vsub.f32 %v9856_v22, %v9860_v19  ;;  %v12088_v22 = vld [vmem:[%s22235_s6 + $0x3a0] sm:$0xff] }
0x4328   :  { %v9868_v40 = vmul.f32 1.442695, %v9865_v38  ;;  %v17485_v18 = vpack.c.bf16 %v12089_v49, %v12088_v22  ;;  %v12091_v38 = vld [vmem:[%s22235_s6 + $0x3b8] sm:$0xff] }
0x4329   :  { %v9866_v42 = vmul.f32 1.442695, %v9864_v25  ;;  %v17489_v19 = vpack.c.bf16 %v12091_v38, %v12090_v45  ;;  %v12092_v25 = vld [vmem:[%s22235_s6 + $0x3c0] sm:$0xff] }
0x432a   :  { %17798 = vpow2.f32 %v9868_v40  ;;  %v12093_v40 = vld [vmem:[%s22235_s6 + $0x3c8] sm:$0xff] }
0x432b   :  { %17800 = vpow2.f32 %v9866_v42  ;;  %v17493_v42 = vpack.c.bf16 %v12093_v40, %v12092_v25 }
0x4334   :  { %v17799_v56 = vpop.eup %17798 }
0x4335   :  { %v17801_v57 = vpop.eup %17800  ;;  %v9873_v59 = vsel %vm458_vm2, %v17799_v56, 0.0 }
0x4336   :  { %9874 = vadd.xlane.f32.xlu1 %v9873_v59  ;;  %v9870_v1 = vsel %vm458_vm2, %v17801_v57, 0.0 }
0x4337   :  { %9871 = vadd.xlane.f32.xlu0 %v9870_v1  ;;  %v12096_v1 = vld [vmem:[%s22235_s6 + $0x3e0] sm:$0xff] }
0x4338   :  { %v17501_v63 = vpack.c.bf16 %v12097_v58, %v12096_v1 }
0x43c3   :  { %v9875_v55 = vpop.xlane.xlu1 %9874 }
0x43c4   :  { %17802 = vrcp.f32 %v9875_v55  ;;  %v9872_v33 = vpop.xlane.xlu0 %9871  ;;  %v12099_v55 = vld [vmem:[%s22235_s6 + $0x3f8] sm:$0xff] }
0x43c5   :  { %17804 = vrcp.f32 %v9872_v33 }
0x43ce   :  { %v17803_v11 = vpop.eup %17802 }
0x43cf   :  { %v17805_v36 = vpop.eup %17804  ;;  %v9879_v23 = vmul.f32 %v17803_v11, %v17799_v56  ;;  %v12094_v56 = vld [vmem:[%s22235_s6 + $0x3d0] sm:$0xff]  ;;  %v12065_v11 = vld [vmem:[%s22259_s28 + $0x7] ss:$0 sm:$0xff] }
0x43d0   :  { %v9877_v48 = vmul.f32 %v17805_v36, %v17801_v57  ;;  %v12095_v57 = vld [vmem:[%s22235_s6 + $0x3d8] sm:$0xff] }
0x43d1   :  { %v17497_v59 = vpack.c.bf16 %v12095_v57, %v12094_v56 }
0x43d2   :  { %15367 = vmatprep.mubr.msk.f32.mxu1 %vm458_vm2, %v9877_v48 }
0x43d3   :  { %15368 = vmatmul.mubr.msk.f32.vlgmr.msra.gmra.mrb[82].mxu1 %vm458_vm2, %v9879_v23  ;;  %v12101_v23 = vld [vmem:[%s22236_s7 + $0x7] ss:$0 sm:$0xff] }
0x43d4   :  { %17408 = vmatpush3.bf16.msra.mxu1 %v17405_v62  ;;  %v12098_v62 = vld [vmem:[%s22235_s6 + $0x3f0] sm:$0xff] }
0x43d5   :  { %17410 = vmatprep.subr.bf16.mxu1 %v17409_v15  ;;  %v17505_v33 = vpack.c.bf16 %v12099_v55, %v12098_v62  ;;  %v12121_v62 = vld [vmem:[%s22239_s10 + $0x108] sm:$0xff]  ;;  %v12120_v55 = vld [vmem:[%s22239_s10 + $0x100] sm:$0xff] }
0x43d8   :  { %17412 = vmatpush3.bf16.msra.mxu1 %v17409_v15 }
0x43d9   :  { %17414 = vmatprep.subr.bf16.mxu1 %v17413_v10 }
0x44a6   :  { %v15369_v27 = vpop.f32.mrb[82].mxu1 }
0x44a7   :  { %v9952_v37 = vpop.f32.mrb[83].mxu1 }
0x44a8   :  { %15378 = vmatprep.mubr.msk.f32.mxu1 %vm360_vm0, %v9952_v37 }
0x44a9   :  { %15379 = vmatmul.mubr.msk.f32.vlgmr.msra.gmra.mrb[76].mxu1 %vm360_vm0, %v15369_v27 }
0x44aa   :  { %17416 = vmatpush3.bf16.msra.mxu1 %v17413_v10  ;;  %15413 = vmatprep.mubr.f32.mxu1 %v21245_v2 }
0x44ab   :  { %17418 = vmatprep.subr.bf16.mxu1 %v17417_v39 }
0x44ae   :  { %17420 = vmatpush3.bf16.msra.mxu1 %v17417_v39 }
0x44af   :  { %17422 = vmatprep.subr.bf16.mxu1 %v17421_v17 }
0x44b2   :  { %17424 = vmatpush3.bf16.msra.mxu1 %v17421_v17 }
0x44b3   :  { %17426 = vmatprep.subr.bf16.mxu1 %v17425_v29 }
0x44b6   :  { %17428 = vmatpush3.bf16.msra.mxu1 %v17425_v29 }
0x44b7   :  { %17430 = vmatprep.subr.bf16.mxu1 %v17429_v9 }
0x44ba   :  { %17432 = vmatpush3.bf16.msra.mxu1 %v17429_v9 }
0x44bb   :  { %17434 = vmatprep.subr.bf16.mxu1 %v17433_v44 }
0x44be   :  { %17436 = vmatpush3.bf16.msra.mxu1 %v17433_v44 }
0x44bf   :  { %17438 = vmatprep.subr.bf16.mxu1 %v17437_v31 }
0x44c2   :  { %17440 = vmatpush3.bf16.msra.mxu1 %v17437_v31 }
0x44c3   :  { %17442 = vmatprep.subr.bf16.mxu1 %v17441_v13 }
0x44c6   :  { %17444 = vmatpush3.bf16.msra.mxu1 %v17441_v13  ;;  %v12110_v13 = vld [vmem:[%s22237_s8 + $0xf0] sm:$0xff] }
0x44c7   :  { %17478 = vmatprep.subr.bf16.mxu1 %v17477_v6 }
0x44c9   :  { %15414 = vmatmul.mubr.f32.vlgmr.msra.gmra.mrb[84].mxu1 %v21256_v61 }
0x44ca   :  { %17480 = vmatpush3.bf16.msra.mxu1 %v17477_v6  ;;  %15483 = vmatprep.mubr.f32.mxu1 %v21245_v2  ;;  %v17523_v6 = vpack.c.bf16 %v12111_v3, %v12110_v13  ;;  %v12136_v13 = vld [vmem:[%s22239_s10 + $0x180] sm:$0xff] }
0x44cb   :  { %17482 = vmatprep.subr.bf16.mxu1 %v17481_v46 }
0x44ce   :  { %17484 = vmatpush3.bf16.msra.mxu1 %v17481_v46 }
0x44cf   :  { %17486 = vmatprep.subr.bf16.mxu1 %v17485_v18 }
0x44d2   :  { %17488 = vmatpush3.bf16.msra.mxu1 %v17485_v18 }
0x44d3   :  { %17490 = vmatprep.subr.bf16.mxu1 %v17489_v19 }
0x44d6   :  { %17492 = vmatpush3.bf16.msra.mxu1 %v17489_v19  ;;  %v12115_v19 = vld [vmem:[%s22238_s9 + $0x1] ss:$0 sm:$0xff] }
0x44d7   :  { %17494 = vmatprep.subr.bf16.mxu1 %v17493_v42 }
0x44da   :  { %17496 = vmatpush3.bf16.msra.mxu1 %v17493_v42 }
0x44db   :  { %17498 = vmatprep.subr.bf16.mxu1 %v17497_v59 }
0x44de   :  { %17500 = vmatpush3.bf16.msra.mxu1 %v17497_v59  ;;  %v11626_v59 = vld [vmem:[%s22242_s13 + $0x1] ss:$0 sm:$0xff] }
0x44df   :  { %17502 = vmatprep.subr.bf16.mxu1 %v17501_v63  ;;  %v5545_v1 = vadd.f32 %v20200_v20, %v11626_v59  ;;  %v12122_v20 = vld [vmem:[%s22239_s10 + $0x110] sm:$0xff] }
0x44e2   :  { %17504 = vmatpush3.bf16.msra.mxu1 %v17501_v63  ;;  %v5556_v63 = vadd.f32 %v5545_v1, %v19944_v24  ;;  %v12125_v24 = vld [vmem:[%s22239_s10 + $0x128] sm:$0xff]  ;;  %v12150_v1 = vld [vmem:[%s22239_s10 + $0x1f0] sm:$0xff] }
0x44e3   :  { %17506 = vmatprep.subr.bf16.mxu1 %v17505_v33 }
0x44e6   :  { %17508 = vmatpush3.bf16.msra.mxu1 %v17505_v33 }
0x44e7   :  { %17520 = vmatprep.subr.bf16.mxu1 %v17519_v32 }
0x44e9   :  { %15484 = vmatmul.mubr.f32.vlgmr.msra.gmra.mrb[86].mxu1 %v21256_v61 }
0x44ea   :  { %17522 = vmatpush3.bf16.msra.mxu1 %v17519_v32  ;;  %v12138_v32 = vld [vmem:[%s22239_s10 + $0x190] sm:$0xff] }
0x44eb   :  { %17524 = vmatprep.subr.bf16.mxu1 %v17523_v6  ;;  %v17545_v3 = vpack.c.bf16 %v12138_v32, %v12136_v13  ;;  %v12158_v13 = vld [vmem:[%s22241_s12 + $0x128] sm:$0xff] }
0x44ee   :  { %17526 = vmatpush3.bf16.msra.mxu1 %v17523_v6  ;;  %v12141_v6 = vld [vmem:[%s22239_s10 + $0x1a8] sm:$0xff] }
0x459c   :  { %v15415_v0 = vpop.f32.mrb[84].mxu1 }
0x459d   :  { %v10137_v4 = vpop.f32.mrb[85].mxu1  ;;  %v10143_v48 = vadd.f32 %v15415_v0, %v12065_v11 }
0x459e   :  { %v10138_v36 = vadd.f32 %v12065_v11, %v10137_v4  ;;  %v17529_v11 = vpack.c.bf16 %v12122_v20, %v12120_v55  ;;  %v12124_v4 = vld [vmem:[%s22239_s10 + $0x120] sm:$0xff] }
0x45a0   :  { %15490 = vmatprep.mubr.msk.f32.mxu0 %vm360_vm0, %v10138_v36  ;;  %v12126_v36 = vld [vmem:[%s22239_s10 + $0x130] sm:$0xff] }
0x45a1   :  { %15491 = vmatmul.mubr.msk.f32.vlgmr.msra.gmra.mrb[100].mxu0 %vm360_vm0, %v10143_v48  ;;  %v12129_v48 = vld [vmem:[%s22239_s10 + $0x148] sm:$0xff] }
0x45bc   :  { %v15485_v15 = vpop.f32.mrb[86].mxu1 }
0x45bd   :  { %v10339_v8 = vadd.f32 %v15485_v15, %v12101_v23  ;;  %v10333_v41 = vpop.f32.mrb[87].mxu1  ;;  %v17533_v15 = vpack.c.bf16 %v12126_v36, %v12124_v4  ;;  %v12118_v4 = vld [vmem:[%s22243_s14 + $0x1] ss:$0 sm:$0xff] }
0x45be   :  { %v10334_v10 = vadd.f32 %v12101_v23, %v10333_v41  ;;  %v12131_v23 = vld [vmem:[%s22239_s10 + $0x158] sm:$0xff]  ;;  %v12128_v41 = vld [vmem:[%s22239_s10 + $0x140] sm:$0xff] }
0x45c0   :  { %v17515_v53 = vpack.c.bf16 %v10339_v8, %v10334_v10  ;;  %v17535_v8 = vpack.c.bf16 %v12131_v23, %v12129_v48  ;;  %v12130_v10 = vld [vmem:[%s22239_s10 + $0x150] sm:$0xff]  ;;  %v12119_v48 = vld [vmem:[%s22244_s15 + $0x1] ss:$0 sm:$0xff] }
0x45c2   :  { %17516 = vmatprep.subr.bf16.mxu0 %v17515_v53 }
0x45c3   :  { %17518 = vmatpush3.bf16.msra.mxu0 %v17515_v53  ;;  %v17537_v53 = vpack.c.bf16 %v12130_v10, %v12128_v41 }
0x4674   :  { %v15492_v16 = vpop.f32.mrb[100].mxu0 }
0x4675   :  { %v10430_v27 = vmul.f32 0.17677669, %v15492_v16  ;;  %v10420_v37 = vpop.f32.mrb[101].mxu0 }
0x4676   :  { %v10429_v39 = vmul.f32 0.17677669, %v10420_v37 }
0x4677   :  { %v10432_v35 = vadd.f32 %v17847_v50, %v10430_v27 }
0x4678   :  { %v10431_v17 = vadd.f32 %v17847_v50, %v10429_v39 }
0x4679   :  { %v10436_v21 = vsel %vm458_vm2, %v10432_v35, -inf }
0x467a   :  { %10437 = vmax.xlane.f32.xlu1 %v10436_v21  ;;  %v10433_v47 = vsel %vm458_vm2, %v10431_v17, -inf }
0x467b   :  { %10434 = vmax.xlane.f32.xlu0 %v10433_v47 }
0x4707   :  { %v10438_v29 = vpop.xlane.xlu1 %10437 }
0x4708   :  { %v10440_v14 = vsub.f32 %v10432_v35, %v10438_v29  ;;  %v10435_v54 = vpop.xlane.xlu0 %10434 }
0x4709   :  { %v10439_v9 = vsub.f32 %v10431_v17, %v10435_v54 }
0x470a   :  { %v10443_v26 = vmul.f32 1.442695, %v10440_v14 }
0x470b   :  { %v10441_v30 = vmul.f32 1.442695, %v10439_v9  ;;  %v12133_v9 = vld [vmem:[%s22239_s10 + $0x168] sm:$0xff] }
0x470c   :  { %17806 = vpow2.f32 %v10443_v26  ;;  %v12135_v26 = vld [vmem:[%s22239_s10 + $0x178] sm:$0xff] }
0x470d   :  { %17808 = vpow2.f32 %v10441_v30  ;;  %v17539_v30 = vpack.c.bf16 %v12135_v26, %v12133_v9  ;;  %v12172_v9 = vld [vmem:[%s22241_s12 + $0x198] sm:$0xff] }
0x4716   :  { %v17807_v44 = vpop.eup %17806 }
0x4717   :  { %v17809_v51 = vpop.eup %17808  ;;  %v10448_v34 = vsel %vm458_vm2, %v17807_v44, 0.0 }
0x4718   :  { %10449 = vadd.xlane.f32.xlu1 %v10448_v34  ;;  %v10445_v31 = vsel %vm458_vm2, %v17809_v51, 0.0 }
0x4719   :  { %10446 = vadd.xlane.f32.xlu0 %v10445_v31  ;;  %v12137_v31 = vld [vmem:[%s22239_s10 + $0x188] sm:$0xff] }
0x471a   :  { %v17543_v12 = vpack.c.bf16 %v12139_v28, %v12137_v31  ;;  %v12174_v31 = vld [vmem:[%s22241_s12 + $0x1a8] sm:$0xff] }
0x47a5   :  { %v10450_v60 = vpop.xlane.xlu1 %10449 }
0x47a6   :  { %17810 = vrcp.f32 %v10450_v60  ;;  %v10447_v43 = vpop.xlane.xlu0 %10446  ;;  %v12143_v60 = vld [vmem:[%s22239_s10 + $0x1b8] sm:$0xff] }
0x47a7   :  { %17812 = vrcp.f32 %v10447_v43  ;;  %v17547_v43 = vpack.c.bf16 %v12143_v60, %v12141_v6  ;;  %v12176_v6 = vld [vmem:[%s22241_s12 + $0x1b8] sm:$0xff] }
0x47b0   :  { %v17811_v46 = vpop.eup %17810 }
0x47b1   :  { %v17813_v22 = vpop.eup %17812  ;;  %v10454_v18 = vmul.f32 %v17811_v46, %v17807_v44  ;;  %v12132_v44 = vld [vmem:[%s22239_s10 + $0x160] sm:$0xff] }
0x47b2   :  { %v10452_v49 = vmul.f32 %v17813_v22, %v17809_v51  ;;  %v12134_v51 = vld [vmem:[%s22239_s10 + $0x170] sm:$0xff]  ;;  %v12140_v46 = vld [vmem:[%s22239_s10 + $0x1a0] sm:$0xff] }
0x47b3   :  { %v17541_v34 = vpack.c.bf16 %v12134_v51, %v12132_v44  ;;  %v12142_v22 = vld [vmem:[%s22239_s10 + $0x1b0] sm:$0xff]  ;;  %v12156_v44 = vld [vmem:[%s22241_s12 + $0x118] sm:$0xff] }
0x47b4   :  { %15497 = vmatprep.mubr.msk.f32.mxu0 %vm458_vm2, %v10452_v49  ;;  %v17549_v49 = vpack.c.bf16 %v12142_v22, %v12140_v46  ;;  %v12160_v46 = vld [vmem:[%s22241_s12 + $0x138] sm:$0xff] }
0x47b5   :  { %15498 = vmatmul.mubr.msk.f32.vlgmr.msra.gmra.mrb[102].mxu0 %vm458_vm2, %v10454_v18  ;;  %v12145_v18 = vld [vmem:[%s22239_s10 + $0x1c8] sm:$0xff] }
0x47b6   :  { %10782 = vmatprep.mubr.f32.mxu0 %v17896_v52 }
0x4888   :  { %v15499_v45 = vpop.f32.mrb[102].mxu0 }
0x4889   :  { %v10527_v38 = vpop.f32.mrb[103].mxu0 }
0x488a   :  { %15508 = vmatprep.mubr.msk.f32.mxu1 %vm360_vm0, %v10527_v38 }
0x488b   :  { %15509 = vmatmul.mubr.msk.f32.vlgmr.msra.gmra.mrb[76].mxu1 %vm360_vm0, %v15499_v45  ;;  %v12147_v45 = vld [vmem:[%s22239_s10 + $0x1d8] sm:$0xff] }
0x488c   :  { %v17551_v38 = vpack.c.bf16 %v12147_v45, %v12145_v18  ;;  %v12178_v18 = vld [vmem:[%s22241_s12 + $0x1c8] sm:$0xff] }
0x495e   :  { %v15510_v25 = vpop.f32.mrb[76].mxu1 }
0x495f   :  { %v10612_v40 = vpop.f32.mrb[77].mxu1  ;;  %v10631_v56 = vadd.f32 %v15510_v25, %v12115_v19  ;;  %v12146_v25 = vld [vmem:[%s22239_s10 + $0x1d0] sm:$0xff] }
0x4960   :  { %v10630_v42 = vadd.f32 %v12115_v19, %v10612_v40  ;;  %v12144_v19 = vld [vmem:[%s22239_s10 + $0x1c0] sm:$0xff] }
0x4961   :  { %v10635_v58 = vadd.f32 %v10631_v56, %v21256_v61  ;;  %v12127_v61 = vld [vmem:[%s22239_s10 + $0x138] sm:$0xff]  ;;  %v17553_v40 = vpack.c.bf16 %v12146_v25, %v12144_v19  ;;  %v12162_v19 = vld [vmem:[%s22241_s12 + $0x148] sm:$0xff] }
0x4962   :  { %v10634_v57 = vadd.f32 %v10630_v42, %v21245_v2  ;;  %v12123_v2 = vld [vmem:[%s22239_s10 + $0x118] sm:$0xff]  ;;  %v17531_v0 = vpack.c.bf16 %v12127_v61, %v12125_v24  ;;  %v12149_v42 = vld [vmem:[%s22239_s10 + $0x1e8] sm:$0xff] }
0x4963   :  { %v17527_v33 = vpack.c.bf16 %v12123_v2, %v12121_v62  ;;  %v12151_v56 = vld [vmem:[%s22239_s10 + $0x1f8] sm:$0xff] }
0x4964   :  { %10636 = vadd.xlane.f32.xlu0 %v10634_v57  ;;  %v17555_v59 = vpack.c.bf16 %v12151_v56, %v12149_v42  ;;  %v12180_v42 = vld [vmem:[%s22241_s12 + $0x1d8] sm:$0xff] }
0x4965   :  { %17528 = vmatprep.subr.bf16.mxu0 %v17527_v33 }
0x4966   :  { %17530 = vmatpush1.bf16.msra.mxu0 %v17529_v11 }
0x4967   :  { %17532 = vmatprep.subr.bf16.mxu0 %v17531_v0 }
0x4968   :  { %10638 = vadd.xlane.f32.xlu0 %v10635_v58 }
0x496a   :  { %17534 = vmatpush1.bf16.msra.mxu0 %v17533_v15 }
0x496b   :  { %17536 = vmatprep.subr.bf16.mxu0 %v17535_v8 }
0x496c   :  { %5557 = vadd.xlane.f32.xlu0 %v5556_v63 }
0x496e   :  { %17538 = vmatpush1.bf16.msra.mxu0 %v17537_v53 }
0x496f   :  { %17540 = vmatprep.subr.bf16.mxu0 %v17539_v30  ;;  %v12155_v30 = vld [vmem:[%s22241_s12 + $0x110] sm:$0xff] }
0x4970   :  { %v17565_v51 = vpack.c.bf16 %v12156_v44, %v12155_v30 }
0x4972   :  { %17542 = vmatpush1.bf16.msra.mxu0 %v17541_v34  ;;  %v12173_v34 = vld [vmem:[%s22241_s12 + $0x1a0] sm:$0xff] }
0x4973   :  { %17544 = vmatprep.subr.bf16.mxu0 %v17543_v12  ;;  %v17567_v28 = vpack.c.bf16 %v12174_v31, %v12173_v34  ;;  %v12157_v12 = vld [vmem:[%s22241_s12 + $0x120] sm:$0xff] }
0x4974   :  { %v17569_v32 = vpack.c.bf16 %v12158_v13, %v12157_v12 }
0x4976   :  { %17546 = vmatpush1.bf16.msra.mxu0 %v17545_v3  ;;  %v12175_v3 = vld [vmem:[%s22241_s12 + $0x1b0] sm:$0xff] }
0x4977   :  { %17548 = vmatprep.subr.bf16.mxu0 %v17547_v43  ;;  %v17571_v60 = vpack.c.bf16 %v12176_v6, %v12175_v3  ;;  %v12159_v43 = vld [vmem:[%s22241_s12 + $0x130] sm:$0xff] }
0x4978   :  { %v17573_v22 = vpack.c.bf16 %v12160_v46, %v12159_v43 }
0x497a   :  { %17550 = vmatpush1.bf16.msra.mxu0 %v17549_v49  ;;  %v12177_v49 = vld [vmem:[%s22241_s12 + $0x1c0] sm:$0xff] }
0x497b   :  { %17552 = vmatprep.subr.bf16.mxu0 %v17551_v38  ;;  %v17575_v45 = vpack.c.bf16 %v12178_v18, %v12177_v49  ;;  %v12161_v38 = vld [vmem:[%s22241_s12 + $0x140] sm:$0xff] }
0x497c   :  { %v17577_v25 = vpack.c.bf16 %v12162_v19, %v12161_v38 }
0x497e   :  { %17554 = vmatpush1.bf16.msra.mxu0 %v17553_v40  ;;  %v12179_v40 = vld [vmem:[%s22241_s12 + $0x1d0] sm:$0xff] }
0x497f   :  { %17556 = vmatprep.subr.bf16.mxu0 %v17555_v59  ;;  %v17579_v56 = vpack.c.bf16 %v12180_v42, %v12179_v40  ;;  %v12164_v59 = vld [vmem:[%s22241_s12 + $0x158] sm:$0xff] }
0x49f1   :  { %v10637_v16 = vpop.xlane.xlu0 %10636 }
0x49f2   :  { %v10640_v27 = vmul.f32 0.0078125, %v10637_v16  ;;  %v22056_v16 = vld [vmem:[%s22245_s16 + $0x1] ss:$0 sm:$0xff] }
0x49f4   :  { %v21969_v37 = vsub.f32 %v10634_v57, %v10640_v27  ;;  %v12148_v57 = vld [vmem:[%s22239_s10 + $0x1e0] sm:$0xff] }
0x49f5   :  { %v10639_v39 = vpop.xlane.xlu0 %10638 }
0x49f6   :  { %v10641_v50 = vmul.f32 0.0078125, %v10639_v39  ;;  %v10644_v35 = vmul.f32 %v21969_v37, %v21969_v37  ;;  %v22062_v39 = vld [vmem:[%s22246_s17 + $0x1] ss:$0 sm:$0xff] }
0x49f8   :  { %v21973_v17 = vsub.f32 %v10635_v58, %v10641_v50  ;;  %10646 = vadd.xlane.f32.xlu1 %v10644_v35  ;;  %v17557_v58 = vpack.c.bf16 %v12150_v1, %v12148_v57  ;;  %v12163_v57 = vld [vmem:[%s22241_s12 + $0x150] sm:$0xff] }
0x49f9   :  { %v5558_v21 = vpop.xlane.xlu0 %5557  ;;  %v17581_v1 = vpack.c.bf16 %v12164_v59, %v12163_v57 }
0x49fa   :  { %v5559_v47 = vmul.f32 0.0078125, %v5558_v21  ;;  %v10645_v29 = vmul.f32 %v21973_v17, %v21973_v17  ;;  %17558 = vmatpush1.bf16.msra.mxu0 %v17557_v58  ;;  %v12181_v58 = vld [vmem:[%s22241_s12 + $0x1e0] sm:$0xff] }
0x49fc   :  { %v21977_v14 = vsub.f32 %v5556_v63, %v5559_v47  ;;  %10648 = vadd.xlane.f32.xlu1 %v10645_v29  ;;  %v12153_v47 = vld [vmem:[%s22241_s12 + $0x100] sm:$0xff]  ;;  %v12154_v29 = vld [vmem:[%s22241_s12 + $0x108] sm:$0xff] }
0x49fe   :  { %v5561_v54 = vmul.f32 %v21977_v14, %v21977_v14 }
0x4a00   :  { %5562 = vadd.xlane.f32.xlu0 %v5561_v54  ;;  %v12171_v54 = vld [vmem:[%s22241_s12 + $0x190] sm:$0xff] }
0x4a01   :  { %v17563_v26 = vpack.c.bf16 %v12172_v9, %v12171_v54 }
0x4a85   :  { %v10647_v63 = vpop.xlane.xlu1 %10646 }
0x4a86   :  { %v10650_v62 = vmul.f32 0.0078125, %v10647_v63  ;;  %v12182_v63 = vld [vmem:[%s22241_s12 + $0x1e8] sm:$0xff] }
0x4a88   :  { %v10652_v2 = vadd.f32 1e-05, %v10650_v62  ;;  %v17583_v62 = vpack.c.bf16 %v12182_v63, %v12181_v58 }
0x4a89   :  { %v10649_v55 = vpop.xlane.xlu1 %10648 }
0x4a8a   :  { %17814 = vrsqrt.f32 %v10652_v2  ;;  %v10651_v33 = vmul.f32 0.0078125, %v10649_v55  ;;  %v12165_v2 = vld [vmem:[%s22241_s12 + $0x160] sm:$0xff]  ;;  %v12166_v55 = vld [vmem:[%s22241_s12 + $0x168] sm:$0xff] }
0x4a8c   :  { %v10653_v20 = vadd.f32 1e-05, %v10651_v33  ;;  %v17585_v33 = vpack.c.bf16 %v12166_v55, %v12165_v2 }
0x4a8d   :  { %v5563_v24 = vpop.xlane.xlu0 %5562 }
0x4a8e   :  { %17816 = vrsqrt.f32 %v10653_v20  ;;  %v5564_v61 = vmul.f32 0.0078125, %v5563_v24  ;;  %v12183_v20 = vld [vmem:[%s22241_s12 + $0x1f0] sm:$0xff]  ;;  %v12184_v24 = vld [vmem:[%s22241_s12 + $0x1f8] sm:$0xff] }
0x4a90   :  { %v5565_v11 = vadd.f32 1e-05, %v5564_v61  ;;  %v17587_v61 = vpack.c.bf16 %v12184_v24, %v12183_v20 }
0x4a92   :  { %17818 = vrsqrt.f32 %v5565_v11  ;;  %v12167_v11 = vld [vmem:[%s22241_s12 + $0x170] sm:$0xff] }
0x4a94   :  { %v17815_v0 = vpop.eup %17814 }
0x4a95   :  { %v10656_v36 = vmul.f32 %v17815_v0, %v21969_v37  ;;  %v12168_v0 = vld [vmem:[%s22241_s12 + $0x178] sm:$0xff] }
0x4a97   :  { %v10664_v23 = vmul.f32 %v12118_v4, %v10656_v36  ;;  %v12152_v36 = vld [vmem:[%s22240_s11 + $0x2] sm:$0x3] }
0x4a98   :  { %v17817_v15 = vpop.eup %17816 }
0x4a99   :  { %v22048_v8 = vadd.f32 %v12119_v48, %v10664_v23  ;;  %v10657_v41 = vmul.f32 %v17817_v15, %v21973_v17  ;;  %v12170_v17 = vld [vmem:[%s22241_s12 + $0x188] sm:$0xff]  ;;  %v10715_v23 = vrot.slane %v12152_v36, %v19001_v7 }
0x4a9b   :  { %10783 = vmatmul.mubr.f32.vlgmr.msra.gmra.mrb[104].mxu0 %v22048_v8  ;;  %v10665_v10 = vmul.f32 %v12118_v4, %v10657_v41  ;;  %v17589_v4 = vpack.c.bf16 %v12168_v0, %v12167_v11 }
0x4a9c   :  { %v17819_v53 = vpop.eup %17818  ;;  %10788 = vmatprep.mubr.f32.mxu0 %v17896_v52  ;;  %v12169_v52 = vld [vmem:[%s22241_s12 + $0x180] sm:$0xff] }
0x4a9d   :  { %v10673_v27 = vadd.f32 %v12119_v48, %v10665_v10  ;;  %v5567_v37 = vmul.f32 %v17819_v53, %v21977_v14  ;;  %v17559_v21 = vpack.c.bf16 %v12170_v17, %v12169_v52  ;;  %v17561_v14 = vpack.c.bf16 %v12154_v29, %v12153_v47 }
0x4a9e   :  { %v10711_v48 = vrot.slane %v12152_v36, %v18996_v5 }
0x4a9f   :  { %10789 = vmatmul.mubr.f32.gmra.mrb[106].mxu0 %v10673_v27  ;;  %v5574_v50 = vmul.f32 %v22056_v16, %v5567_v37  ;;  %17560 = vmatprep.subr.bf16.mxu1 %v17559_v21 }
0x4aa0   :  { %17562 = vmatpush3.bf16.msra.mxu1 %v17561_v14 }
0x4aa1   :  { %v5581_v35 = vadd.f32 %v22062_v39, %v5574_v50  ;;  %17564 = vmatprep.subr.bf16.mxu1 %v17563_v26 }
0x4aa3   :  { %5582 = vst [vmem:[#allocation2] sm:$0x1] %v5581_v35  ;;  %5583 = vst [vmem:[#allocation4 - $0x1] sm:$0x2] %v5581_v35 }
0x4aa4   :  { %17566 = vmatpush3.bf16.msra.mxu1 %v17565_v51 }
0x4aa5   :  { %17568 = vmatprep.subr.bf16.mxu1 %v17567_v28 }
0x4aa8   :  { %17570 = vmatpush3.bf16.msra.mxu1 %v17569_v32 }
0x4aa9   :  { %17572 = vmatprep.subr.bf16.mxu1 %v17571_v60 }
0x4aac   :  { %17574 = vmatpush3.bf16.msra.mxu1 %v17573_v22 }
0x4aad   :  { %17576 = vmatprep.subr.bf16.mxu1 %v17575_v45 }
0x4ab0   :  { %17578 = vmatpush3.bf16.msra.mxu1 %v17577_v25 }
0x4ab1   :  { %17580 = vmatprep.subr.bf16.mxu1 %v17579_v56 }
0x4ab4   :  { %17582 = vmatpush3.bf16.msra.mxu1 %v17581_v1 }
0x4ab5   :  { %17584 = vmatprep.subr.bf16.mxu1 %v17583_v62 }
0x4ab8   :  { %17586 = vmatpush3.bf16.msra.mxu1 %v17585_v33 }
0x4ab9   :  { %17588 = vmatprep.subr.bf16.mxu1 %v17587_v61 }
0x4abc   :  { %17590 = vmatpush3.bf16.msra.mxu1 %v17589_v4 }
0x4b6e   :  { %v10784_v15 = vpop.f32.mrb[104].mxu0 }
0x4b6f   :  { %v22167_v41 = vadd.f32 %v10784_v15, %v10711_v48  ;;  %v10786_v10 = vpop.f32.mrb[105].mxu0 }
0x4b70   :  { %v22169_v53 = vadd.f32 %v10786_v10, %v10715_v23 }
0x4b71   :  { %v22172_v27 = vmul.f32 0.70710677, %v22167_v41 }
0x4b72   :  { %v22175_v37 = vmul.f32 0.70710677, %v22169_v53  ;;  %v10790_v50 = vpop.f32.mrb[106].mxu0 }
0x4b73   :  { %v10803_v35 = vand.u32 2147483647, %v22172_v27  ;;  %v22178_v52 = vadd.f32 %v10790_v50, %v10711_v48  ;;  %v10792_v5 = vpop.f32.mrb[107].mxu0  ;;  %vm10883_vm15 = vcmp.lt.f32.partialorder %v22172_v27, 0.0 }
0x4b74   :  { %v10804_v7 = vand.u32 2147483647, %v22175_v37  ;;  %v22181_v17 = vadd.f32 %v10792_v5, %v10715_v23  ;;  %vm10884_vm0 = vcmp.lt.f32.partialorder %v22175_v37, 0.0 }
0x4b75   :  { %v10807_v21 = vmul.f32 0.3275911, %v10803_v35  ;;  %v22184_v47 = vmul.f32 0.70710677, %v22178_v52  ;;  %v10859_v28 = vsub.f32 0.0, %v10803_v35 }
0x4b76   :  { %v10808_v29 = vmul.f32 0.3275911, %v10804_v7  ;;  %v22187_v14 = vmul.f32 0.70710677, %v22181_v17  ;;  %v10860_v12 = vsub.f32 0.0, %v10804_v7 }
0x4b77   :  { %v10811_v54 = vadd.f32 1.0, %v10807_v21  ;;  %v10805_v9 = vand.u32 2147483647, %v22184_v47  ;;  %v10863_v32 = vmul.f32 %v10859_v28, %v10803_v35  ;;  %vm10885_vm1 = vcmp.lt.f32.partialorder %v22184_v47, 0.0  ;;  %v12186_v47 = vld [vmem:[%s22242_s13 + $0x1] ss:$0 sm:$0xff] }
0x4b78   :  { %v10812_v26 = vadd.f32 1.0, %v10808_v29  ;;  %v10806_v30 = vand.u32 2147483647, %v22187_v14  ;;  %v10864_v43 = vmul.f32 %v10860_v12, %v10804_v7  ;;  %vm10886_vm2 = vcmp.lt.f32.partialorder %v22187_v14, 0.0  ;;  %s17897_s13 = smov [#allocation2]  }
0x4b79   :  { %17820 = vrcp.f32 %v10811_v54  ;;  %v10809_v44 = vmul.f32 0.3275911, %v10805_v9  ;;  %v10861_v3 = vsub.f32 0.0, %v10805_v9  ;;  %v10867_v45 = vmul.f32 1.442695, %v10863_v32  ;;  %s11052_s20 = sshll.u32 %s17897_s13, 4  ;;  %s11053_s20 = int_to_ptr.vmem [resolvable:$true] %s11052_s20 }
0x4b7a   :  { %17822 = vrcp.f32 %v10812_v26  ;;  %v10810_v51 = vmul.f32 0.3275911, %v10806_v30  ;;  %v10862_v46 = vsub.f32 0.0, %v10806_v30  ;;  %v10869_v42 = vmul.f32 1.442695, %v10864_v43  ;;  %s17848_s9 = scalar_lea.vmem %s11053_s20, 32  ;;  %p17853_p1 = scmp.lt.s32.totalorder %s11053_s20, %s11053_s20 }
0x4b7b   :  { %v10813_v34 = vadd.f32 1.0, %v10809_v44  ;;  %v10865_v38 = vmul.f32 %v10861_v3, %v10805_v9  ;;  %p17849_p0 = scmp.ne.s32.totalorder %s11053_s20, %s17848_s9  ;;  %p17854_p2 = scmp.lt.s32.totalorder %s17848_s9, %s17848_s9 }
0x4b7c   :  { %v10814_v31 = vadd.f32 1.0, %v10810_v51  ;;  %v10866_v56 = vmul.f32 %v10862_v46, %v10806_v30 }
0x4b7d   :  { %17824 = vrcp.f32 %v10813_v34  ;;  %v10871_v62 = vmul.f32 1.442695, %v10865_v38  ;;  %p17855_p3 = por %p17854_p2, %p17853_p1 }
0x4b7e   :  { %17826 = vrcp.f32 %v10814_v31  ;;  %v10873_v20 = vmul.f32 1.442695, %v10866_v56  ;;  %v10796_v56 = vmul.f32 0.5, %v22169_v53  ;;  %v10797_v53 = vmul.f32 0.5, %v22178_v52 }
0x4b7f   :  { %17828 = vpow2.f32 %v10867_v45  ;;  %p17856_p4 = pnand %p17855_p3, %p17849_p0 }
0x4b80   :  { %17830 = vpow2.f32 %v10869_v42 }
0x4b81   :  { %17832 = vpow2.f32 %v10871_v62  ;;  %v10798_v62 = vmul.f32 0.5, %v22181_v17 }
0x4b82   :  { %17834 = vpow2.f32 %v10873_v20 }
0x4b83   :  { %v17821_v13 = vpop.eup %17820 }
0x4b84   :  { %v17823_v6 = vpop.eup %17822  ;;  %v10823_v60 = vmul.f32 1.0614054, %v17821_v13 }
0x4b85   :  { %v10824_v22 = vmul.f32 1.0614054, %v17823_v6 }
0x4b86   :  { %v10827_v49 = vadd.f32 -1.4531521, %v10823_v60 }
0x4b87   :  { %v17825_v18 = vpop.eup %17824  ;;  %v10828_v19 = vadd.f32 -1.4531521, %v10824_v22 }
0x4b88   :  { %v17827_v25 = vpop.eup %17826  ;;  %v10831_v40 = vmul.f32 %v17821_v13, %v10827_v49  ;;  %v10825_v57 = vmul.f32 1.0614054, %v17825_v18 }
0x4b89   :  { %v10832_v59 = vmul.f32 %v17823_v6, %v10828_v19  ;;  %v10826_v1 = vmul.f32 1.0614054, %v17827_v25  ;;  %v17829_v9 = vpop.eup %17828 }
0x4b8a   :  { %v10835_v58 = vadd.f32 1.4214138, %v10831_v40  ;;  %v10829_v63 = vadd.f32 -1.4531521, %v10825_v57  ;;  %v17831_v44 = vpop.eup %17830 }
0x4b8b   :  { %v10836_v2 = vadd.f32 1.4214138, %v10832_v59  ;;  %v10830_v55 = vadd.f32 -1.4531521, %v10826_v1  ;;  %v17833_v3 = vpop.eup %17832 }
0x4b8c   :  { %v10839_v33 = vmul.f32 %v17821_v13, %v10835_v58  ;;  %v10833_v24 = vmul.f32 %v17825_v18, %v10829_v63  ;;  %v17835_v46 = vpop.eup %17834 }
0x4b8d   :  { %v10840_v61 = vmul.f32 %v17823_v6, %v10836_v2  ;;  %v10834_v11 = vmul.f32 %v17827_v25, %v10830_v55 }
0x4b8e   :  { %v10843_v0 = vadd.f32 -0.28449672, %v10839_v33  ;;  %v10837_v4 = vadd.f32 1.4214138, %v10833_v24 }
0x4b8f   :  { %v10844_v36 = vadd.f32 -0.28449672, %v10840_v61  ;;  %v10838_v48 = vadd.f32 1.4214138, %v10834_v11 }
0x4b90   :  { %v10847_v23 = vmul.f32 %v17821_v13, %v10843_v0  ;;  %v10841_v15 = vmul.f32 %v17825_v18, %v10837_v4 }
0x4b91   :  { %v10848_v10 = vmul.f32 %v17823_v6, %v10844_v36  ;;  %v10842_v50 = vmul.f32 %v17827_v25, %v10838_v48 }
0x4b92   :  { %v10851_v35 = vadd.f32 0.2548296, %v10847_v23  ;;  %v10845_v5 = vadd.f32 -0.28449672, %v10841_v15 }
0x4b93   :  { %v10852_v7 = vadd.f32 0.2548296, %v10848_v10  ;;  %v10846_v21 = vadd.f32 -0.28449672, %v10842_v50 }
0x4b94   :  { %v10855_v29 = vmul.f32 %v17821_v13, %v10851_v35  ;;  %v10849_v54 = vmul.f32 %v17825_v18, %v10845_v5 }
0x4b95   :  { %v10856_v26 = vmul.f32 %v17823_v6, %v10852_v7  ;;  %v10850_v30 = vmul.f32 %v17827_v25, %v10846_v21 }
0x4b96   :  { %v10875_v51 = vmul.f32 %v17829_v9, %v10855_v29  ;;  %v10853_v34 = vadd.f32 0.2548296, %v10849_v54 }
0x4b97   :  { %v10876_v31 = vmul.f32 %v17831_v44, %v10856_v26  ;;  %v10854_v28 = vadd.f32 0.2548296, %v10850_v30 }
0x4b98   :  { %v10879_v12 = vsub.f32 1.0, %v10875_v51  ;;  %v10857_v32 = vmul.f32 %v17825_v18, %v10853_v34 }
0x4b99   :  { %v10880_v60 = vsub.f32 1.0, %v10876_v31  ;;  %v10858_v43 = vmul.f32 %v17827_v25, %v10854_v28  ;;  %v10795_v25 = vmul.f32 0.5, %v22167_v41 }
0x4b9a   :  { %v10887_v22 = vsub.f32 0.0, %v10879_v12  ;;  %v10877_v49 = vmul.f32 %v17833_v3, %v10857_v32 }
0x4b9b   :  { %v10888_v13 = vsub.f32 0.0, %v10880_v60  ;;  %v10878_v45 = vmul.f32 %v17835_v46, %v10858_v43 }
0x4b9c   :  { %v10891_v38 = vsel %vm10883_vm15, %v10887_v22, %v10879_v12  ;;  %v10881_v6 = vsub.f32 1.0, %v10877_v49 }
0x4b9d   :  { %v10895_v19 = vadd.f32 1.0, %v10891_v38  ;;  %v10892_v40 = vsel %vm10884_vm0, %v10888_v13, %v10880_v60  ;;  %v10882_v42 = vsub.f32 1.0, %v10878_v45 }
0x4b9e   :  { %v10896_v18 = vadd.f32 1.0, %v10892_v40  ;;  %v10889_v57 = vsub.f32 0.0, %v10881_v6 }
0x4b9f   :  { %v10890_v59 = vsub.f32 0.0, %v10882_v42  ;;  %v10899_v58 = vmul.f32 %v10895_v19, %v10795_v25 }
0x4ba0   :  { %v10900_v27 = vmul.f32 %v10896_v18, %v10796_v56  ;;  %v10893_v1 = vsel %vm10885_vm1, %v10889_v57, %v10881_v6 }
0x4ba1   :  { %v10894_v63 = vsel %vm10886_vm2, %v10890_v59, %v10882_v42  ;;  %v10897_v37 = vadd.f32 1.0, %v10893_v1 }
0x4ba2   :  { %11006 = vmatprep.mubr.f32.mxu1 %v10900_v27  ;;  %v10898_v2 = vadd.f32 1.0, %v10894_v63 }
0x4ba3   :  { %11007 = vmatmul.mubr.f32.vlgmr.msra.gmra.mrb[88].mxu1 %v10899_v58  ;;  %v10901_v33 = vmul.f32 %v10897_v37, %v10797_v53 }
0x4ba4   :  { %v10902_v55 = vmul.f32 %v10898_v2, %v10798_v62 }
0x4ba6   :  { %11011 = vmatprep.mubr.f32.mxu1 %v10902_v55 }
0x4ba7   :  { %11012 = vmatmul.mubr.f32.gmra.mrb[90].mxu1 %v10901_v33 }
0x4c76   :  { %v13425_v41 = vpop.f32.mrb[88].mxu1 }
0x4c77   :  { %v13426_v14 = vpop.f32.mrb[89].mxu1 }
0x4c78   :  { %v13427_v20 = vadd.f32 %v13426_v14, %v13425_v41 }
0x4c7a   :  { %v11009_v24 = vadd.f32 %v13427_v20, %v12186_v47  ;;  %v13428_v61 = vpop.f32.mrb[90].mxu1 }
0x4c7b   :  { %v13429_v11 = vpop.f32.mrb[91].mxu1 }
0x4c7c   :  { %v11018_v17 = vadd.f32 %v11009_v24, %v22048_v8 }
0x4c7e   :  { %11019 = vadd.xlane.f32.xlu1 %v11018_v17 }
0x4d0b   :  { %v11020_v0 = vpop.xlane.xlu1 %11019 }
0x4d0c   :  { %v11021_v52 = vmul.f32 0.0078125, %v11020_v0 }
0x4d0e   :  { %v11022_v4 = vsub.f32 %v11018_v17, %v11021_v52 }
0x4d10   :  { %v11023_v36 = vmul.f32 %v11022_v4, %v11022_v4 }
0x4d12   :  { %11024 = vadd.xlane.f32.xlu1 %v11023_v36 }
0x4d9f   :  { %v11025_v48 = vpop.xlane.xlu1 %11024 }
0x4da0   :  { %v11026_v23 = vmul.f32 0.0078125, %v11025_v48 }
0x4da2   :  { %v11027_v15 = vadd.f32 1e-05, %v11026_v23 }
0x4da4   :  { %17836 = vrsqrt.f32 %v11027_v15 }
0x4dae   :  { %v17837_v10 = vpop.eup %17836 }
0x4daf   :  { %v11029_v50 = vmul.f32 %v17837_v10, %v11022_v4 }
0x4db1   :  { %v11036_v35 = vmul.f32 %v22056_v16, %v11029_v50 }
0x4db3   :  { %v11043_v8 = vadd.f32 %v22062_v39, %v11036_v35 }
0x4db5   :  { %11044 = vst [vmem:[#allocation2 + $0x1] sm:$0x1] %v11043_v8  ;;  %11045 = vst [vmem:[#allocation4] sm:$0x2] %v11043_v8 }
0x4db6   :  { %17859 = shalt.err (!%p17856_p4)
}
0x4db7   :  { %s17860_s10 = scalar_lea.hbm %s22247_s18, 32 }
0x4db8   :  { %p17861_p5 = scmp.ne.s32.totalorder %s22247_s18, %s17860_s10  ;;  %p17864_p6 = scmp.lt.u32.totalorder %s17860_s10, %s22247_s18 }
0x4dba   :  { %p17866_p7 = pnand %p17864_p6, %p17861_p5 }
0x4dbc   :  { %17869 = shalt.err (!%p17866_p7)
}
0x4dbd   :  { %11055 = dma.vmem_to_hbm [thread:$0]  %s11053_s20, 32, %s22247_s18, [#allocation3]  }
0x4dbe   :  { %s17870_s28 = scalar_lea.vmem %s11063_s22, 32  ;;  %p17875_p9 = scmp.lt.s32.totalorder %s11063_s22, %s11063_s22 }
0x4dbf   :  { %p17871_p8 = scmp.ne.s32.totalorder %s11063_s22, %s17870_s28  ;;  %p17876_p10 = scmp.lt.s32.totalorder %s17870_s28, %s17870_s28 }
0x4dc1   :  { %p17877_p11 = por %p17876_p10, %p17875_p9 }
0x4dc3   :  { %p17878_p12 = pnand %p17877_p11, %p17871_p8 }
0x4dc5   :  { %17881 = shalt.err (!%p17878_p12)
}
0x4dc6   :  { %s17882_s7 = scalar_lea.hbm %s22248_s19, 32 }
0x4dc7   :  { %p17883_p13 = scmp.ne.s32.totalorder %s22248_s19, %s17882_s7  ;;  %p17886_p0 = scmp.lt.u32.totalorder %s17882_s7, %s22248_s19 }
0x4dc9   :  { %p17888_p1 = pnand %p17886_p0, %p17883_p13 }
0x4dcb   :  { %17891 = shalt.err (!%p17888_p1)
}
0x4dcc   :  { %11065 = dma.vmem_to_hbm [thread:$0]  %s11063_s22, 32, %s22248_s19, [#allocation5]  }
0x4dcd   :  { %17892 = dma.done.wait [#allocation3], 32  }
0x4dce   :  { %17893 = vsyncadd [#allocation3], 4294967264 }
0x4dcf   :  { %17894 = dma.done.wait [#allocation5], 32  }
0x4dd0   :  { %17895 = vsyncadd [#allocation5], 4294967264 }
0x4dd1   :  { %11072 = vsyncpa [#allocation3], 1 }
0x4dd2   :  { %11073 = vsyncpa [#allocation5], 1 }

</bundles_post_ra>
